<compile_context>
chip_gen: v6e
topology: v6e:2x2x1
jax: 0.10.0
libtpu: 0.0.40
codegen_flags: <defaults>
</compile_context>

<pallas_src>
import functools

import numpy as np
import jax
import jax.numpy as jnp
from jax.experimental import pallas as pl
from jax.experimental.pallas import tpu as pltpu


# ----------------------------- helpers ---------------------------------------

def _round_up(x, m):
    return ((x + m - 1) // m) * m


def encode_dim(d, multires):
    return d if multires <= 0 else d * (1 + 2 * multires)


def positional_encode(x, multires):
    """torch Embedder: cat([x, sin(f0 x), cos(f0 x), sin(f1 x), cos(f1 x), ...], -1)."""
    if multires <= 0:
        return x
    freqs = 2.0 ** np.linspace(0.0, multires - 1, multires)
    parts = [x]
    for f in freqs:
        parts.append(jnp.sin(x * float(f)))
        parts.append(jnp.cos(x * float(f)))
    return jnp.concatenate(parts, axis=-1)


def _posenc_constants(d, d_pad, multires, k_pad):
    """Matrices so that posenc(x) == x_pad @ imat + sin(x_pad @ fmat + phase)."""
    imat = np.zeros((d_pad, k_pad), np.float32)
    fmat = np.zeros((d_pad, k_pad), np.float32)
    phase = np.zeros((1, k_pad), np.float32)
    imat[:d, :d] = np.eye(d, dtype=np.float32)
    if multires > 0:
        freqs = 2.0 ** np.linspace(0.0, multires - 1, multires)
        for k, f in enumerate(freqs):
            base = d + 2 * d * k
            for j in range(d):
                fmat[j, base + j] = f                  # sin(f * x_j)
                fmat[j, base + d + j] = f              # cos(f * x_j) == sin(f x_j + pi/2)
                phase[0, base + d + j] = np.pi / 2.0
    return jnp.asarray(imat), jnp.asarray(fmat), jnp.asarray(phase)


# --------------------------------- kernel ------------------------------------

def _nerf_mlp_kernel(*refs, D, skip_in_layers, store_feature, compute_dtype):
    """refs = (pts, views, imat_p, fmat_p, ph_p, imat_v, fmat_v, ph_v,
               *layer_params, *head_params, out4[, feature])."""
    it = iter(refs)
    pts = next(it)[...]          # (tn, d_pad) f32
    views = next(it)[...]        # (tn, d_pad) f32
    imat_p = next(it)[...]; fmat_p = next(it)[...]; ph_p = next(it)[...]
    imat_v = next(it)[...]; fmat_v = next(it)[...]; ph_v = next(it)[...]

    f32 = jnp.float32

    def dot(a, b):
        return jnp.dot(a, b, preferred_element_type=f32)

    # ---- positional encodings, computed in-kernel (sin on the EUP slot) ----
    pts_e = dot(pts, imat_p) + jnp.sin(dot(pts, fmat_p) + ph_p)        # (tn, k_pts) f32
    views_e = dot(views, imat_v) + jnp.sin(dot(views, fmat_v) + ph_v)  # (tn, k_views) f32

    pts_e_c = pts_e.astype(compute_dtype)
    views_e_c = views_e.astype(compute_dtype)

    # ---- pts MLP with skip connection (weights pre-split, no lane concat) ----
    h = pts_e_c
    for j in range(D):
        if j in skip_in_layers:
            w_pe = next(it)[...]; w_h = next(it)[...]; b = next(it)[...]
            z = dot(pts_e_c, w_pe) + dot(h, w_h) + b
        else:
            w = next(it)[...]; b = next(it)[...]
            z = dot(h, w) + b
        h = jnp.maximum(z, 0.0).astype(compute_dtype)      # ReLU in f32, cast for next dot

    # ---- heads (use_viewdirs=True path) ----
    w_f = next(it)[...]; b_f = next(it)[...]
    wv_f = next(it)[...]; wv_e = next(it)[...]; b_v = next(it)[...]
    w_a4 = next(it)[...]; w_r4 = next(it)[...]; b4 = next(it)[...]

    feature = dot(h, w_f) + b_f                                         # (tn, W) f32
    hv = jnp.maximum(dot(feature.astype(compute_dtype), wv_f)
                     + dot(views_e_c, wv_e) + b_v, 0.0)                 # (tn, W//2) f32
    out4 = dot(h, w_a4) + dot(hv.astype(compute_dtype), w_r4) + b4      # (tn, 4) = [a, r, g, b]

    out4_ref = next(it)
    out4_ref[...] = out4.astype(out4_ref.dtype)
    if store_feature:
        feat_ref = next(it)
        feat_ref[...] = feature.astype(feat_ref.dtype)


# ------------------------- wrapper param packing ------------------------------

def _prep_kernel_params(params, *, D, W, skips, enc_pts, k_pts, k_views, wdtype):
    f32 = jnp.float32
    skip_in = {s + 1 for s in skips}

    def pad_rows(w, k):
        return jnp.zeros((k, w.shape[1]), w.dtype).at[: w.shape[0]].set(w)

    flat = []
    for j in range(D):
        w, b = params["pts_linears"][j]                       # w: (in, out)
        if j == 0:
            flat += [pad_rows(w, k_pts).astype(wdtype), b.astype(f32)]
        elif j in skip_in:
            # torch input to this layer is cat([pts_e, h]) -> rows 0:enc_pts are pts_e
            flat += [pad_rows(w[:enc_pts], k_pts).astype(wdtype),
                     w[enc_pts:].astype(wdtype), b.astype(f32)]
        else:
            flat += [w.astype(wdtype), b.astype(f32)]

    w_f, b_f = params["feature_linear"]
    w_a, b_a = params["alpha_linear"]
    w_v, b_v = params["views_linear"]                          # (W + enc_views, W//2)
    w_r, b_r = params["rgb_linear"]                            # (W//2, 3)

    wv_f = w_v[:W]                                             # feature part
    wv_e = pad_rows(w_v[W:], k_views)                          # views_e part (padded)
    w_a4 = jnp.zeros((W, 4), f32).at[:, 0:1].set(w_a)          # col 0 = alpha
    w_r4 = jnp.zeros((W // 2, 4), f32).at[:, 1:4].set(w_r)     # cols 1:4 = rgb
    b4 = jnp.concatenate([b_a, b_r], axis=1)                   # (1, 4)

    flat += [w_f.astype(wdtype), b_f.astype(f32),
             wv_f.astype(wdtype), wv_e.astype(wdtype), b_v.astype(f32),
             w_a4.astype(wdtype), w_r4.astype(wdtype), b4.astype(f32)]
    return flat


# --------------------------------- wrapper -----------------------------------

def nerf_forward(params, input_pts, input_views, *, D, W, skips, multires,
                 multires_view, tile_n=1024, is_feature=False,
                 compute_dtype=jnp.bfloat16, interpret=False):
    skips = tuple(skips)
    assert all(0 <= s < D - 1 for s in skips), "skip at the last pts layer unsupported"
    skip_in_layers = frozenset(s + 1 for s in skips)

    d_in = input_pts.shape[-1]
    d_in_view = input_views.shape[-1]
    enc_pts = encode_dim(d_in, multires)
    enc_views = encode_dim(d_in_view, multires_view)
    # contraction dims padded to multiples of 16 (bf16 sublane tile); raw dims to 8.
    k_pts, k_views = _round_up(enc_pts, 16), _round_up(enc_views, 16)
    dp_pts, dp_views = _round_up(d_in, 8), _round_up(d_in_view, 8)

    imat_p, fmat_p, ph_p = _posenc_constants(d_in, dp_pts, multires, k_pts)
    imat_v, fmat_v, ph_v = _posenc_constants(d_in_view, dp_views, multires_view, k_views)
    flat_params = _prep_kernel_params(params, D=D, W=W, skips=skips, enc_pts=enc_pts,
                                      k_pts=k_pts, k_views=k_views, wdtype=compute_dtype)

    # --- batch tiling: big tiles, but keep >= 2 grid steps for megacore sharding ---
    N = input_pts.shape[0]
    tile_n = max(8, (int(tile_n) // 8) * 8)
    tile_n = min(tile_n, _round_up(N, 8))
    if N >= 16:
        tile_n = min(tile_n, _round_up((N + 1) // 2, 8))
    n_pad = _round_up(N, tile_n)
    grid = (n_pad // tile_n,)

    pts = jnp.pad(input_pts.astype(jnp.float32), ((0, n_pad - N), (0, dp_pts - d_in)))
    views = jnp.pad(input_views.astype(jnp.float32), ((0, n_pad - N), (0, dp_views - d_in_view)))

    const_inputs = [imat_p, fmat_p, ph_p, imat_v, fmat_v, ph_v] + flat_params
    in_specs = ([pl.BlockSpec((tile_n, dp_pts), lambda i: (i, 0)),
                 pl.BlockSpec((tile_n, dp_views), lambda i: (i, 0))]
                + [pl.BlockSpec(p.shape, lambda i: (0, 0)) for p in const_inputs])

    out_shape = [jax.ShapeDtypeStruct((n_pad, 4), jnp.float32)]
    out_specs = [pl.BlockSpec((tile_n, 4), lambda i: (i, 0))]
    if is_feature:
        out_shape.append(jax.ShapeDtypeStruct((n_pad, W), jnp.float32))
        out_specs.append(pl.BlockSpec((tile_n, W), lambda i: (i, 0)))

    kernel = functools.partial(_nerf_mlp_kernel, D=D, skip_in_layers=skip_in_layers,
                               store_feature=is_feature, compute_dtype=compute_dtype)

    results = pl.pallas_call(
        kernel,
        out_shape=tuple(out_shape),
        grid_spec=pltpu.PrefetchScalarGridSpec(
            num_scalar_prefetch=0,
            grid=grid,
            in_specs=in_specs,
            out_specs=tuple(out_specs),
        ),
        compiler_params=pltpu.CompilerParams(
            dimension_semantics=("parallel",),
        ),
        interpret=interpret,
    )(pts, views, *const_inputs)

    out4 = results[0]
    alpha, rgb = out4[:N, 0:1], out4[:N, 1:4]
    if is_feature:
        return alpha, rgb, results[1][:N]
    return alpha, rgb

# TODO(synk): NeRFNetwork.density() (alpha-only path) is the same pts-MLP + alpha head;
# it can reuse this kernel with the view head / feature outputs skipped.


# ------------------------------- params / ref --------------------------------

def init_nerf_params(key, *, D, W, input_ch, input_ch_view, skips):
    """torch nn.Linear-style init; weights stored as (in, out), biases as (1, out)."""
    def linear(k, fan_in, fan_out):
        kw, kb = jax.random.split(k)
        bound = 1.0 / float(np.sqrt(fan_in))
        w = jax.random.uniform(kw, (fan_in, fan_out), jnp.float32, -bound, bound)
        b = jax.random.uniform(kb, (1, fan_out), jnp.float32, -bound, bound)
        return w, b

    keys = jax.random.split(key, D + 4)
    pts_linears = []
    for j in range(D):
        fan_in = input_ch if j == 0 else (W + input_ch if (j - 1) in skips else W)
        pts_linears.append(linear(keys[j], fan_in, W))
    return {
        "pts_linears": pts_linears,
        "feature_linear": linear(keys[D], W, W),
        "alpha_linear": linear(keys[D + 1], W, 1),
        "views_linear": linear(keys[D + 2], W + input_ch_view, W // 2),
        "rgb_linear": linear(keys[D + 3], W // 2, 3),
    }


def nerf_forward_ref(params, input_pts, input_views, *, D, W, skips, multires,
                     multires_view):
    """Pure-JAX f32 reference mirroring the torch forward literally (with concats)."""
    hp = jax.lax.Precision.HIGHEST
    dot = lambda a, b: jnp.dot(a, b, precision=hp)

    pts_e = positional_encode(input_pts.astype(jnp.float32), multires)
    views_e = positional_encode(input_views.astype(jnp.float32), multires_view)

    h = pts_e
    for j in range(D):
        w, b = params["pts_linears"][j]
        h = jax.nn.relu(dot(h, w) + b)
        if j in skips:
            h = jnp.concatenate([pts_e, h], axis=-1)

    w, b = params["alpha_linear"];   alpha = dot(h, w) + b
    w, b = params["feature_linear"]; feature = dot(h, w) + b
    w, b = params["views_linear"]
    hv = jax.nn.relu(dot(jnp.concatenate([feature, views_e], -1), w) + b)
    w, b = params["rgb_linear"];     rgb = dot(hv, w) + b
    return alpha, rgb, feature


# ----------------------------------- demo ------------------------------------

if __name__ == "__main__":
    # Small config consistent with NeRFNetwork(..., use_viewdirs=True).
    D, W = 8, 64
    skips = (4,)
    multires, multires_view = 6, 4
    d_in = d_in_view = 3
    N = 256

    input_ch = encode_dim(d_in, multires)                   # 39
    input_ch_view = encode_dim(d_in_view, multires_view)    # 27

    key = jax.random.PRNGKey(0)
    kp, kpts, kviews = jax.random.split(key, 3)
    params = init_nerf_params(kp, D=D, W=W, input_ch=input_ch,
                              input_ch_view=input_ch_view, skips=skips)
    input_pts = jax.random.normal(kpts, (N, d_in), dtype=jnp.float32)
    vdirs = jax.random.normal(kviews, (N, d_in_view), dtype=jnp.float32)
    input_views = vdirs / jnp.linalg.norm(vdirs, axis=-1, keepdims=True)

    fwd_feat = jax.jit(functools.partial(
        nerf_forward, D=D, W=W, skips=skips, multires=multires,
        multires_view=multires_view, is_feature=True))
    fwd = jax.jit(functools.partial(
        nerf_forward, D=D, W=W, skips=skips, multires=multires,
        multires_view=multires_view, is_feature=False))

    alpha, rgb, feature = fwd_feat(params, input_pts, input_views)
    jax.block_until_ready((alpha, rgb, feature))
    alpha2, rgb2 = fwd(params, input_pts, input_views)
    jax.block_until_ready((alpha2, rgb2))

    a_ref, r_ref, f_ref = nerf_forward_ref(params, input_pts, input_views, D=D, W=W,
                                           skips=skips, multires=multires,
                                           multires_view=multires_view)

    assert alpha.shape == (N, 1) and rgb.shape == (N, 3) and feature.shape == (N, W)
    tol = 5e-2   # bf16 matmul operands (f32 accumulation) vs f32 HIGHEST reference
    for name, got, want in (("alpha", alpha, a_ref), ("rgb", rgb, r_ref),
                            ("feature", feature, f_ref)):
        err = float(jnp.max(jnp.abs(got - want)))
        assert err < tol, f"{name} max abs err {err}"
    # alpha/rgb-only path must agree with the is_feature path
    for got, want in ((alpha2, alpha), (rgb2, rgb)):
        assert float(jnp.max(jnp.abs(got - want))) < 1e-5

    print("KERNEL_OK")
</pallas_src>

<mosaic_0001>
module attributes {stable_mosaic.version = 11 : i64} {
  func.func @_nerf_mlp_kernel(%arg0: i32, %arg1: memref<128x8xf32, #tpu.memory_space<vmem>>, %arg2: memref<128x8xf32, #tpu.memory_space<vmem>>, %arg3: memref<8x48xf32, #tpu.memory_space<vmem>>, %arg4: memref<8x48xf32, #tpu.memory_space<vmem>>, %arg5: memref<1x48xf32, #tpu.memory_space<vmem>>, %arg6: memref<8x32xf32, #tpu.memory_space<vmem>>, %arg7: memref<8x32xf32, #tpu.memory_space<vmem>>, %arg8: memref<1x32xf32, #tpu.memory_space<vmem>>, %arg9: memref<48x64xbf16, #tpu.memory_space<vmem>>, %arg10: memref<1x64xf32, #tpu.memory_space<vmem>>, %arg11: memref<64x64xbf16, #tpu.memory_space<vmem>>, %arg12: memref<1x64xf32, #tpu.memory_space<vmem>>, %arg13: memref<64x64xbf16, #tpu.memory_space<vmem>>, %arg14: memref<1x64xf32, #tpu.memory_space<vmem>>, %arg15: memref<64x64xbf16, #tpu.memory_space<vmem>>, %arg16: memref<1x64xf32, #tpu.memory_space<vmem>>, %arg17: memref<64x64xbf16, #tpu.memory_space<vmem>>, %arg18: memref<1x64xf32, #tpu.memory_space<vmem>>, %arg19: memref<48x64xbf16, #tpu.memory_space<vmem>>, %arg20: memref<64x64xbf16, #tpu.memory_space<vmem>>, %arg21: memref<1x64xf32, #tpu.memory_space<vmem>>, %arg22: memref<64x64xbf16, #tpu.memory_space<vmem>>, %arg23: memref<1x64xf32, #tpu.memory_space<vmem>>, %arg24: memref<64x64xbf16, #tpu.memory_space<vmem>>, %arg25: memref<1x64xf32, #tpu.memory_space<vmem>>, %arg26: memref<64x64xbf16, #tpu.memory_space<vmem>>, %arg27: memref<1x64xf32, #tpu.memory_space<vmem>>, %arg28: memref<64x32xbf16, #tpu.memory_space<vmem>>, %arg29: memref<32x32xbf16, #tpu.memory_space<vmem>>, %arg30: memref<1x32xf32, #tpu.memory_space<vmem>>, %arg31: memref<64x4xbf16, #tpu.memory_space<vmem>>, %arg32: memref<32x4xbf16, #tpu.memory_space<vmem>>, %arg33: memref<1x4xf32, #tpu.memory_space<vmem>>, %arg34: memref<128x4xf32, #tpu.memory_space<vmem>>, %arg35: memref<128x64xf32, #tpu.memory_space<vmem>>) attributes {dimension_semantics = [#tpu.dimension_semantics<parallel>], iteration_bounds = array<i64: 2>, scalar_prefetch = 0 : i64, scratch_operands = 0 : i64, tpu.core_type = #tpu.core_type<tc>, window_params = [{transform_indices = @transform_0, window_bounds = array<i64: 128, 8>}, {transform_indices = @transform_1, window_bounds = array<i64: 128, 8>}, {pipeline_mode = #tpu.pipeline_mode<synchronous>, transform_indices = @transform_2, window_bounds = array<i64: 8, 48>}, {pipeline_mode = #tpu.pipeline_mode<synchronous>, transform_indices = @transform_3, window_bounds = array<i64: 8, 48>}, {pipeline_mode = #tpu.pipeline_mode<synchronous>, transform_indices = @transform_4, window_bounds = array<i64: 1, 48>}, {pipeline_mode = #tpu.pipeline_mode<synchronous>, transform_indices = @transform_5, window_bounds = array<i64: 8, 32>}, {pipeline_mode = #tpu.pipeline_mode<synchronous>, transform_indices = @transform_6, window_bounds = array<i64: 8, 32>}, {pipeline_mode = #tpu.pipeline_mode<synchronous>, transform_indices = @transform_7, window_bounds = array<i64: 1, 32>}, {pipeline_mode = #tpu.pipeline_mode<synchronous>, transform_indices = @transform_8, window_bounds = array<i64: 48, 64>}, {pipeline_mode = #tpu.pipeline_mode<synchronous>, transform_indices = @transform_9, window_bounds = array<i64: 1, 64>}, {pipeline_mode = #tpu.pipeline_mode<synchronous>, transform_indices = @transform_10, window_bounds = array<i64: 64, 64>}, {pipeline_mode = #tpu.pipeline_mode<synchronous>, transform_indices = @transform_11, window_bounds = array<i64: 1, 64>}, {pipeline_mode = #tpu.pipeline_mode<synchronous>, transform_indices = @transform_12, window_bounds = array<i64: 64, 64>}, {pipeline_mode = #tpu.pipeline_mode<synchronous>, transform_indices = @transform_13, window_bounds = array<i64: 1, 64>}, {pipeline_mode = #tpu.pipeline_mode<synchronous>, transform_indices = @transform_14, window_bounds = array<i64: 64, 64>}, {pipeline_mode = #tpu.pipeline_mode<synchronous>, transform_indices = @transform_15, window_bounds = array<i64: 1, 64>}, {pipeline_mode = #tpu.pipeline_mode<synchronous>, transform_indices = @transform_16, window_bounds = array<i64: 64, 64>}, {pipeline_mode = #tpu.pipeline_mode<synchronous>, transform_indices = @transform_17, window_bounds = array<i64: 1, 64>}, {pipeline_mode = #tpu.pipeline_mode<synchronous>, transform_indices = @transform_18, window_bounds = array<i64: 48, 64>}, {pipeline_mode = #tpu.pipeline_mode<synchronous>, transform_indices = @transform_19, window_bounds = array<i64: 64, 64>}, {pipeline_mode = #tpu.pipeline_mode<synchronous>, transform_indices = @transform_20, window_bounds = array<i64: 1, 64>}, {pipeline_mode = #tpu.pipeline_mode<synchronous>, transform_indices = @transform_21, window_bounds = array<i64: 64, 64>}, {pipeline_mode = #tpu.pipeline_mode<synchronous>, transform_indices = @transform_22, window_bounds = array<i64: 1, 64>}, {pipeline_mode = #tpu.pipeline_mode<synchronous>, transform_indices = @transform_23, window_bounds = array<i64: 64, 64>}, {pipeline_mode = #tpu.pipeline_mode<synchronous>, transform_indices = @transform_24, window_bounds = array<i64: 1, 64>}, {pipeline_mode = #tpu.pipeline_mode<synchronous>, transform_indices = @transform_25, window_bounds = array<i64: 64, 64>}, {pipeline_mode = #tpu.pipeline_mode<synchronous>, transform_indices = @transform_26, window_bounds = array<i64: 1, 64>}, {pipeline_mode = #tpu.pipeline_mode<synchronous>, transform_indices = @transform_27, window_bounds = array<i64: 64, 32>}, {pipeline_mode = #tpu.pipeline_mode<synchronous>, transform_indices = @transform_28, window_bounds = array<i64: 32, 32>}, {pipeline_mode = #tpu.pipeline_mode<synchronous>, transform_indices = @transform_29, window_bounds = array<i64: 1, 32>}, {pipeline_mode = #tpu.pipeline_mode<synchronous>, transform_indices = @transform_30, window_bounds = array<i64: 64, 4>}, {pipeline_mode = #tpu.pipeline_mode<synchronous>, transform_indices = @transform_31, window_bounds = array<i64: 32, 4>}, {pipeline_mode = #tpu.pipeline_mode<synchronous>, transform_indices = @transform_32, window_bounds = array<i64: 1, 4>}, {transform_indices = @transform_33, window_bounds = array<i64: 128, 4>}, {transform_indices = @transform_34, window_bounds = array<i64: 128, 64>}]} {
    %c0 = arith.constant 0 : index
    %c0_0 = arith.constant 0 : index
    %0 = vector.load %arg1[%c0, %c0_0] : memref<128x8xf32, #tpu.memory_space<vmem>>, vector<128x8xf32>
    %c0_1 = arith.constant 0 : index
    %c0_2 = arith.constant 0 : index
    %1 = vector.load %arg2[%c0_1, %c0_2] : memref<128x8xf32, #tpu.memory_space<vmem>>, vector<128x8xf32>
    %c0_3 = arith.constant 0 : index
    %c0_4 = arith.constant 0 : index
    %2 = vector.load %arg3[%c0_3, %c0_4] : memref<8x48xf32, #tpu.memory_space<vmem>>, vector<8x48xf32>
    %c0_5 = arith.constant 0 : index
    %c0_6 = arith.constant 0 : index
    %3 = vector.load %arg4[%c0_5, %c0_6] : memref<8x48xf32, #tpu.memory_space<vmem>>, vector<8x48xf32>
    %c0_7 = arith.constant 0 : index
    %c0_8 = arith.constant 0 : index
    %4 = vector.load %arg5[%c0_7, %c0_8] : memref<1x48xf32, #tpu.memory_space<vmem>>, vector<1x48xf32>
    %c0_9 = arith.constant 0 : index
    %c0_10 = arith.constant 0 : index
    %5 = vector.load %arg6[%c0_9, %c0_10] : memref<8x32xf32, #tpu.memory_space<vmem>>, vector<8x32xf32>
    %c0_11 = arith.constant 0 : index
    %c0_12 = arith.constant 0 : index
    %6 = vector.load %arg7[%c0_11, %c0_12] : memref<8x32xf32, #tpu.memory_space<vmem>>, vector<8x32xf32>
    %c0_13 = arith.constant 0 : index
    %c0_14 = arith.constant 0 : index
    %7 = vector.load %arg8[%c0_13, %c0_14] : memref<1x32xf32, #tpu.memory_space<vmem>>, vector<1x32xf32>
    %cst = arith.constant dense<0.000000e+00> : vector<128x48xf32>
    %8 = tpu.matmul %0, %2, %cst {dimension_numbers = #tpu.dot_dimension_numbers<[1], [0], [0], [1], [0, 0, 1, 1], [], []>} : vector<128x8xf32>, vector<8x48xf32>, vector<128x48xf32> -> vector<128x48xf32>
    %cst_15 = arith.constant dense<0.000000e+00> : vector<128x48xf32>
    %9 = tpu.matmul %0, %3, %cst_15 {dimension_numbers = #tpu.dot_dimension_numbers<[1], [0], [0], [1], [0, 0, 1, 1], [], []>} : vector<128x8xf32>, vector<8x48xf32>, vector<128x48xf32> -> vector<128x48xf32>
    %10 = vector.broadcast %4 : vector<1x48xf32> to vector<128x48xf32>
    %11 = arith.addf %9, %10 : vector<128x48xf32>
    %12 = math.sin %11 : vector<128x48xf32>
    %13 = arith.addf %8, %12 : vector<128x48xf32>
    %cst_16 = arith.constant dense<0.000000e+00> : vector<128x32xf32>
    %14 = tpu.matmul %1, %5, %cst_16 {dimension_numbers = #tpu.dot_dimension_numbers<[1], [0], [0], [1], [0, 0, 1, 1], [], []>} : vector<128x8xf32>, vector<8x32xf32>, vector<128x32xf32> -> vector<128x32xf32>
    %cst_17 = arith.constant dense<0.000000e+00> : vector<128x32xf32>
    %15 = tpu.matmul %1, %6, %cst_17 {dimension_numbers = #tpu.dot_dimension_numbers<[1], [0], [0], [1], [0, 0, 1, 1], [], []>} : vector<128x8xf32>, vector<8x32xf32>, vector<128x32xf32> -> vector<128x32xf32>
    %16 = vector.broadcast %7 : vector<1x32xf32> to vector<128x32xf32>
    %17 = arith.addf %15, %16 : vector<128x32xf32>
    %18 = math.sin %17 : vector<128x32xf32>
    %19 = arith.addf %14, %18 : vector<128x32xf32>
    %20 = arith.truncf %13 : vector<128x48xf32> to vector<128x48xbf16>
    %21 = arith.truncf %19 : vector<128x32xf32> to vector<128x32xbf16>
    %c0_18 = arith.constant 0 : index
    %c0_19 = arith.constant 0 : index
    %22 = vector.load %arg9[%c0_18, %c0_19] : memref<48x64xbf16, #tpu.memory_space<vmem>>, vector<48x64xbf16>
    %c0_20 = arith.constant 0 : index
    %c0_21 = arith.constant 0 : index
    %23 = vector.load %arg10[%c0_20, %c0_21] : memref<1x64xf32, #tpu.memory_space<vmem>>, vector<1x64xf32>
    %cst_22 = arith.constant dense<0.000000e+00> : vector<128x64xf32>
    %24 = tpu.matmul %20, %22, %cst_22 {dimension_numbers = #tpu.dot_dimension_numbers<[1], [0], [0], [1], [0, 0, 1, 1], [], []>} : vector<128x48xbf16>, vector<48x64xbf16>, vector<128x64xf32> -> vector<128x64xf32>
    %25 = vector.broadcast %23 : vector<1x64xf32> to vector<128x64xf32>
    %26 = arith.addf %24, %25 : vector<128x64xf32>
    %cst_23 = arith.constant 0.000000e+00 : f32
    %27 = vector.broadcast %cst_23 : f32 to vector<128x64xf32>
    %28 = arith.maximumf %26, %27 : vector<128x64xf32>
    %29 = arith.truncf %28 : vector<128x64xf32> to vector<128x64xbf16>
    %c0_24 = arith.constant 0 : index
    %c0_25 = arith.constant 0 : index
    %30 = vector.load %arg11[%c0_24, %c0_25] : memref<64x64xbf16, #tpu.memory_space<vmem>>, vector<64x64xbf16>
    %c0_26 = arith.constant 0 : index
    %c0_27 = arith.constant 0 : index
    %31 = vector.load %arg12[%c0_26, %c0_27] : memref<1x64xf32, #tpu.memory_space<vmem>>, vector<1x64xf32>
    %cst_28 = arith.constant dense<0.000000e+00> : vector<128x64xf32>
    %32 = tpu.matmul %29, %30, %cst_28 {dimension_numbers = #tpu.dot_dimension_numbers<[1], [0], [0], [1], [0, 0, 1, 1], [], []>} : vector<128x64xbf16>, vector<64x64xbf16>, vector<128x64xf32> -> vector<128x64xf32>
    %33 = vector.broadcast %31 : vector<1x64xf32> to vector<128x64xf32>
    %34 = arith.addf %32, %33 : vector<128x64xf32>
    %cst_29 = arith.constant 0.000000e+00 : f32
    %35 = vector.broadcast %cst_29 : f32 to vector<128x64xf32>
    %36 = arith.maximumf %34, %35 : vector<128x64xf32>
    %37 = arith.truncf %36 : vector<128x64xf32> to vector<128x64xbf16>
    %c0_30 = arith.constant 0 : index
    %c0_31 = arith.constant 0 : index
    %38 = vector.load %arg13[%c0_30, %c0_31] : memref<64x64xbf16, #tpu.memory_space<vmem>>, vector<64x64xbf16>
    %c0_32 = arith.constant 0 : index
    %c0_33 = arith.constant 0 : index
    %39 = vector.load %arg14[%c0_32, %c0_33] : memref<1x64xf32, #tpu.memory_space<vmem>>, vector<1x64xf32>
    %cst_34 = arith.constant dense<0.000000e+00> : vector<128x64xf32>
    %40 = tpu.matmul %37, %38, %cst_34 {dimension_numbers = #tpu.dot_dimension_numbers<[1], [0], [0], [1], [0, 0, 1, 1], [], []>} : vector<128x64xbf16>, vector<64x64xbf16>, vector<128x64xf32> -> vector<128x64xf32>
    %41 = vector.broadcast %39 : vector<1x64xf32> to vector<128x64xf32>
    %42 = arith.addf %40, %41 : vector<128x64xf32>
    %cst_35 = arith.constant 0.000000e+00 : f32
    %43 = vector.broadcast %cst_35 : f32 to vector<128x64xf32>
    %44 = arith.maximumf %42, %43 : vector<128x64xf32>
    %45 = arith.truncf %44 : vector<128x64xf32> to vector<128x64xbf16>
    %c0_36 = arith.constant 0 : index
    %c0_37 = arith.constant 0 : index
    %46 = vector.load %arg15[%c0_36, %c0_37] : memref<64x64xbf16, #tpu.memory_space<vmem>>, vector<64x64xbf16>
    %c0_38 = arith.constant 0 : index
    %c0_39 = arith.constant 0 : index
    %47 = vector.load %arg16[%c0_38, %c0_39] : memref<1x64xf32, #tpu.memory_space<vmem>>, vector<1x64xf32>
    %cst_40 = arith.constant dense<0.000000e+00> : vector<128x64xf32>
    %48 = tpu.matmul %45, %46, %cst_40 {dimension_numbers = #tpu.dot_dimension_numbers<[1], [0], [0], [1], [0, 0, 1, 1], [], []>} : vector<128x64xbf16>, vector<64x64xbf16>, vector<128x64xf32> -> vector<128x64xf32>
    %49 = vector.broadcast %47 : vector<1x64xf32> to vector<128x64xf32>
    %50 = arith.addf %48, %49 : vector<128x64xf32>
    %cst_41 = arith.constant 0.000000e+00 : f32
    %51 = vector.broadcast %cst_41 : f32 to vector<128x64xf32>
    %52 = arith.maximumf %50, %51 : vector<128x64xf32>
    %53 = arith.truncf %52 : vector<128x64xf32> to vector<128x64xbf16>
    %c0_42 = arith.constant 0 : index
    %c0_43 = arith.constant 0 : index
    %54 = vector.load %arg17[%c0_42, %c0_43] : memref<64x64xbf16, #tpu.memory_space<vmem>>, vector<64x64xbf16>
    %c0_44 = arith.constant 0 : index
    %c0_45 = arith.constant 0 : index
    %55 = vector.load %arg18[%c0_44, %c0_45] : memref<1x64xf32, #tpu.memory_space<vmem>>, vector<1x64xf32>
    %cst_46 = arith.constant dense<0.000000e+00> : vector<128x64xf32>
    %56 = tpu.matmul %53, %54, %cst_46 {dimension_numbers = #tpu.dot_dimension_numbers<[1], [0], [0], [1], [0, 0, 1, 1], [], []>} : vector<128x64xbf16>, vector<64x64xbf16>, vector<128x64xf32> -> vector<128x64xf32>
    %57 = vector.broadcast %55 : vector<1x64xf32> to vector<128x64xf32>
    %58 = arith.addf %56, %57 : vector<128x64xf32>
    %cst_47 = arith.constant 0.000000e+00 : f32
    %59 = vector.broadcast %cst_47 : f32 to vector<128x64xf32>
    %60 = arith.maximumf %58, %59 : vector<128x64xf32>
    %61 = arith.truncf %60 : vector<128x64xf32> to vector<128x64xbf16>
    %c0_48 = arith.constant 0 : index
    %c0_49 = arith.constant 0 : index
    %62 = vector.load %arg19[%c0_48, %c0_49] : memref<48x64xbf16, #tpu.memory_space<vmem>>, vector<48x64xbf16>
    %c0_50 = arith.constant 0 : index
    %c0_51 = arith.constant 0 : index
    %63 = vector.load %arg20[%c0_50, %c0_51] : memref<64x64xbf16, #tpu.memory_space<vmem>>, vector<64x64xbf16>
    %c0_52 = arith.constant 0 : index
    %c0_53 = arith.constant 0 : index
    %64 = vector.load %arg21[%c0_52, %c0_53] : memref<1x64xf32, #tpu.memory_space<vmem>>, vector<1x64xf32>
    %cst_54 = arith.constant dense<0.000000e+00> : vector<128x64xf32>
    %65 = tpu.matmul %20, %62, %cst_54 {dimension_numbers = #tpu.dot_dimension_numbers<[1], [0], [0], [1], [0, 0, 1, 1], [], []>} : vector<128x48xbf16>, vector<48x64xbf16>, vector<128x64xf32> -> vector<128x64xf32>
    %cst_55 = arith.constant dense<0.000000e+00> : vector<128x64xf32>
    %66 = tpu.matmul %61, %63, %cst_55 {dimension_numbers = #tpu.dot_dimension_numbers<[1], [0], [0], [1], [0, 0, 1, 1], [], []>} : vector<128x64xbf16>, vector<64x64xbf16>, vector<128x64xf32> -> vector<128x64xf32>
    %67 = arith.addf %65, %66 : vector<128x64xf32>
    %68 = vector.broadcast %64 : vector<1x64xf32> to vector<128x64xf32>
    %69 = arith.addf %67, %68 : vector<128x64xf32>
    %cst_56 = arith.constant 0.000000e+00 : f32
    %70 = vector.broadcast %cst_56 : f32 to vector<128x64xf32>
    %71 = arith.maximumf %69, %70 : vector<128x64xf32>
    %72 = arith.truncf %71 : vector<128x64xf32> to vector<128x64xbf16>
    %c0_57 = arith.constant 0 : index
    %c0_58 = arith.constant 0 : index
    %73 = vector.load %arg22[%c0_57, %c0_58] : memref<64x64xbf16, #tpu.memory_space<vmem>>, vector<64x64xbf16>
    %c0_59 = arith.constant 0 : index
    %c0_60 = arith.constant 0 : index
    %74 = vector.load %arg23[%c0_59, %c0_60] : memref<1x64xf32, #tpu.memory_space<vmem>>, vector<1x64xf32>
    %cst_61 = arith.constant dense<0.000000e+00> : vector<128x64xf32>
    %75 = tpu.matmul %72, %73, %cst_61 {dimension_numbers = #tpu.dot_dimension_numbers<[1], [0], [0], [1], [0, 0, 1, 1], [], []>} : vector<128x64xbf16>, vector<64x64xbf16>, vector<128x64xf32> -> vector<128x64xf32>
    %76 = vector.broadcast %74 : vector<1x64xf32> to vector<128x64xf32>
    %77 = arith.addf %75, %76 : vector<128x64xf32>
    %cst_62 = arith.constant 0.000000e+00 : f32
    %78 = vector.broadcast %cst_62 : f32 to vector<128x64xf32>
    %79 = arith.maximumf %77, %78 : vector<128x64xf32>
    %80 = arith.truncf %79 : vector<128x64xf32> to vector<128x64xbf16>
    %c0_63 = arith.constant 0 : index
    %c0_64 = arith.constant 0 : index
    %81 = vector.load %arg24[%c0_63, %c0_64] : memref<64x64xbf16, #tpu.memory_space<vmem>>, vector<64x64xbf16>
    %c0_65 = arith.constant 0 : index
    %c0_66 = arith.constant 0 : index
    %82 = vector.load %arg25[%c0_65, %c0_66] : memref<1x64xf32, #tpu.memory_space<vmem>>, vector<1x64xf32>
    %cst_67 = arith.constant dense<0.000000e+00> : vector<128x64xf32>
    %83 = tpu.matmul %80, %81, %cst_67 {dimension_numbers = #tpu.dot_dimension_numbers<[1], [0], [0], [1], [0, 0, 1, 1], [], []>} : vector<128x64xbf16>, vector<64x64xbf16>, vector<128x64xf32> -> vector<128x64xf32>
    %84 = vector.broadcast %82 : vector<1x64xf32> to vector<128x64xf32>
    %85 = arith.addf %83, %84 : vector<128x64xf32>
    %cst_68 = arith.constant 0.000000e+00 : f32
    %86 = vector.broadcast %cst_68 : f32 to vector<128x64xf32>
    %87 = arith.maximumf %85, %86 : vector<128x64xf32>
    %88 = arith.truncf %87 : vector<128x64xf32> to vector<128x64xbf16>
    %c0_69 = arith.constant 0 : index
    %c0_70 = arith.constant 0 : index
    %89 = vector.load %arg26[%c0_69, %c0_70] : memref<64x64xbf16, #tpu.memory_space<vmem>>, vector<64x64xbf16>
    %c0_71 = arith.constant 0 : index
    %c0_72 = arith.constant 0 : index
    %90 = vector.load %arg27[%c0_71, %c0_72] : memref<1x64xf32, #tpu.memory_space<vmem>>, vector<1x64xf32>
    %c0_73 = arith.constant 0 : index
    %c0_74 = arith.constant 0 : index
    %91 = vector.load %arg28[%c0_73, %c0_74] : memref<64x32xbf16, #tpu.memory_space<vmem>>, vector<64x32xbf16>
    %c0_75 = arith.constant 0 : index
    %c0_76 = arith.constant 0 : index
    %92 = vector.load %arg29[%c0_75, %c0_76] : memref<32x32xbf16, #tpu.memory_space<vmem>>, vector<32x32xbf16>
    %c0_77 = arith.constant 0 : index
    %c0_78 = arith.constant 0 : index
    %93 = vector.load %arg30[%c0_77, %c0_78] : memref<1x32xf32, #tpu.memory_space<vmem>>, vector<1x32xf32>
    %c0_79 = arith.constant 0 : index
    %c0_80 = arith.constant 0 : index
    %94 = vector.load %arg31[%c0_79, %c0_80] : memref<64x4xbf16, #tpu.memory_space<vmem>>, vector<64x4xbf16>
    %c0_81 = arith.constant 0 : index
    %c0_82 = arith.constant 0 : index
    %95 = vector.load %arg32[%c0_81, %c0_82] : memref<32x4xbf16, #tpu.memory_space<vmem>>, vector<32x4xbf16>
    %c0_83 = arith.constant 0 : index
    %c0_84 = arith.constant 0 : index
    %96 = vector.load %arg33[%c0_83, %c0_84] : memref<1x4xf32, #tpu.memory_space<vmem>>, vector<1x4xf32>
    %cst_85 = arith.constant dense<0.000000e+00> : vector<128x64xf32>
    %97 = tpu.matmul %88, %89, %cst_85 {dimension_numbers = #tpu.dot_dimension_numbers<[1], [0], [0], [1], [0, 0, 1, 1], [], []>} : vector<128x64xbf16>, vector<64x64xbf16>, vector<128x64xf32> -> vector<128x64xf32>
    %98 = vector.broadcast %90 : vector<1x64xf32> to vector<128x64xf32>
    %99 = arith.addf %97, %98 : vector<128x64xf32>
    %100 = arith.truncf %99 : vector<128x64xf32> to vector<128x64xbf16>
    %cst_86 = arith.constant dense<0.000000e+00> : vector<128x32xf32>
    %101 = tpu.matmul %100, %91, %cst_86 {dimension_numbers = #tpu.dot_dimension_numbers<[1], [0], [0], [1], [0, 0, 1, 1], [], []>} : vector<128x64xbf16>, vector<64x32xbf16>, vector<128x32xf32> -> vector<128x32xf32>
    %cst_87 = arith.constant dense<0.000000e+00> : vector<128x32xf32>
    %102 = tpu.matmul %21, %92, %cst_87 {dimension_numbers = #tpu.dot_dimension_numbers<[1], [0], [0], [1], [0, 0, 1, 1], [], []>} : vector<128x32xbf16>, vector<32x32xbf16>, vector<128x32xf32> -> vector<128x32xf32>
    %103 = arith.addf %101, %102 : vector<128x32xf32>
    %104 = vector.broadcast %93 : vector<1x32xf32> to vector<128x32xf32>
    %105 = arith.addf %103, %104 : vector<128x32xf32>
    %cst_88 = arith.constant 0.000000e+00 : f32
    %106 = vector.broadcast %cst_88 : f32 to vector<128x32xf32>
    %107 = arith.maximumf %105, %106 : vector<128x32xf32>
    %cst_89 = arith.constant dense<0.000000e+00> : vector<128x4xf32>
    %108 = tpu.matmul %88, %94, %cst_89 {dimension_numbers = #tpu.dot_dimension_numbers<[1], [0], [0], [1], [0, 0, 1, 1], [], []>} : vector<128x64xbf16>, vector<64x4xbf16>, vector<128x4xf32> -> vector<128x4xf32>
    %109 = arith.truncf %107 : vector<128x32xf32> to vector<128x32xbf16>
    %cst_90 = arith.constant dense<0.000000e+00> : vector<128x4xf32>
    %110 = tpu.matmul %109, %95, %cst_90 {dimension_numbers = #tpu.dot_dimension_numbers<[1], [0], [0], [1], [0, 0, 1, 1], [], []>} : vector<128x32xbf16>, vector<32x4xbf16>, vector<128x4xf32> -> vector<128x4xf32>
    %111 = arith.addf %108, %110 : vector<128x4xf32>
    %112 = vector.broadcast %96 : vector<1x4xf32> to vector<128x4xf32>
    %113 = arith.addf %111, %112 : vector<128x4xf32>
    %c0_91 = arith.constant 0 : index
    %c0_92 = arith.constant 0 : index
    %114 = vector.load %arg34[%c0_91, %c0_92] : memref<128x4xf32, #tpu.memory_space<vmem>>, vector<128x4xf32>
    tpu.vector_store %arg34[%c0_91, %c0_92], %113 {strides = array<i32>} : memref<128x4xf32, #tpu.memory_space<vmem>>, vector<128x4xf32>,
    %c0_93 = arith.constant 0 : index
    %c0_94 = arith.constant 0 : index
    %115 = vector.load %arg35[%c0_93, %c0_94] : memref<128x64xf32, #tpu.memory_space<vmem>>, vector<128x64xf32>
    tpu.vector_store %arg35[%c0_93, %c0_94], %99 {strides = array<i32>} : memref<128x64xf32, #tpu.memory_space<vmem>>, vector<128x64xf32>,
    return
  }
  func.func @transform_0(%arg0: i32) -> (i32, i32) {
    %c0_i32 = arith.constant 0 : i32
    %c0_i32_0 = arith.constant 0 : i32
    return %arg0, %c0_i32 : i32, i32
  }
  func.func @transform_1(%arg0: i32) -> (i32, i32) {
    %c0_i32 = arith.constant 0 : i32
    %c0_i32_0 = arith.constant 0 : i32
    return %arg0, %c0_i32 : i32, i32
  }
  func.func @transform_2(%arg0: i32) -> (i32, i32) {
    %c0_i32 = arith.constant 0 : i32
    %c0_i32_0 = arith.constant 0 : i32
    %c0_i32_1 = arith.constant 0 : i32
    return %c0_i32, %c0_i32_0 : i32, i32
  }
  func.func @transform_3(%arg0: i32) -> (i32, i32) {
    %c0_i32 = arith.constant 0 : i32
    %c0_i32_0 = arith.constant 0 : i32
    %c0_i32_1 = arith.constant 0 : i32
    return %c0_i32, %c0_i32_0 : i32, i32
  }
  func.func @transform_4(%arg0: i32) -> (i32, i32) {
    %c0_i32 = arith.constant 0 : i32
    %c0_i32_0 = arith.constant 0 : i32
    %c0_i32_1 = arith.constant 0 : i32
    return %c0_i32, %c0_i32_0 : i32, i32
  }
  func.func @transform_5(%arg0: i32) -> (i32, i32) {
    %c0_i32 = arith.constant 0 : i32
    %c0_i32_0 = arith.constant 0 : i32
    %c0_i32_1 = arith.constant 0 : i32
    return %c0_i32, %c0_i32_0 : i32, i32
  }
  func.func @transform_6(%arg0: i32) -> (i32, i32) {
    %c0_i32 = arith.constant 0 : i32
    %c0_i32_0 = arith.constant 0 : i32
    %c0_i32_1 = arith.constant 0 : i32
    return %c0_i32, %c0_i32_0 : i32, i32
  }
  func.func @transform_7(%arg0: i32) -> (i32, i32) {
    %c0_i32 = arith.constant 0 : i32
    %c0_i32_0 = arith.constant 0 : i32
    %c0_i32_1 = arith.constant 0 : i32
    return %c0_i32, %c0_i32_0 : i32, i32
  }
  func.func @transform_8(%arg0: i32) -> (i32, i32) {
    %c0_i32 = arith.constant 0 : i32
    %c0_i32_0 = arith.constant 0 : i32
    %c0_i32_1 = arith.constant 0 : i32
    return %c0_i32, %c0_i32_0 : i32, i32
  }
  func.func @transform_9(%arg0: i32) -> (i32, i32) {
    %c0_i32 = arith.constant 0 : i32
    %c0_i32_0 = arith.constant 0 : i32
    %c0_i32_1 = arith.constant 0 : i32
    return %c0_i32, %c0_i32_0 : i32, i32
  }
  func.func @transform_10(%arg0: i32) -> (i32, i32) {
    %c0_i32 = arith.constant 0 : i32
    %c0_i32_0 = arith.constant 0 : i32
    %c0_i32_1 = arith.constant 0 : i32
    return %c0_i32, %c0_i32_0 : i32, i32
  }
  func.func @transform_11(%arg0: i32) -> (i32, i32) {
    %c0_i32 = arith.constant 0 : i32
    %c0_i32_0 = arith.constant 0 : i32
    %c0_i32_1 = arith.constant 0 : i32
    return %c0_i32, %c0_i32_0 : i32, i32
  }
  func.func @transform_12(%arg0: i32) -> (i32, i32) {
    %c0_i32 = arith.constant 0 : i32
    %c0_i32_0 = arith.constant 0 : i32
    %c0_i32_1 = arith.constant 0 : i32
    return %c0_i32, %c0_i32_0 : i32, i32
  }
  func.func @transform_13(%arg0: i32) -> (i32, i32) {
    %c0_i32 = arith.constant 0 : i32
    %c0_i32_0 = arith.constant 0 : i32
    %c0_i32_1 = arith.constant 0 : i32
    return %c0_i32, %c0_i32_0 : i32, i32
  }
  func.func @transform_14(%arg0: i32) -> (i32, i32) {
    %c0_i32 = arith.constant 0 : i32
    %c0_i32_0 = arith.constant 0 : i32
    %c0_i32_1 = arith.constant 0 : i32
    return %c0_i32, %c0_i32_0 : i32, i32
  }
  func.func @transform_15(%arg0: i32) -> (i32, i32) {
    %c0_i32 = arith.constant 0 : i32
    %c0_i32_0 = arith.constant 0 : i32
    %c0_i32_1 = arith.constant 0 : i32
    return %c0_i32, %c0_i32_0 : i32, i32
  }
  func.func @transform_16(%arg0: i32) -> (i32, i32) {
    %c0_i32 = arith.constant 0 : i32
    %c0_i32_0 = arith.constant 0 : i32
    %c0_i32_1 = arith.constant 0 : i32
    return %c0_i32, %c0_i32_0 : i32, i32
  }
  func.func @transform_17(%arg0: i32) -> (i32, i32) {
    %c0_i32 = arith.constant 0 : i32
    %c0_i32_0 = arith.constant 0 : i32
    %c0_i32_1 = arith.constant 0 : i32
    return %c0_i32, %c0_i32_0 : i32, i32
  }
  func.func @transform_18(%arg0: i32) -> (i32, i32) {
    %c0_i32 = arith.constant 0 : i32
    %c0_i32_0 = arith.constant 0 : i32
    %c0_i32_1 = arith.constant 0 : i32
    return %c0_i32, %c0_i32_0 : i32, i32
  }
  func.func @transform_19(%arg0: i32) -> (i32, i32) {
    %c0_i32 = arith.constant 0 : i32
    %c0_i32_0 = arith.constant 0 : i32
    %c0_i32_1 = arith.constant 0 : i32
    return %c0_i32, %c0_i32_0 : i32, i32
  }
  func.func @transform_20(%arg0: i32) -> (i32, i32) {
    %c0_i32 = arith.constant 0 : i32
    %c0_i32_0 = arith.constant 0 : i32
    %c0_i32_1 = arith.constant 0 : i32
    return %c0_i32, %c0_i32_0 : i32, i32
  }
  func.func @transform_21(%arg0: i32) -> (i32, i32) {
    %c0_i32 = arith.constant 0 : i32
    %c0_i32_0 = arith.constant 0 : i32
    %c0_i32_1 = arith.constant 0 : i32
    return %c0_i32, %c0_i32_0 : i32, i32
  }
  func.func @transform_22(%arg0: i32) -> (i32, i32) {
    %c0_i32 = arith.constant 0 : i32
    %c0_i32_0 = arith.constant 0 : i32
    %c0_i32_1 = arith.constant 0 : i32
    return %c0_i32, %c0_i32_0 : i32, i32
  }
  func.func @transform_23(%arg0: i32) -> (i32, i32) {
    %c0_i32 = arith.constant 0 : i32
    %c0_i32_0 = arith.constant 0 : i32
    %c0_i32_1 = arith.constant 0 : i32
    return %c0_i32, %c0_i32_0 : i32, i32
  }
  func.func @transform_24(%arg0: i32) -> (i32, i32) {
    %c0_i32 = arith.constant 0 : i32
    %c0_i32_0 = arith.constant 0 : i32
    %c0_i32_1 = arith.constant 0 : i32
    return %c0_i32, %c0_i32_0 : i32, i32
  }
  func.func @transform_25(%arg0: i32) -> (i32, i32) {
    %c0_i32 = arith.constant 0 : i32
    %c0_i32_0 = arith.constant 0 : i32
    %c0_i32_1 = arith.constant 0 : i32
    return %c0_i32, %c0_i32_0 : i32, i32
  }
  func.func @transform_26(%arg0: i32) -> (i32, i32) {
    %c0_i32 = arith.constant 0 : i32
    %c0_i32_0 = arith.constant 0 : i32
    %c0_i32_1 = arith.constant 0 : i32
    return %c0_i32, %c0_i32_0 : i32, i32
  }
  func.func @transform_27(%arg0: i32) -> (i32, i32) {
    %c0_i32 = arith.constant 0 : i32
    %c0_i32_0 = arith.constant 0 : i32
    %c0_i32_1 = arith.constant 0 : i32
    return %c0_i32, %c0_i32_0 : i32, i32
  }
  func.func @transform_28(%arg0: i32) -> (i32, i32) {
    %c0_i32 = arith.constant 0 : i32
    %c0_i32_0 = arith.constant 0 : i32
    %c0_i32_1 = arith.constant 0 : i32
    return %c0_i32, %c0_i32_0 : i32, i32
  }
  func.func @transform_29(%arg0: i32) -> (i32, i32) {
    %c0_i32 = arith.constant 0 : i32
    %c0_i32_0 = arith.constant 0 : i32
    %c0_i32_1 = arith.constant 0 : i32
    return %c0_i32, %c0_i32_0 : i32, i32
  }
  func.func @transform_30(%arg0: i32) -> (i32, i32) {
    %c0_i32 = arith.constant 0 : i32
    %c0_i32_0 = arith.constant 0 : i32
    %c0_i32_1 = arith.constant 0 : i32
    return %c0_i32, %c0_i32_0 : i32, i32
  }
  func.func @transform_31(%arg0: i32) -> (i32, i32) {
    %c0_i32 = arith.constant 0 : i32
    %c0_i32_0 = arith.constant 0 : i32
    %c0_i32_1 = arith.constant 0 : i32
    return %c0_i32, %c0_i32_0 : i32, i32
  }
  func.func @transform_32(%arg0: i32) -> (i32, i32) {
    %c0_i32 = arith.constant 0 : i32
    %c0_i32_0 = arith.constant 0 : i32
    %c0_i32_1 = arith.constant 0 : i32
    return %c0_i32, %c0_i32_0 : i32, i32
  }
  func.func @transform_33(%arg0: i32) -> (i32, i32) {
    %c0_i32 = arith.constant 0 : i32
    %c0_i32_0 = arith.constant 0 : i32
    return %arg0, %c0_i32 : i32, i32
  }
  func.func @transform_34(%arg0: i32) -> (i32, i32) {
    %c0_i32 = arith.constant 0 : i32
    %c0_i32_0 = arith.constant 0 : i32
    return %arg0, %c0_i32 : i32, i32
  }
}

</mosaic_0001>

<bundles_post_ra>
// kernel: nerf_forward.1
= control target key start
LH: loop header
LB: loop body
LE: loop exit
PB: predicated region body
PF: predicated region fallthrough
CT: control target
= control target key end

     0   :  { %s9123_s6 = smov 1   ;;  %s9124_s10 = smov 2   ;;  %s14527_s0 = inlined_call_operand.smem [shape: u32[35], index: -1, kind: input, shape index: {}] }
   0x1   :  { %s9171_s5 = sld [smem:[%s14527_s0]]   ;;  %s9125_s14 = smov 3  }
   0x2   :  { %s9176_s9 = sld [smem:[%s14527_s0 + %s9123_s6]]   ;;  %s9126_s18 = smov 4  }
   0x3   :  { %s9181_s13 = sld [smem:[%s14527_s0 + %s9124_s10]]   ;;  %s9127_s22 = smov 5  }
   0x4   :  { %s9186_s17 = sld [smem:[%s14527_s0 + %s9125_s14]]   ;;  %s9128_s26 = smov 6  }
   0x5   :  { %s9191_s21 = sld [smem:[%s14527_s0 + %s9126_s18]]   ;;  %s9129_s30 = smov 7  }
   0x6   :  { %s9196_s25 = sld [smem:[%s14527_s0 + %s9127_s22]]   ;;  %s9130_s4 = smov 8  }
   0x7   :  { %s9201_s29 = sld [smem:[%s14527_s0 + %s9128_s26]]   ;;  %s9131_s10 = smov 9  }
   0x8   :  { %s9206_s3 = sld [smem:[%s14527_s0 + %s9129_s30]]   ;;  %s9132_s15 = smov 10  }
   0x9   :  { %s9211_s8 = sld [smem:[%s14527_s0 + %s9130_s4]]   ;;  %s9133_s20 = smov 11  }
   0xa   :  { %s9216_s14 = sld [smem:[%s14527_s0 + %s9131_s10]]   ;;  %s9134_s26 = smov 12  }
   0xb   :  { %s9221_s19 = sld [smem:[%s14527_s0 + %s9132_s15]]   ;;  %s9135_s1 = smov 13  }
   0xc   :  { %s9226_s24 = sld [smem:[%s14527_s0 + %s9133_s20]]   ;;  %s9136_s7 = smov 14  }
   0xd   :  { %s9231_s30 = sld [smem:[%s14527_s0 + %s9134_s26]]   ;;  %s9137_s15 = smov 15  }
   0xe   :  { %14798 = sst [smem:[#allocation2_spill]] %s9206_s3  ;;  %s9138_s22 = smov 16  }
   0xf   :  { %s9236_s6 = sld [smem:[%s14527_s0 + %s9135_s1]]   ;;  %s9139_s28 = smov 17  }
  0x10   :  { %s9241_s12 = sld [smem:[%s14527_s0 + %s9136_s7]]   ;;  %s9140_s7 = smov 18  }
  0x11   :  { %s9246_s20 = sld [smem:[%s14527_s0 + %s9137_s15]]   ;;  %s9141_s15 = smov 19  }
  0x12   :  { %s9251_s27 = sld [smem:[%s14527_s0 + %s9138_s22]]   ;;  %s9142_s22 = smov 20  }
  0x13   :  { %s9256_s4 = sld [smem:[%s14527_s0 + %s9139_s28]]   ;;  %s9143_s28 = smov 21  }
  0x14   :  { %s9261_s3 = sld [smem:[%s14527_s0 + %s9140_s7]]   ;;  %s9144_s7 = smov 22  }
  0x15   :  { %14799 = sst [smem:[#allocation3_spill]] %s9236_s6 }
  0x16   :  { %s9271_s6 = sld [smem:[%s14527_s0 + %s9142_s22]]   ;;  %s9146_s22 = smov 24  }
  0x17   :  { %14800 = sst [smem:[#allocation4_spill]] %s9246_s20 }
  0x18   :  { %s9266_s20 = sld [smem:[%s14527_s0 + %s9141_s15]]   ;;  %s9145_s15 = smov 23  }
  0x19   :  { %14801 = sst [smem:[#allocation5_spill]] %s9256_s4 }
  0x1a   :  { %14802 = sst [smem:[#allocation6_spill]] %s9261_s3 }
  0x1b   :  { %s9276_s4 = sld [smem:[%s14527_s0 + %s9143_s28]]   ;;  %s9147_s28 = smov 25  }
  0x1c   :  { %14804 = sst [smem:[#allocation8_spill]] %s9271_s6 }
  0x1d   :  { %s9281_s3 = sld [smem:[%s14527_s0 + %s9144_s7]]   ;;  %s9148_s7 = smov 26  }
  0x1e   :  { %14803 = sst [smem:[#allocation7_spill]] %s9266_s20 }
  0x1f   :  { %s9286_s20 = sld [smem:[%s14527_s0 + %s9145_s15]]   ;;  %s9149_s15 = smov 27  }
  0x20   :  { %s9291_s6 = sld [smem:[%s14527_s0 + %s9146_s22]]   ;;  %s9150_s22 = smov 28  }
  0x21   :  { %14805 = sst [smem:[#allocation9_spill]] %s9276_s4 }
  0x22   :  { %s9296_s4 = sld [smem:[%s14527_s0 + %s9147_s28]]   ;;  %s9151_s28 = smov 29  }
  0x23   :  { %14806 = sst [smem:[#allocation10_spill]] %s9281_s3 }
  0x24   :  { %s9301_s3 = sld [smem:[%s14527_s0 + %s9148_s7]]   ;;  %s9152_s7 = smov 30  }
  0x25   :  { %14807 = sst [smem:[#allocation11_spill]] %s9286_s20 }
  0x26   :  { %14808 = sst [smem:[#allocation12_spill]] %s9291_s6 }
  0x27   :  { %s9306_s20 = sld [smem:[%s14527_s0 + %s9149_s15]]   ;;  %s9153_s15 = smov 31  }
  0x28   :  { %14809 = sst [smem:[#allocation13_spill]] %s9296_s4 }
  0x29   :  { %s9311_s6 = sld [smem:[%s14527_s0 + %s9150_s22]]   ;;  %s9154_s22 = smov 32  }
  0x2a   :  { %14810 = sst [smem:[#allocation14_spill]] %s9301_s3 }
  0x2b   :  { %s9316_s4 = sld [smem:[%s14527_s0 + %s9151_s28]]   ;;  %s9155_s28 = smov 33  }
  0x2c   :  { %s9321_s3 = sld [smem:[%s14527_s0 + %s9152_s7]]   ;;  %s9156_s7 = smov 34  }
  0x2d   :  { %14811 = sst [smem:[#allocation15_spill]] %s9306_s20 }
  0x2e   :  { %s9326_s20 = sld [smem:[%s14527_s0 + %s9153_s15]]   ;;  %s9343_s15 = smov 0  }
  0x2f   :  { %14812 = sst [smem:[#allocation16_spill]] %s9311_s6 }
  0x30   :  { %s9331_s6 = sld [smem:[%s14527_s0 + %s9154_s22]]  }
  0x31   :  { %14813 = sst [smem:[#allocation17_spill]] %s9316_s4 }
  0x32   :  { %14814 = sst [smem:[#allocation18_spill]] %s9321_s3 }
  0x33   :  { %s9336_s4 = sld [smem:[%s14527_s0 + %s9155_s28]]  }
  0x34   :  { %s9341_s3 = sld [smem:[%s14527_s0 + %s9156_s7]]  }
  0x35 LB: > { %s7721_s16 = sadd.s32 4294967295, %s9121_s15   ;;  %p7725_p0 = scmp.ge.s32.totalorder %s9121_s15, 1  ;;  %s9121_s15 = sphi %s9343_s15, %s80_s15  }
  0x36   : > { %p962_p1 = scmp.lt.s32.totalorder %s9121_s15, 3 }
  0x38   : > { %p963_p2 = pnand %p7725_p0, %p962_p1 }
  0x3a   : > { %966 = sbr.rel (%p963_p2) target bundleno = 2986 (0xbaa), region = 152 }
  0x3f   : > { %v1116_v0 = vld [vmem:[%s9186_s17] sm:$0xff]  ;;  %s7726_s0 = sshll.u32 %s7721_s16, 4  ;;  %vm1127_vm0 = vcmask 64512   ;;  %v8937_v35 = vld [vmem:[%s9211_s8 + $0x10] sm:$0xff]   ;;  %v8938_v37 = vld [vmem:[%s9211_s8 + $0x8] sm:$0xff]   ;;  %s14991_s26 = sld [smem:[#allocation3_spill]] }
  0x40   : > { %v1115_v1 = vld [vmem:[%s9181_s13] sm:$0xff]  ;;  %8333 = vmatprep.subr.mxu0 %v1116_v0  ;;  %p1059_p3 = scmp.lt.s32.totalorder %s7726_s0, 31  ;;  %s14992_s28 = sld [smem:[#allocation6_spill]] }
  0x41   : > { %v1119_v2 = vld [vmem:[%s9201_s29] sm:$0xff]  ;;  %8359 = vmatprep.subr.mxu1 %v1115_v1  ;;  %8334 = vmatpush3.msra.mxu0 %v1116_v0  ;;  %s14993_s1 = sld [smem:[#allocation7_spill]] }
  0x42   : > { %8360 = vmatpush3.msra.mxu1 %v1115_v1  ;;  %s15328_s0 = smov (!%p1059_p3, %s7726_s0), 31  ;;  %8385 = vmatprep.subr.mxu0 %v1119_v2  ;;  %v1118_v36 = vld [vmem:[%s9196_s25] sm:$0xff]  ;;  %s14994_s2 = sld [smem:[#allocation4_spill]] }
  0x43   : > { %s9354_s18 = sshll.u32 %s15328_s0, 3  ;;  %8411 = vmatprep.subr.mxu1 %v1118_v36  ;;  %v9464_v39 = vld [vmem:[%s9191_s21] ss:$0 sm:$0xff]  ;;  %s14995_s7 = sld [smem:[#allocation9_spill]] }
  0x44   : > { %s9358_s22 = scalar_lea.vmem %s9171_s5, %s9354_s18  ;;  %s9403_s23 = scalar_lea.vmem %s9176_s9, %s9354_s18 }
  0x45   : > { %v1083_v3 = vld [vmem:[%s9358_s22] sm:$0xff]  ;;  %v1084_v4 = vld [vmem:[%s9358_s22 + $0x8] sm:$0xff]  ;;  %v1085_v5 = vld [vmem:[%s9358_s22 + $0x10] sm:$0xff]  ;;  %s14996_s10 = sld [smem:[#allocation5_spill]] }
  0x46   : > { %8335 = vmatprep.mubr.msk.f32.mxu0 %vm1127_vm0, %v1083_v3  ;;  %8361 = vmatprep.mubr.msk.f32.mxu1 %vm1127_vm0, %v1083_v3  ;;  %v1086_v6 = vld [vmem:[%s9358_s22 + $0x18] sm:$0xff]  ;;  %v1087_v7 = vld [vmem:[%s9358_s22 + $0x20] sm:$0xff]  ;;  %v1088_v8 = vld [vmem:[%s9358_s22 + $0x28] sm:$0xff]  ;;  %s14997_s11 = sld [smem:[#allocation2_spill]] }
  0x47   : > { %8336 = vmatmul.mubr.msk.f32.vlgmr.msra.gmra.mxu0 %vm1127_vm0, %v1084_v4  ;;  %8362 = vmatmul.mubr.msk.f32.vlgmr.msra.gmra.mxu1 %vm1127_vm0, %v1084_v4  ;;  %v1089_v9 = vld [vmem:[%s9358_s22 + $0x30] sm:$0xff]  ;;  %v1090_v10 = vld [vmem:[%s9358_s22 + $0x38] sm:$0xff]  ;;  %v1091_v11 = vld [vmem:[%s9358_s22 + $0x40] sm:$0xff]  ;;  %s15036_s16 = sld [smem:[#allocation11_spill]] }
  0x48   : > { %8338 = vmatprep.mubr.msk.f32.mxu0 %vm1127_vm0, %v1085_v5  ;;  %8364 = vmatprep.mubr.msk.f32.mxu1 %vm1127_vm0, %v1085_v5  ;;  %v1092_v12 = vld [vmem:[%s9358_s22 + $0x48] sm:$0xff]  ;;  %v1093_v13 = vld [vmem:[%s9358_s22 + $0x50] sm:$0xff]  ;;  %v1094_v14 = vld [vmem:[%s9358_s22 + $0x58] sm:$0xff]  ;;  %s15116_s0 = sld [smem:[#allocation8_spill]] }
  0x49   : > { %8386 = vmatpush3.msra.mxu0 %v1119_v2  ;;  %v1095_v15 = vld [vmem:[%s9358_s22 + $0x60] sm:$0xff]  ;;  %v1096_v16 = vld [vmem:[%s9358_s22 + $0x68] sm:$0xff]  ;;  %v1097_v17 = vld [vmem:[%s9358_s22 + $0x70] sm:$0xff]  ;;  %8412 = vmatpush3.msra.mxu1 %v1118_v36 }
  0x4a   : > { %v1098_v18 = vld [vmem:[%s9358_s22 + $0x78] sm:$0xff]  ;;  %v1099_v19 = vld [vmem:[%s9403_s23] sm:$0xff]  ;;  %v1100_v20 = vld [vmem:[%s9403_s23 + $0x8] sm:$0xff]  ;;  %8437 = vmatprep.subr.bf16.mxu0 %v8937_v35  ;;  %s15207_s22 = sld [smem:[#allocation16_spill]] }
  0x4b   : > { %8339 = vmatmul.mubr.msk.f32.gmra.mxu0 %vm1127_vm0, %v1086_v6  ;;  %8365 = vmatmul.mubr.msk.f32.gmra.mxu1 %vm1127_vm0, %v1086_v6  ;;  %v1101_v21 = vld [vmem:[%s9403_s23 + $0x10] sm:$0xff]  ;;  %v1102_v22 = vld [vmem:[%s9403_s23 + $0x18] sm:$0xff]  ;;  %v1103_v23 = vld [vmem:[%s9403_s23 + $0x20] sm:$0xff] }
  0x4c   : > { %8341 = vmatprep.mubr.msk.f32.mxu0 %vm1127_vm0, %v1087_v7  ;;  %8367 = vmatprep.mubr.msk.f32.mxu1 %vm1127_vm0, %v1087_v7  ;;  %v1104_v24 = vld [vmem:[%s9403_s23 + $0x28] sm:$0xff]  ;;  %v1105_v25 = vld [vmem:[%s9403_s23 + $0x30] sm:$0xff]  ;;  %v1106_v26 = vld [vmem:[%s9403_s23 + $0x38] sm:$0xff] }
  0x4d   : > { %v1107_v27 = vld [vmem:[%s9403_s23 + $0x40] sm:$0xff]  ;;  %v1108_v28 = vld [vmem:[%s9403_s23 + $0x48] sm:$0xff]  ;;  %v1109_v29 = vld [vmem:[%s9403_s23 + $0x50] sm:$0xff] }
  0x4e   : > { %v1110_v30 = vld [vmem:[%s9403_s23 + $0x58] sm:$0xff]  ;;  %v1111_v31 = vld [vmem:[%s9403_s23 + $0x60] sm:$0xff]  ;;  %v1112_v32 = vld [vmem:[%s9403_s23 + $0x68] sm:$0xff] }
  0x4f   : > { %8342 = vmatmul.mubr.msk.f32.gmra.mxu0 %vm1127_vm0, %v1088_v8  ;;  %8368 = vmatmul.mubr.msk.f32.gmra.mxu1 %vm1127_vm0, %v1088_v8  ;;  %v1113_v33 = vld [vmem:[%s9403_s23 + $0x70] sm:$0xff]  ;;  %v1114_v34 = vld [vmem:[%s9403_s23 + $0x78] sm:$0xff]  ;;  %s15239_s23 = sld [smem:[#allocation13_spill]] }
  0x50   : > { %8344 = vmatprep.mubr.msk.f32.mxu0 %vm1127_vm0, %v1089_v9  ;;  %8370 = vmatprep.mubr.msk.f32.mxu1 %vm1127_vm0, %v1089_v9 }
  0x53   : > { %8345 = vmatmul.mubr.msk.f32.gmra.mxu0 %vm1127_vm0, %v1090_v10  ;;  %8371 = vmatmul.mubr.msk.f32.gmra.mxu1 %vm1127_vm0, %v1090_v10 }
  0x54   : > { %8347 = vmatprep.mubr.msk.f32.mxu0 %vm1127_vm0, %v1091_v11  ;;  %8373 = vmatprep.mubr.msk.f32.mxu1 %vm1127_vm0, %v1091_v11 }
  0x57   : > { %8348 = vmatmul.mubr.msk.f32.gmra.mxu0 %vm1127_vm0, %v1092_v12  ;;  %8374 = vmatmul.mubr.msk.f32.gmra.mxu1 %vm1127_vm0, %v1092_v12 }
  0x58   : > { %8350 = vmatprep.mubr.msk.f32.mxu0 %vm1127_vm0, %v1093_v13  ;;  %8376 = vmatprep.mubr.msk.f32.mxu1 %vm1127_vm0, %v1093_v13 }
  0x5b   : > { %8351 = vmatmul.mubr.msk.f32.gmra.mxu0 %vm1127_vm0, %v1094_v14  ;;  %8377 = vmatmul.mubr.msk.f32.gmra.mxu1 %vm1127_vm0, %v1094_v14 }
  0x5c   : > { %8353 = vmatprep.mubr.msk.f32.mxu0 %vm1127_vm0, %v1095_v15  ;;  %8379 = vmatprep.mubr.msk.f32.mxu1 %vm1127_vm0, %v1095_v15 }
  0x5f   : > { %8354 = vmatmul.mubr.msk.f32.gmra.mxu0 %vm1127_vm0, %v1096_v16  ;;  %8380 = vmatmul.mubr.msk.f32.gmra.mxu1 %vm1127_vm0, %v1096_v16 }
  0x60   : > { %8356 = vmatprep.mubr.msk.f32.mxu0 %vm1127_vm0, %v1097_v17  ;;  %8382 = vmatprep.mubr.msk.f32.mxu1 %vm1127_vm0, %v1097_v17 }
  0x63   : > { %8357 = vmatmul.mubr.msk.f32.gmra.mxu0 %vm1127_vm0, %v1098_v18  ;;  %8383 = vmatmul.mubr.msk.f32.gmra.mxu1 %vm1127_vm0, %v1098_v18 }
  0x64   : > { %8387 = vmatprep.mubr.msk.f32.mxu0 %vm1127_vm0, %v1099_v19  ;;  %8413 = vmatprep.mubr.msk.f32.mxu1 %vm1127_vm0, %v1099_v19 }
  0x67   : > { %8388 = vmatmul.mubr.msk.f32.vlgmr.msra.gmra.mxu0 %vm1127_vm0, %v1100_v20  ;;  %8414 = vmatmul.mubr.msk.f32.vlgmr.msra.gmra.mxu1 %vm1127_vm0, %v1100_v20 }
  0x68   : > { %8390 = vmatprep.mubr.msk.f32.mxu0 %vm1127_vm0, %v1101_v21  ;;  %8438 = vmatpush3.bf16.msra.mxu0 %v8937_v35  ;;  %v14544_v35 = vmov 2102212464  }
  0x69   : > { %8416 = vmatprep.mubr.msk.f32.mxu1 %vm1127_vm0, %v1101_v21  ;;  %8439 = vmatprep.subr.bf16.mxu0 %v8938_v37 }
  0x6b   : > { %8391 = vmatmul.mubr.msk.f32.gmra.mxu0 %vm1127_vm0, %v1102_v22  ;;  %8417 = vmatmul.mubr.msk.f32.gmra.mxu1 %vm1127_vm0, %v1102_v22 }
  0x6c   : > { %8393 = vmatprep.mubr.msk.f32.mxu0 %vm1127_vm0, %v1103_v23  ;;  %8440 = vmatpush3.bf16.msra.mxu0 %v8938_v37  ;;  %v14579_v37 = vmov 920167782  }
  0x6d   : > { %8419 = vmatprep.mubr.msk.f32.mxu1 %vm1127_vm0, %v1103_v23 }
  0x6f   : > { %8394 = vmatmul.mubr.msk.f32.gmra.mxu0 %vm1127_vm0, %v1104_v24  ;;  %8420 = vmatmul.mubr.msk.f32.gmra.mxu1 %vm1127_vm0, %v1104_v24 }
  0x70   : > { %8396 = vmatprep.mubr.msk.f32.mxu0 %vm1127_vm0, %v1105_v25  ;;  %8422 = vmatprep.mubr.msk.f32.mxu1 %vm1127_vm0, %v1105_v25 }
  0x73   : > { %8397 = vmatmul.mubr.msk.f32.gmra.mxu0 %vm1127_vm0, %v1106_v26  ;;  %8423 = vmatmul.mubr.msk.f32.gmra.mxu1 %vm1127_vm0, %v1106_v26 }
  0x74   : > { %8399 = vmatprep.mubr.msk.f32.mxu0 %vm1127_vm0, %v1107_v27  ;;  %8425 = vmatprep.mubr.msk.f32.mxu1 %vm1127_vm0, %v1107_v27 }
  0x77   : > { %8400 = vmatmul.mubr.msk.f32.gmra.mxu0 %vm1127_vm0, %v1108_v28  ;;  %8426 = vmatmul.mubr.msk.f32.gmra.mxu1 %vm1127_vm0, %v1108_v28 }
  0x78   : > { %8402 = vmatprep.mubr.msk.f32.mxu0 %vm1127_vm0, %v1109_v29  ;;  %8428 = vmatprep.mubr.msk.f32.mxu1 %vm1127_vm0, %v1109_v29 }
  0x7b   : > { %8403 = vmatmul.mubr.msk.f32.gmra.mxu0 %vm1127_vm0, %v1110_v30  ;;  %8429 = vmatmul.mubr.msk.f32.gmra.mxu1 %vm1127_vm0, %v1110_v30 }
  0x7c   : > { %8405 = vmatprep.mubr.msk.f32.mxu0 %vm1127_vm0, %v1111_v31  ;;  %8431 = vmatprep.mubr.msk.f32.mxu1 %vm1127_vm0, %v1111_v31 }
  0x7f   : > { %8406 = vmatmul.mubr.msk.f32.gmra.mxu0 %vm1127_vm0, %v1112_v32  ;;  %8432 = vmatmul.mubr.msk.f32.gmra.mxu1 %vm1127_vm0, %v1112_v32 }
  0x80   : > { %8408 = vmatprep.mubr.msk.f32.mxu0 %vm1127_vm0, %v1113_v33  ;;  %8434 = vmatprep.mubr.msk.f32.mxu1 %vm1127_vm0, %v1113_v33 }
  0x83   : > { %8409 = vmatmul.mubr.msk.f32.gmra.mxu0 %vm1127_vm0, %v1114_v34  ;;  %8435 = vmatmul.mubr.msk.f32.gmra.mxu1 %vm1127_vm0, %v1114_v34 }
 0x107   : > { %v8337_v38 = vpop.f32.mrf.mxu0 }
 0x108   : > { %v9467_v41 = vadd.f32 %v8337_v38, %v9464_v39 }
 0x109   : > { %v1242_v40 = vpop.f32.mrf.mxu0 }
 0x10a   : > { %v9470_v43 = vadd.f32 %v9464_v39, %v1242_v40  ;;  %v1428_v44 = vand.u32 2139095040, %v9467_v41  ;;  %v14537_v0 = vand.u32 2147483647, %v9467_v41 }
 0x10b   : > { %v8340_v42 = vpop.f32.mrf.mxu0 }
 0x10c   : > { %v1324_v46 = vand.u32 2139095040, %v9470_v43  ;;  %v1429_v47 = vshrl.u32 %v1428_v44, 23  ;;  %v9475_v48 = vadd.f32 %v8340_v42, %v9464_v39  ;;  %v1432_v7 = vand.u32 8388607, %v14537_v0 }
 0x10d   : > { %v1252_v45 = vpop.f32.mrf.mxu0  ;;  %v14536_v8 = vand.u32 2147483647, %v9470_v43 }
 0x10e   : > { %v1325_v50 = vshrl.u32 %v1324_v46, 23  ;;  %v7755_v51 = vadd.s32 4294967169, %v1429_v47  ;;  %v1636_v52 = vand.u32 2139095040, %v9475_v48  ;;  %v9479_v53 = vadd.f32 %v9464_v39, %v1252_v45  ;;  %v8939_v46 = vld [vmem:[%s9211_s8] sm:$0xff]  }
 0x10f   : > { %v8343_v49 = vpop.f32.mrf.mxu0  ;;  %v1433_v17 = vor.u32 8388608, %v1432_v7  ;;  %v9504_v18 = vand.u32 8388607, %v14536_v8  ;;  %v14538_v47 = vmov 1326507024   ;;  %8441 = vmatprep.subr.bf16.mxu0 %v8939_v46 }
 0x110   : > { %v7751_v55 = vadd.s32 4294967169, %v1325_v50  ;;  %v9482_v56 = vadd.f32 %v8343_v49, %v9464_v39  ;;  %v1435_v57 = vadd.s32 1, %v7755_v51  ;;  %v1637_v58 = vshrl.u32 %v1636_v52, 23  ;;  %8442 = vmatpush3.bf16.msra.mxu0 %v8939_v46 }
 0x111   : > { %v1262_v54 = vpop.f32.mrf.mxu0  ;;  %v1532_v59 = vand.u32 2139095040, %v9479_v53  ;;  %v9518_v30 = vshll.u32 %v1433_v17, 8 }
 0x112   : > { %14815 = vst [vmem:[#allocation19_spill] sm:$0xff] %v9482_v56  ;;  %v1331_v61 = vadd.s32 1, %v7751_v55  ;;  %v1844_v62 = vand.u32 2139095040, %v9482_v56  ;;  %vm1436_vm1 = vcmp.gt.s32.totalorder %v1435_v57, 0  ;;  %v7763_v63 = vadd.s32 4294967169, %v1637_v58 }
 0x113   : > { %v8346_v60 = vpop.f32.mrf.mxu0  ;;  %v1533_v1 = vshrl.u32 %v1532_v59, 23  ;;  %v1437_v3 = vsel %vm1436_vm1, %v1435_v57, 0  ;;  %v9488_v5 = vadd.f32 %v9464_v39, %v1262_v54 }
 0x114   : > { %vm1332_vm2 = vcmp.gt.s32.totalorder %v1331_v61, 0  ;;  %v1845_v4 = vshrl.u32 %v1844_v62, 23  ;;  %v1643_v6 = vadd.s32 1, %v7763_v63  ;;  %v9494_v10 = vadd.f32 %v8346_v60, %v9464_v39 }
 0x115   : > { %v1272_v2 = vpop.f32.mrf.mxu0  ;;  %14816 = vst [vmem:[#allocation20_spill] sm:$0xff] %v9488_v5  ;;  %v7759_v9 = vadd.s32 4294967169, %v1533_v1  ;;  %v9496_v11 = vand.u32 31, %v1437_v3  ;;  %v1333_v12 = vsel %vm1332_vm2, %v1331_v61, 0  ;;  %v1740_v15 = vand.u32 2139095040, %v9488_v5 }
 0x116   : > { %14817 = vst [vmem:[#allocation21_spill] sm:$0xff] %v9494_v10  ;;  %v7771_v14 = vadd.s32 4294967169, %v1845_v4  ;;  %vm1644_vm3 = vcmp.gt.s32.totalorder %v1643_v6, 0  ;;  %v9500_v16 = vadd.f32 %v9464_v39, %v1272_v2  ;;  %v9506_v19 = vand.u32 31, %v1333_v12 }
 0x117   : > { %v8349_v13 = vpop.f32.mrf.mxu0  ;;  %v1539_v20 = vadd.s32 1, %v7759_v9  ;;  %v2052_v21 = vand.u32 2139095040, %v9494_v10  ;;  %v9513_v23 = vsub.s32 32, %v9496_v11  ;;  %v9515_v24 = vshrl.u32 %v1437_v3, 5 }
 0x118   : > { %14818 = vst [vmem:[#allocation22_spill] sm:$0xff] %v9500_v16  ;;  %v9510_v22 = vadd.f32 %v8349_v13, %v9464_v39  ;;  %v1645_v25 = vsel %vm1644_vm3, %v1643_v6, 0  ;;  %v1851_v26 = vadd.s32 1, %v7771_v14  ;;  %v1741_v27 = vshrl.u32 %v1740_v15, 23 }
 0x119   : > { %v1948_v28 = vand.u32 2139095040, %v9500_v16  ;;  %v1282_v29 = vpop.f32.mrf.mxu0  ;;  %v9522_v32 = vsub.s32 32, %v9506_v19  ;;  %vm1540_vm4 = vcmp.gt.s32.totalorder %v1539_v20, 0  ;;  %v2053_v33 = vshrl.u32 %v2052_v21, 23 }
 0x11a   : > { %14819 = vst [vmem:[#allocation23_spill] sm:$0xff] %v9510_v22  ;;  %v2260_v34 = vand.u32 2139095040, %v9510_v22  ;;  %v1451_v36 = vshll.u32 %v14544_v35, %v9496_v11  ;;  %v1452_v38 = vshrl.u32 %v14579_v37, %v9513_v23  ;;  %v1454_v40 = vshll.u32 %v14579_v37, %v9496_v11 }
 0x11b   : > { %v9531_v42 = vand.u32 31, %v1645_v25  ;;  %vm1460_vm5 = vcmp.lt.s32.totalorder %v9515_v24, 4  ;;  %vm1852_vm6 = vcmp.gt.s32.totalorder %v1851_v26, 0  ;;  %v7767_v44 = vadd.s32 4294967169, %v1741_v27  ;;  %v8352_v4 = vpop.f32.mrf.mxu0 }
 0x11c   : > { %v9535_v45 = vadd.f32 %v9464_v39, %v1282_v29  ;;  %v1455_v49 = vshrl.u32 %v14538_v47, %v9513_v23  ;;  %v9540_v50 = vshrl.u32 %v1333_v12, 5  ;;  %v1541_v51 = vsel %vm1540_vm4, %v1539_v20, 0 }
 0x11d   : > { %v1949_v52 = vshrl.u32 %v1948_v28, 23  ;;  %v1347_v54 = vshll.u32 %v14544_v35, %v9506_v19  ;;  %v1348_v55 = vshrl.u32 %v14579_v37, %v9522_v32  ;;  %v7779_v57 = vadd.s32 4294967169, %v2053_v33  ;;  %v1292_v46 = vpop.f32.mrf.mxu0 }
 0x11e   : > { %14820 = vst [vmem:[#allocation24_spill] sm:$0xff] %v9535_v45  ;;  %v2261_v58 = vshrl.u32 %v2260_v34, 23  ;;  %v9547_v59 = vor.u32 %v1452_v38, %v1451_v36  ;;  %v1351_v60 = vshrl.u32 %v14538_v47, %v9522_v32  ;;  %v9552_v61 = vsub.s32 32, %v9531_v42 }
 0x11f   : > { %v1853_v62 = vsel %vm1852_vm6, %v1851_v26, 0  ;;  %v1350_v63 = vshll.u32 %v14579_v37, %v9506_v19  ;;  %v9557_v1 = vand.u32 31, %v1541_v51  ;;  %v1747_v2 = vadd.s32 1, %v7767_v44 }
 0x120   : > { %v2156_v3 = vand.u32 2139095040, %v9535_v45  ;;  %v1456_v6 = vor.u32 %v1455_v49, %v1454_v40  ;;  %vm1356_vm7 = vcmp.lt.s32.totalorder %v9540_v50, 4  ;;  %v9561_v7 = vshrl.u32 %v1645_v25, 5 }
 0x121   : > { %v7775_v9 = vadd.s32 4294967169, %v1949_v52  ;;  %v9563_v12 = vor.u32 %v1348_v55, %v1347_v54  ;;  %v9565_v13 = vand.u32 31, %v1853_v62  ;;  %v2059_v14 = vadd.s32 1, %v7779_v57 }
 0x122   : > { %v7787_v15 = vadd.s32 4294967169, %v2261_v58  ;;  %v9570_v17 = vsel %vm1460_vm5, %v9547_v59, 920167782  ;;  %v1352_v20 = vor.u32 %v1351_v60, %v1350_v63  ;;  %v1660_v21 = vshrl.u32 %v14579_v37, %v9552_v61 }
 0x123   : > { %14821 = vst [vmem:[#allocation25_spill] sm:$0xff] %v9565_v13  ;;  %v9575_v26 = vadd.f32 %v8352_v4, %v9464_v39  ;;  %v1663_v25 = vshrl.u32 %v14538_v47, %v9552_v61  ;;  %v9580_v27 = vsub.s32 32, %v9557_v1  ;;  %vm1748_vm8 = vcmp.gt.s32.totalorder %v1747_v2, 0 }
 0x124   : > { %v2157_v28 = vshrl.u32 %v2156_v3, 23  ;;  %v9584_v29 = vsel %vm1460_vm5, %v1456_v6, 1326507024  ;;  %v1659_v33 = vshll.u32 %v14544_v35, %v9531_v42  ;;  %v1662_v34 = vshll.u32 %v14579_v37, %v9531_v42 }
 0x125   : > { %14822 = vst [vmem:[#allocation26_spill] sm:$0xff] %v9575_v26  ;;  %v1955_v36 = vadd.s32 1, %v7775_v9  ;;  %v9593_v38 = vsel %vm1356_vm7, %v9563_v12, 920167782  ;;  %vm1668_vm9 = vcmp.lt.s32.totalorder %v9561_v7, 4  ;;  %v9597_v40 = vsub.s32 32, %v9565_v13 }
 0x126   : > { %vm2060_vm10 = vcmp.gt.s32.totalorder %v2059_v14, 0  ;;  %v2267_v44 = vadd.s32 1, %v7787_v15  ;;  %v9601_v49 = vsel %vm1356_vm7, %v1352_v20, 1326507024  ;;  %v9603_v52 = vshrl.u32 %v1541_v51, 5 }
 0x127   : > { %14823 = vst [vmem:[#allocation27_spill] sm:$0xff] %v9597_v40  ;;  %v1749_v54 = vsel %vm1748_vm8, %v1747_v2, 0  ;;  %v2468_v55 = vand.u32 2139095040, %v9575_v26  ;;  %v9606_v57 = vor.u32 %v1660_v21, %v1659_v33  ;;  %v1664_v58 = vor.u32 %v1663_v25, %v1662_v34 }
 0x128   : > { %v1556_v60 = vshrl.u32 %v14579_v37, %v9580_v27  ;;  %v7783_v63 = vadd.s32 4294967169, %v2157_v28  ;;  %v1559_v3 = vshrl.u32 %v14538_v47, %v9580_v27  ;;  %v2061_v4 = vsel %vm2060_vm10, %v2059_v14, 0 }
 0x129   : > { %vm1956_vm11 = vcmp.gt.s32.totalorder %v1955_v36, 0  ;;  %v9613_v6 = vadd.f32 %v9464_v39, %v1292_v46  ;;  %v1868_v51 = vshrl.u32 %v14579_v37, %v9597_v40  ;;  %v1871_v2 = vshrl.u32 %v14538_v47, %v9597_v40 }
 0x12a   : > { %v9619_v9 = vand.u32 31, %v1749_v54  ;;  %vm2268_vm12 = vcmp.gt.s32.totalorder %v2267_v44, 0  ;;  %v1555_v15 = vshll.u32 %v14544_v35, %v9557_v1  ;;  %v1558_v20 = vshll.u32 %v14579_v37, %v9557_v1 }
 0x12b   : > { %14824 = vst [vmem:[#allocation28_spill] sm:$0xff] %v9613_v6  ;;  %v1867_v14 = vshll.u32 %v14544_v35, %v9565_v13  ;;  %v2469_v21 = vshrl.u32 %v2468_v55, 23  ;;  %v1870_v25 = vshll.u32 %v14579_v37, %v9565_v13  ;;  %v9629_v28 = vand.u32 31, %v2061_v4 }
 0x12c   : > { %14825 = vst [vmem:[#allocation29_spill] sm:$0xff] %v9619_v9  ;;  %v1957_v33 = vsel %vm1956_vm11, %v1955_v36, 0  ;;  %v2163_v34 = vadd.s32 1, %v7783_v63  ;;  %v9631_v46 = vor.u32 %v1556_v60, %v1555_v15  ;;  %v9633_v8 = vshrl.u32 %v1853_v62, 5 }
 0x12d   : > { %14826 = vst [vmem:[#allocation30_spill] sm:$0xff] %v9629_v28  ;;  %v2269_v0 = vsel %vm2268_vm12, %v2267_v44, 0  ;;  %v2364_v31 = vand.u32 2139095040, %v9613_v6  ;;  %v1560_v47 = vor.u32 %v1559_v3, %v1558_v20  ;;  %v9636_v26 = vor.u32 %v1868_v51, %v1867_v14 }
 0x12e   : > { %14827 = vst [vmem:[#allocation31_spill] sm:$0xff] %v9633_v8  ;;  %v1872_v45 = vor.u32 %v1871_v2, %v1870_v25  ;;  %v9639_v55 = vsub.s32 32, %v9619_v9  ;;  %v9644_v35 = vsel %vm1668_vm9, %v9606_v57, 920167782  ;;  %vm1564_vm13 = vcmp.lt.s32.totalorder %v9603_v52, 4 }
 0x12f   : > { %14828 = vst [vmem:[#allocation32_spill] sm:$0xff] %v9636_v26  ;;  %v9647_v36 = vand.u32 31, %v1957_v33  ;;  %v7795_v62 = vadd.s32 4294967169, %v2469_v21  ;;  %v9651_v44 = vsel %vm1668_vm9, %v1664_v58, 1326507024  ;;  %v9654_v60 = vsub.s32 32, %v9629_v28 }
 0x130   : > { %14829 = vst [vmem:[#allocation33_spill] sm:$0xff] %v9639_v55  ;;  %v9656_v63 = vand.u32 31, %v2269_v0  ;;  %vm2164_vm14 = vcmp.gt.s32.totalorder %v2163_v34, 0  ;;  %v9661_v3 = vsel %vm1564_vm13, %v9631_v46, 920167782  ;;  %vm1876_vm15 = vcmp.lt.s32.totalorder %v9633_v8, 4 }
 0x131   : > { %14830 = vst [vmem:[#allocation34_spill] sm:$0xff] %v9647_v36  ;;  %14831 = vst [vmem:[#allocation35_spill] sm:$0xff] %v9654_v60  ;;  %v9664_v51 = vshrl.u32 %v1749_v54, 5  ;;  %v2365_v2 = vshrl.u32 %v2364_v31, 23  ;;  %v9668_v58 = vsel %vm1564_vm13, %v1560_v47, 1326507024  ;;  %v1764_v14 = vshrl.u32 %v14579_v37, %v9639_v55 }
 0x132   : > { %14832 = vst [vmem:[#allocation36_spill] sm:$0xff] %v9656_v63  ;;  %v9673_v15 = vsel %vm1876_vm15, %v9636_v26, 920167782  ;;  %v9677_v20 = vsel %vm1876_vm15, %v1872_v45, 1326507024  ;;  %v9684_v31 = vsub.s32 32, %v9647_v36  ;;  %v2076_v16 = vshrl.u32 %v14579_v37, %v9654_v60 }
 0x133   : > { %14833 = vst [vmem:[#allocation37_spill] sm:$0xff] %v9673_v15  ;;  %14834 = vst [vmem:[#allocation38_spill] sm:$0xff] %v9677_v20  ;;  %v14835_v54 = vmov 1326507024   ;;  %v2165_v47 = vsel %vm2164_vm14, %v2163_v34, 0  ;;  %v2475_v25 = vadd.s32 1, %v7795_v62  ;;  %v2078_v20 = vshll.u32 %v14579_v37, %v9629_v28 }
 0x134   : > { %v1767_v21 = vshrl.u32 %v14835_v54, %v9639_v55  ;;  %14836 = vst [vmem:[#allocation39_spill] sm:$0xff] %v9684_v31  ;;  %v14837_v6 = vmov 2102212464   ;;  %v2079_v45 = vshrl.u32 %v14835_v54, %v9654_v60  ;;  %v9693_v10 = vsub.s32 32, %v9656_v63 }
 0x135   : > { %v1763_v22 = vshll.u32 %v14837_v6, %v9619_v9  ;;  %v1766_v55 = vshll.u32 %v14579_v37, %v9619_v9  ;;  %vm1772_vm0 = vcmp.lt.s32.totalorder %v9664_v51, 4  ;;  %v9698_v5 = vshrl.u32 %v2061_v4, 5  ;;  %v8355_v4 = vpop.f32.mrf.mxu0 }
 0x136   : > { %14838 = vst [vmem:[#allocation40_spill] sm:$0xff] %v9693_v10  ;;  %v7791_v34 = vadd.s32 4294967169, %v2365_v2  ;;  %v2075_v26 = vshll.u32 %v14837_v6, %v9629_v28  ;;  %v9706_v60 = vand.u32 31, %v2165_v47  ;;  %v9708_v8 = vshrl.u32 %v1957_v33, 5 }
 0x137   : > { %14839 = vst [vmem:[#allocation41_spill] sm:$0xff] %v9698_v5  ;;  %v9700_v62 = vor.u32 %v1764_v14, %v1763_v22  ;;  %v1768_v15 = vor.u32 %v1767_v21, %v1766_v55  ;;  %v1972_v9 = vshrl.u32 %v14579_v37, %v9684_v31  ;;  %vm2476_vm1 = vcmp.gt.s32.totalorder %v2475_v25, 0  ;;  %v1302_v56 = vpop.f32.mrf.mxu0 }
 0x138   : > { %14841 = vst [vmem:[#allocation43_spill] sm:$0xff] %v9706_v60  ;;  %14842 = vst [vmem:[#allocation44_spill] sm:$0xff] %v9708_v8  ;;  %v9712_v13 = vor.u32 %v2076_v16, %v2075_v26  ;;  %v2080_v22 = vor.u32 %v2079_v45, %v2078_v20  ;;  %v1975_v2 = vshrl.u32 %v14835_v54, %v9684_v31  ;;  %v2371_v21 = vadd.s32 1, %v7791_v34 }
 0x139   : > { %14840 = vst [vmem:[#allocation42_spill] sm:$0xff] %v9700_v62  ;;  %v2284_v14 = vshrl.u32 %v14579_v37, %v9693_v10  ;;  %v1971_v28 = vshll.u32 %v14837_v6, %v9647_v36  ;;  %v1974_v33 = vshll.u32 %v14579_v37, %v9647_v36  ;;  %v2287_v55 = vshrl.u32 %v14835_v54, %v9693_v10 }
 0x13a   : > { %14843 = vst [vmem:[#allocation45_spill] sm:$0xff] %v9712_v13  ;;  %v2283_v16 = vshll.u32 %v14837_v6, %v9656_v63  ;;  %v9727_v26 = vsub.s32 32, %v9706_v60  ;;  %v2477_v20 = vsel %vm2476_vm1, %v2475_v25, 0  ;;  %v9730_v45 = vadd.f32 %v8355_v4, %v9464_v39 }
 0x13b   : > { %vm2084_vm2 = vcmp.lt.s32.totalorder %v9698_v5, 4  ;;  %v9733_v31 = vor.u32 %v1972_v9, %v1971_v28  ;;  %v9735_v40 = vshrl.u32 %v2269_v0, 5  ;;  %v2286_v10 = vshll.u32 %v14579_v37, %v9656_v63 }
 0x13c   : > { %14844 = vst [vmem:[#allocation46_spill] sm:$0xff] %v9727_v26  ;;  %14845 = vst [vmem:[#allocation47_spill] sm:$0xff] %v9730_v45  ;;  %v9742_v34 = vsel %vm1772_vm0, %v9700_v62, 920167782  ;;  %v9746_v25 = vsel %vm1772_vm0, %v1768_v15, 1326507024  ;;  %v1976_v4 = vor.u32 %v1975_v2, %v1974_v33  ;;  %v9748_v36 = vor.u32 %v2284_v14, %v2283_v16 }
 0x13d   : > { %14846 = vst [vmem:[#allocation48_spill] sm:$0xff] %v9733_v31  ;;  %14847 = vst [vmem:[#allocation49_spill] sm:$0xff] %v9735_v40  ;;  %vm1980_vm3 = vcmp.lt.s32.totalorder %v9708_v8, 4  ;;  %v2288_v0 = vor.u32 %v2287_v55, %v2286_v10  ;;  %v9751_v9 = vand.u32 31, %v2477_v20  ;;  %vm2372_vm4 = vcmp.gt.s32.totalorder %v2371_v21, 0 }
 0x13e   : > { %14848 = vst [vmem:[#allocation50_spill] sm:$0xff] %v9748_v36  ;;  %v9756_v28 = vsel %vm2084_vm2, %v9712_v13, 920167782  ;;  %v9760_v37 = vsel %vm2084_vm2, %v2080_v22, 1326507024  ;;  %v2676_v14 = vand.u32 2139095040, %v9730_v45  ;;  %v2183_v33 = vshrl.u32 %v14835_v54, %v9727_v26 }
 0x13f   : > { %14849 = vst [vmem:[#allocation51_spill] sm:$0xff] %v9751_v9  ;;  %14850 = vst [vmem:[#allocation52_spill] sm:$0xff] %v9756_v28  ;;  %v14852_v15 = vmov 920167782   ;;  %v9768_v10 = vsel %vm1980_vm3, %v9733_v31, 920167782  ;;  %v9774_v55 = vadd.f32 %v9464_v39, %v1302_v56  ;;  %v2179_v45 = vshll.u32 %v14837_v6, %v9706_v60  ;;  %v8358_v28 = vpop.f32.mrf.mxu0 }
 0x140   : > { %14851 = vst [vmem:[#allocation53_spill] sm:$0xff] %v9760_v37  ;;  %v2180_v2 = vshrl.u32 %v14852_v15, %v9727_v26  ;;  %14853 = vst [vmem:[#allocation54_spill] sm:$0xff] %v9768_v10  ;;  %vm2292_vm6 = vcmp.lt.s32.totalorder %v9735_v40, 4  ;;  %v9778_v22 = vsel %vm1980_vm3, %v1976_v4, 1326507024  ;;  %v2373_v63 = vsel %vm2372_vm4, %v2371_v21, 0 }
 0x141   : > { %14854 = vst [vmem:[#allocation55_spill] sm:$0xff] %v9774_v55  ;;  %14855 = vst [vmem:[#allocation56_spill] sm:$0xff] %v9778_v22  ;;  %v9783_v16 = vsel %vm2292_vm6, %v9748_v36, 920167782  ;;  %v9789_v10 = vsel %vm2292_vm6, %v2288_v0, 1326507024  ;;  %v2182_v56 = vshll.u32 %v14852_v15, %v9706_v60 }
 0x142   : > { %14856 = vst [vmem:[#allocation57_spill] sm:$0xff] %v9783_v16  ;;  %14857 = vst [vmem:[#allocation58_spill] sm:$0xff] %v9789_v10  ;;  %v9791_v26 = vshrl.u32 %v2165_v47, 5  ;;  %v9796_v4 = vsub.s32 32, %v9751_v9  ;;  %v9798_v31 = vor.u32 %v2180_v2, %v2179_v45  ;;  %v9800_v36 = vshrl.u32 %v2477_v20, 5 }
 0x143   : > { %v2677_v16 = vshrl.u32 %v2676_v14, 23  ;;  %v14599_v22 = vmov 2475754826   ;;  %v2184_v40 = vor.u32 %v2183_v33, %v2182_v56  ;;  %v9804_v0 = vand.u32 31, %v2373_v63 }
 0x144   : > { %14858 = vst [vmem:[#allocation59_spill] sm:$0xff] %v9796_v4  ;;  %14859 = vst [vmem:[#allocation60_spill] sm:$0xff] %v9798_v31  ;;  %v1443_v21 = vshrl.u32 %v14599_v22, %v9513_v23  ;;  %v2572_v47 = vand.u32 2139095040, %v9774_v55  ;;  %v14602_v10 = vmov 2131351028   ;;  %v1445_v20 = vshll.u32 %v14599_v22, %v9496_v11 }
 0x145   : > { %14860 = vst [vmem:[#allocation61_spill] sm:$0xff] %v9804_v0  ;;  %v1446_v60 = vshrl.u32 %v14602_v10, %v9513_v23  ;;  %v14595_v8 = vmov 683565275   ;;  %v1448_v2 = vshll.u32 %v14602_v10, %v9496_v11  ;;  %v1449_v14 = vshrl.u32 %v14837_v6, %v9513_v23 }
 0x146   : > { %v1442_v45 = vshll.u32 %v14595_v8, %v9496_v11  ;;  %vm2188_vm8 = vcmp.lt.s32.totalorder %v9791_v26, 4  ;;  %v2491_v33 = vshll.u32 %v14837_v6, %v9751_v9  ;;  %v2492_v56 = vshrl.u32 %v14852_v15, %v9796_v4 }
 0x147   : > { %v2495_v8 = vshrl.u32 %v14835_v54, %v9796_v4  ;;  %v7803_v55 = vadd.s32 4294967169, %v2677_v16  ;;  %v1447_v13 = vor.u32 %v1446_v60, %v1445_v20  ;;  %v1450_v37 = vor.u32 %v1449_v14, %v1448_v2 }
 0x148   : > { %v1444_v22 = vor.u32 %v1443_v21, %v1442_v45  ;;  %v2494_v11 = vshll.u32 %v14852_v15, %v9751_v9  ;;  %vm14632_vm10 = vcmp.lt.s32.totalorder %v9800_v36, 4  ;;  %v9828_v10 = vsub.s32 32, %v9804_v0 }
 0x149   : > { %v2573_v5 = vshrl.u32 %v2572_v47, 23  ;;  %v9833_v62 = vsel %vm2188_vm8, %v9798_v31, 920167782  ;;  %v9837_v16 = vsel %vm2188_vm8, %v2184_v40, 1326507024  ;;  %v9839_v60 = vshrl.u32 %v2373_v63, 5  ;;  %v1312_v40 = vpop.f32.mrf.mxu0 }
 0x14a   : > { %14861 = vst [vmem:[#allocation62_spill] sm:$0xff] %v9828_v10  ;;  %14862 = vst [vmem:[#allocation63_spill] sm:$0xff] %v9833_v62  ;;  %v2387_v21 = vshll.u32 %v14837_v6, %v9804_v0  ;;  %v9843_v45 = vor.u32 %v2492_v56, %v2491_v33  ;;  %v9847_v20 = vshll.u32 %v14852_v15, %v9804_v0  ;;  %vm1457_vm11 = vcmp.lt.s32.totalorder %v9515_v24, 1 }
 0x14b   : > { %14863 = vst [vmem:[#allocation64_spill] sm:$0xff] %v9839_v60  ;;  %v1462_v47 = vsel %vm1460_vm5, %v1450_v37, 2102212464  ;;  %v2496_v2 = vor.u32 %v2495_v8, %v2494_v11  ;;  %v2683_v14 = vadd.s32 1, %v7803_v55  ;;  %v14865_v63 = vmov 683565275  }
 0x14c   : > { %14864 = vst [vmem:[#allocation65_spill] sm:$0xff] %v9843_v45  ;;  %v1441_v9 = vshrl.u32 %v14865_v63, %v9513_v23  ;;  %v1465_v4 = vsel %vm1457_vm11, %v1444_v22, %v1447_v13  ;;  %v2388_v33 = vshrl.u32 %v14852_v15, %v9828_v10  ;;  %v9860_v56 = vshrl.u32 %v14835_v54, %v9828_v10 }
 0x14d   : > { %v7799_v0 = vadd.s32 4294967169, %v2573_v5  ;;  %vm1459_vm12 = vcmp.lt.s32.totalorder %v9515_v24, 3  ;;  %vm1458_vm5 = vcmp.lt.s32.totalorder %v9515_v24, 2  ;;  %v9868_v11 = vadd.f32 %v8358_v28, %v9464_v39 }
 0x14e   : > { %v1461_v8 = vsel %vm1457_vm11, %v1441_v9, %v1444_v22  ;;  %v1463_v55 = vsel %vm1459_vm12, %v1447_v13, %v1462_v47  ;;  %v1467_v23 = vsel %vm1459_vm12, %v1450_v37, %v9570_v17  ;;  %v9871_v62 = vadd.f32 %v9464_v39, %v1312_v40 }
 0x14f   : > { %14866 = vst [vmem:[#allocation66_spill] sm:$0xff] %v9868_v11  ;;  %v1468_v31 = vsel %vm1458_vm5, %v1465_v4, %v1467_v23  ;;  %v1469_v5 = vsel %vm1457_vm11, %v1447_v13, %v1450_v37  ;;  %v9878_v10 = vsel %vm14632_vm10, %v9843_v45, 920167782  ;;  %v9882_v9 = vsel %vm14632_vm10, %v2496_v2, 1326507024 }
 0x150   : > { %14867 = vst [vmem:[#allocation67_spill] sm:$0xff] %v9871_v62  ;;  %14868 = vst [vmem:[#allocation68_spill] sm:$0xff] %v9878_v10  ;;  %vm2684_vm14 = vcmp.gt.s32.totalorder %v2683_v14, 0  ;;  %v1471_v17 = vsel %vm1459_vm12, %v9547_v59, %v9584_v29  ;;  %v9886_v28 = vor.u32 %v2388_v33, %v2387_v21  ;;  %v9888_v39 = vadd.s32 1, %v7799_v0 }
 0x151   : > { %v1464_v22 = vsel %vm1458_vm5, %v1461_v8, %v1463_v55  ;;  %v1472_v24 = vsel %vm1458_vm5, %v1469_v5, %v1471_v17  ;;  %v9895_v4 = vmul.u32.u64.low %v9518_v30, %v1468_v31  ;;  %v9896_v47 = vmul.u32.u64.high %v9518_v30, %v1468_v31, %v9895_v4 }
 0x152   : > { %14869 = vst [vmem:[#allocation69_spill] sm:$0xff] %v9886_v28  ;;  %v9891_v37 = vmul.u32.u64.low %v9518_v30, %v1472_v24  ;;  %v9892_v13 = vmul.u32.u64.high %v9518_v30, %v1472_v24, %v9891_v37  ;;  %v2392_v2 = vor.u32 %v9860_v56, %v9847_v20  ;;  %v2685_v40 = vsel %vm2684_vm14, %v2683_v14, 0 }
 0x153   : > { %v1338_v59 = vshll.u32 %v14865_v63, %v9506_v19  ;;  %v14870_v29 = vmov 2475754826   ;;  %v1480_v21 = vmul.u32 %v9518_v30, %v1464_v22  ;;  %v14871_v8 = vmov 2131351028  }
 0x154   : > { %v1339_v0 = vshrl.u32 %v14870_v29, %v9522_v32  ;;  %v1341_v33 = vshll.u32 %v14870_v29, %v9506_v19  ;;  %v1342_v31 = vshrl.u32 %v14871_v8, %v9522_v32  ;;  %v1345_v55 = vshrl.u32 %v14837_v6, %v9522_v32 }
 0x155   : > { %v1337_v20 = vshrl.u32 %v14865_v63, %v9522_v32  ;;  %v1344_v56 = vshll.u32 %v14871_v8, %v9506_v19  ;;  %vm1353_vm1 = vcmp.lt.s32.totalorder %v9540_v50, 1  ;;  %vm14631_vm4 = vcmp.lt.s32.totalorder %v9839_v60, 4 }
 0x156   : > { %v1340_v14 = vor.u32 %v1339_v0, %v1338_v59  ;;  %vm1482_vm11 = vc.u32 %v9892_v13, %v9895_v4  ;;  %v1483_v30 = vadd.s32 1, %v9896_v47  ;;  %v1343_v23 = vor.u32 %v1342_v31, %v1341_v33 }
 0x157   : > { %vm1355_vm12 = vcmp.lt.s32.totalorder %v9540_v50, 3  ;;  %v1346_v5 = vor.u32 %v1345_v55, %v1344_v56  ;;  %vm1354_vm5 = vcmp.lt.s32.totalorder %v9540_v50, 2  ;;  %v14872_v24 = vor.u32 8388608, %v9504_v18 }
 0x158   : > { %v1357_v32 = vsel %vm1353_vm1, %v1337_v20, %v1340_v14  ;;  %v1367_v19 = vsel %vm1355_vm12, %v9563_v12, %v9601_v49  ;;  %v1484_v17 = vsel %vm1482_vm11, %v1483_v30, %v9896_v47  ;;  %v1361_v22 = vsel %vm1353_vm1, %v1340_v14, %v1343_v23 }
 0x159   : > { %v1369_v37 = vshll.u32 %v14872_v24, 8  ;;  %v14616_v59 = vand.u32 2147483647, %v9475_v48  ;;  %v1485_v0 = vadd.s32 %v1484_v17, %v1480_v21  ;;  %v1358_v33 = vsel %vm1356_vm7, %v1346_v5, 2102212464 }
 0x15a   : > { %v1363_v31 = vsel %vm1355_vm12, %v1346_v5, %v9593_v38  ;;  %v1365_v55 = vsel %vm1353_vm1, %v1343_v23, %v1346_v5  ;;  %v9938_v12 = vshrl.u32 %v2685_v40, 5  ;;  %v1359_v49 = vsel %vm1355_vm12, %v1343_v23, %v1358_v33 }
 0x15b   : > { %v1364_v47 = vsel %vm1354_vm5, %v1361_v22, %v1363_v31  ;;  %v1368_v18 = vsel %vm1354_vm5, %v1365_v55, %v1367_v19  ;;  %v9944_v20 = vand.u32 31, %v2685_v40  ;;  %v1486_v21 = vadd.s32 536870912, %v1485_v0 }
 0x15c   : > { %v9946_v14 = vmul.u32.u64.low %v1369_v37, %v1368_v18  ;;  %v9947_v56 = vmul.u32.u64.high %v1369_v37, %v1368_v18, %v9946_v14  ;;  %vm2580_vm7 = vcmp.gt.s32.totalorder %v9888_v39, 0  ;;  %v1360_v38 = vsel %vm1354_vm5, %v1357_v32, %v1359_v49 }
 0x15d   : > { %14873 = vst [vmem:[#allocation70_spill] sm:$0xff] %v9944_v20  ;;  %v9952_v30 = vmul.u32.u64.low %v1369_v37, %v1364_v47  ;;  %v9953_v5 = vmul.u32.u64.high %v1369_v37, %v1364_v47, %v9952_v30  ;;  %v9956_v23 = vshrl.u32 %v1486_v21, 30  ;;  %v1640_v19 = vand.u32 8388607, %v14616_v59 }
 0x15e   : > { %v1650_v40 = vshll.u32 %v14865_v63, %v9531_v42  ;;  %v1651_v17 = vshrl.u32 %v14870_v29, %v9552_v61  ;;  %v1653_v22 = vshll.u32 %v14870_v29, %v9531_v42  ;;  %v1654_v50 = vshrl.u32 %v14871_v8, %v9552_v61 }
 0x15f   : > { %v1656_v32 = vshll.u32 %v14871_v8, %v9531_v42  ;;  %v1657_v24 = vshrl.u32 %v14837_v6, %v9552_v61  ;;  %v9975_v33 = vsel %vm14631_vm4, %v9886_v28, 920167782  ;;  %v2884_v31 = vand.u32 2139095040, %v9868_v11 }
 0x160   : > { %14874 = vst [vmem:[#allocation71_spill] sm:$0xff] %v9975_v33  ;;  %v1488_v55 = vshll.u32 %v9956_v23, 30  ;;  %vm1378_vm14 = vc.u32 %v9947_v56, %v9952_v30  ;;  %v1379_v49 = vadd.s32 1, %v9953_v5  ;;  %v1652_v47 = vor.u32 %v1651_v17, %v1650_v40 }
 0x161   : > { %v1655_v18 = vor.u32 %v1654_v50, %v1653_v22  ;;  %v1658_v42 = vor.u32 %v1657_v24, %v1656_v32  ;;  %v9984_v21 = vsel %vm14631_vm4, %v2392_v2, 1326507024  ;;  %v2581_v14 = vsel %vm2580_vm7, %v9888_v39, 0 }
 0x162   : > { %14875 = vst [vmem:[#allocation72_spill] sm:$0xff] %v9984_v21  ;;  %v9989_v59 = vsub.s32 %v1485_v0, %v1488_v55  ;;  %v1376_v11 = vmul.u32 %v1369_v37, %v1360_v38  ;;  %v9992_v33 = vsub.s32 32, %v9944_v20  ;;  %v2699_v28 = vshll.u32 %v14837_v6, %v9944_v20 }
 0x163   : > { %v1380_v40 = vsel %vm1378_vm14, %v1379_v49, %v9953_v5  ;;  %v1641_v17 = vor.u32 8388608, %v1640_v19  ;;  %vm1665_vm1 = vcmp.lt.s32.totalorder %v9561_v7, 1  ;;  %vm1667_vm11 = vcmp.lt.s32.totalorder %v9561_v7, 3 }
 0x164   : > { %14876 = vst [vmem:[#allocation73_spill] sm:$0xff] %v9992_v33  ;;  %v1491_v22 = vsub.s32 0, %v9989_v59  ;;  %v1381_v2 = vadd.s32 %v1380_v40, %v1376_v11  ;;  %v1649_v39 = vshrl.u32 %v14865_v63, %v9552_v61  ;;  %v1670_v37 = vsel %vm1668_vm9, %v1658_v42, 2102212464 }
 0x165   : > { %v1673_v0 = vsel %vm1665_vm1, %v1652_v47, %v1655_v18  ;;  %v1675_v38 = vsel %vm1667_vm11, %v1658_v42, %v9644_v35  ;;  %vm1666_vm12 = vcmp.lt.s32.totalorder %v9561_v7, 2  ;;  %v1677_v19 = vsel %vm1665_vm1, %v1655_v18, %v1658_v42 }
 0x166   : > { %v7756_v5 = vmin.u32 %v1491_v22, %v9989_v59  ;;  %v1382_v11 = vadd.s32 536870912, %v1381_v2  ;;  %v10015_v61 = vshll.u32 %v14852_v15, %v9944_v20  ;;  %v1676_v50 = vsel %vm1666_vm12, %v1673_v0, %v1675_v38 }
 0x167   : > { %v1679_v35 = vsel %vm1667_vm11, %v9606_v57, %v9651_v44  ;;  %v1681_v32 = vshll.u32 %v1641_v17, 8  ;;  %v10023_v24 = vand.u32 31, %v2581_v14  ;;  %v1669_v49 = vsel %vm1665_vm1, %v1649_v39, %v1652_v47 }
 0x168   : > { %v1493_v55 = vclz %v7756_v5  ;;  %v1671_v42 = vsel %vm1667_vm11, %v1655_v18, %v1670_v37  ;;  %v10029_v40 = vshrl.u32 %v1382_v11, 30  ;;  %v1680_v22 = vsel %vm1666_vm12, %v1677_v19, %v1679_v35 }
 0x169   : > { %14877 = vst [vmem:[#allocation74_spill] sm:$0xff] %v10023_v24  ;;  %v10033_v0 = vmul.u32.u64.low %v1681_v32, %v1676_v50  ;;  %v10034_v38 = vmul.u32.u64.high %v1681_v32, %v1676_v50, %v10033_v0  ;;  %v10037_v57 = vshrl.u32 %v2581_v14, 5  ;;  %vm1427_vm9 = vcmp.lt.s32.totalorder %v9467_v41, 0 }
 0x16a   : > { %v7757_v44 = vadd.s32 4294967294, %v1493_v55  ;;  %v10039_v17 = vmul.u32.u64.low %v1681_v32, %v1680_v22  ;;  %v10040_v5 = vmul.u32.u64.high %v1681_v32, %v1680_v22, %v10039_v17  ;;  %v2700_v47 = vshrl.u32 %v14852_v15, %v9992_v33 }
 0x16b   : > { %v2885_v18 = vshrl.u32 %v2884_v31, 23  ;;  %v2780_v39 = vand.u32 2139095040, %v9871_v62  ;;  %v1384_v37 = vshll.u32 %v10029_v40, 30  ;;  %v10049_v11 = vshrl.u32 %v14835_v54, %v9992_v33 }
 0x16c   : > { %v10052_v14 = vsub.s32 32, %v10023_v24  ;;  %vm7758_vm5 = vcmp.lt.s32.totalorder %v7757_v44, 0  ;;  %v1672_v19 = vsel %vm1666_vm12, %v1669_v49, %v1671_v42  ;;  %v10058_v50 = vshll.u32 %v14837_v6, %v10023_v24 }
 0x16d   : > { %v1496_v31 = vsel %vm7758_vm5, 0, %v7757_v44  ;;  %v10060_v35 = vsub.s32 %v1381_v2, %v1384_v37  ;;  %v1691_v55 = vadd.s32 1, %v10034_v38  ;;  %v10065_v22 = vshll.u32 %v14852_v15, %v10023_v24 }
 0x16e   : > { %v1481_v17 = vadd.s32 %v9895_v4, %v9892_v13  ;;  %v1497_v62 = vsub.s32 32, %v1496_v31  ;;  %v1501_v20 = vsub.s32 4294967266, %v1496_v31  ;;  %v1511_v7 = vsub.s32 4, %v9956_v23 }
 0x16f   : > { %v1387_v49 = vsub.s32 0, %v10060_v35  ;;  %v1688_v42 = vmul.u32 %v1681_v32, %v1672_v19  ;;  %vm1690_vm7 = vc.u32 %v10040_v5, %v10033_v0  ;;  %v14878_v2 = vand.u32 2147483647, %v9467_v41 }
 0x170   : > { %v1498_v37 = vshll.u32 %v9989_v59, %v1496_v31  ;;  %v1499_v24 = vshrl.u32 %v1481_v17, %v1497_v62  ;;  %v1502_v13 = vadd.s32 127, %v1501_v20  ;;  %v1692_v4 = vsel %vm1690_vm7, %v1691_v55, %v10034_v38 }
 0x171   : > { %vm10075_vm14 = vcmp.le.f32.partialorder %v14878_v2, 0.7853982  ;;  %v10081_v33 = vor.u32 %v2700_v47, %v2699_v28  ;;  %v7752_v19 = vmin.u32 %v1387_v49, %v10060_v35  ;;  %v1693_v21 = vadd.s32 %v1692_v4, %v1688_v42 }
 0x172   : > { %v10086_v60 = vadd.s32 4294967169, %v2885_v18  ;;  %v1500_v2 = vor.u32 %v1499_v24, %v1498_v37  ;;  %v1503_v10 = vshll.u32 %v1502_v13, 23  ;;  %v1529_v45 = vand.u32 2147483647, %v9479_v53 }
 0x173   : > { %v10091_v62 = vshrl.u32 %v14852_v15, %v10052_v14  ;;  %v10093_v59 = vshrl.u32 %v2780_v39, 23  ;;  %v1389_v28 = vclz %v7752_v19  ;;  %v1547_v20 = vshrl.u32 %v14870_v29, %v9580_v27 }
 0x174   : > { %v1504_v38 = vor.u32 4788187, %v1503_v10  ;;  %v1512_v47 = vsel %vm1427_vm9, %v1511_v7, %v9956_v23  ;;  %v1694_v18 = vadd.s32 536870912, %v1693_v21  ;;  %v1550_v24 = vshrl.u32 %v14871_v8, %v9580_v27 }
 0x175   : > { %vm1323_vm1 = vcmp.lt.s32.totalorder %v9470_v43, 0  ;;  %v7753_v31 = vadd.s32 4294967294, %v1389_v28  ;;  %v1546_v39 = vshll.u32 %v14865_v63, %v9557_v1  ;;  %v1549_v55 = vshll.u32 %v14870_v29, %v9557_v1 }
 0x176   : > { %v1553_v10 = vshrl.u32 %v14837_v6, %v9580_v27  ;;  %v1505_v17 = vand.u32 2147483647, %v1504_v38  ;;  %v1507_v49 = vcvt.s32.f32 %v1500_v2  ;;  %v10109_v42 = vshrl.u32 %v1694_v18, 30 }
 0x177   : > { %v1536_v23 = vand.u32 8388607, %v1529_v45  ;;  %v1377_v7 = vadd.s32 %v9952_v30, %v9947_v56  ;;  %vm7754_vm11 = vcmp.lt.s32.totalorder %v7753_v31, 0  ;;  %v1548_v37 = vor.u32 %v1547_v20, %v1546_v39 }
 0x178   : > { %v1552_v13 = vshll.u32 %v14871_v8, %v9557_v1  ;;  %v1508_v4 = vmul.f32 %v1507_v49, %v1505_v17  ;;  %v1392_v19 = vsel %vm7754_vm11, 0, %v7753_v31  ;;  %v1696_v28 = vshll.u32 %v10109_v42, 30 }
 0x179   : > { %v1551_v32 = vor.u32 %v1550_v24, %v1549_v55  ;;  %v1514_v2 = vsel %vm10075_vm14, 0, %v1512_v47  ;;  %v14881_v38 = vand.u32 2147483647, %v9470_v43  ;;  %v1393_v56 = vsub.s32 32, %v1392_v19 }
 0x17a   : > { %v1397_v30 = vsub.s32 4294967266, %v1392_v19  ;;  %v1554_v20 = vor.u32 %v1553_v10, %v1552_v13  ;;  %v1509_v39 = vxor.u32 2147483648, %v1508_v4  ;;  %v1407_v1 = vsub.s32 4, %v10029_v40 }
 0x17b   : > { %vm10122_vm12 = vcmp.le.f32.partialorder %v14881_v38, 0.7853982  ;;  %v10127_v17 = vsub.s32 %v1693_v21, %v1696_v28  ;;  %v1537_v31 = vor.u32 8388608, %v1536_v23  ;;  %v1394_v24 = vshll.u32 %v10060_v35, %v1392_v19 }
 0x17c   : > { %v1395_v55 = vshrl.u32 %v1377_v7, %v1393_v56  ;;  %v1398_v49 = vadd.s32 127, %v1397_v30  ;;  %vm1561_vm5 = vcmp.lt.s32.totalorder %v9603_v52, 1  ;;  %v1510_v47 = vsel %vm1427_vm9, %v1509_v39, %v1508_v4 }
 0x17d   : > { %v1699_v38 = vsub.s32 0, %v10127_v17  ;;  %vm1563_vm7 = vcmp.lt.s32.totalorder %v9603_v52, 3  ;;  %v1569_v10 = vsel %vm1561_vm5, %v1548_v37, %v1551_v32  ;;  %v1513_v21 = vsel %vm10075_vm14, %v9467_v41, %v1510_v47 }
 0x17e   : > { %v1396_v23 = vor.u32 %v1395_v55, %v1394_v24  ;;  %v1399_v35 = vshll.u32 %v1398_v49, 23  ;;  %v1571_v7 = vsel %vm1563_vm7, %v1554_v20, %v9661_v3  ;;  %8987 = vcosq.f32 %v1513_v21 }
 0x17f   : > { %v1518_v13 = vadd.s32 3, %v1514_v2  ;;  %v1408_v4 = vsel %vm1323_vm1, %v1407_v1, %v10029_v40  ;;  %v7764_v19 = vmin.u32 %v1699_v38, %v10127_v17  ;;  %8989 = vsinq.f32 %v1513_v21 }
 0x180   : > { %v1400_v28 = vor.u32 4788187, %v1399_v35  ;;  %vm1562_vm9 = vcmp.lt.s32.totalorder %v9603_v52, 2  ;;  %v1573_v44 = vsel %vm1561_vm5, %v1551_v32, %v1554_v20  ;;  %v1545_v30 = vshrl.u32 %v14865_v63, %v9580_v27 }
 0x181   : > { %v1701_v56 = vclz %v7764_v19  ;;  %v1566_v3 = vsel %vm1564_vm13, %v1554_v20, 2102212464  ;;  %v1572_v2 = vsel %vm1562_vm9, %v1569_v10, %v1571_v7  ;;  %v1403_v39 = vcvt.s32.f32 %v1396_v23 }
 0x182   : > { %v1401_v40 = vand.u32 2147483647, %v1400_v28  ;;  %v1575_v1 = vsel %vm1563_vm7, %v9631_v46, %v9668_v58  ;;  %v1577_v24 = vshll.u32 %v1537_v31, 8  ;;  %v1410_v55 = vsel %vm10122_vm12, 0, %v1408_v4 }
 0x183   : > { %v7765_v49 = vadd.s32 4294967294, %v1701_v56  ;;  %v1565_v27 = vsel %vm1561_vm5, %v1545_v30, %v1548_v37  ;;  %v1576_v20 = vsel %vm1562_vm9, %v1573_v44, %v1575_v1  ;;  %v1567_v38 = vsel %vm1563_vm7, %v1551_v32, %v1566_v3 }
 0x184   : > { %v1404_v47 = vmul.f32 %v1403_v39, %v1401_v40  ;;  %v10168_v10 = vmul.u32.u64.low %v1577_v24, %v1576_v20  ;;  %v10169_v21 = vmul.u32.u64.high %v1577_v24, %v1576_v20, %v10168_v10  ;;  %v10173_v46 = vshrl.u32 %v14835_v54, %v10052_v14  ;;  %v14885_v40 = vld [vmem:[#allocation27_spill] sm:$0xff] }
 0x185   : > { %vm7766_vm13 = vcmp.lt.s32.totalorder %v7765_v49, 0  ;;  %v10175_v58 = vmul.u32.u64.low %v1577_v24, %v1572_v2  ;;  %v10176_v31 = vmul.u32.u64.high %v1577_v24, %v1572_v2, %v10175_v58  ;;  %v10179_v37 = vand.u32 3, %v1518_v13  ;;  %v14884_v13 = vld [vmem:[#allocation19_spill] sm:$0xff] }
 0x186   : > { %v1405_v23 = vxor.u32 2147483648, %v1404_v47  ;;  %v1414_v35 = vadd.s32 3, %v1410_v55  ;;  %v1704_v7 = vsel %vm7766_vm13, 0, %v7765_v49  ;;  %v1689_v32 = vadd.s32 %v10033_v0, %v10040_v5 }
 0x187   : > { %v1705_v4 = vsub.s32 32, %v1704_v7  ;;  %v1709_v19 = vsub.s32 4294967266, %v1704_v7  ;;  %v1568_v28 = vsel %vm1562_vm9, %v1565_v27, %v1567_v38  ;;  %v1706_v56 = vshll.u32 %v10127_v17, %v1704_v7 }
 0x188   : > { %v1406_v44 = vsel %vm1323_vm1, %v1405_v23, %v1404_v47  ;;  %vm1586_vm14 = vc.u32 %v10169_v21, %v10175_v58  ;;  %v1841_v30 = vand.u32 2147483647, %v14884_v13  ;;  %v1587_v2 = vadd.s32 1, %v10176_v31 }
 0x189   : > { %v1409_v3 = vsel %vm10122_vm12, %v9470_v43, %v1406_v44  ;;  %v1707_v0 = vshrl.u32 %v1689_v32, %v1705_v4  ;;  %v1710_v5 = vadd.s32 127, %v1709_v19  ;;  %v1584_v52 = vmul.u32 %v1577_v24, %v1568_v28  ;;  %v14886_v24 = vld [vmem:[#allocation25_spill] sm:$0xff] }
 0x18a   : > { %8991 = vcosq.f32 %v1409_v3  ;;  %v1859_v39 = vshrl.u32 %v14870_v29, %v14885_v40  ;;  %v1862_v17 = vshrl.u32 %v14871_v8, %v14885_v40  ;;  %v1588_v49 = vsel %vm1586_vm14, %v1587_v2, %v10176_v31 }
 0x18b   : > { %8993 = vsinq.f32 %v1409_v3  ;;  %v1708_v1 = vor.u32 %v1707_v0, %v1706_v56  ;;  %v1711_v55 = vshll.u32 %v1710_v5, 23  ;;  %v8988_v27 = vpop.eup %8987  ;;  %vm1635_vm1 = vcmp.lt.s32.totalorder %v9475_v48, 0  ;;  %v14894_v56 = vld [vmem:[#allocation20_spill] sm:$0xff] }
 0x18c   : > { %vm1520_vm11 = vcmp.lt.s32.totalorder %v10179_v37, 2  ;;  %v10202_v18 = vand.u32 3, %v1414_v35  ;;  %v1589_v20 = vadd.s32 %v1588_v49, %v1584_v52  ;;  %v1858_v47 = vshll.u32 %v14865_v63, %v14886_v24  ;;  %v8990_v10 = vpop.eup %8989 }
 0x18d   : > { %v1865_v38 = vshrl.u32 %v14837_v6, %v14885_v40  ;;  %v1712_v23 = vor.u32 4788187, %v1711_v55  ;;  %v1848_v7 = vand.u32 8388607, %v1841_v30  ;;  %v1861_v31 = vshll.u32 %v14870_v29, %v14886_v24 }
 0x18e   : > { %v1864_v32 = vshll.u32 %v14871_v8, %v14886_v24  ;;  %v1522_v35 = vxor.u32 2147483648, %v8990_v10  ;;  %v1525_v4 = vxor.u32 2147483648, %v8988_v27  ;;  %v1590_v19 = vadd.s32 536870912, %v1589_v20 }
 0x18f   : > { %v1860_v28 = vor.u32 %v1859_v39, %v1858_v47  ;;  %vm1517_vm12 = vweird.f32 %v9467_v41  ;;  %v14887_v44 = vand.u32 2147483647, %v9475_v48  ;;  %v1713_v3 = vand.u32 2147483647, %v1712_v23  ;;  %v14890_v47 = vld [vmem:[#allocation31_spill] sm:$0xff] }
 0x190   : > { %v1715_v0 = vcvt.s32.f32 %v1708_v1  ;;  %v1863_v5 = vor.u32 %v1862_v17, %v1861_v31  ;;  %v1866_v2 = vor.u32 %v1865_v38, %v1864_v32  ;;  %vm1521_vm7 = vcmp.eq.s32.totalorder %v10179_v37, 0  ;;  %v14891_v31 = vld [vmem:[#allocation37_spill] sm:$0xff]  ;;  %v14892_v32 = vld [vmem:[#allocation38_spill] sm:$0xff] }
 0x191   : > { %vm10217_vm5 = vcmp.le.f32.partialorder %v14887_v44, 0.7853982  ;;  %vm1524_vm9 = vcmp.eq.s32.totalorder %v10179_v37, 2  ;;  %v1719_v52 = vsub.s32 4, %v10109_v42  ;;  %v10224_v55 = vshrl.u32 %v1590_v19, 30 }
 0x192   : > { %v1716_v39 = vmul.f32 %v1715_v0, %v1713_v3  ;;  %v1849_v49 = vor.u32 8388608, %v1848_v7  ;;  %v1857_v24 = vshrl.u32 %v14865_v63, %v14885_v40  ;;  %vm1873_vm13 = vcmp.lt.s32.totalorder %v14890_v47, 1 }
 0x193   : > { %v1523_v44 = vsel %vm1521_vm7, %v8988_v27, %v1522_v35  ;;  %v1526_v23 = vsel %vm1524_vm9, %v1525_v4, %v8990_v10  ;;  %v1592_v17 = vshll.u32 %v10224_v55, 30  ;;  %vm1875_vm14 = vcmp.lt.s32.totalorder %v14890_v47, 3  ;;  %v14893_v35 = vld [vmem:[#allocation32_spill] sm:$0xff] }
 0x194   : > { %vm1416_vm4 = vcmp.lt.s32.totalorder %v10202_v18, 2  ;;  %v1717_v1 = vxor.u32 2147483648, %v1716_v39  ;;  %v1881_v38 = vsel %vm1873_vm13, %v1860_v28, %v1863_v5  ;;  %v1883_v7 = vsel %vm1875_vm14, %v1866_v2, %v14891_v31 }
 0x195   : > { %v1885_v40 = vsel %vm1873_vm13, %v1863_v5, %v1866_v2  ;;  %vm1413_vm7 = vweird.f32 %v9470_v43  ;;  %v10240_v27 = vsub.s32 %v1589_v20, %v1592_v17  ;;  %vm1874_vm9 = vcmp.lt.s32.totalorder %v14890_v47, 2 }
 0x196   : > { %v1878_v10 = vsel %vm1876_vm15, %v1866_v2, 2102212464  ;;  %v1887_v4 = vsel %vm1875_vm14, %v14893_v35, %v14892_v32  ;;  %v1527_v19 = vsel %vm1520_vm11, %v1523_v44, %v1526_v23  ;;  %v1720_v3 = vsel %vm1635_vm1, %v1719_v52, %v10109_v42 }
 0x197   : > { %v1888_v20 = vsel %vm1874_vm9, %v1885_v40, %v1887_v4  ;;  %v1889_v0 = vshll.u32 %v1849_v49, 8  ;;  %vm1417_vm10 = vcmp.eq.s32.totalorder %v10202_v18, 0  ;;  %v1595_v2 = vsub.s32 0, %v10240_v27  ;;  %v8992_v37 = vpop.eup %8991 }
 0x198   : > { %v1877_v17 = vsel %vm1873_vm13, %v1857_v24, %v1860_v28  ;;  %v1884_v31 = vsel %vm1874_vm9, %v1881_v38, %v1883_v7  ;;  %v1718_v44 = vsel %vm1635_vm1, %v1717_v1, %v1716_v39  ;;  %v1879_v42 = vsel %vm1875_vm14, %v1863_v5, %v1878_v10  ;;  %v8994_v49 = vpop.eup %8993  ;;  %v8363_v38 = vpop.f32.mrf.mxu1 }
 0x199   : > { %v10266_v52 = vmul.u32.u64.low %v1889_v0, %v1888_v20  ;;  %v10267_v23 = vmul.u32.u64.high %v1889_v0, %v1888_v20, %v10266_v52  ;;  %v1528_v40 = vsel %vm1517_vm12, nan, %v1527_v19  ;;  %v1421_v32 = vxor.u32 2147483648, %v8992_v37 }
 0x19a   : > { %v1722_v28 = vsel %vm10217_vm5, 0, %v1720_v3  ;;  %v7760_v24 = vmin.u32 %v1595_v2, %v10240_v27  ;;  %v1418_v7 = vxor.u32 2147483648, %v8994_v49  ;;  %vm1420_vm15 = vcmp.eq.s32.totalorder %v10202_v18, 2  ;;  %v14895_v52 = vld [vmem:[#allocation33_spill] sm:$0xff] }
 0x19b   : > { %v10275_v39 = vmul.u32.u64.low %v1889_v0, %v1884_v31  ;;  %v10276_v1 = vmul.u32.u64.high %v1889_v0, %v1884_v31, %v10275_v39  ;;  %v1422_v5 = vsel %vm1420_vm15, %v1421_v32, %v8994_v49  ;;  %v1721_v41 = vsel %vm10217_vm5, %v9475_v48, %v1718_v44  ;;  %v3051_v44 = vpop.f32.mrf.mxu1 }
 0x19c   : > { %v1597_v10 = vclz %v7760_v24  ;;  %v1880_v35 = vsel %vm1874_vm9, %v1877_v17, %v1879_v42  ;;  %vm2708_vm1 = vcmp.lt.s32.totalorder %v9938_v12, 4  ;;  %v3057_v4 = vadd.f32 %v8363_v38, %v1528_v40 }
 0x19d   : > { %v1419_v19 = vsel %vm1417_vm10, %v8992_v37, %v1418_v7  ;;  %v1726_v3 = vadd.s32 3, %v1722_v28  ;;  %v1585_v20 = vadd.s32 %v10175_v58, %v10169_v21  ;;  %vm1898_vm11 = vc.u32 %v10267_v23, %v10275_v39  ;;  %v14896_v7 = vld [vmem:[#allocation29_spill] sm:$0xff] }
 0x19e   : > { %v1423_v2 = vsel %vm1416_vm4, %v1419_v19, %v1422_v5  ;;  %v7761_v31 = vadd.s32 4294967294, %v1597_v10  ;;  %v1737_v47 = vand.u32 2147483647, %v14894_v56  ;;  %8995 = vcosq.f32 %v1721_v41 }
 0x19f   : > { %v1424_v17 = vsel %vm1413_vm7, nan, %v1423_v2  ;;  %v1896_v42 = vmul.u32 %v1889_v0, %v1880_v35  ;;  %v1899_v37 = vadd.s32 1, %v10276_v1  ;;  %vm1531_vm10 = vcmp.lt.s32.totalorder %v9479_v53, 0 }
 0x1a0   : > { %v3052_v21 = vadd.f32 %v3051_v44, %v1424_v17  ;;  %8997 = vsinq.f32 %v1721_v41  ;;  %vm7762_vm12 = vcmp.lt.s32.totalorder %v7761_v31, 0  ;;  %vm5185_vm4 = vcmask 392192  }
 0x1a1   : > { %v1600_v58 = vsel %vm7762_vm12, 0, %v7761_v31  ;;  %v1900_v18 = vsel %vm1898_vm11, %v1899_v37, %v10276_v1  ;;  %v1755_v49 = vshrl.u32 %v14870_v29, %v14895_v52  ;;  %v1758_v43 = vshrl.u32 %v14871_v8, %v14895_v52 }
 0x1a2   : > { %v10303_v40 = vpack.c.bf16 %v3057_v4, %v3052_v21  ;;  %v1601_v0 = vsub.s32 32, %v1600_v58  ;;  %v1605_v32 = vsub.s32 4294967266, %v1600_v58  ;;  %v1744_v28 = vand.u32 8388607, %v1737_v47 }
 0x1a3   : > { %v1602_v24 = vshll.u32 %v10240_v27, %v1600_v58  ;;  %v1901_v38 = vadd.s32 %v1900_v18, %v1896_v42  ;;  %v1754_v5 = vshll.u32 %v14865_v63, %v14896_v7  ;;  %v1757_v1 = vshll.u32 %v14870_v29, %v14896_v7 }
 0x1a4   : > { %v1603_v41 = vshrl.u32 %v1585_v20, %v1601_v0  ;;  %v1606_v10 = vadd.s32 127, %v1605_v32  ;;  %8443 = vmatprep.mubr.msk.bf16.mxu0 %vm5185_vm4, %v10303_v40  ;;  %v1760_v35 = vshll.u32 %v14871_v8, %v14896_v7  ;;  %v1761_v4 = vshrl.u32 %v14837_v6, %v14895_v52 }
 0x1a5   : > { %v1615_v27 = vsub.s32 4, %v10224_v55  ;;  %v1902_v19 = vadd.s32 536870912, %v1901_v38  ;;  %v1756_v2 = vor.u32 %v1755_v49, %v1754_v5  ;;  %v1759_v31 = vor.u32 %v1758_v43, %v1757_v1 }
 0x1a6   : > { %v10322_v17 = vsel %vm2708_vm1, %v10081_v33, 920167782  ;;  %v1604_v20 = vor.u32 %v1603_v41, %v1602_v24  ;;  %v1607_v44 = vshll.u32 %v1606_v10, 23  ;;  %v1762_v42 = vor.u32 %v1761_v4, %v1760_v35 }
 0x1a7   : > { %v14897_v37 = vor.u32 %v10049_v11, %v10015_v61  ;;  %v10332_v58 = vadd.s32 1, %v10086_v60  ;;  %vm10336_vm5 = vcmp.le.f32.partialorder %v1529_v45, 0.7853982  ;;  %v10340_v49 = vshrl.u32 %v1902_v19, 30 }
 0x1a8   : > { %v10342_v43 = vand.u32 3, %v1726_v3  ;;  %v1608_v0 = vor.u32 4788187, %v1607_v44  ;;  %v1745_v32 = vor.u32 8388608, %v1744_v28  ;;  %vm1769_vm13 = vcmp.lt.s32.totalorder %v9664_v51, 1  ;;  %v14900_v28 = vld [vmem:[#allocation42_spill] sm:$0xff] }
 0x1a9   : > { %v10329_v21 = vsel %vm2708_vm1, %v14897_v37, 1326507024  ;;  %v1616_v61 = vsel %vm1531_vm10, %v1615_v27, %v10224_v55  ;;  %v1904_v60 = vshll.u32 %v10340_v49, 30  ;;  %vm1771_vm14 = vcmp.lt.s32.totalorder %v9664_v51, 3 }
 0x1aa   : > { %v1777_v45 = vsel %vm1769_vm13, %v1756_v2, %v1759_v31  ;;  %v1609_v11 = vand.u32 2147483647, %v1608_v0  ;;  %v1611_v24 = vcvt.s32.f32 %v1604_v20  ;;  %v1779_v3 = vsel %vm1771_vm14, %v1762_v42, %v9742_v34 }
 0x1ab   : > { %v1783_v7 = vsel %vm1771_vm14, %v14900_v28, %v9746_v25  ;;  %v10359_v5 = vsub.s32 %v1901_v38, %v1904_v60  ;;  %v1753_v55 = vshrl.u32 %v14865_v63, %v14895_v52  ;;  %vm1770_vm7 = vcmp.lt.s32.totalorder %v9664_v51, 2  ;;  %v8996_v41 = vpop.eup %8995 }
 0x1ac   : > { %v1774_v1 = vsel %vm1772_vm0, %v1762_v42, 2102212464  ;;  %v1612_v10 = vmul.f32 %v1611_v24, %v1609_v11  ;;  %v1780_v34 = vsel %vm1770_vm7, %v1777_v45, %v1779_v3  ;;  %v1781_v35 = vsel %vm1769_vm13, %v1759_v31, %v1762_v42 }
 0x1ad   : > { %v1785_v4 = vshll.u32 %v1745_v32, 8  ;;  %v8998_v25 = vpop.eup %8997  ;;  %v1618_v38 = vsel %vm10336_vm5, 0, %v1616_v61  ;;  %v1907_v52 = vsub.s32 0, %v10359_v5  ;;  %v1773_v27 = vsel %vm1769_vm13, %v1753_v55, %v1756_v2 }
 0x1ae   : > { %v1784_v19 = vsel %vm1770_vm7, %v1781_v35, %v1783_v7  ;;  %v1613_v20 = vxor.u32 2147483648, %v1612_v10  ;;  %v1775_v44 = vsel %vm1771_vm14, %v1759_v31, %v1774_v1  ;;  %v10383_v42 = vadd.s32 4294967169, %v10093_v59  ;;  %v14901_v7 = vld [vmem:[#allocation21_spill] sm:$0xff] }
 0x1af   : > { %v10379_v37 = vmul.u32.u64.low %v1785_v4, %v1784_v19  ;;  %v10380_v0 = vmul.u32.u64.high %v1785_v4, %v1784_v19, %v10379_v37  ;;  %v7772_v32 = vmin.u32 %v1907_v52, %v10359_v5  ;;  %v10392_v2 = vor.u32 %v10091_v62, %v10058_v50 }
 0x1b0   : > { %v10386_v61 = vmul.u32.u64.low %v1785_v4, %v1780_v34  ;;  %v10387_v60 = vmul.u32.u64.high %v1785_v4, %v1780_v34, %v10386_v61  ;;  %vm1729_vm0 = vcmp.eq.s32.totalorder %v10342_v43, 0  ;;  %v1614_v31 = vsel %vm1531_vm10, %v1613_v20, %v1612_v10  ;;  %v14902_v10 = vld [vmem:[#allocation35_spill] sm:$0xff] }
 0x1b1   : > { %v1622_v45 = vadd.s32 3, %v1618_v38  ;;  %vm1728_vm9 = vcmp.lt.s32.totalorder %v10342_v43, 2  ;;  %v1733_v59 = vxor.u32 2147483648, %v8996_v41  ;;  %v1617_v11 = vsel %vm10336_vm5, %v9479_v53, %v1614_v31 }
 0x1b2   : > { %v1909_v24 = vclz %v7772_v32  ;;  %v1776_v3 = vsel %vm1770_vm7, %v1773_v27, %v1775_v44  ;;  %v1730_v28 = vxor.u32 2147483648, %v8998_v25  ;;  %vm1732_vm15 = vcmp.eq.s32.totalorder %v10342_v43, 2  ;;  %v14903_v44 = vld [vmem:[#allocation30_spill] sm:$0xff] }
 0x1b3   : > { %8999 = vcosq.f32 %v1617_v11  ;;  %vm1794_vm11 = vc.u32 %v10380_v0, %v10386_v61  ;;  %v1795_v62 = vadd.s32 1, %v10387_v60  ;;  %v2049_v55 = vand.u32 2147483647, %v14901_v7 }
 0x1b4   : > { %9001 = vsinq.f32 %v1617_v11  ;;  %v7773_v50 = vadd.s32 4294967294, %v1909_v24  ;;  %v10408_v1 = vand.u32 3, %v1622_v45  ;;  %v1897_v18 = vadd.s32 %v10275_v39, %v10267_v23 }
 0x1b5   : > { %v1792_v51 = vmul.u32 %v1785_v4, %v1776_v3  ;;  %v2067_v34 = vshrl.u32 %v14870_v29, %v14902_v10  ;;  %v1734_v35 = vsel %vm1732_vm15, %v1733_v59, %v8998_v25  ;;  %v1796_v38 = vsel %vm1794_vm11, %v1795_v62, %v10387_v60 }
 0x1b6   : > { %vm7774_vm10 = vcmp.lt.s32.totalorder %v7773_v50, 0  ;;  %v2070_v52 = vshrl.u32 %v14871_v8, %v14902_v10  ;;  %v1731_v27 = vsel %vm1729_vm0, %v8996_v41, %v1730_v28  ;;  %v2066_v37 = vshll.u32 %v14865_v63, %v14903_v44 }
 0x1b7   : > { %v1912_v19 = vsel %vm7774_vm10, 0, %v7773_v50  ;;  %v1797_v20 = vadd.s32 %v1796_v38, %v1792_v51  ;;  %v2056_v4 = vand.u32 8388607, %v2049_v55  ;;  %v2069_v25 = vshll.u32 %v14870_v29, %v14903_v44 }
 0x1b8   : > { %v1913_v23 = vsub.s32 32, %v1912_v19  ;;  %v1917_v39 = vsub.s32 4294967266, %v1912_v19  ;;  %v2068_v60 = vor.u32 %v2067_v34, %v2066_v37  ;;  %v2072_v31 = vshll.u32 %v14871_v8, %v14903_v44  ;;  %v14904_v44 = vld [vmem:[#allocation41_spill] sm:$0xff] }
 0x1b9   : > { %v1798_v32 = vadd.s32 536870912, %v1797_v20  ;;  %v2073_v41 = vshrl.u32 %v14837_v6, %v14902_v10  ;;  %vm1843_vm12 = vcmp.lt.s32.totalorder %v14884_v13, 0  ;;  %vm1725_vm5 = vweird.f32 %v9475_v48 }
 0x1ba   : > { %vm1628_vm13 = vcmp.eq.s32.totalorder %v10408_v1, 2  ;;  %v1914_v45 = vshll.u32 %v10359_v5, %v1912_v19  ;;  %v1915_v59 = vshrl.u32 %v1897_v18, %v1913_v23  ;;  %v1918_v11 = vadd.s32 127, %v1917_v39  ;;  %v14909_v23 = vld [vmem:[#allocation52_spill] sm:$0xff] }
 0x1bb   : > { %v2071_v24 = vor.u32 %v2070_v52, %v2069_v25  ;;  %v1735_v3 = vsel %vm1728_vm9, %v1731_v27, %v1734_v35  ;;  %vm1625_vm14 = vcmp.eq.s32.totalorder %v10408_v1, 0  ;;  %v1927_v28 = vsub.s32 4, %v10340_v49  ;;  %v14907_v35 = vld [vmem:[#allocation53_spill] sm:$0xff] }
 0x1bc   : > { %v10437_v50 = vshrl.u32 %v1798_v32, 30  ;;  %v2074_v62 = vor.u32 %v2073_v41, %v2072_v31  ;;  %vm1624_vm7 = vcmp.lt.s32.totalorder %v10408_v1, 2  ;;  %v1916_v51 = vor.u32 %v1915_v59, %v1914_v45  ;;  %v14908_v52 = vld [vmem:[#allocation45_spill] sm:$0xff] }
 0x1bd   : > { %v1919_v34 = vshll.u32 %v1918_v11, 23  ;;  %v2057_v38 = vor.u32 8388608, %v2056_v4  ;;  %vm2083_vm0 = vcmp.lt.s32.totalorder %v14904_v44, 3  ;;  %vm1621_vm15 = vweird.f32 %v9479_v53 }
 0x1be   : > { %vm10444_vm11 = vcmp.le.f32.partialorder %v1841_v30, 0.7853982  ;;  %v1800_v5 = vshll.u32 %v10437_v50, 30  ;;  %v2065_v18 = vshrl.u32 %v14865_v63, %v14902_v10  ;;  %vm2081_vm9 = vcmp.lt.s32.totalorder %v14904_v44, 1 }
 0x1bf   : > { %v2095_v27 = vsel %vm2083_vm0, %v14908_v52, %v14907_v35  ;;  %v1920_v19 = vor.u32 4788187, %v1919_v34  ;;  %v2086_v37 = vsel %vm2084_vm2, %v2074_v62, 2102212464  ;;  %v2089_v30 = vsel %vm2081_vm9, %v2068_v60, %v2071_v24 }
 0x1c0   : > { %v2091_v39 = vsel %vm2083_vm0, %v2074_v62, %v14909_v23  ;;  %v10461_v4 = vsub.s32 %v1797_v20, %v1800_v5  ;;  %vm2082_vm10 = vcmp.lt.s32.totalorder %v14904_v44, 2  ;;  %v2085_v10 = vsel %vm2081_vm9, %v2065_v18, %v2068_v60  ;;  %v9000_v32 = vpop.eup %8999  ;;  %v8366_v5 = vpop.f32.mrf.mxu1 }
 0x1c1   : > { %v2093_v25 = vsel %vm2081_vm9, %v2071_v24, %v2074_v62  ;;  %v1921_v31 = vand.u32 2147483647, %v1920_v19  ;;  %v1923_v41 = vcvt.s32.f32 %v1916_v51  ;;  %v2097_v59 = vshll.u32 %v2057_v38, 8  ;;  %v9002_v11 = vpop.eup %9001 }
 0x1c2   : > { %v2096_v45 = vsel %vm2082_vm10, %v2093_v25, %v2095_v27  ;;  %v1629_v34 = vxor.u32 2147483648, %v9000_v32  ;;  %v1803_v35 = vsub.s32 0, %v10461_v4  ;;  %v2087_v52 = vsel %vm2083_vm0, %v2071_v24, %v2086_v37 }
 0x1c3   : > { %v2092_v20 = vsel %vm2082_vm10, %v2089_v30, %v2091_v39  ;;  %v1626_v60 = vxor.u32 2147483648, %v9002_v11  ;;  %v1924_v62 = vmul.f32 %v1923_v41, %v1921_v31  ;;  %v1736_v51 = vsel %vm1725_vm5, nan, %v1735_v3  ;;  %v3061_v41 = vpop.f32.mrf.mxu1 }
 0x1c4   : > { %v10471_v18 = vmul.u32.u64.low %v2097_v59, %v2096_v45  ;;  %v10472_v19 = vmul.u32.u64.high %v2097_v59, %v2096_v45, %v10471_v18  ;;  %v1630_v38 = vsel %vm1628_vm13, %v1629_v34, %v9002_v11  ;;  %v1928_v27 = vsel %vm1843_vm12, %v1927_v28, %v10340_v49  ;;  %v14910_v49 = vld [vmem:[#allocation22_spill] sm:$0xff] }
 0x1c5   : > { %v7768_v24 = vmin.u32 %v1803_v35, %v10461_v4  ;;  %v1627_v37 = vsel %vm1625_vm14, %v9000_v32, %v1626_v60  ;;  %v1925_v30 = vxor.u32 2147483648, %v1924_v62  ;;  %vm1739_vm2 = vcmp.lt.s32.totalorder %v14894_v56, 0 }
 0x1c6   : > { %v10484_v23 = vmul.u32.u64.low %v2097_v59, %v2092_v20  ;;  %v10485_v39 = vmul.u32.u64.high %v2097_v59, %v2092_v20, %v10484_v23  ;;  %v1631_v48 = vsel %vm1624_vm7, %v1627_v37, %v1630_v38  ;;  %v2088_v25 = vsel %vm2082_vm10, %v2085_v10, %v2087_v52 }
 0x1c7   : > { %v1805_v3 = vclz %v7768_v24  ;;  %v1945_v28 = vand.u32 2147483647, %v14910_v49  ;;  %v3067_v31 = vadd.f32 %v8366_v5, %v1736_v51  ;;  %v1632_v32 = vsel %vm1621_vm15, nan, %v1631_v48 }
 0x1c8   : > { %v1926_v45 = vsel %vm1843_vm12, %v1925_v30, %v1924_v62  ;;  %v1930_v11 = vsel %vm10444_vm11, 0, %v1928_v27  ;;  %v3062_v34 = vadd.f32 %v3061_v41, %v1632_v32  ;;  %vm2106_vm5 = vc.u32 %v10472_v19, %v10484_v23  ;;  %v14911_v62 = vld [vmem:[#allocation39_spill] sm:$0xff] }
 0x1c9   : > { %v1929_v1 = vsel %vm10444_vm11, %v14884_v13, %v1926_v45  ;;  %v7769_v44 = vadd.s32 4294967294, %v1805_v3  ;;  %v1793_v53 = vadd.s32 %v10386_v61, %v10380_v0  ;;  %v1823_v10 = vsub.s32 4, %v10437_v50 }
 0x1ca   : > { %v2104_v35 = vmul.u32 %v2097_v59, %v2088_v25  ;;  %v2107_v52 = vadd.s32 1, %v10485_v39  ;;  %v10509_v20 = vpack.c.bf16 %v3067_v31, %v3062_v34  ;;  %9003 = vcosq.f32 %v1929_v1  ;;  %v14912_v59 = vld [vmem:[#allocation34_spill] sm:$0xff] }
 0x1cb   : > { %vm7770_vm12 = vcmp.lt.s32.totalorder %v7769_v44, 0  ;;  %v1952_v43 = vand.u32 8388607, %v1945_v28  ;;  %9005 = vsinq.f32 %v1929_v1  ;;  %v1963_v18 = vshrl.u32 %v14870_v29, %v14911_v62 }
 0x1cc   : > { %v1808_v5 = vsel %vm7770_vm12, 0, %v7769_v44  ;;  %v2108_v60 = vsel %vm2106_vm5, %v2107_v52, %v10485_v39  ;;  %8444 = vmatmul.mubr.msk.bf16.vlgmr.msra.gmra.mxu0 %vm5185_vm4, %v10509_v20  ;;  %v1962_v38 = vshll.u32 %v14865_v63, %v14912_v59  ;;  %v1965_v24 = vshll.u32 %v14870_v29, %v14912_v59 }
 0x1cd   : > { %v1809_v0 = vsub.s32 32, %v1808_v5  ;;  %v1813_v61 = vsub.s32 4294967266, %v1808_v5  ;;  %v2109_v51 = vadd.s32 %v2108_v60, %v2104_v35  ;;  %v1810_v27 = vshll.u32 %v10461_v4, %v1808_v5  ;;  %v14915_v5 = vld [vmem:[#allocation44_spill] sm:$0xff] }
 0x1ce   : > { %v1966_v37 = vshrl.u32 %v14871_v8, %v14911_v62  ;;  %v1968_v30 = vshll.u32 %v14871_v8, %v14912_v59  ;;  %v1969_v25 = vshrl.u32 %v14837_v6, %v14911_v62  ;;  %v1824_v4 = vsel %vm1739_vm2, %v1823_v10, %v10437_v50  ;;  %v14916_v60 = vld [vmem:[#allocation56_spill] sm:$0xff] }
 0x1cf   : > { %v1811_v39 = vshrl.u32 %v1793_v53, %v1809_v0  ;;  %v1814_v48 = vadd.s32 127, %v1813_v61  ;;  %v2110_v3 = vadd.s32 536870912, %v2109_v51  ;;  %v1964_v32 = vor.u32 %v1963_v18, %v1962_v38  ;;  %v14917_v18 = vld [vmem:[#allocation48_spill] sm:$0xff]  ;;  %v14918_v61 = vld [vmem:[#allocation54_spill] sm:$0xff] }
 0x1d0   : > { %v1967_v41 = vor.u32 %v1966_v37, %v1965_v24  ;;  %vm2604_vm13 = vcmp.lt.s32.totalorder %v10037_v57, 4  ;;  %v1970_v44 = vor.u32 %v1969_v25, %v1968_v30  ;;  %v1934_v53 = vadd.s32 3, %v1930_v11 }
 0x1d1   : > { %v1812_v45 = vor.u32 %v1811_v39, %v1810_v27  ;;  %v1815_v34 = vshll.u32 %v1814_v48, 23  ;;  %v10535_v1 = vshrl.u32 %v2110_v3, 30  ;;  %vm10539_vm14 = vcmp.le.f32.partialorder %v1737_v47, 0.7853982 }
 0x1d2   : > { %v1953_v52 = vor.u32 8388608, %v1952_v43  ;;  %vm1979_vm7 = vcmp.lt.s32.totalorder %v14915_v5, 3  ;;  %vm1977_vm0 = vcmp.lt.s32.totalorder %v14915_v5, 1  ;;  %v1826_v11 = vsel %vm10539_vm14, 0, %v1824_v4 }
 0x1d3   : > { %v1816_v50 = vor.u32 4788187, %v1815_v34  ;;  %v2112_v10 = vshll.u32 %v10535_v1, 30  ;;  %v1991_v0 = vsel %vm1979_vm7, %v14917_v18, %v14916_v60  ;;  %v1985_v47 = vsel %vm1977_vm0, %v1964_v32, %v1967_v41 }
 0x1d4   : > { %v1987_v43 = vsel %vm1979_vm7, %v1970_v44, %v14918_v61  ;;  %v1989_v59 = vsel %vm1977_vm0, %v1967_v41, %v1970_v44  ;;  %v1819_v27 = vcvt.s32.f32 %v1812_v45  ;;  %vm1978_vm15 = vcmp.lt.s32.totalorder %v14915_v5, 2 }
 0x1d5   : > { %v1817_v38 = vand.u32 2147483647, %v1816_v50  ;;  %v10559_v24 = vsub.s32 %v2109_v51, %v2112_v10  ;;  %v10562_v37 = vand.u32 3, %v1934_v53  ;;  %v1982_v30 = vsel %vm1980_vm3, %v1970_v44, 2102212464 }
 0x1d6   : > { %v1992_v39 = vsel %vm1978_vm15, %v1989_v59, %v1991_v0  ;;  %v1993_v48 = vshll.u32 %v1953_v52, 8  ;;  %v1961_v4 = vshrl.u32 %v14865_v63, %v14911_v62  ;;  %v1988_v51 = vsel %vm1978_vm15, %v1985_v47, %v1987_v43  ;;  %v14919_v59 = vld [vmem:[#allocation23_spill] sm:$0xff] }
 0x1d7   : > { %v1820_v3 = vmul.f32 %v1819_v27, %v1817_v38  ;;  %v2115_v25 = vsub.s32 0, %v10559_v24  ;;  %v9004_v45 = vpop.eup %9003  ;;  %vm2892_vm11 = vcmp.gt.s32.totalorder %v10332_v58, 0  ;;  %v1830_v34 = vadd.s32 3, %v1826_v11 }
 0x1d8   : > { %v10574_v53 = vmul.u32.u64.low %v1993_v48, %v1992_v39  ;;  %v10575_v50 = vmul.u32.u64.high %v1993_v48, %v1992_v39, %v10574_v53  ;;  %v9006_v44 = vpop.eup %9005  ;;  %v1981_v60 = vsel %vm1977_vm0, %v1961_v4, %v1964_v32  ;;  %v1983_v62 = vsel %vm1979_vm7, %v1967_v41, %v1982_v30 }
 0x1d9   : > { %v1821_v10 = vxor.u32 2147483648, %v1820_v3  ;;  %v7780_v52 = vmin.u32 %v2115_v25, %v10559_v24  ;;  %v10585_v18 = vsel %vm2604_vm13, %v10392_v2, 920167782  ;;  %v10588_v0 = vadd.s32 1, %v10383_v42 }
 0x1da   : > { %v10590_v11 = vmul.u32.u64.low %v1993_v48, %v1988_v51  ;;  %v10591_v47 = vmul.u32.u64.high %v1993_v48, %v1988_v51, %v10590_v11  ;;  %v10595_v61 = vsel %vm2892_vm11, %v10332_v58, 0  ;;  %vm1937_vm3 = vcmp.eq.s32.totalorder %v10562_v37, 0 }
 0x1db   : > { %v1822_v32 = vsel %vm1739_vm2, %v1821_v10, %v1820_v3  ;;  %v2117_v41 = vclz %v7780_v52  ;;  %vm1940_vm9 = vcmp.eq.s32.totalorder %v10562_v37, 2  ;;  %v1984_v43 = vsel %vm1978_vm15, %v1981_v60, %v1983_v62  ;;  %v14921_v60 = vld [vmem:[#allocation36_spill] sm:$0xff] }
 0x1dc   : > { %v1825_v42 = vsel %vm10539_vm14, %v14894_v56, %v1822_v32  ;;  %v14633_v38 = vand.u32 2147483647, %v14919_v59  ;;  %vm2051_vm10 = vcmp.lt.s32.totalorder %v14901_v7, 0  ;;  %v10608_v58 = vand.u32 3, %v1830_v34 }
 0x1dd   : > { %9007 = vcosq.f32 %v1825_v42  ;;  %v2105_v27 = vadd.s32 %v10484_v23, %v10472_v19  ;;  %v7781_v30 = vadd.s32 4294967294, %v2117_v41  ;;  %v2135_v39 = vsub.s32 4, %v10535_v1  ;;  %v14920_v23 = vld [vmem:[#allocation40_spill] sm:$0xff] }
 0x1de   : > { %9009 = vsinq.f32 %v1825_v42  ;;  %vm2002_vm2 = vc.u32 %v10575_v50, %v10590_v11  ;;  %v2003_v35 = vadd.s32 1, %v10591_v47  ;;  %vm1936_vm5 = vcmp.lt.s32.totalorder %v10562_v37, 2 }
 0x1df   : > { %v1938_v5 = vxor.u32 2147483648, %v9006_v44  ;;  %v1941_v3 = vxor.u32 2147483648, %v9004_v45  ;;  %vm7782_vm12 = vcmp.lt.s32.totalorder %v7781_v30, 0  ;;  %v2000_v25 = vmul.u32 %v1993_v48, %v1984_v43 }
 0x1e0   : > { %v2120_v4 = vsel %vm7782_vm12, 0, %v7781_v30  ;;  %v2004_v51 = vsel %vm2002_vm2, %v2003_v35, %v10591_v47  ;;  %v2264_v19 = vand.u32 8388607, %v14633_v38  ;;  %v2275_v34 = vshrl.u32 %v14870_v29, %v14920_v23 }
 0x1e1   : > { %v2121_v53 = vsub.s32 32, %v2120_v4  ;;  %v2125_v10 = vsub.s32 4294967266, %v2120_v4  ;;  %v2005_v52 = vadd.s32 %v2004_v51, %v2000_v25  ;;  %v2274_v62 = vshll.u32 %v14865_v63, %v14921_v60 }
 0x1e2   : > { %v2122_v32 = vshll.u32 %v10559_v24, %v2120_v4  ;;  %v2277_v48 = vshll.u32 %v14870_v29, %v14921_v60  ;;  %v2278_v47 = vshrl.u32 %v14871_v8, %v14920_v23  ;;  %v2280_v41 = vshll.u32 %v14871_v8, %v14921_v60 }
 0x1e3   : > { %v2123_v42 = vshrl.u32 %v2105_v27, %v2121_v53  ;;  %v2126_v43 = vadd.s32 127, %v2125_v10  ;;  %v2006_v30 = vadd.s32 536870912, %v2005_v52  ;;  %v2281_v35 = vshrl.u32 %v14837_v6, %v14920_v23  ;;  %v14923_v10 = vld [vmem:[#allocation58_spill] sm:$0xff] }
 0x1e4   : > { %v1939_v25 = vsel %vm1937_vm3, %v9004_v45, %v1938_v5  ;;  %v1942_v24 = vsel %vm1940_vm9, %v1941_v3, %v9006_v44  ;;  %v2276_v4 = vor.u32 %v2275_v34, %v2274_v62  ;;  %v2279_v51 = vor.u32 %v2278_v47, %v2277_v48  ;;  %v14922_v5 = vld [vmem:[#allocation49_spill] sm:$0xff]  ;;  %v14924_v62 = vld [vmem:[#allocation50_spill] sm:$0xff] }
 0x1e5   : > { %vm1933_vm14 = vweird.f32 %v14884_v13  ;;  %vm1833_vm7 = vcmp.eq.s32.totalorder %v10608_v58, 0  ;;  %v2124_v38 = vor.u32 %v2123_v42, %v2122_v32  ;;  %v2127_v60 = vshll.u32 %v2126_v43, 23 }
 0x1e6   : > { %v10639_v27 = vshrl.u32 %v2006_v30, 30  ;;  %v2282_v53 = vor.u32 %v2281_v35, %v2280_v41  ;;  %vm1832_vm0 = vcmp.lt.s32.totalorder %v10608_v58, 2  ;;  %vm1836_vm15 = vcmp.eq.s32.totalorder %v10608_v58, 2 }
 0x1e7   : > { %v10646_v45 = vsel %vm2051_vm10, %v2135_v39, %v10535_v1  ;;  %v2265_v44 = vor.u32 8388608, %v2264_v19  ;;  %vm2291_vm11 = vcmp.lt.s32.totalorder %v14922_v5, 3  ;;  %vm1829_vm3 = vweird.f32 %v14894_v56  ;;  %v14925_v39 = vld [vmem:[#allocation57_spill] sm:$0xff] }
 0x1e8   : > { %v2128_v3 = vor.u32 4788187, %v2127_v60  ;;  %v2008_v34 = vshll.u32 %v10639_v27, 30  ;;  %vm2289_vm9 = vcmp.lt.s32.totalorder %v14922_v5, 1  ;;  %v2303_v32 = vsel %vm2291_vm11, %v14924_v62, %v14923_v10 }
 0x1e9   : > { %v1943_v48 = vsel %vm1936_vm5, %v1939_v25, %v1942_v24  ;;  %v2297_v1 = vsel %vm2289_vm9, %v2276_v4, %v2279_v51  ;;  %v2299_v19 = vsel %vm2291_vm11, %v2282_v53, %v14925_v39  ;;  %v2301_v47 = vsel %vm2289_vm9, %v2279_v51, %v2282_v53 }
 0x1ea   : > { %v2129_v41 = vand.u32 2147483647, %v2128_v3  ;;  %v2131_v42 = vcvt.s32.f32 %v2124_v38  ;;  %v10665_v43 = vsub.s32 %v2005_v52, %v2008_v34  ;;  %vm2290_vm2 = vcmp.lt.s32.totalorder %v14922_v5, 2  ;;  %v9008_v30 = vpop.eup %9007  ;;  %v8369_v3 = vpop.f32.mrf.mxu1 }
 0x1eb   : > { %v2273_v37 = vshrl.u32 %v14865_v63, %v14920_v23  ;;  %v2294_v35 = vsel %vm2292_vm6, %v2282_v53, 2102212464  ;;  %v2304_v25 = vsel %vm2290_vm2, %v2301_v47, %v2303_v32  ;;  %v2305_v24 = vshll.u32 %v2265_v44, 8  ;;  %v9010_v60 = vpop.eup %9009 }
 0x1ec   : > { %v1837_v10 = vxor.u32 2147483648, %v9008_v30  ;;  %v2132_v62 = vmul.f32 %v2131_v42, %v2129_v41  ;;  %v2011_v38 = vsub.s32 0, %v10665_v43  ;;  %v2300_v52 = vsel %vm2290_vm2, %v2297_v1, %v2299_v19 }
 0x1ed   : > { %v1834_v34 = vxor.u32 2147483648, %v9010_v60  ;;  %v2293_v23 = vsel %vm2289_vm9, %v2273_v37, %v2276_v4  ;;  %v10679_v39 = vmul.u32.u64.low %v2305_v24, %v2304_v25  ;;  %v10680_v31 = vmul.u32.u64.high %v2305_v24, %v2304_v25, %v10679_v39 }
 0x1ee   : > { %v1838_v53 = vsel %vm1836_vm15, %v1837_v10, %v9010_v60  ;;  %v2133_v44 = vxor.u32 2147483648, %v2132_v62  ;;  %v7776_v32 = vmin.u32 %v2011_v38, %v10665_v43  ;;  %v2295_v47 = vsel %vm2291_vm11, %v2279_v51, %v2294_v35  ;;  %v3071_v35 = vpop.f32.mrf.mxu1 }
 0x1ef   : > { %v1944_v1 = vsel %vm1933_vm14, nan, %v1943_v48  ;;  %v1835_v19 = vsel %vm1833_vm7, %v9008_v30, %v1834_v34  ;;  %v10691_v41 = vmul.u32.u64.low %v2305_v24, %v2300_v52  ;;  %v10692_v4 = vmul.u32.u64.high %v2305_v24, %v2300_v52, %v10691_v41  ;;  %v14928_v52 = vld [vmem:[#allocation24_spill] sm:$0xff] }
 0x1f0   : > { %v1839_v42 = vsel %vm1832_vm0, %v1835_v19, %v1838_v53  ;;  %vm10699_vm6 = vcmp.le.f32.partialorder %v2049_v55, 0.7853982  ;;  %v2134_v13 = vsel %vm2051_vm10, %v2133_v44, %v2132_v62  ;;  %v2013_v51 = vclz %v7776_v32 }
 0x1f1   : > { %v10706_v48 = vand.u32 31, %v10595_v61  ;;  %v1840_v30 = vsel %vm1829_vm3, nan, %v1839_v42  ;;  %v2138_v58 = vsel %vm10699_vm6, 0, %v10646_v45  ;;  %v2296_v55 = vsel %vm2290_vm2, %v2293_v23, %v2295_v47 }
 0x1f2   : > { %v3077_v25 = vadd.f32 %v8369_v3, %v1944_v1  ;;  %v3072_v60 = vadd.f32 %v3071_v35, %v1840_v30  ;;  %v2137_v10 = vsel %vm10699_vm6, %v14901_v7, %v2134_v13  ;;  %v7777_v62 = vadd.s32 4294967294, %v2013_v51  ;;  %v14930_v1 = vld [vmem:[#allocation43_spill] sm:$0xff] }
 0x1f3   : > { %v2001_v38 = vadd.s32 %v10590_v11, %v10575_v50  ;;  %vm2314_vm10 = vc.u32 %v10680_v31, %v10691_v41  ;;  %v2315_v56 = vadd.s32 1, %v10692_v4  ;;  %v2153_v45 = vand.u32 2147483647, %v14928_v52  ;;  %v14929_v50 = vld [vmem:[#allocation46_spill] sm:$0xff] }
 0x1f4   : > { %vm1947_vm5 = vcmp.lt.s32.totalorder %v14910_v49, 0  ;;  %v10725_v5 = vpack.c.bf16 %v3077_v25, %v3072_v60  ;;  %vm7778_vm12 = vcmp.lt.s32.totalorder %v7777_v62, 0  ;;  %v2031_v3 = vsub.s32 4, %v10639_v27 }
 0x1f5   : > { %v2312_v34 = vmul.u32 %v2305_v24, %v2296_v55  ;;  %9011 = vcosq.f32 %v2137_v10  ;;  %v2016_v23 = vsel %vm7778_vm12, 0, %v7777_v62  ;;  %v2316_v39 = vsel %vm2314_vm10, %v2315_v56, %v10692_v4 }
 0x1f6   : > { %v2171_v11 = vshrl.u32 %v14870_v29, %v14929_v50  ;;  %9013 = vsinq.f32 %v2137_v10  ;;  %v2017_v53 = vsub.s32 32, %v2016_v23  ;;  %v2021_v44 = vsub.s32 4294967266, %v2016_v23  ;;  %8447 = vmatprep.mubr.msk.bf16.mxu0 %vm5185_vm4, %v10725_v5 }
 0x1f7   : > { %v2317_v32 = vadd.s32 %v2316_v39, %v2312_v34  ;;  %v2160_v47 = vand.u32 8388607, %v2153_v45  ;;  %v2170_v24 = vshll.u32 %v14865_v63, %v14930_v1  ;;  %v2173_v19 = vshll.u32 %v14870_v29, %v14930_v1  ;;  %v14931_v39 = vld [vmem:[#allocation60_spill] sm:$0xff] }
 0x1f8   : > { %v2174_v4 = vshrl.u32 %v14871_v8, %v14929_v50  ;;  %v2018_v42 = vshll.u32 %v10665_v43, %v2016_v23  ;;  %v2019_v37 = vshrl.u32 %v2001_v38, %v2017_v53  ;;  %v2022_v13 = vadd.s32 127, %v2021_v44  ;;  %v14932_v44 = vld [vmem:[#allocation63_spill] sm:$0xff] }
 0x1f9   : > { %v2318_v51 = vadd.s32 536870912, %v2317_v32  ;;  %v2172_v30 = vor.u32 %v2171_v11, %v2170_v24  ;;  %v2176_v55 = vshll.u32 %v14871_v8, %v14930_v1  ;;  %v2177_v25 = vshrl.u32 %v14837_v6, %v14929_v50 }
 0x1fa   : > { %v2175_v35 = vor.u32 %v2174_v4, %v2173_v19  ;;  %vm2788_vm14 = vcmp.gt.s32.totalorder %v10588_v0, 0  ;;  %v2020_v60 = vor.u32 %v2019_v37, %v2018_v42  ;;  %v2023_v10 = vshll.u32 %v2022_v13, 23 }
 0x1fb   : > { %v10747_v62 = vshrl.u32 %v2318_v51, 30  ;;  %v2142_v56 = vadd.s32 3, %v2138_v58  ;;  %v2161_v34 = vor.u32 8388608, %v2160_v47  ;;  %v2178_v43 = vor.u32 %v2177_v25, %v2176_v55 }
 0x1fc   : > { %vm2187_vm7 = vcmp.lt.s32.totalorder %v9791_v26, 3  ;;  %v2024_v38 = vor.u32 4788187, %v2023_v10  ;;  %vm2185_vm0 = vcmp.lt.s32.totalorder %v9791_v26, 1  ;;  %v2032_v53 = vsel %vm1947_vm5, %v2031_v3, %v10639_v27 }
 0x1fd   : > { %v2320_v23 = vshll.u32 %v10747_v62, 30  ;;  %v2199_v11 = vsel %vm2187_vm7, %v14931_v39, %v9837_v16  ;;  %v2193_v58 = vsel %vm2185_vm0, %v2172_v30, %v2175_v35  ;;  %v2195_v47 = vsel %vm2187_vm7, %v2178_v43, %v14932_v44 }
 0x1fe   : > { %v2197_v1 = vsel %vm2185_vm0, %v2175_v35, %v2178_v43  ;;  %v2025_v24 = vand.u32 2147483647, %v2024_v38  ;;  %v2027_v19 = vcvt.s32.f32 %v2020_v60  ;;  %vm2186_vm15 = vcmp.lt.s32.totalorder %v9791_v26, 2 }
 0x1ff   : > { %v10766_v4 = vsub.s32 %v2317_v32, %v2320_v23  ;;  %vm10771_vm11 = vcmp.le.f32.partialorder %v1945_v28, 0.7853982  ;;  %v2190_v27 = vsel %vm2188_vm8, %v2178_v43, 2102212464  ;;  %v2200_v3 = vsel %vm2186_vm15, %v2197_v1, %v2199_v11 }
 0x200   : > { %v2201_v42 = vshll.u32 %v2161_v34, 8  ;;  %v2028_v37 = vmul.f32 %v2027_v19, %v2025_v24  ;;  %v2169_v32 = vshrl.u32 %v14865_v63, %v14929_v50  ;;  %v2196_v51 = vsel %vm2186_vm15, %v2193_v58, %v2195_v47  ;;  %v14936_v19 = vld [vmem:[#allocation26_spill] sm:$0xff] }
 0x201   : > { %v2323_v13 = vsub.s32 0, %v10766_v4  ;;  %v10784_v28 = vand.u32 3, %v2142_v56  ;;  %v2034_v55 = vsel %vm10771_vm11, 0, %v2032_v53  ;;  %v2191_v50 = vsel %vm2187_vm7, %v2175_v35, %v2190_v27 }
 0x202   : > { %v10788_v25 = vmul.u32.u64.low %v2201_v42, %v2200_v3  ;;  %v10789_v60 = vmul.u32.u64.high %v2201_v42, %v2200_v3, %v10788_v25  ;;  %v9012_v10 = vpop.eup %9011  ;;  %v2029_v43 = vxor.u32 2147483648, %v2028_v37  ;;  %v2189_v38 = vsel %vm2185_vm0, %v2169_v32, %v2172_v30 }
 0x203   : > { %v7788_v34 = vmin.u32 %v2323_v13, %v10766_v4  ;;  %v9014_v23 = vpop.eup %9013  ;;  %v14935_v56 = vor.u32 %v10173_v46, %v10065_v22  ;;  %v10804_v11 = vshrl.u32 %v10595_v61, 5  ;;  %v10813_v30 = vsel %vm2788_vm14, %v10588_v0, 0 }
 0x204   : > { %v10806_v53 = vmul.u32.u64.low %v2201_v42, %v2196_v51  ;;  %v10807_v58 = vmul.u32.u64.high %v2201_v42, %v2196_v51, %v10806_v53  ;;  %v2030_v35 = vsel %vm1947_vm5, %v2029_v43, %v2028_v37  ;;  %v2038_v22 = vadd.s32 3, %v2034_v55  ;;  %v14937_v51 = vld [vmem:[#allocation59_spill] sm:$0xff] }
 0x205   : > { %v10801_v39 = vsel %vm2604_vm13, %v14935_v56, 1326507024  ;;  %v2325_v46 = vclz %v7788_v34  ;;  %v10818_v44 = vsub.s32 32, %v10706_v48  ;;  %vm2145_vm8 = vcmp.eq.s32.totalorder %v10784_v28, 0  ;;  %v14938_v56 = vld [vmem:[#allocation51_spill] sm:$0xff] }
 0x206   : > { %v2033_v61 = vsel %vm10771_vm11, %v14910_v49, %v2030_v35  ;;  %v2192_v47 = vsel %vm2186_vm15, %v2189_v38, %v2191_v50  ;;  %vm2148_vm3 = vcmp.eq.s32.totalorder %v10784_v28, 2  ;;  %v2149_v0 = vxor.u32 2147483648, %v9012_v10 }
 0x207   : > { %9015 = vcosq.f32 %v2033_v61  ;;  %v7789_v1 = vadd.s32 4294967294, %v2325_v46  ;;  %vm2210_vm9 = vc.u32 %v10789_v60, %v10806_v53  ;;  %v2211_v24 = vadd.s32 1, %v10807_v58 }
 0x208   : > { %9017 = vsinq.f32 %v2033_v61  ;;  %v2465_v27 = vand.u32 2147483647, %v14936_v19  ;;  %vm2144_vm2 = vcmp.lt.s32.totalorder %v10784_v28, 2  ;;  %v10832_v16 = vand.u32 3, %v2038_v22 }
 0x209   : > { %v2313_v26 = vadd.s32 %v10691_v41, %v10680_v31  ;;  %vm7790_vm6 = vcmp.lt.s32.totalorder %v7789_v1, 0  ;;  %v2208_v3 = vmul.u32 %v2201_v42, %v2192_v47  ;;  %v2146_v37 = vxor.u32 2147483648, %v9014_v23 }
 0x20a   : > { %v2328_v13 = vsel %vm7790_vm6, 0, %v7789_v1  ;;  %v2212_v32 = vsel %vm2210_vm9, %v2211_v24, %v10807_v58  ;;  %v2483_v55 = vshrl.u32 %v14870_v29, %v14937_v51  ;;  %v2150_v25 = vsel %vm2148_vm3, %v2149_v0, %v9014_v23 }
 0x20b   : > { %v2329_v43 = vsub.s32 32, %v2328_v13  ;;  %v2333_v34 = vsub.s32 4294967266, %v2328_v13  ;;  %v2213_v38 = vadd.s32 %v2212_v32, %v2208_v3  ;;  %v2472_v50 = vand.u32 8388607, %v2465_v27 }
 0x20c   : > { %v2482_v31 = vshll.u32 %v14865_v63, %v14938_v56  ;;  %v2485_v41 = vshll.u32 %v14870_v29, %v14938_v56  ;;  %v2486_v42 = vshrl.u32 %v14871_v8, %v14937_v51  ;;  %v2330_v58 = vshll.u32 %v10766_v4, %v2328_v13 }
 0x20d   : > { %v2331_v35 = vshrl.u32 %v2313_v26, %v2329_v43  ;;  %v2334_v22 = vadd.s32 127, %v2333_v34  ;;  %v2214_v23 = vadd.s32 536870912, %v2213_v38  ;;  %vm2044_vm10 = vcmp.eq.s32.totalorder %v10832_v16, 2 }
 0x20e   : > { %v2484_v46 = vor.u32 %v2483_v55, %v2482_v31  ;;  %v2487_v61 = vor.u32 %v2486_v42, %v2485_v41  ;;  %v2488_v47 = vshll.u32 %v14871_v8, %v14938_v56  ;;  %v2489_v0 = vshrl.u32 %v14837_v6, %v14937_v51  ;;  %v14940_v56 = vld [vmem:[#allocation68_spill] sm:$0xff] }
 0x20f   : > { %vm2141_vm5 = vweird.f32 %v14901_v7  ;;  %v2147_v1 = vsel %vm2145_vm8, %v9012_v10, %v2146_v37  ;;  %vm2041_vm12 = vcmp.eq.s32.totalorder %v10832_v16, 0  ;;  %v2332_v4 = vor.u32 %v2331_v35, %v2330_v58  ;;  %v14939_v37 = vld [vmem:[#allocation65_spill] sm:$0xff] }
 0x210   : > { %v2335_v24 = vshll.u32 %v2334_v22, 23  ;;  %v10859_v26 = vshrl.u32 %v2214_v23, 30  ;;  %vm2259_vm14 = vcmp.lt.s32.totalorder %v14919_v59, 0  ;;  %vm2040_vm7 = vcmp.lt.s32.totalorder %v10832_v16, 2 }
 0x211   : > { %v2343_v3 = vsub.s32 4, %v10747_v62  ;;  %v2473_v13 = vor.u32 8388608, %v2472_v50  ;;  %v2490_v32 = vor.u32 %v2489_v0, %v2488_v47  ;;  %vm2499_vm0 = vcmp.lt.s32.totalorder %v9800_v36, 3 }
 0x212   : > { %vm2037_vm15 = vweird.f32 %v14910_v49  ;;  %v2336_v55 = vor.u32 4788187, %v2335_v24  ;;  %v2216_v10 = vshll.u32 %v10859_v26, 30  ;;  %vm2497_vm11 = vcmp.lt.s32.totalorder %v9800_v36, 1  ;;  %v8372_v24 = vpop.f32.mrf.mxu1 }
 0x213   : > { %v2511_v43 = vsel %vm2499_vm0, %v14939_v37, %v9882_v9  ;;  %v2151_v34 = vsel %vm2144_vm2, %v2147_v1, %v2150_v25  ;;  %v2505_v50 = vsel %vm2497_vm11, %v2484_v46, %v2487_v61  ;;  %v2507_v31 = vsel %vm2499_vm0, %v2490_v32, %v14940_v56 }
 0x214   : > { %v2509_v41 = vsel %vm2497_vm11, %v2487_v61, %v2490_v32  ;;  %v2337_v42 = vand.u32 2147483647, %v2336_v55  ;;  %v2339_v58 = vcvt.s32.f32 %v2332_v4  ;;  %v10881_v35 = vsub.s32 %v2213_v38, %v2216_v10  ;;  %v9016_v9 = vpop.eup %9015 }
 0x215   : > { %vm2498_vm8 = vcmp.lt.s32.totalorder %v9800_v36, 2  ;;  %v2481_v28 = vshrl.u32 %v14865_v63, %v14937_v51  ;;  %vm14941_vm3 = vcmp.lt.s32.totalorder %v9800_v36, 4  ;;  %v2513_v23 = vshll.u32 %v2473_v13, 8  ;;  %v9018_v47 = vpop.eup %9017 }
 0x216   : > { %v2502_v25 = vsel %vm14941_vm3, %v2490_v32, 2102212464  ;;  %v2512_v22 = vsel %vm2498_vm8, %v2509_v41, %v2511_v43  ;;  %v2045_v0 = vxor.u32 2147483648, %v9016_v9  ;;  %v2340_v1 = vmul.f32 %v2339_v58, %v2337_v42 }
 0x217   : > { %v2219_v4 = vsub.s32 0, %v10881_v35  ;;  %v2508_v38 = vsel %vm2498_vm8, %v2505_v50, %v2507_v31  ;;  %vm2155_vm9 = vcmp.lt.s32.totalorder %v14928_v52, 0  ;;  %v2042_v55 = vxor.u32 2147483648, %v9018_v47 }
 0x218   : > { %v2501_v51 = vsel %vm2497_vm11, %v2481_v28, %v2484_v46  ;;  %v10896_v32 = vmul.u32.u64.low %v2513_v23, %v2512_v22  ;;  %v10897_v10 = vmul.u32.u64.high %v2513_v23, %v2512_v22, %v10896_v32  ;;  %v2046_v13 = vsel %vm2044_vm10, %v2045_v0, %v9018_v47 }
 0x219   : > { %v2341_v37 = vxor.u32 2147483648, %v2340_v1  ;;  %v7784_v43 = vmin.u32 %v2219_v4, %v10881_v35  ;;  %v2503_v56 = vsel %vm2499_vm0, %v2487_v61, %v2502_v25  ;;  %v2152_v50 = vsel %vm2141_vm5, nan, %v2151_v34 }
 0x21a   : > { %v2043_v31 = vsel %vm2041_vm12, %v9016_v9, %v2042_v55  ;;  %v10908_v41 = vmul.u32.u64.low %v2513_v23, %v2508_v38  ;;  %v10909_v46 = vmul.u32.u64.high %v2513_v23, %v2508_v38, %v10908_v41  ;;  %v14942_v58 = vand.u32 2147483647, %v14919_v59  ;;  %v3081_v9 = vpop.f32.mrf.mxu1 }
 0x21b   : > { %v2047_v42 = vsel %vm2040_vm7, %v2043_v31, %v2046_v13  ;;  %v2342_v7 = vsel %vm2259_vm14, %v2341_v37, %v2340_v1  ;;  %v2221_v61 = vclz %v7784_v43  ;;  %v2344_v25 = vsel %vm2259_vm14, %v2343_v3, %v10747_v62  ;;  %v14945_v3 = vld [vmem:[#allocation28_spill] sm:$0xff]  ;;  %v14946_v31 = vld [vmem:[#allocation61_spill] sm:$0xff] }
 0x21c   : > { %vm10916_vm2 = vcmp.le.f32.partialorder %v14942_v58, 0.7853982  ;;  %v2048_v34 = vsel %vm2037_vm15, nan, %v2047_v42  ;;  %v2504_v22 = vsel %vm2498_vm8, %v2501_v51, %v2503_v56  ;;  %v3087_v47 = vadd.f32 %v8372_v24, %v2152_v50 }
 0x21d   : > { %v2345_v16 = vsel %vm10916_vm2, %v14919_v59, %v2342_v7  ;;  %v3082_v0 = vadd.f32 %v3081_v9, %v2048_v34  ;;  %v7785_v4 = vadd.s32 4294967294, %v2221_v61  ;;  %v2239_v1 = vsub.s32 4, %v10859_v26 }
 0x21e   : > { %v10935_v49 = vshll.u32 %v14837_v6, %v10706_v48  ;;  %vm2522_vm6 = vc.u32 %v10897_v10, %v10908_v41  ;;  %v2523_v62 = vadd.s32 1, %v10909_v46  ;;  %v14635_v38 = vand.u32 2147483647, %v14945_v3 }
 0x21f   : > { %v10941_v55 = vpack.c.bf16 %v3087_v47, %v3082_v0  ;;  %9019 = vcosq.f32 %v2345_v16  ;;  %vm7786_vm10 = vcmp.lt.s32.totalorder %v7785_v4, 0  ;;  %v2520_v36 = vmul.u32 %v2513_v23, %v2504_v22 }
 0x220   : > { %v2346_v24 = vsel %vm10916_vm2, 0, %v2344_v25  ;;  %v2209_v51 = vadd.s32 %v10806_v53, %v10789_v60  ;;  %v2224_v32 = vsel %vm7786_vm10, 0, %v7785_v4  ;;  %v2524_v13 = vsel %vm2522_vm6, %v2523_v62, %v10909_v46  ;;  %v14947_v53 = vld [vmem:[#allocation62_spill] sm:$0xff] }
 0x221   : > { %v2225_v37 = vsub.s32 32, %v2224_v32  ;;  %v2229_v43 = vsub.s32 4294967266, %v2224_v32  ;;  %v2240_v56 = vsel %vm2155_vm9, %v2239_v1, %v10859_v26  ;;  %v2525_v50 = vadd.s32 %v2524_v13, %v2520_v36  ;;  %8448 = vmatmul.mubr.msk.bf16.gmra.mxu0 %vm5185_vm4, %v10941_v55 }
 0x222   : > { %9021 = vsinq.f32 %v2345_v16  ;;  %v2368_v23 = vand.u32 8388607, %v14635_v38  ;;  %v2381_v60 = vshll.u32 %v14870_v29, %v14946_v31  ;;  %v2382_v46 = vshrl.u32 %v14871_v8, %v14947_v53 }
 0x223   : > { %v2226_v42 = vshll.u32 %v10881_v35, %v2224_v32  ;;  %v2227_v58 = vshrl.u32 %v2209_v51, %v2225_v37  ;;  %v2230_v28 = vadd.s32 127, %v2229_v43  ;;  %v2526_v7 = vadd.s32 536870912, %v2525_v50  ;;  %v14950_v51 = vld [vmem:[#allocation64_spill] sm:$0xff]  ;;  %v14952_v37 = vld [vmem:[#allocation69_spill] sm:$0xff] }
 0x224   : > { %v2379_v26 = vshrl.u32 %v14870_v29, %v14947_v53  ;;  %v2383_v61 = vor.u32 %v2382_v46, %v2381_v60  ;;  %v2384_v34 = vshll.u32 %v14871_v8, %v14946_v31  ;;  %v2385_v9 = vshrl.u32 %v14837_v6, %v14947_v53 }
 0x225   : > { %vm10968_vm5 = vcmp.le.f32.partialorder %v2153_v45, 0.7853982  ;;  %v2228_v35 = vor.u32 %v2227_v58, %v2226_v42  ;;  %v2231_v16 = vshll.u32 %v2230_v28, 23  ;;  %v10972_v22 = vshrl.u32 %v2526_v7, 30 }
 0x226   : > { %v2350_v47 = vadd.s32 3, %v2346_v24  ;;  %v2242_v0 = vsel %vm10968_vm5, 0, %v2240_v56  ;;  %v2378_v4 = vshll.u32 %v14865_v63, %v14946_v31  ;;  %v2386_v1 = vor.u32 %v2385_v9, %v2384_v34  ;;  %v14951_v24 = vld [vmem:[#allocation72_spill] sm:$0xff] }
 0x227   : > { %v2232_v62 = vor.u32 4788187, %v2231_v16  ;;  %v2528_v36 = vshll.u32 %v10972_v22, 30  ;;  %vm2393_vm12 = vcmp.lt.s32.totalorder %v14950_v51, 1  ;;  %vm2395_vm14 = vcmp.lt.s32.totalorder %v14950_v51, 3  ;;  %v14954_v16 = vld [vmem:[#allocation71_spill] sm:$0xff] }
 0x228   : > { %v2369_v45 = vor.u32 8388608, %v2368_v23  ;;  %v2380_v32 = vor.u32 %v2379_v26, %v2378_v4  ;;  %v2405_v13 = vsel %vm2393_vm12, %v2383_v61, %v2386_v1  ;;  %v2407_v43 = vsel %vm2395_vm14, %v14952_v37, %v14951_v24 }
 0x229   : > { %v10989_v56 = vshll.u32 %v14852_v15, %v10706_v48  ;;  %v2233_v31 = vand.u32 2147483647, %v2232_v62  ;;  %v2235_v60 = vcvt.s32.f32 %v2228_v35  ;;  %v10991_v46 = vsub.s32 %v2525_v50, %v2528_v36 }
 0x22a   : > { %v10994_v42 = vshrl.u32 %v10813_v30, 5  ;;  %v10996_v23 = vand.u32 3, %v2350_v47  ;;  %v2246_v58 = vadd.s32 3, %v2242_v0  ;;  %vm2394_vm7 = vcmp.lt.s32.totalorder %v14950_v51, 2 }
 0x22b   : > { %v2236_v28 = vmul.f32 %v2235_v60, %v2233_v31  ;;  %v2531_v7 = vsub.s32 0, %v10991_v46  ;;  %vm14953_vm0 = vcmp.lt.s32.totalorder %v14950_v51, 4  ;;  %v2408_v34 = vsel %vm2394_vm7, %v2405_v13, %v2407_v43 }
 0x22c   : > { %v2398_v26 = vsel %vm14953_vm0, %v2386_v1, 2102212464  ;;  %v11004_v9 = vpop.eup %9019  ;;  %v2377_v50 = vshrl.u32 %v14865_v63, %v14947_v53  ;;  %v2401_v35 = vsel %vm2393_vm12, %v2380_v32, %v2383_v61  ;;  %v2403_v47 = vsel %vm2395_vm14, %v2386_v1, %v14954_v16 }
 0x22d   : > { %v2409_v0 = vshll.u32 %v2369_v45, 8  ;;  %v11015_v4 = vshrl.u32 %v14852_v15, %v10818_v44  ;;  %v11018_v62 = vand.u32 31, %v10813_v30  ;;  %v2237_v36 = vxor.u32 2147483648, %v2236_v28 }
 0x22e   : > { %v7796_v13 = vmin.u32 %v2531_v7, %v10991_v46  ;;  %v2397_v53 = vsel %vm2393_vm12, %v2377_v50, %v2380_v32  ;;  %v2399_v24 = vsel %vm2395_vm14, %v2383_v61, %v2398_v26  ;;  %v2357_v45 = vxor.u32 2147483648, %v11004_v9  ;;  %v14955_v7 = vld [vmem:[#allocation47_spill] sm:$0xff] }
 0x22f   : > { %v11025_v37 = vmul.u32.u64.low %v2409_v0, %v2408_v34  ;;  %v11026_v43 = vmul.u32.u64.high %v2409_v0, %v2408_v34, %v11025_v37  ;;  %v9022_v1 = vpop.eup %9021  ;;  %v2238_v31 = vsel %vm2155_vm9, %v2237_v36, %v2236_v28  ;;  %v2404_v60 = vsel %vm2394_vm7, %v2401_v35, %v2403_v47  ;;  %v14956_v36 = vld [vmem:[#allocation73_spill] sm:$0xff] }
 0x230   : > { %v2533_v30 = vclz %v7796_v13  ;;  %vm2356_vm15 = vcmp.eq.s32.totalorder %v10996_v23, 2  ;;  %v2241_v32 = vsel %vm10968_vm5, %v14928_v52, %v2238_v31  ;;  %v11037_v61 = vand.u32 3, %v2246_v58 }
 0x231   : > { %v14634_v26 = vand.u32 2147483647, %v14955_v7  ;;  %vm2353_vm11 = vcmp.eq.s32.totalorder %v10996_v23, 0  ;;  %9023 = vcosq.f32 %v2241_v32  ;;  %v2521_v28 = vadd.s32 %v10908_v41, %v10897_v10  ;;  %v14957_v41 = vld [vmem:[#allocation70_spill] sm:$0xff] }
 0x232   : > { %v7797_v34 = vadd.s32 4294967294, %v2533_v30  ;;  %v2400_v50 = vsel %vm2394_vm7, %v2397_v53, %v2399_v24  ;;  %9025 = vsinq.f32 %v2241_v32  ;;  %v2551_v35 = vsub.s32 4, %v10972_v22 }
 0x233   : > { %v11046_v16 = vmul.u32.u64.low %v2409_v0, %v2404_v60  ;;  %v11047_v25 = vmul.u32.u64.high %v2409_v0, %v2404_v60, %v11046_v16  ;;  %v2354_v58 = vxor.u32 2147483648, %v9022_v1  ;;  %v2358_v47 = vsel %vm2356_vm15, %v2357_v45, %v9022_v1 }
 0x234   : > { %vm7798_vm8 = vcmp.lt.s32.totalorder %v7797_v34, 0  ;;  %v2691_v13 = vshrl.u32 %v14870_v29, %v14956_v36  ;;  %v2416_v31 = vmul.u32 %v2409_v0, %v2400_v50  ;;  %v2680_v10 = vand.u32 8388607, %v14634_v26 }
 0x235   : > { %v2536_v37 = vsel %vm7798_vm8, 0, %v7797_v34  ;;  %v2690_v51 = vshll.u32 %v14865_v63, %v14957_v41  ;;  %vm2352_vm3 = vcmp.lt.s32.totalorder %v10996_v23, 2  ;;  %vm2418_vm9 = vc.u32 %v11026_v43, %v11046_v16 }
 0x236   : > { %v2537_v53 = vsub.s32 32, %v2536_v37  ;;  %v2538_v24 = vshll.u32 %v10991_v46, %v2536_v37  ;;  %v2541_v30 = vsub.s32 4294967266, %v2536_v37  ;;  %v2419_v1 = vadd.s32 1, %v11047_v25 }
 0x237   : > { %v2692_v45 = vor.u32 %v2691_v13, %v2690_v51  ;;  %v2693_v0 = vshll.u32 %v14870_v29, %v14957_v41  ;;  %v2694_v60 = vshrl.u32 %v14871_v8, %v14956_v36  ;;  %v2696_v50 = vshll.u32 %v14871_v8, %v14957_v41 }
 0x238   : > { %v2539_v32 = vshrl.u32 %v2521_v28, %v2537_v53  ;;  %v2542_v34 = vadd.s32 127, %v2541_v30  ;;  %v2697_v46 = vshrl.u32 %v14837_v6, %v14956_v36  ;;  %vm2252_vm2 = vcmp.eq.s32.totalorder %v11037_v61, 2 }
 0x239   : > { %v2420_v37 = vsel %vm2418_vm9, %v2419_v1, %v11047_v25  ;;  %v2681_v26 = vor.u32 8388608, %v2680_v10  ;;  %v2695_v13 = vor.u32 %v2694_v60, %v2693_v0  ;;  %vm2705_vm6 = vcmp.lt.s32.totalorder %v9938_v12, 1 }
 0x23a   : > { %vm2349_vm10 = vweird.f32 %v14919_v59  ;;  %v2540_v51 = vor.u32 %v2539_v32, %v2538_v24  ;;  %v2543_v38 = vshll.u32 %v2542_v34, 23  ;;  %v2421_v28 = vadd.s32 %v2420_v37, %v2416_v31 }
 0x23b   : > { %v2698_v53 = vor.u32 %v2697_v46, %v2696_v50  ;;  %v2355_v41 = vsel %vm2353_vm11, %v11004_v9, %v2354_v58  ;;  %v2689_v30 = vshrl.u32 %v14865_v63, %v14956_v36  ;;  %vm2707_vm5 = vcmp.lt.s32.totalorder %v9938_v12, 3 }
 0x23c   : > { %v2713_v25 = vsel %vm2705_vm6, %v2692_v45, %v2695_v13  ;;  %vm2467_vm12 = vcmp.lt.s32.totalorder %v14936_v19, 0  ;;  %v2544_v10 = vor.u32 4788187, %v2543_v38  ;;  %v2422_v1 = vadd.s32 536870912, %v2421_v28 }
 0x23d   : > { %vm2706_vm14 = vcmp.lt.s32.totalorder %v9938_v12, 2  ;;  %v2719_v31 = vsel %vm2707_vm5, %v10081_v33, %v10329_v21  ;;  %v2547_v9 = vcvt.s32.f32 %v2540_v51  ;;  %v2715_v58 = vsel %vm2707_vm5, %v2698_v53, %v10322_v17 }
 0x23e   : > { %v2717_v36 = vsel %vm2705_vm6, %v2695_v13, %v2698_v53  ;;  %v2721_v24 = vshll.u32 %v2681_v26, 8  ;;  %v2545_v0 = vand.u32 2147483647, %v2544_v10  ;;  %v11092_v60 = vshrl.u32 %v2422_v1, 30  ;;  %v9024_v34 = vpop.eup %9023 }
 0x23f   : > { %v2710_v38 = vsel %vm2708_vm1, %v2698_v53, 2102212464  ;;  %v2716_v32 = vsel %vm2706_vm14, %v2713_v25, %v2715_v58  ;;  %v2359_v33 = vsel %vm2352_vm3, %v2355_v41, %v2358_v47  ;;  %v2720_v17 = vsel %vm2706_vm14, %v2717_v36, %v2719_v31  ;;  %v9026_v26 = vpop.eup %9025  ;;  %v8375_v25 = vpop.f32.mrf.mxu1 }
 0x240   : > { %v11102_v21 = vmul.u32.u64.low %v2721_v24, %v2716_v32  ;;  %v11103_v50 = vmul.u32.u64.high %v2721_v24, %v2716_v32, %v11102_v21  ;;  %v2253_v46 = vxor.u32 2147483648, %v9024_v34  ;;  %v2548_v37 = vmul.f32 %v2547_v9, %v2545_v0 }
 0x241   : > { %v2424_v51 = vshll.u32 %v11092_v60, 30  ;;  %v2709_v53 = vsel %vm2705_vm6, %v2689_v30, %v2692_v45  ;;  %v2250_v10 = vxor.u32 2147483648, %v9026_v26  ;;  %v2711_v23 = vsel %vm2707_vm5, %v2695_v13, %v2710_v38  ;;  %v3091_v32 = vpop.f32.mrf.mxu1 }
 0x242   : > { %v11111_v47 = vmul.u32.u64.low %v2721_v24, %v2720_v17  ;;  %v11112_v41 = vmul.u32.u64.high %v2721_v24, %v2720_v17, %v11111_v47  ;;  %vm2249_vm1 = vcmp.eq.s32.totalorder %v11037_v61, 0  ;;  %v2254_v1 = vsel %vm2252_vm2, %v2253_v46, %v9026_v26 }
 0x243   : > { %v2549_v31 = vxor.u32 2147483648, %v2548_v37  ;;  %v11117_v9 = vsub.s32 %v2421_v28, %v2424_v51  ;;  %v2360_v58 = vsel %vm2349_vm10, nan, %v2359_v33  ;;  %vm2248_vm7 = vcmp.lt.s32.totalorder %v11037_v61, 2  ;;  %v14958_v61 = vld [vmem:[#allocation55_spill] sm:$0xff] }
 0x244   : > { %v2251_v45 = vsel %vm2249_vm1, %v9024_v34, %v2250_v10  ;;  %v2731_v30 = vadd.s32 1, %v11103_v50  ;;  %vm2245_vm0 = vweird.f32 %v14928_v52  ;;  %v2712_v0 = vsel %vm2706_vm14, %v2709_v53, %v2711_v23 }
 0x245   : > { %v2255_v13 = vsel %vm2248_vm7, %v2251_v45, %v2254_v1  ;;  %v2427_v36 = vsub.s32 0, %v11117_v9  ;;  %v2552_v59 = vsel %vm2467_vm12, %v2551_v35, %v10972_v22  ;;  %vm2730_vm15 = vc.u32 %v11112_v41, %v11102_v21 }
 0x246   : > { %v2256_v38 = vsel %vm2245_vm0, nan, %v2255_v13  ;;  %v2569_v28 = vand.u32 2147483647, %v14958_v61  ;;  %v3097_v52 = vadd.f32 %v8375_v25, %v2360_v58  ;;  %v2550_v33 = vsel %vm2467_vm12, %v2549_v31, %v2548_v37 }
 0x247   : > { %v3092_v34 = vadd.f32 %v3091_v32, %v2256_v38  ;;  %v7792_v12 = vmin.u32 %v2427_v36, %v11117_v9  ;;  %v11140_v17 = vshrl.u32 %v14835_v54, %v10818_v44  ;;  %v11143_v26 = vsub.s32 32, %v11018_v62 }
 0x248   : > { %v2728_v22 = vmul.u32 %v2721_v24, %v2712_v0  ;;  %v2732_v35 = vsel %vm2730_vm15, %v2731_v30, %v11103_v50  ;;  %v11148_v46 = vshll.u32 %v14837_v6, %v11018_v62  ;;  %vm11154_vm11 = vcmp.le.f32.partialorder %v2465_v27, 0.7853982  ;;  %v14961_v27 = vld [vmem:[#allocation74_spill] sm:$0xff] }
 0x249   : > { %v11150_v51 = vpack.c.bf16 %v3097_v52, %v3092_v34  ;;  %v2429_v53 = vclz %v7792_v12  ;;  %v2553_v25 = vsel %vm11154_vm11, %v14936_v19, %v2550_v33  ;;  %v2554_v24 = vsel %vm11154_vm11, 0, %v2552_v59 }
 0x24a   : > { %v2733_v50 = vadd.s32 %v2732_v35, %v2728_v22  ;;  %v2576_v10 = vand.u32 8388607, %v2569_v28  ;;  %v2586_v47 = vshll.u32 %v14865_v63, %v14961_v27  ;;  %v2587_v1 = vshrl.u32 %v14870_v29, %v10052_v14 }
 0x24b   : > { %v7793_v23 = vadd.s32 4294967294, %v2429_v53  ;;  %8451 = vmatprep.mubr.msk.bf16.mxu0 %vm5185_vm4, %v11150_v51  ;;  %v2590_v31 = vshrl.u32 %v14871_v8, %v10052_v14  ;;  %vm2363_vm8 = vcmp.lt.s32.totalorder %v14945_v3, 0  ;;  %v2589_v45 = vshll.u32 %v14870_v29, %v14961_v27 }
 0x24c   : > { %v2734_v58 = vadd.s32 536870912, %v2733_v50  ;;  %v2592_v30 = vshll.u32 %v14871_v8, %v14961_v27  ;;  %v2593_v13 = vshrl.u32 %v14837_v6, %v10052_v14  ;;  %v11182_v36 = vor.u32 %v11015_v4, %v10935_v49 }
 0x24d   : > { %v2558_v0 = vadd.s32 3, %v2554_v24  ;;  %vm7794_vm3 = vcmp.lt.s32.totalorder %v7793_v23, 0  ;;  %v2588_v38 = vor.u32 %v2587_v1, %v2586_v47  ;;  %v2591_v52 = vor.u32 %v2590_v31, %v2589_v45 }
 0x24e   : > { %v2432_v32 = vsel %vm7794_vm3, 0, %v7793_v23  ;;  %v11184_v59 = vshrl.u32 %v2734_v58, 30  ;;  %v2594_v34 = vor.u32 %v2593_v13, %v2592_v30  ;;  %9027 = vcosq.f32 %v2553_v25 }
 0x24f   : > { %v2417_v33 = vadd.s32 %v11046_v16, %v11026_v43  ;;  %v2433_v12 = vsub.s32 32, %v2432_v32  ;;  %v2437_v22 = vsub.s32 4294967266, %v2432_v32  ;;  %9029 = vsinq.f32 %v2553_v25 }
 0x250   : > { %v2447_v35 = vsub.s32 4, %v11092_v60  ;;  %v2736_v49 = vshll.u32 %v11184_v59, 30  ;;  %v2577_v4 = vor.u32 8388608, %v2576_v10  ;;  %v2434_v37 = vshll.u32 %v11117_v9, %v2432_v32 }
 0x251   : > { %v2435_v53 = vshrl.u32 %v2417_v33, %v2433_v12  ;;  %v2438_v24 = vadd.s32 127, %v2437_v22  ;;  %vm2601_vm9 = vcmp.lt.s32.totalorder %v10037_v57, 1  ;;  %vm2916_vm2 = vcmp.lt.s32.totalorder %v10804_v11, 4 }
 0x252   : > { %v11193_v23 = vsub.s32 %v2733_v50, %v2736_v49  ;;  %vm2603_vm6 = vcmp.lt.s32.totalorder %v10037_v57, 3  ;;  %v2606_v43 = vsel %vm2604_vm13, %v2594_v34, 2102212464  ;;  %v2609_v16 = vsel %vm2601_vm9, %v2588_v38, %v2591_v52 }
 0x253   : > { %v2436_v25 = vor.u32 %v2435_v53, %v2434_v37  ;;  %v2439_v10 = vshll.u32 %v2438_v24, 23  ;;  %v2611_v9 = vsel %vm2603_vm6, %v2594_v34, %v10585_v18  ;;  %v2613_v27 = vsel %vm2601_vm9, %v2591_v52, %v2594_v34 }
 0x254   : > { %v2739_v50 = vsub.s32 0, %v11193_v23  ;;  %v2585_v47 = vshrl.u32 %v14865_v63, %v10052_v14  ;;  %vm2602_vm10 = vcmp.lt.s32.totalorder %v10037_v57, 2  ;;  %v2615_v1 = vsel %vm2603_vm6, %v10392_v2, %v10801_v39 }
 0x255   : > { %v2440_v31 = vor.u32 4788187, %v2439_v10  ;;  %v2448_v18 = vsel %vm2363_vm8, %v2447_v35, %v11092_v60  ;;  %v2616_v58 = vsel %vm2602_vm10, %v2613_v27, %v2615_v1  ;;  %v2617_v45 = vshll.u32 %v2577_v4, 8  ;;  %v14965_v10 = vld [vmem:[#allocation66_spill] sm:$0xff] }
 0x256   : > { %v7804_v30 = vmin.u32 %v2739_v50, %v11193_v23  ;;  %v2605_v14 = vsel %vm2601_vm9, %v2585_v47, %v2588_v38  ;;  %v2607_v13 = vsel %vm2603_vm6, %v2591_v52, %v2606_v43  ;;  %v2612_v2 = vsel %vm2602_vm10, %v2609_v16, %v2611_v9 }
 0x257   : > { %v2441_v39 = vand.u32 2147483647, %v2440_v31  ;;  %v2443_v32 = vcvt.s32.f32 %v2436_v25  ;;  %v11225_v34 = vmul.u32.u64.low %v2617_v45, %v2616_v58  ;;  %v11226_v33 = vmul.u32.u64.high %v2617_v45, %v2616_v58, %v11225_v34 }
 0x258   : > { %v2912_v60 = vor.u32 %v11140_v17, %v10989_v56  ;;  %v11232_v12 = vshll.u32 %v14852_v15, %v11018_v62  ;;  %v14962_v38 = vand.u32 2147483647, %v14945_v3  ;;  %v2741_v52 = vclz %v7804_v30 }
 0x259   : > { %v11242_v35 = vshrl.u32 %v14852_v15, %v11143_v26  ;;  %v11246_v49 = vshrl.u32 %v14835_v54, %v11143_v26  ;;  %v2444_v56 = vmul.f32 %v2443_v32, %v2441_v39  ;;  %v2608_v37 = vsel %vm2602_vm10, %v2605_v14, %v2607_v13 }
 0x25a   : > { %vm11236_vm13 = vcmp.le.f32.partialorder %v14962_v38, 0.7853982  ;;  %v7805_v4 = vadd.s32 4294967294, %v2741_v52  ;;  %v11252_v53 = vmul.u32.u64.low %v2617_v45, %v2612_v2  ;;  %v11253_v24 = vmul.u32.u64.high %v2617_v45, %v2612_v2, %v11252_v53 }
 0x25b   : > { %v2450_v17 = vsel %vm11236_vm13, 0, %v2448_v18  ;;  %v2922_v43 = vsel %vm2916_vm2, %v11182_v36, 920167782  ;;  %v11259_v16 = vand.u32 3, %v2558_v0  ;;  %v2445_v25 = vxor.u32 2147483648, %v2444_v56  ;;  %v11262_v27 = vpop.eup %9027 }
 0x25c   : > { %v2881_v9 = vand.u32 2147483647, %v14965_v10  ;;  %v2926_v50 = vsel %vm2916_vm2, %v2912_v60, 1326507024  ;;  %v2454_v57 = vadd.s32 3, %v2450_v17  ;;  %v2729_v47 = vadd.s32 %v11102_v21, %v11112_v41  ;;  %v9030_v1 = vpop.eup %9029 }
 0x25d   : > { %vm7806_vm5 = vcmp.lt.s32.totalorder %v7805_v4, 0  ;;  %v2446_v31 = vsel %vm2363_vm8, %v2445_v25, %v2444_v56  ;;  %v2624_v0 = vmul.u32 %v2617_v45, %v2608_v37  ;;  %vm2626_vm12 = vc.u32 %v11226_v33, %v11252_v53 }
 0x25e   : > { %v2744_v18 = vsel %vm7806_vm5, 0, %v7805_v4  ;;  %v2888_v58 = vand.u32 8388607, %v2881_v9  ;;  %v2449_v30 = vsel %vm11236_vm13, %v14945_v3, %v2446_v31  ;;  %vm2564_vm14 = vcmp.eq.s32.totalorder %v11259_v16, 2 }
 0x25f   : > { %v2745_v14 = vsub.s32 32, %v2744_v18  ;;  %v2749_v13 = vsub.s32 4294967266, %v2744_v18  ;;  %9031 = vcosq.f32 %v2449_v30  ;;  %v2627_v21 = vadd.s32 1, %v11253_v24 }
 0x260   : > { %v2898_v41 = vshll.u32 %v14865_v63, %v10706_v48  ;;  %v2899_v45 = vshrl.u32 %v14870_v29, %v10818_v44  ;;  %9033 = vsinq.f32 %v2449_v30  ;;  %v2889_v32 = vor.u32 8388608, %v2888_v58 }
 0x261   : > { %v2747_v2 = vshrl.u32 %v2729_v47, %v2745_v14  ;;  %v2750_v39 = vadd.s32 127, %v2749_v13  ;;  %vm2561_vm1 = vcmp.eq.s32.totalorder %v11259_v16, 0  ;;  %v2628_v34 = vsel %vm2626_vm12, %v2627_v21, %v11253_v24 }
 0x262   : > { %v2900_v60 = vor.u32 %v2899_v45, %v2898_v41  ;;  %v2901_v38 = vshll.u32 %v14870_v29, %v10706_v48  ;;  %v2902_v22 = vshrl.u32 %v14871_v8, %v10818_v44  ;;  %v2629_v56 = vadd.s32 %v2628_v34, %v2624_v0 }
 0x263   : > { %v2751_v52 = vshll.u32 %v2750_v39, 23  ;;  %v2904_v17 = vshll.u32 %v14871_v8, %v10706_v48  ;;  %v2905_v4 = vshrl.u32 %v14837_v6, %v10818_v44  ;;  %v2562_v37 = vxor.u32 2147483648, %v9030_v1 }
 0x264   : > { %v2565_v25 = vxor.u32 2147483648, %v11262_v27  ;;  %v2746_v24 = vshll.u32 %v11193_v23, %v2744_v18  ;;  %v2903_v47 = vor.u32 %v2902_v22, %v2901_v38  ;;  %v2630_v58 = vadd.s32 536870912, %v2629_v56 }
 0x265   : > { %v2752_v31 = vor.u32 4788187, %v2751_v52  ;;  %v2906_v30 = vor.u32 %v2905_v4, %v2904_v17  ;;  %vm2913_vm7 = vcmp.lt.s32.totalorder %v10804_v11, 1  ;;  %vm2914_vm0 = vcmp.lt.s32.totalorder %v10804_v11, 2 }
 0x266   : > { %v2748_v14 = vor.u32 %v2747_v2, %v2746_v24  ;;  %vm2915_vm15 = vcmp.lt.s32.totalorder %v10804_v11, 3  ;;  %v2921_v48 = vsel %vm2913_vm7, %v2900_v60, %v2903_v47  ;;  %v11300_v0 = vshrl.u32 %v2630_v58, 30  ;;  %v8378_v58 = vpop.f32.mrf.mxu1 }
 0x267   : > { %v2923_v13 = vsel %vm2915_vm15, %v2906_v30, %v2922_v43  ;;  %v2927_v23 = vsel %vm2915_vm15, %v11182_v36, %v2926_v50  ;;  %v2929_v18 = vshll.u32 %v2889_v32, 8  ;;  %v2753_v21 = vand.u32 2147483647, %v2752_v31 }
 0x268   : > { %v2918_v41 = vsel %vm2916_vm2, %v2906_v30, 2102212464  ;;  %v2924_v45 = vsel %vm2914_vm0, %v2921_v48, %v2923_v13  ;;  %v2925_v2 = vsel %vm2913_vm7, %v2903_v47, %v2906_v30  ;;  %vm2812_vm11 = vcmp.lt.s32.totalorder %v10994_v42, 4 }
 0x269   : > { %v2566_v43 = vsel %vm2564_vm14, %v2565_v25, %v9030_v1  ;;  %v2455_v39 = vand.u32 3, %v2454_v57  ;;  %v2632_v34 = vshll.u32 %v11300_v0, 30  ;;  %v2897_v36 = vshrl.u32 %v14865_v63, %v10818_v44 }
 0x26a   : > { %v2755_v50 = vcvt.s32.f32 %v2748_v14  ;;  %v2928_v32 = vsel %vm2914_vm0, %v2925_v2, %v2927_v23  ;;  %v11321_v38 = vmul.u32.u64.low %v2929_v18, %v2924_v45  ;;  %v11322_v22 = vmul.u32.u64.high %v2929_v18, %v2924_v45, %v11321_v38  ;;  %v3101_v2 = vpop.f32.mrf.mxu1 }
 0x26b   : > { %vm2675_vm8 = vcmp.lt.s32.totalorder %v14955_v7, 0  ;;  %v2563_v1 = vsel %vm2561_vm1, %v11262_v27, %v2562_v37  ;;  %v11329_v57 = vsub.s32 %v2629_v56, %v2632_v34  ;;  %v2917_v52 = vsel %vm2913_vm7, %v2897_v36, %v2900_v60 }
 0x26c   : > { %v2919_v44 = vsel %vm2915_vm15, %v2903_v47, %v2918_v41  ;;  %v11337_v17 = vor.u32 %v11242_v35, %v11148_v46  ;;  %v2756_v4 = vmul.f32 %v2755_v50, %v2753_v21  ;;  %v9032_v31 = vpop.eup %9031  ;;  %v2808_v27 = vor.u32 %v11246_v49, %v11232_v12 }
 0x26d   : > { %v11339_v25 = vmul.u32.u64.low %v2929_v18, %v2928_v32  ;;  %v11340_v24 = vmul.u32.u64.high %v2929_v18, %v2928_v32, %v11339_v25  ;;  %vm2557_vm3 = vweird.f32 %v14936_v19  ;;  %vm2560_vm9 = vcmp.lt.s32.totalorder %v11259_v16, 2  ;;  %v9034_v56 = vpop.eup %9033  ;;  %v14969_v32 = vld [vmem:[#allocation67_spill] sm:$0xff] }
 0x26e   : > { %v2635_v60 = vsub.s32 0, %v11329_v57  ;;  %v2567_v37 = vsel %vm2560_vm9, %v2563_v1, %v2566_v43  ;;  %v2461_v47 = vxor.u32 2147483648, %v9032_v31  ;;  %v2920_v46 = vsel %vm2914_vm0, %v2917_v52, %v2919_v44 }
 0x26f   : > { %v2939_v35 = vadd.s32 1, %v11322_v22  ;;  %vm2456_vm2 = vcmp.lt.s32.totalorder %v2455_v39, 2  ;;  %v2458_v30 = vxor.u32 2147483648, %v9034_v56  ;;  %vm2460_vm6 = vcmp.eq.s32.totalorder %v2455_v39, 2 }
 0x270   : > { %v7800_v12 = vmin.u32 %v2635_v60, %v11329_v57  ;;  %vm2457_vm10 = vcmp.eq.s32.totalorder %v2455_v39, 0  ;;  %v2462_v49 = vsel %vm2460_vm6, %v2461_v47, %v9034_v56  ;;  %v2757_v14 = vxor.u32 2147483648, %v2756_v4 }
 0x271   : > { %vm2938_vm13 = vc.u32 %v11340_v24, %v11321_v38  ;;  %v2568_v16 = vsel %vm2557_vm3, nan, %v2567_v37  ;;  %v2459_v48 = vsel %vm2457_vm10, %v9032_v31, %v2458_v30  ;;  %v2936_v13 = vmul.u32 %v2929_v18, %v2920_v46 }
 0x272   : > { %v2637_v11 = vclz %v7800_v12  ;;  %v2818_v23 = vsel %vm2812_vm11, %v11337_v17, 920167782  ;;  %vm2453_vm5 = vweird.f32 %v14945_v3  ;;  %v2463_v21 = vsel %vm2456_vm2, %v2459_v48, %v2462_v49 }
 0x273   : > { %v2940_v41 = vsel %vm2938_vm13, %v2939_v35, %v11322_v22  ;;  %v2464_v45 = vsel %vm2453_vm5, nan, %v2463_v21  ;;  %v14966_v43 = vand.u32 2147483647, %v14955_v7  ;;  %v3107_v18 = vadd.f32 %v8378_v58, %v2568_v16 }
 0x274   : > { %v7801_v19 = vadd.s32 4294967294, %v2637_v11  ;;  %v2941_v34 = vadd.s32 %v2940_v41, %v2936_v13  ;;  %v3102_v36 = vadd.f32 %v3101_v2, %v2464_v45  ;;  %v2758_v50 = vsel %vm2675_vm8, %v2757_v14, %v2756_v4 }
 0x275   : > { %vm11362_vm12 = vcmp.le.f32.partialorder %v14966_v43, 0.7853982  ;;  %v2777_v3 = vand.u32 2147483647, %v14969_v32  ;;  %v2625_v22 = vadd.s32 %v11252_v53, %v11226_v33  ;;  %v2795_v52 = vshrl.u32 %v14870_v29, %v11143_v26 }
 0x276   : > { %vm7802_vm14 = vcmp.lt.s32.totalorder %v7801_v19, 0  ;;  %v2942_v1 = vadd.s32 536870912, %v2941_v34  ;;  %v11373_v44 = vpack.c.bf16 %v3107_v18, %v3102_v36  ;;  %v2798_v31 = vshrl.u32 %v14871_v8, %v11143_v26 }
 0x277   : > { %v2640_v25 = vsel %vm7802_vm14, 0, %v7801_v19  ;;  %v2801_v60 = vshrl.u32 %v14837_v6, %v11143_v26  ;;  %v2761_v4 = vsel %vm11362_vm12, %v14955_v7, %v2758_v50  ;;  %v2784_v37 = vand.u32 8388607, %v2777_v3 }
 0x278   : > { %v2641_v56 = vsub.s32 32, %v2640_v25  ;;  %v2645_v33 = vsub.s32 4294967266, %v2640_v25  ;;  %v11382_v53 = vshrl.u32 %v2942_v1, 30  ;;  %8452 = vmatmul.mubr.msk.bf16.gmra.mxu0 %vm5185_vm4, %v11373_v44  ;;  %v2794_v47 = vshll.u32 %v14865_v63, %v11018_v62 }
 0x279   : > { %v2797_v46 = vshll.u32 %v14870_v29, %v11018_v62  ;;  %v2800_v35 = vshll.u32 %v14871_v8, %v11018_v62  ;;  %v2642_v58 = vshll.u32 %v11329_v57, %v2640_v25  ;;  %v2822_v14 = vsel %vm2812_vm11, %v2808_v27, 1326507024 }
 0x27a   : > { %v2643_v30 = vshrl.u32 %v2625_v22, %v2641_v56  ;;  %v2646_v12 = vadd.s32 127, %v2645_v33  ;;  %v2944_v49 = vshll.u32 %v11382_v53, 30  ;;  %v2796_v16 = vor.u32 %v2795_v52, %v2794_v47 }
 0x27b   : > { %v2799_v48 = vor.u32 %v2798_v31, %v2797_v46  ;;  %v2802_v11 = vor.u32 %v2801_v60, %v2800_v35  ;;  %9035 = vcosq.f32 %v2761_v4  ;;  %v2759_v45 = vsub.s32 4, %v11184_v59 }
 0x27c   : > { %v2644_v13 = vor.u32 %v2643_v30, %v2642_v58  ;;  %v2647_v21 = vshll.u32 %v2646_v12, 23  ;;  %v11398_v41 = vsub.s32 %v2941_v34, %v2944_v49  ;;  %9037 = vsinq.f32 %v2761_v4 }
 0x27d   : > { %v2785_v62 = vor.u32 8388608, %v2784_v37  ;;  %vm2809_vm1 = vcmp.lt.s32.totalorder %v10994_v42, 1  ;;  %vm2811_vm7 = vcmp.lt.s32.totalorder %v10994_v42, 3  ;;  %v2793_v22 = vshrl.u32 %v14865_v63, %v11143_v26 }
 0x27e   : > { %v2648_v57 = vor.u32 4788187, %v2647_v21  ;;  %v2947_v2 = vsub.s32 0, %v11398_v41  ;;  %v2817_v27 = vsel %vm2809_vm1, %v2796_v16, %v2799_v48  ;;  %v2819_v43 = vsel %vm2811_vm7, %v2802_v11, %v2818_v23 }
 0x27f   : > { %v2821_v19 = vsel %vm2809_vm1, %v2799_v48, %v2802_v11  ;;  %v2823_v34 = vsel %vm2811_vm7, %v11337_v17, %v2822_v14  ;;  %v2651_v36 = vcvt.s32.f32 %v2644_v13  ;;  %vm2810_vm0 = vcmp.lt.s32.totalorder %v10994_v42, 2 }
 0x280   : > { %v2649_v18 = vand.u32 2147483647, %v2648_v57  ;;  %v7812_v50 = vmin.u32 %v2947_v2, %v11398_v41  ;;  %v2814_v1 = vsel %vm2812_vm11, %v2802_v11, 2102212464  ;;  %v2820_v25 = vsel %vm2810_vm0, %v2817_v27, %v2819_v43 }
 0x281   : > { %v2824_v17 = vsel %vm2810_vm0, %v2821_v19, %v2823_v34  ;;  %vm2571_vm15 = vcmp.lt.s32.totalorder %v14958_v61, 0  ;;  %v2760_v31 = vsel %vm2675_vm8, %v2759_v45, %v11184_v59  ;;  %v2655_v26 = vsub.s32 4, %v11300_v0 }
 0x282   : > { %v2652_v23 = vmul.f32 %v2651_v36, %v2649_v18  ;;  %v2949_v52 = vclz %v7812_v50  ;;  %v2825_v60 = vshll.u32 %v2785_v62, 8  ;;  %v2813_v33 = vsel %vm2809_vm1, %v2793_v22, %v2796_v16 }
 0x283   : > { %v2815_v37 = vsel %vm2811_vm7, %v2799_v48, %v2814_v1  ;;  %vm11441_vm11 = vcmp.le.f32.partialorder %v2569_v28, 0.7853982  ;;  %v2762_v12 = vsel %vm11362_vm12, 0, %v2760_v31  ;;  %v2656_v11 = vsel %vm2571_vm15, %v2655_v26, %v11300_v0 }
 0x284   : > { %v2653_v4 = vxor.u32 2147483648, %v2652_v23  ;;  %v7813_v56 = vadd.s32 4294967294, %v2949_v52  ;;  %v11432_v47 = vmul.u32.u64.low %v2825_v60, %v2824_v17  ;;  %v11433_v46 = vmul.u32.u64.high %v2825_v60, %v2824_v17, %v11432_v47 }
 0x285   : > { %v11435_v35 = vmul.u32.u64.low %v2825_v60, %v2820_v25  ;;  %v11436_v58 = vmul.u32.u64.high %v2825_v60, %v2820_v25, %v11435_v35  ;;  %v2816_v16 = vsel %vm2810_vm0, %v2813_v33, %v2815_v37  ;;  %v2766_v21 = vadd.s32 3, %v2762_v12 }
 0x286   : > { %v2654_v30 = vsel %vm2571_vm15, %v2653_v4, %v2652_v23  ;;  %vm7814_vm8 = vcmp.lt.s32.totalorder %v7813_v56, 0  ;;  %v2832_v57 = vmul.u32 %v2825_v60, %v2816_v16  ;;  %v2658_v2 = vsel %vm11441_vm11, 0, %v2656_v11 }
 0x287   : > { %v2657_v49 = vsel %vm11441_vm11, %v14958_v61, %v2654_v30  ;;  %v2952_v14 = vsel %vm7814_vm8, 0, %v7813_v56  ;;  %vm2834_vm3 = vc.u32 %v11433_v46, %v11435_v35  ;;  %v2835_v39 = vadd.s32 1, %v11436_v58 }
 0x288   : > { %9039 = vcosq.f32 %v2657_v49  ;;  %v2957_v28 = vsub.s32 4294967266, %v2952_v14  ;;  %v9036_v48 = vpop.eup %9035  ;;  %v2953_v45 = vsub.s32 32, %v2952_v14  ;;  %v2937_v27 = vadd.s32 %v11321_v38, %v11340_v24 }
 0x289   : > { %9041 = vsinq.f32 %v2657_v49  ;;  %v9038_v13 = vpop.eup %9037  ;;  %v2836_v42 = vsel %vm2834_vm3, %v2835_v39, %v11436_v58  ;;  %v2767_v19 = vand.u32 3, %v2766_v21  ;;  %v2773_v50 = vxor.u32 2147483648, %v9036_v48  ;;  %v8381_v58 = vpop.f32.mrf.mxu1 }
 0x28a   : > { %v2958_v62 = vadd.s32 127, %v2957_v28  ;;  %v2837_v43 = vadd.s32 %v2836_v42, %v2832_v57  ;;  %v2955_v34 = vshrl.u32 %v2937_v27, %v2953_v45  ;;  %v2770_v36 = vxor.u32 2147483648, %v9038_v13 }
 0x28b   : > { %v2662_v22 = vadd.s32 3, %v2658_v2  ;;  %v2954_v1 = vshll.u32 %v11398_v41, %v2952_v14  ;;  %vm2769_vm9 = vcmp.eq.s32.totalorder %v2767_v19, 0  ;;  %vm2772_vm2 = vcmp.eq.s32.totalorder %v2767_v19, 2  ;;  %v3111_v39 = vpop.f32.mrf.mxu1 }
 0x28c   : > { %v2959_v0 = vshll.u32 %v2958_v62, 23  ;;  %v2838_v18 = vadd.s32 536870912, %v2837_v43  ;;  %v2771_v31 = vsel %vm2769_vm9, %v9036_v48, %v2770_v36  ;;  %v2774_v38 = vsel %vm2772_vm2, %v2773_v50, %v9038_v13 }
 0x28d   : > { %v2956_v25 = vor.u32 %v2955_v34, %v2954_v1  ;;  %v2663_v24 = vand.u32 3, %v2662_v22  ;;  %vm2768_vm6 = vcmp.lt.s32.totalorder %v2767_v19, 2  ;;  %vm2765_vm10 = vweird.f32 %v14955_v7 }
 0x28e   : > { %v2960_v23 = vor.u32 4788187, %v2959_v0  ;;  %v11466_v52 = vshrl.u32 %v2838_v18, 30  ;;  %v2775_v33 = vsel %vm2768_vm6, %v2771_v31, %v2774_v38  ;;  %vm2661_vm14 = vweird.f32 %v14958_v61 }
 0x28f   : > { %v2963_v47 = vcvt.s32.f32 %v2956_v25  ;;  %vm2668_vm13 = vcmp.eq.s32.totalorder %v2663_v24, 2  ;;  %vm2665_vm5 = vcmp.eq.s32.totalorder %v2663_v24, 0  ;;  %v2776_v14 = vsel %vm2765_vm10, nan, %v2775_v33 }
 0x290   : > { %v2840_v17 = vshll.u32 %v11466_v52, 30  ;;  %v2961_v26 = vand.u32 2147483647, %v2960_v23  ;;  %vm2664_vm12 = vcmp.lt.s32.totalorder %v2663_v24, 2  ;;  %v3117_v13 = vadd.f32 %v8381_v58, %v2776_v14 }
 0x291   : > { %vm2883_vm7 = vcmp.lt.s32.totalorder %v14965_v10, 0  ;;  %v2833_v61 = vadd.s32 %v11435_v35, %v11433_v46  ;;  %vm11482_vm0 = vcmp.le.f32.partialorder %v2881_v9, 0.7853982  ;;  %v2967_v50 = vsub.s32 4, %v11382_v53 }
 0x292   : > { %v2841_v60 = vsub.s32 %v2837_v43, %v2840_v17  ;;  %v2964_v12 = vmul.f32 %v2963_v47, %v2961_v26  ;;  %vm2779_vm15 = vcmp.lt.s32.totalorder %v14969_v32, 0  ;;  %v2863_v17 = vsub.s32 4, %v11466_v52 }
 0x293   : > { %v2968_v23 = vsel %vm2883_vm7, %v2967_v50, %v11382_v53  ;;  %vm2778_vm11 = vcmp.le.f32.partialorder %v2777_v3, 0.7853982  ;;  %vm2973_vm6 = vweird.f32 %v14965_v10 }
 0x294   : > { %v2843_v41 = vsub.s32 0, %v2841_v60  ;;  %v2965_v45 = vxor.u32 2147483648, %v2964_v12  ;;  %v2970_v38 = vsel %vm11482_vm0, 0, %v2968_v23  ;;  %v2864_v26 = vsel %vm2779_vm15, %v2863_v17, %v11466_v52  ;;  %v8384_v52 = vpop.f32.mrf.mxu1 }
 0x295   : > { %v9040_v4 = vpop.eup %9039 }
 0x296   : > { %v9042_v56 = vpop.eup %9041  ;;  %v2669_v37 = vxor.u32 2147483648, %v9040_v4  ;;  %v7808_v49 = vmin.u32 %v2843_v41, %v2841_v60  ;;  %v2966_v42 = vsel %vm2883_vm7, %v2965_v45, %v2964_v12 }
 0x297   : > { %v2666_v59 = vxor.u32 2147483648, %v9042_v56  ;;  %v2969_v18 = vsel %vm11482_vm0, %v14965_v10, %v2966_v42  ;;  %v8940_v10 = vld [vmem:[%s9221_s19 + $0x18] sm:$0xff]   ;;  %v8941_v42 = vld [vmem:[%s9221_s19 + $0x10] sm:$0xff]  }
 0x298   : > { %v2670_v30 = vsel %vm2668_vm13, %v2669_v37, %v9042_v56  ;;  %v2845_v48 = vclz %v7808_v49  ;;  %9043 = vcosq.f32 %v2969_v18  ;;  %v2866_v56 = vsel %vm2778_vm11, 0, %v2864_v26  ;;  %8459 = vmatprep.subr.bf16.mxu1 %v8940_v10 }
 0x299   : > { %v2667_v16 = vsel %vm2665_vm5, %v9040_v4, %v2666_v59  ;;  %9045 = vsinq.f32 %v2969_v18  ;;  %v2870_v41 = vadd.s32 3, %v2866_v56  ;;  %vm2869_vm5 = vweird.f32 %v14969_v32  ;;  %8460 = vmatpush3.bf16.msra.mxu1 %v8940_v10 }
 0x29a   : > { %v2671_v28 = vsel %vm2664_vm12, %v2667_v16, %v2670_v30  ;;  %v7809_v7 = vadd.s32 4294967294, %v2845_v48  ;;  %8461 = vmatprep.subr.bf16.mxu1 %v8941_v42  ;;  %vm5370_vm12 = vcmask 523264  }
 0x29b   : > { %v2672_v11 = vsel %vm2661_vm14, nan, %v2671_v28  ;;  %v2871_v59 = vand.u32 3, %v2870_v41 }
 0x29c   : > { %v3112_v21 = vadd.f32 %v3111_v39, %v2672_v11  ;;  %vm7810_vm1 = vcmp.lt.s32.totalorder %v7809_v7, 0 }
 0x29d   : > { %v2848_v57 = vsel %vm7810_vm1, 0, %v7809_v7  ;;  %vm2876_vm2 = vcmp.eq.s32.totalorder %v2871_v59, 2  ;;  %vm2873_vm10 = vcmp.eq.s32.totalorder %v2871_v59, 0  ;;  %vm2872_vm13 = vcmp.lt.s32.totalorder %v2871_v59, 2  ;;  %8462 = vmatpush3.bf16.msra.mxu1 %v8941_v42  ;;  %v7928_v59 = vld [vmem:[%s9216_s14] ss:$0 sm:$0xff] }
 0x29e   : > { %v11471_v62 = vpack.c.bf16 %v3117_v13, %v3112_v21  ;;  %v2849_v2 = vsub.s32 32, %v2848_v57  ;;  %v2853_v27 = vsub.s32 4294967266, %v2848_v57  ;;  %v2850_v43 = vshll.u32 %v2841_v60, %v2848_v57  ;;  %v3121_v21 = vpop.f32.mrf.mxu1 }
 0x29f   : > { %v2974_v60 = vadd.s32 3, %v2970_v38 }
 0x2a0   : > { %8455 = vmatprep.mubr.msk.bf16.mxu0 %vm5185_vm4, %v11471_v62  ;;  %v2851_v19 = vshrl.u32 %v2833_v61, %v2849_v2  ;;  %v2854_v34 = vadd.s32 127, %v2853_v27  ;;  %v11509_v61 = vpop.f32.mrf.mxu0  ;;  %v8942_v2 = vld [vmem:[%s9221_s19 + $0x8] sm:$0xff]  }
 0x2a1   : > { %v2975_v33 = vand.u32 3, %v2974_v60  ;;  %8463 = vmatprep.subr.bf16.mxu1 %v8942_v2 }
 0x2a2   : > { %v2852_v36 = vor.u32 %v2851_v19, %v2850_v43  ;;  %v2855_v46 = vshll.u32 %v2854_v34, 23  ;;  %8464 = vmatpush3.bf16.msra.mxu1 %v8942_v2 }
 0x2a3   : > { %vm2977_vm8 = vcmp.eq.s32.totalorder %v2975_v33, 0  ;;  %vm2980_vm3 = vcmp.eq.s32.totalorder %v2975_v33, 2  ;;  %vm2976_vm9 = vcmp.lt.s32.totalorder %v2975_v33, 2 }
 0x2a4   : > { %v2856_v35 = vor.u32 4788187, %v2855_v46  ;;  %v2859_v1 = vcvt.s32.f32 %v2852_v36 }
 0x2a5   : > { %v9044_v53 = vpop.eup %9043 }
 0x2a6   : > { %v2857_v22 = vand.u32 2147483647, %v2856_v35  ;;  %v9046_v4 = vpop.eup %9045  ;;  %v2981_v47 = vxor.u32 2147483648, %v9044_v53 }
 0x2a7   : > { %v2978_v37 = vxor.u32 2147483648, %v9046_v4 }
 0x2a8   : > { %v2860_v9 = vmul.f32 %v2859_v1, %v2857_v22  ;;  %v2982_v58 = vsel %vm2980_vm3, %v2981_v47, %v9046_v4  ;;  %v8943_v22 = vld [vmem:[%s9221_s19] sm:$0xff]   ;;  %v8944_v1 = vld [vmem:[%s9231_s30 + $0x18] sm:$0xff]  }
 0x2a9   : > { %v2979_v3 = vsel %vm2977_vm8, %v9044_v53, %v2978_v37  ;;  %8465 = vmatprep.subr.bf16.mxu1 %v8943_v22  ;;  %8483 = vmatprep.subr.bf16.mxu0 %v8944_v1 }
 0x2aa   : > { %v2861_v25 = vxor.u32 2147483648, %v2860_v9  ;;  %v2983_v49 = vsel %vm2976_vm9, %v2979_v3, %v2982_v58  ;;  %8466 = vmatpush3.bf16.msra.mxu1 %v8943_v22  ;;  %8484 = vmatpush3.bf16.msra.mxu0 %v8944_v1 }
 0x2ab   : > { %v2984_v48 = vsel %vm2973_vm6, nan, %v2983_v49 }
 0x2ac   : > { %v2862_v31 = vsel %vm2779_vm15, %v2861_v25, %v2860_v9  ;;  %v3127_v45 = vadd.f32 %v8384_v52, %v2984_v48  ;;  %v8945_v9 = vld [vmem:[%s9231_s30 + $0x10] sm:$0xff]   ;;  %v8946_v25 = vld [vmem:[%s9231_s30 + $0x8] sm:$0xff]  }
 0x2ad   : > { %v2865_v24 = vsel %vm2778_vm11, %v14969_v32, %v2862_v31  ;;  %v11511_v32 = vpop.f32.mrf.mxu0  ;;  %8485 = vmatprep.subr.bf16.mxu0 %v8945_v9 }
 0x2ae   : > { %9047 = vcosq.f32 %v2865_v24  ;;  %8486 = vmatpush3.bf16.msra.mxu0 %v8945_v9 }
 0x2af   : > { %9049 = vsinq.f32 %v2865_v24  ;;  %v11514_v27 = vpop.f32.mrf.mxu0  ;;  %8487 = vmatprep.subr.bf16.mxu0 %v8946_v25 }
 0x2b1   : > { %v11516_v0 = vpop.f32.mrf.mxu0 }
 0x2b2   : > { %8488 = vmatpush3.bf16.msra.mxu0 %v8946_v25 }
 0x2b3   : > { %v11518_v43 = vpop.f32.mrf.mxu0 }
 0x2b5   : > { %v11520_v19 = vpop.f32.mrf.mxu0 }
 0x2b7   : > { %v11522_v34 = vpop.f32.mrf.mxu0 }
 0x2b9   : > { %v11524_v18 = vpop.f32.mrf.mxu0 }
 0x2bb   : > { %v9048_v30 = vpop.eup %9047  ;;  %v11526_v36 = vpop.f32.mrf.mxu0 }
 0x2bc   : > { %v9050_v12 = vpop.eup %9049  ;;  %v2877_v14 = vxor.u32 2147483648, %v9048_v30 }
 0x2bd   : > { %v2874_v16 = vxor.u32 2147483648, %v9050_v12  ;;  %v11528_v46 = vpop.f32.mrf.mxu0 }
 0x2be   : > { %v2878_v28 = vsel %vm2876_vm2, %v2877_v14, %v9050_v12 }
 0x2bf   : > { %v2875_v11 = vsel %vm2873_vm10, %v9048_v30, %v2874_v16  ;;  %v11530_v35 = vpop.f32.mrf.mxu0 }
 0x2c0   : > { %v2879_v39 = vsel %vm2872_vm13, %v2875_v11, %v2878_v28 }
 0x2c1   : > { %v2880_v13 = vsel %vm2869_vm5, nan, %v2879_v39  ;;  %v11532_v50 = vpop.f32.mrf.mxu0 }
 0x2c2   : > { %v3122_v7 = vadd.f32 %v3121_v21, %v2880_v13 }
 0x2c3   : > { %v11537_v23 = vpop.f32.mrf.mxu0 }
 0x2c4   : > { %v11503_v57 = vpack.c.bf16 %v3127_v45, %v3122_v7 }
 0x2c5   : > { %v11540_v17 = vpop.f32.mrf.mxu0 }
 0x2c6   : > { %8456 = vmatmul.mubr.msk.bf16.gmra.mxu0 %vm5185_vm4, %v11503_v57 }
 0x2c7   : > { %v11542_v31 = vpop.f32.mrf.mxu0 }
 0x2c9   : > { %v11544_v38 = vpop.f32.mrf.mxu0 }
 0x2ca   : > { %14974 = vst [vmem:[#allocation19_spill] sm:$0xff] %v11544_v38 }
 0x2cb   : > { %v8445_v24 = vpop.f32.mrf.mxu0 }
 0x2cc   : > { %v5253_v14 = vadd.f32 %v8445_v24, %v7928_v59 }
 0x2cd   : > { %v5244_v26 = vpop.f32.mrf.mxu0 }
 0x2ce   : > { %v5245_v30 = vadd.f32 %v7928_v59, %v5244_v26  ;;  %v5309_v11 = vmax.f32 %v5253_v14, 0.0 }
 0x2cf   : > { %v8446_v60 = vpop.f32.mrf.mxu0 }
 0x2d0   : > { %v5256_v12 = vadd.f32 %v8446_v60, %v7928_v59  ;;  %v5307_v28 = vmax.f32 %v5245_v30, 0.0 }
 0x2d1   : > { %v5247_v53 = vpop.f32.mrf.mxu0 }
 0x2d2   : > { %v5248_v49 = vadd.f32 %v7928_v59, %v5247_v53  ;;  %v5310_v16 = vmax.f32 %v5256_v12, 0.0 }
 0x2d4   : > { %v5308_v48 = vmax.f32 %v5248_v49, 0.0  ;;  %v5324_v45 = vpack.c.bf16 %v5310_v16, %v5309_v11 }
 0x2d6   : > { %v5323_v13 = vpack.c.bf16 %v5308_v48, %v5307_v28 }
 0x2d8   : > { %8467 = vmatprep.mubr.msk.bf16.mxu1 %vm5370_vm12, %v5323_v13 }
 0x2d9   : > { %8468 = vmatmul.mubr.msk.bf16.vlgmr.msra.gmra.mxu1 %vm5370_vm12, %v5324_v45  ;;  %v8947_v45 = vld [vmem:[%s9231_s30] sm:$0xff]  }
 0x2da   : > { %8489 = vmatprep.subr.bf16.mxu0 %v8947_v45 }
 0x2db   : > { %8490 = vmatpush3.bf16.msra.mxu0 %v8947_v45 }
 0x2e1   : > { %v8449_v4 = vpop.f32.mrf.mxu0 }
 0x2e2   : > { %v5269_v2 = vadd.f32 %v8449_v4, %v7928_v59 }
 0x2e3   : > { %v5260_v56 = vpop.f32.mrf.mxu0 }
 0x2e4   : > { %v5261_v21 = vadd.f32 %v7928_v59, %v5260_v56  ;;  %v5313_v30 = vmax.f32 %v5269_v2, 0.0 }
 0x2e5   : > { %v8450_v33 = vpop.f32.mrf.mxu0 }
 0x2e6   : > { %v5272_v7 = vadd.f32 %v8450_v33, %v7928_v59  ;;  %v5311_v9 = vmax.f32 %v5261_v21, 0.0 }
 0x2e7   : > { %v5263_v37 = vpop.f32.mrf.mxu0 }
 0x2e8   : > { %v5264_v10 = vadd.f32 %v7928_v59, %v5263_v37  ;;  %v5314_v24 = vmax.f32 %v5272_v7, 0.0  ;;  %v8948_v7 = vld [vmem:[%s9241_s12 + $0x18] sm:$0xff]  }
 0x2e9   : > { %8507 = vmatprep.subr.bf16.mxu1 %v8948_v7 }
 0x2ea   : > { %v5312_v25 = vmax.f32 %v5264_v10, 0.0  ;;  %v5326_v12 = vpack.c.bf16 %v5314_v24, %v5313_v30  ;;  %v8949_v10 = vld [vmem:[%s9241_s12 + $0x10] sm:$0xff]   ;;  %8508 = vmatpush3.bf16.msra.mxu1 %v8948_v7 }
 0x2eb   : > { %8509 = vmatprep.subr.bf16.mxu1 %v8949_v10 }
 0x2ec   : > { %v5325_v26 = vpack.c.bf16 %v5312_v25, %v5311_v9 }
 0x2ee   : > { %8471 = vmatprep.mubr.msk.bf16.mxu1 %vm5370_vm12, %v5325_v26  ;;  %8510 = vmatpush3.bf16.msra.mxu1 %v8949_v10 }
 0x2ef   : > { %8472 = vmatmul.mubr.msk.bf16.gmra.mxu1 %vm5370_vm12, %v5326_v12 }
 0x338   : > { %v8453_v47 = vpop.f32.mrf.mxu0 }
 0x339   : > { %v5285_v4 = vadd.f32 %v8453_v47, %v7928_v59 }
 0x33a   : > { %v5276_v41 = vpop.f32.mrf.mxu0 }
 0x33b   : > { %v5277_v42 = vadd.f32 %v7928_v59, %v5276_v41  ;;  %v5317_v28 = vmax.f32 %v5285_v4, 0.0  ;;  %v7940_v4 = vld [vmem:[%s9226_s24] ss:$0 sm:$0xff] }
 0x33c   : > { %v8454_v3 = vpop.f32.mrf.mxu0 }
 0x33d   : > { %v5315_v60 = vmax.f32 %v5277_v42, 0.0  ;;  %v5288_v49 = vadd.f32 %v8454_v3, %v7928_v59  ;;  %v8950_v42 = vld [vmem:[%s9241_s12 + $0x8] sm:$0xff]  }
 0x33e   : > { %v5279_v58 = vpop.f32.mrf.mxu0  ;;  %8511 = vmatprep.subr.bf16.mxu1 %v8950_v42 }
 0x33f   : > { %v5280_v22 = vadd.f32 %v7928_v59, %v5279_v58  ;;  %v5318_v14 = vmax.f32 %v5288_v49, 0.0  ;;  %8512 = vmatpush3.bf16.msra.mxu1 %v8950_v42 }
 0x341   : > { %v5316_v53 = vmax.f32 %v5280_v22, 0.0  ;;  %v5328_v11 = vpack.c.bf16 %v5318_v14, %v5317_v28 }
 0x343   : > { %v5327_v33 = vpack.c.bf16 %v5316_v53, %v5315_v60 }
 0x345   : > { %8475 = vmatprep.mubr.msk.bf16.mxu1 %vm5370_vm12, %v5327_v33 }
 0x346   : > { %8476 = vmatmul.mubr.msk.bf16.gmra.mxu1 %vm5370_vm12, %v5328_v11 }
 0x386   : > { %v8457_v52 = vpop.f32.mrf.mxu0 }
 0x387   : > { %v5301_v21 = vadd.f32 %v8457_v52, %v7928_v59 }
 0x388   : > { %v5292_v39 = vpop.f32.mrf.mxu0 }
 0x389   : > { %v5293_v37 = vadd.f32 %v7928_v59, %v5292_v39  ;;  %v5321_v3 = vmax.f32 %v5301_v21, 0.0 }
 0x38a   : > { %v8458_v1 = vpop.f32.mrf.mxu0 }
 0x38b   : > { %v5319_v16 = vmax.f32 %v5293_v37, 0.0  ;;  %v5304_v13 = vadd.f32 %v8458_v1, %v7928_v59 }
 0x38c   : > { %v5295_v56 = vpop.f32.mrf.mxu0 }
 0x38d   : > { %v5296_v41 = vadd.f32 %v7928_v59, %v5295_v56  ;;  %v5322_v47 = vmax.f32 %v5304_v13, 0.0  ;;  %v11559_v59 = vpop.f32.mrf.mxu1 }
 0x38e   : > { %14975 = vst [vmem:[#allocation27_spill] sm:$0xff] %v11559_v59 }
 0x38f   : > { %v5320_v58 = vmax.f32 %v5296_v41, 0.0  ;;  %v5330_v39 = vpack.c.bf16 %v5322_v47, %v5321_v3  ;;  %v11561_v52 = vpop.f32.mrf.mxu1 }
 0x390   : > { %14976 = vst [vmem:[#allocation25_spill] sm:$0xff] %v11561_v52 }
 0x391   : > { %v5329_v48 = vpack.c.bf16 %v5320_v58, %v5319_v16  ;;  %v11563_v2 = vpop.f32.mrf.mxu1 }
 0x392   : > { %14977 = vst [vmem:[#allocation31_spill] sm:$0xff] %v11563_v2 }
 0x393   : > { %8479 = vmatprep.mubr.msk.bf16.mxu1 %vm5370_vm12, %v5329_v48  ;;  %v11565_v22 = vpop.f32.mrf.mxu1 }
 0x394   : > { %8480 = vmatmul.mubr.msk.bf16.gmra.mxu1 %vm5370_vm12, %v5330_v39  ;;  %14978 = vst [vmem:[#allocation37_spill] sm:$0xff] %v11565_v22 }
 0x395   : > { %v11567_v1 = vpop.f32.mrf.mxu1 }
 0x396   : > { %14979 = vst [vmem:[#allocation38_spill] sm:$0xff] %v11567_v1 }
 0x397   : > { %v11569_v9 = vpop.f32.mrf.mxu1 }
 0x398   : > { %14980 = vst [vmem:[#allocation32_spill] sm:$0xff] %v11569_v9 }
 0x399   : > { %v11571_v25 = vpop.f32.mrf.mxu1 }
 0x39a   : > { %14981 = vst [vmem:[#allocation20_spill] sm:$0xff] %v11571_v25 }
 0x39b   : > { %v11573_v24 = vpop.f32.mrf.mxu1 }
 0x39c   : > { %14982 = vst [vmem:[#allocation33_spill] sm:$0xff] %v11573_v24 }
 0x39d   : > { %v11575_v26 = vpop.f32.mrf.mxu1 }
 0x39e   : > { %14983 = vst [vmem:[#allocation29_spill] sm:$0xff] %v11575_v26 }
 0x39f   : > { %v11577_v60 = vpop.f32.mrf.mxu1 }
 0x3a0   : > { %14984 = vst [vmem:[#allocation42_spill] sm:$0xff] %v11577_v60 }
 0x3a1   : > { %v11579_v53 = vpop.f32.mrf.mxu1 }
 0x3a2   : > { %14985 = vst [vmem:[#allocation21_spill] sm:$0xff] %v11579_v53 }
 0x3a3   : > { %v11581_v30 = vpop.f32.mrf.mxu1 }
 0x3a4   : > { %14986 = vst [vmem:[#allocation35_spill] sm:$0xff] %v11581_v30 }
 0x3a5   : > { %v11583_v56 = vpop.f32.mrf.mxu1 }
 0x3a6   : > { %14987 = vst [vmem:[#allocation30_spill] sm:$0xff] %v11583_v56 }
 0x3a7   : > { %v11585_v33 = vpop.f32.mrf.mxu1 }
 0x3a8   : > { %14988 = vst [vmem:[#allocation41_spill] sm:$0xff] %v11585_v33 }
 0x3a9   : > { %v11587_v12 = vpop.f32.mrf.mxu1 }
 0x3aa   : > { %14989 = vst [vmem:[#allocation53_spill] sm:$0xff] %v11587_v12 }
 0x3ab   : > { %v11589_v49 = vpop.f32.mrf.mxu1 }
 0x3ac   : > { %14990 = vst [vmem:[#allocation45_spill] sm:$0xff] %v11589_v49 }
 0x3ad   : > { %v8469_v37 = vpop.f32.mrf.mxu1 }
 0x3ae   : > { %v5438_v28 = vadd.f32 %v8469_v37, %v7940_v4 }
 0x3af   : > { %v5429_v41 = vpop.f32.mrf.mxu1 }
 0x3b0   : > { %v5430_v14 = vadd.f32 %v7940_v4, %v5429_v41  ;;  %v5494_v39 = vmax.f32 %v5438_v28, 0.0 }
 0x3b1   : > { %v8470_v58 = vpop.f32.mrf.mxu1 }
 0x3b2   : > { %v5441_v16 = vadd.f32 %v8470_v58, %v7940_v4  ;;  %v5492_v47 = vmax.f32 %v5430_v14, 0.0 }
 0x3b3   : > { %v5432_v48 = vpop.f32.mrf.mxu1 }
 0x3b4   : > { %v5433_v11 = vadd.f32 %v7940_v4, %v5432_v48  ;;  %v5495_v13 = vmax.f32 %v5441_v16, 0.0 }
 0x3b5   : > { %v8473_v21 = vpop.f32.mrf.mxu1 }
 0x3b6   : > { %v5493_v3 = vmax.f32 %v5433_v11, 0.0  ;;  %v5509_v10 = vpack.c.bf16 %v5495_v13, %v5494_v39  ;;  %v5454_v33 = vadd.f32 %v8473_v21, %v7940_v4 }
 0x3b7   : > { %v5445_v45 = vpop.f32.mrf.mxu1 }
 0x3b8   : > { %v5508_v7 = vpack.c.bf16 %v5493_v3, %v5492_v47  ;;  %v5446_v12 = vadd.f32 %v7940_v4, %v5445_v45  ;;  %v5498_v14 = vmax.f32 %v5454_v33, 0.0 }
 0x3b9   : > { %v8474_v42 = vpop.f32.mrf.mxu1 }
 0x3ba   : > { %v5457_v49 = vadd.f32 %v8474_v42, %v7940_v4  ;;  %8491 = vmatprep.mubr.msk.bf16.mxu0 %vm5370_vm12, %v5508_v7  ;;  %v5496_v16 = vmax.f32 %v5446_v12, 0.0 }
 0x3bb   : > { %v5448_v56 = vpop.f32.mrf.mxu1  ;;  %8492 = vmatmul.mubr.msk.bf16.vlgmr.msra.gmra.mxu0 %vm5370_vm12, %v5509_v10 }
 0x3bc   : > { %v5449_v37 = vadd.f32 %v7940_v4, %v5448_v56  ;;  %v5499_v41 = vmax.f32 %v5457_v49, 0.0 }
 0x3be   : > { %v5497_v48 = vmax.f32 %v5449_v37, 0.0  ;;  %v5511_v30 = vpack.c.bf16 %v5499_v41, %v5498_v14 }
 0x3c0   : > { %v5510_v28 = vpack.c.bf16 %v5497_v48, %v5496_v16 }
 0x3c2   : > { %8495 = vmatprep.mubr.msk.bf16.mxu0 %vm5370_vm12, %v5510_v28 }
 0x3c3   : > { %8496 = vmatmul.mubr.msk.bf16.gmra.mxu0 %vm5370_vm12, %v5511_v30 }
 0x406   : > { %v8477_v58 = vpop.f32.mrf.mxu1 }
 0x407   : > { %v5470_v39 = vadd.f32 %v8477_v58, %v7940_v4 }
 0x408   : > { %v5461_v11 = vpop.f32.mrf.mxu1 }
 0x409   : > { %v5462_v13 = vadd.f32 %v7940_v4, %v5461_v11  ;;  %v5502_v12 = vmax.f32 %v5470_v39, 0.0 }
 0x40a   : > { %v8478_v47 = vpop.f32.mrf.mxu1 }
 0x40b   : > { %v5473_v3 = vadd.f32 %v8478_v47, %v7940_v4  ;;  %v5500_v49 = vmax.f32 %v5462_v13, 0.0 }
 0x40c   : > { %v5464_v45 = vpop.f32.mrf.mxu1 }
 0x40d   : > { %v5465_v21 = vadd.f32 %v7940_v4, %v5464_v45  ;;  %v5503_v7 = vmax.f32 %v5473_v3, 0.0  ;;  %v8951_v45 = vld [vmem:[%s9241_s12] sm:$0xff]  }
 0x40e   : > { %8513 = vmatprep.subr.bf16.mxu1 %v8951_v45 }
 0x40f   : > { %v5501_v10 = vmax.f32 %v5465_v21, 0.0  ;;  %v5513_v37 = vpack.c.bf16 %v5503_v7, %v5502_v12  ;;  %8514 = vmatpush3.bf16.msra.mxu1 %v8951_v45  ;;  %v8952_v21 = vld [vmem:[%s9251_s27 + $0x18] sm:$0xff]   ;;  %v8953_v7 = vld [vmem:[%s9251_s27 + $0x10] sm:$0xff]  }
 0x410   : > { %8531 = vmatprep.subr.bf16.mxu0 %v8952_v21 }
 0x411   : > { %v5512_v33 = vpack.c.bf16 %v5501_v10, %v5500_v49  ;;  %8532 = vmatpush3.bf16.msra.mxu0 %v8952_v21  ;;  %v7953_v10 = vld [vmem:[%s14991_s26] ss:$0 sm:$0xff]  ;;  %s15281_s26 = sld [smem:[#allocation10_spill]] }
 0x412   : > { %8533 = vmatprep.subr.bf16.mxu0 %v8953_v7 }
 0x413   : > { %8499 = vmatprep.mubr.msk.bf16.mxu0 %vm5370_vm12, %v5512_v33 }
 0x414   : > { %8500 = vmatmul.mubr.msk.bf16.gmra.mxu0 %vm5370_vm12, %v5513_v37 }
 0x415   : > { %8534 = vmatpush3.bf16.msra.mxu0 %v8953_v7 }
 0x454   : > { %v8481_v56 = vpop.f32.mrf.mxu1 }
 0x455   : > { %v5486_v58 = vadd.f32 %v8481_v56, %v7940_v4 }
 0x456   : > { %v5477_v42 = vpop.f32.mrf.mxu1 }
 0x457   : > { %v5478_v41 = vadd.f32 %v7940_v4, %v5477_v42  ;;  %v5506_v13 = vmax.f32 %v5486_v58, 0.0 }
 0x458   : > { %v8482_v16 = vpop.f32.mrf.mxu1 }
 0x459   : > { %v5489_v48 = vadd.f32 %v8482_v16, %v7940_v4  ;;  %v5504_v28 = vmax.f32 %v5478_v41, 0.0 }
 0x45a   : > { %v5480_v14 = vpop.f32.mrf.mxu1 }
 0x45b   : > { %v5481_v30 = vadd.f32 %v7940_v4, %v5480_v14  ;;  %v5507_v11 = vmax.f32 %v5489_v48, 0.0  ;;  %v8954_v4 = vld [vmem:[%s9251_s27 + $0x8] sm:$0xff]  }
 0x45c   : > { %8535 = vmatprep.subr.bf16.mxu0 %v8954_v4 }
 0x45d   : > { %v5505_v47 = vmax.f32 %v5481_v30, 0.0  ;;  %v5515_v39 = vpack.c.bf16 %v5507_v11, %v5506_v13  ;;  %8536 = vmatpush3.bf16.msra.mxu0 %v8954_v4 }
 0x45f   : > { %v5514_v3 = vpack.c.bf16 %v5505_v47, %v5504_v28 }
 0x461   : > { %8503 = vmatprep.mubr.msk.bf16.mxu0 %vm5370_vm12, %v5514_v3 }
 0x462   : > { %8504 = vmatmul.mubr.msk.bf16.gmra.mxu0 %vm5370_vm12, %v5515_v39 }
 0x47b   : > { %v8493_v56 = vpop.f32.mrf.mxu0 }
 0x47c   : > { %v5622_v37 = vadd.f32 %v8493_v56, %v7953_v10 }
 0x47d   : > { %v5613_v49 = vpop.f32.mrf.mxu0 }
 0x47e   : > { %v5614_v42 = vadd.f32 %v7953_v10, %v5613_v49  ;;  %v5678_v11 = vmax.f32 %v5622_v37, 0.0 }
 0x47f   : > { %v8494_v12 = vpop.f32.mrf.mxu0 }
 0x480   : > { %v5625_v33 = vadd.f32 %v8494_v12, %v7953_v10  ;;  %v5676_v14 = vmax.f32 %v5614_v42, 0.0 }
 0x481   : > { %v5616_v16 = vpop.f32.mrf.mxu0 }
 0x482   : > { %v5617_v41 = vadd.f32 %v7953_v10, %v5616_v16  ;;  %v5679_v48 = vmax.f32 %v5625_v33, 0.0 }
 0x483   : > { %v8497_v58 = vpop.f32.mrf.mxu0 }
 0x484   : > { %v5677_v30 = vmax.f32 %v5617_v41, 0.0  ;;  %v5693_v13 = vpack.c.bf16 %v5679_v48, %v5678_v11  ;;  %v5638_v21 = vadd.f32 %v8497_v58, %v7953_v10 }
 0x485   : > { %v5629_v28 = vpop.f32.mrf.mxu0 }
 0x486   : > { %v5692_v47 = vpack.c.bf16 %v5677_v30, %v5676_v14  ;;  %v5630_v39 = vadd.f32 %v7953_v10, %v5629_v28  ;;  %v5682_v42 = vmax.f32 %v5638_v21, 0.0 }
 0x487   : > { %v8498_v3 = vpop.f32.mrf.mxu0 }
 0x488   : > { %v5641_v45 = vadd.f32 %v8498_v3, %v7953_v10  ;;  %8515 = vmatprep.mubr.msk.bf16.mxu1 %vm5370_vm12, %v5692_v47  ;;  %v5680_v12 = vmax.f32 %v5630_v39, 0.0 }
 0x489   : > { %v5632_v7 = vpop.f32.mrf.mxu0  ;;  %8516 = vmatmul.mubr.msk.bf16.vlgmr.msra.gmra.mxu1 %vm5370_vm12, %v5693_v13 }
 0x48a   : > { %v5633_v4 = vadd.f32 %v7953_v10, %v5632_v7  ;;  %v5683_v56 = vmax.f32 %v5641_v45, 0.0 }
 0x48c   : > { %v5681_v33 = vmax.f32 %v5633_v4, 0.0  ;;  %v5695_v41 = vpack.c.bf16 %v5683_v56, %v5682_v42 }
 0x48e   : > { %v5694_v37 = vpack.c.bf16 %v5681_v33, %v5680_v12 }
 0x490   : > { %8519 = vmatprep.mubr.msk.bf16.mxu1 %vm5370_vm12, %v5694_v37 }
 0x491   : > { %8520 = vmatmul.mubr.msk.bf16.gmra.mxu1 %vm5370_vm12, %v5695_v41 }
 0x4d4   : > { %v8501_v49 = vpop.f32.mrf.mxu0 }
 0x4d5   : > { %v5654_v11 = vadd.f32 %v8501_v49, %v7953_v10 }
 0x4d6   : > { %v5645_v16 = vpop.f32.mrf.mxu0 }
 0x4d7   : > { %v5646_v48 = vadd.f32 %v7953_v10, %v5645_v16  ;;  %v5686_v39 = vmax.f32 %v5654_v11, 0.0 }
 0x4d8   : > { %v8502_v14 = vpop.f32.mrf.mxu0 }
 0x4d9   : > { %v5657_v30 = vadd.f32 %v8502_v14, %v7953_v10  ;;  %v5684_v3 = vmax.f32 %v5646_v48, 0.0 }
 0x4da   : > { %v5648_v28 = vpop.f32.mrf.mxu0 }
 0x4db   : > { %v5649_v58 = vadd.f32 %v7953_v10, %v5648_v28  ;;  %v5687_v47 = vmax.f32 %v5657_v30, 0.0  ;;  %v8955_v28 = vld [vmem:[%s9251_s27] sm:$0xff]  }
 0x4dc   : > { %8537 = vmatprep.subr.bf16.mxu0 %v8955_v28 }
 0x4dd   : > { %v5685_v45 = vmax.f32 %v5649_v58, 0.0  ;;  %v5697_v4 = vpack.c.bf16 %v5687_v47, %v5686_v39  ;;  %8538 = vmatpush3.bf16.msra.mxu0 %v8955_v28  ;;  %v8956_v58 = vld [vmem:[%s14992_s28 + $0x10] sm:$0xff]   ;;  %v8959_v47 = vld [vmem:[%s14993_s1 + $0x18] sm:$0xff]   ;;  %v7966_v39 = vld [vmem:[%s14994_s2] ss:$0 sm:$0xff]  ;;  %s15320_s2 = sld [smem:[#allocation15_spill]] }
 0x4de   : > { %8579 = vmatprep.subr.bf16.mxu0 %v8956_v58  ;;  %8555 = vmatprep.subr.bf16.mxu1 %v8959_v47  ;;  %v8957_v28 = vld [vmem:[%s14992_s28 + $0x8] sm:$0xff]  }
 0x4df   : > { %v5696_v21 = vpack.c.bf16 %v5685_v45, %v5684_v3  ;;  %8556 = vmatpush3.bf16.msra.mxu1 %v8959_v47 }
 0x4e1   : > { %8523 = vmatprep.mubr.msk.bf16.mxu1 %vm5370_vm12, %v5696_v21 }
 0x4e2   : > { %8524 = vmatmul.mubr.msk.bf16.gmra.mxu1 %vm5370_vm12, %v5697_v4 }
 0x522   : > { %v8505_v13 = vpop.f32.mrf.mxu0 }
 0x523   : > { %v5670_v49 = vadd.f32 %v8505_v13, %v7953_v10  ;;  %v8960_v13 = vld [vmem:[%s14993_s1 + $0x10] sm:$0xff]  }
 0x524   : > { %v5661_v7 = vpop.f32.mrf.mxu0  ;;  %8557 = vmatprep.subr.bf16.mxu1 %v8960_v13 }
 0x525   : > { %v5662_v56 = vadd.f32 %v7953_v10, %v5661_v7  ;;  %v5690_v48 = vmax.f32 %v5670_v49, 0.0  ;;  %8558 = vmatpush3.bf16.msra.mxu1 %v8960_v13 }
 0x526   : > { %v8506_v12 = vpop.f32.mrf.mxu0 }
 0x527   : > { %v5673_v33 = vadd.f32 %v8506_v12, %v7953_v10  ;;  %v5688_v41 = vmax.f32 %v5662_v56, 0.0 }
 0x528   : > { %v5664_v42 = vpop.f32.mrf.mxu0 }
 0x529   : > { %v5665_v16 = vadd.f32 %v7953_v10, %v5664_v42  ;;  %v5691_v37 = vmax.f32 %v5673_v33, 0.0  ;;  %v8961_v10 = vld [vmem:[%s14993_s1 + $0x8] sm:$0xff]  }
 0x52a   : > { %8559 = vmatprep.subr.bf16.mxu1 %v8961_v10 }
 0x52b   : > { %v5689_v14 = vmax.f32 %v5665_v16, 0.0  ;;  %v5699_v11 = vpack.c.bf16 %v5691_v37, %v5690_v48  ;;  %8560 = vmatpush3.bf16.msra.mxu1 %v8961_v10 }
 0x52d   : > { %v5698_v30 = vpack.c.bf16 %v5689_v14, %v5688_v41 }
 0x52f   : > { %8527 = vmatprep.mubr.msk.bf16.mxu1 %vm5370_vm12, %v5698_v30 }
 0x530   : > { %8528 = vmatmul.mubr.msk.bf16.gmra.mxu1 %vm5370_vm12, %v5699_v11 }
 0x549   : > { %v8517_v3 = vpop.f32.mrf.mxu1 }
 0x54a   : > { %v5806_v12 = vadd.f32 %v8517_v3, %v7966_v39 }
 0x54b   : > { %v5797_v45 = vpop.f32.mrf.mxu1 }
 0x54c   : > { %v5798_v21 = vadd.f32 %v7966_v39, %v5797_v45  ;;  %v5862_v41 = vmax.f32 %v5806_v12, 0.0 }
 0x54d   : > { %v8518_v7 = vpop.f32.mrf.mxu1 }
 0x54e   : > { %v5809_v4 = vadd.f32 %v8518_v7, %v7966_v39  ;;  %v5860_v16 = vmax.f32 %v5798_v21, 0.0 }
 0x54f   : > { %v5800_v56 = vpop.f32.mrf.mxu1 }
 0x550   : > { %v5801_v33 = vadd.f32 %v7966_v39, %v5800_v56  ;;  %v5863_v49 = vmax.f32 %v5809_v4, 0.0  ;;  %v8958_v4 = vld [vmem:[%s14992_s28] sm:$0xff]  }
 0x551   : > { %v8521_v42 = vpop.f32.mrf.mxu1 }
 0x552   : > { %v5861_v37 = vmax.f32 %v5801_v33, 0.0  ;;  %v5877_v30 = vpack.c.bf16 %v5863_v49, %v5862_v41  ;;  %v5822_v10 = vadd.f32 %v8521_v42, %v7966_v39 }
 0x553   : > { %v5813_v14 = vpop.f32.mrf.mxu1 }
 0x554   : > { %v5876_v48 = vpack.c.bf16 %v5861_v37, %v5860_v16  ;;  %v5814_v47 = vadd.f32 %v7966_v39, %v5813_v14  ;;  %v5866_v33 = vmax.f32 %v5822_v10, 0.0 }
 0x555   : > { %v8522_v11 = vpop.f32.mrf.mxu1 }
 0x556   : > { %v5825_v13 = vadd.f32 %v8522_v11, %v7966_v39  ;;  %8539 = vmatprep.mubr.msk.bf16.mxu0 %vm5370_vm12, %v5876_v48  ;;  %v5864_v12 = vmax.f32 %v5814_v47, 0.0 }
 0x557   : > { %v5816_v45 = vpop.f32.mrf.mxu1  ;;  %8540 = vmatmul.mubr.msk.bf16.vlgmr.msra.gmra.mxu0 %vm5370_vm12, %v5877_v30 }
 0x558   : > { %v5817_v3 = vadd.f32 %v7966_v39, %v5816_v45  ;;  %8580 = vmatpush3.bf16.msra.mxu0 %v8956_v58  ;;  %v5867_v7 = vmax.f32 %v5825_v13, 0.0 }
 0x559   : > { %8581 = vmatprep.subr.bf16.mxu0 %v8957_v28 }
 0x55a   : > { %v5865_v56 = vmax.f32 %v5817_v3, 0.0  ;;  %v5879_v37 = vpack.c.bf16 %v5867_v7, %v5866_v33 }
 0x55c   : > { %v5878_v16 = vpack.c.bf16 %v5865_v56, %v5864_v12  ;;  %8582 = vmatpush3.bf16.msra.mxu0 %v8957_v28 }
 0x55d   : > { %8583 = vmatprep.subr.bf16.mxu0 %v8958_v4 }
 0x55e   : > { %8543 = vmatprep.mubr.msk.bf16.mxu0 %vm5370_vm12, %v5878_v16 }
 0x55f   : > { %8544 = vmatmul.mubr.msk.bf16.gmra.mxu0 %vm5370_vm12, %v5879_v37 }
 0x560   : > { %8584 = vmatpush3.bf16.msra.mxu0 %v8958_v4 }
 0x5a2   : > { %v8525_v21 = vpop.f32.mrf.mxu1 }
 0x5a3   : > { %v5838_v48 = vadd.f32 %v8525_v21, %v7966_v39 }
 0x5a4   : > { %v5829_v49 = vpop.f32.mrf.mxu1 }
 0x5a5   : > { %v5830_v14 = vadd.f32 %v7966_v39, %v5829_v49  ;;  %v5870_v45 = vmax.f32 %v5838_v48, 0.0 }
 0x5a6   : > { %v8526_v41 = vpop.f32.mrf.mxu1 }
 0x5a7   : > { %v5841_v42 = vadd.f32 %v8526_v41, %v7966_v39  ;;  %v5868_v13 = vmax.f32 %v5830_v14, 0.0 }
 0x5a8   : > { %v5832_v30 = vpop.f32.mrf.mxu1 }
 0x5a9   : > { %v5833_v58 = vadd.f32 %v7966_v39, %v5832_v30  ;;  %v5871_v11 = vmax.f32 %v5841_v42, 0.0 }
 0x5ab   : > { %v5869_v10 = vmax.f32 %v5833_v58, 0.0  ;;  %v5881_v7 = vpack.c.bf16 %v5871_v11, %v5870_v45 }
 0x5ad   : > { %v5880_v28 = vpack.c.bf16 %v5869_v10, %v5868_v13 }
 0x5af   : > { %8547 = vmatprep.mubr.msk.bf16.mxu0 %vm5370_vm12, %v5880_v28 }
 0x5b0   : > { %8548 = vmatmul.mubr.msk.bf16.gmra.mxu0 %vm5370_vm12, %v5881_v7 }
 0x5f0   : > { %v8529_v47 = vpop.f32.mrf.mxu1 }
 0x5f1   : > { %v5854_v49 = vadd.f32 %v8529_v47, %v7966_v39 }
 0x5f2   : > { %v5845_v3 = vpop.f32.mrf.mxu1 }
 0x5f3   : > { %v5846_v56 = vadd.f32 %v7966_v39, %v5845_v3  ;;  %v5874_v14 = vmax.f32 %v5854_v49, 0.0 }
 0x5f4   : > { %v8530_v12 = vpop.f32.mrf.mxu1 }
 0x5f5   : > { %v5857_v33 = vadd.f32 %v8530_v12, %v7966_v39  ;;  %v5872_v4 = vmax.f32 %v5846_v56, 0.0  ;;  %v8964_v56 = vld [vmem:[%s14995_s7 + $0x10] sm:$0xff]  }
 0x5f6   : > { %v5848_v21 = vpop.f32.mrf.mxu1 }
 0x5f7   : > { %v5849_v16 = vadd.f32 %v7966_v39, %v5848_v21  ;;  %v5875_v37 = vmax.f32 %v5857_v33, 0.0 }
 0x5f9   : > { %v5873_v41 = vmax.f32 %v5849_v16, 0.0  ;;  %v5883_v48 = vpack.c.bf16 %v5875_v37, %v5874_v14  ;;  %v8965_v14 = vld [vmem:[%s14995_s7 + $0x8] sm:$0xff]  }
 0x5fb   : > { %v5882_v42 = vpack.c.bf16 %v5873_v41, %v5872_v4 }
 0x5fd   : > { %8551 = vmatprep.mubr.msk.bf16.mxu0 %vm5370_vm12, %v5882_v42 }
 0x5fe   : > { %8552 = vmatmul.mubr.msk.bf16.gmra.mxu0 %vm5370_vm12, %v5883_v48 }
 0x5ff   : > { %8585 = vmatprep.mubr.msk.bf16.mxu0 %vm5185_vm4, %v10303_v40  ;;  %v8962_v40 = vld [vmem:[%s14993_s1] sm:$0xff]  }
 0x600   : > { %8561 = vmatprep.subr.bf16.mxu1 %v8962_v40 }
 0x601   : > { %8562 = vmatpush3.bf16.msra.mxu1 %v8962_v40 }
 0x606   : > { %8586 = vmatmul.mubr.msk.bf16.vlgmr.msra.gmra.mxu0 %vm5185_vm4, %v10509_v20  ;;  %v8963_v20 = vld [vmem:[%s14995_s7 + $0x18] sm:$0xff]  }
 0x607   : > { %8589 = vmatprep.mubr.msk.bf16.mxu0 %vm5185_vm4, %v10725_v5  ;;  %8601 = vmatprep.subr.bf16.mxu1 %v8963_v20 }
 0x60e   : > { %8590 = vmatmul.mubr.msk.bf16.gmra.mxu0 %vm5185_vm4, %v10941_v55  ;;  %v7979_v55 = vld [vmem:[%s14996_s10] ss:$0 sm:$0xff]  ;;  %s15321_s10 = sld [smem:[#allocation12_spill]] }
 0x60f   : > { %8593 = vmatprep.mubr.msk.bf16.mxu0 %vm5185_vm4, %v11150_v51 }
 0x616   : > { %8594 = vmatmul.mubr.msk.bf16.gmra.mxu0 %vm5185_vm4, %v11373_v44 }
 0x617   : > { %8597 = vmatprep.mubr.msk.bf16.mxu0 %vm5185_vm4, %v11471_v62  ;;  %v8541_v5 = vpop.f32.mrf.mxu0 }
 0x618   : > { %v5990_v11 = vadd.f32 %v8541_v5, %v7979_v55 }
 0x619   : > { %v5981_v39 = vpop.f32.mrf.mxu0 }
 0x61a   : > { %v5982_v51 = vadd.f32 %v7979_v55, %v5981_v39 }
 0x61b   : > { %v8542_v30 = vpop.f32.mrf.mxu0 }
 0x61c   : > { %v5993_v58 = vadd.f32 %v8542_v30, %v7979_v55  ;;  %v6044_v10 = vmax.f32 %v5982_v51, 0.0 }
 0x61d   : > { %v5984_v44 = vpop.f32.mrf.mxu0 }
 0x61e   : > { %8598 = vmatmul.mubr.msk.bf16.gmra.mxu0 %vm5185_vm4, %v11503_v57  ;;  %v5985_v47 = vadd.f32 %v7979_v55, %v5984_v44  ;;  %v6047_v13 = vmax.f32 %v5993_v58, 0.0  ;;  %v6046_v57 = vmax.f32 %v5990_v11, 0.0 }
 0x61f   : > { %v8545_v62 = vpop.f32.mrf.mxu0 }
 0x620   : > { %v6045_v45 = vmax.f32 %v5985_v47, 0.0  ;;  %v6061_v7 = vpack.c.bf16 %v6047_v13, %v6046_v57  ;;  %v6006_v21 = vadd.f32 %v8545_v62, %v7979_v55 }
 0x621   : > { %v5997_v3 = vpop.f32.mrf.mxu0 }
 0x622   : > { %v6060_v28 = vpack.c.bf16 %v6045_v45, %v6044_v10  ;;  %v5998_v33 = vadd.f32 %v7979_v55, %v5997_v3  ;;  %v6050_v40 = vmax.f32 %v6006_v21, 0.0 }
 0x623   : > { %v8546_v12 = vpop.f32.mrf.mxu0 }
 0x624   : > { %v6009_v49 = vadd.f32 %v8546_v12, %v7979_v55  ;;  %8563 = vmatprep.mubr.msk.bf16.mxu1 %vm5370_vm12, %v6060_v28  ;;  %v6048_v42 = vmax.f32 %v5998_v33, 0.0 }
 0x625   : > { %v6000_v16 = vpop.f32.mrf.mxu0  ;;  %8564 = vmatmul.mubr.msk.bf16.vlgmr.msra.gmra.mxu1 %vm5370_vm12, %v6061_v7 }
 0x626   : > { %v6001_v37 = vadd.f32 %v7979_v55, %v6000_v16  ;;  %8602 = vmatpush3.bf16.msra.mxu1 %v8963_v20  ;;  %v6051_v4 = vmax.f32 %v6009_v49, 0.0  ;;  %v11656_v49 = vld [vmem:[%s14997_s11] ss:$0 sm:$0xff]  ;;  %s15324_s11 = sld [smem:[#allocation18_spill]] }
 0x627   : > { %8603 = vmatprep.subr.bf16.mxu1 %v8964_v56 }
 0x628   : > { %v6049_v48 = vmax.f32 %v6001_v37, 0.0  ;;  %v6063_v30 = vpack.c.bf16 %v6051_v4, %v6050_v40 }
 0x62a   : > { %v6062_v39 = vpack.c.bf16 %v6049_v48, %v6048_v42  ;;  %8604 = vmatpush3.bf16.msra.mxu1 %v8964_v56 }
 0x62b   : > { %8605 = vmatprep.subr.bf16.mxu1 %v8965_v14 }
 0x62c   : > { %8567 = vmatprep.mubr.msk.bf16.mxu1 %vm5370_vm12, %v6062_v39 }
 0x62d   : > { %8568 = vmatmul.mubr.msk.bf16.gmra.mxu1 %vm5370_vm12, %v6063_v30 }
 0x62e   : > { %8606 = vmatpush3.bf16.msra.mxu1 %v8965_v14 }
 0x670   : > { %v8549_v41 = vpop.f32.mrf.mxu0 }
 0x671   : > { %v6022_v44 = vadd.f32 %v8549_v41, %v7979_v55  ;;  %v11661_v41 = vadd.f32 %v11509_v61, %v11656_v49  ;;  %v11672_v61 = vadd.f32 %v11514_v27, %v11656_v49 }
 0x672   : > { %v6013_v5 = vpop.f32.mrf.mxu0 }
 0x673   : > { %v6014_v58 = vadd.f32 %v7979_v55, %v6013_v5  ;;  %v6054_v57 = vmax.f32 %v6022_v44, 0.0  ;;  %14998 = vst [vmem:[#allocation52_spill] sm:$0xff] %v11661_v41  ;;  %v3436_v39 = vand.u32 2139095040, %v11661_v41  ;;  %15000 = vst [vmem:[#allocation39_spill] sm:$0xff] %v11672_v61  ;;  %v11681_v44 = vadd.f32 %v11518_v43, %v11656_v49 }
 0x674   : > { %v8550_v51 = vpop.f32.mrf.mxu0  ;;  %v11688_v43 = vadd.f32 %v11656_v49, %v11520_v19 }
 0x675   : > { %v6025_v11 = vadd.f32 %v8550_v51, %v7979_v55  ;;  %v6052_v10 = vmax.f32 %v6014_v58, 0.0  ;;  %v3437_v30 = vshrl.u32 %v3436_v39, 23  ;;  %15002 = vst [vmem:[#allocation44_spill] sm:$0xff] %v11681_v44  ;;  %v3852_v27 = vand.u32 2139095040, %v11681_v44 }
 0x676   : > { %v6016_v47 = vpop.f32.mrf.mxu0  ;;  %15003 = vst [vmem:[#allocation56_spill] sm:$0xff] %v11688_v43 }
 0x677   : > { %v6017_v20 = vadd.f32 %v7979_v55, %v6016_v47  ;;  %v6055_v13 = vmax.f32 %v6025_v11, 0.0  ;;  %v7852_v51 = vadd.s32 4294967169, %v3437_v30  ;;  %v11677_v11 = vadd.f32 %v11656_v49, %v11516_v0 }
 0x678   : > { %v3644_v47 = vand.u32 2139095040, %v11672_v61 }
 0x679   : > { %v6053_v45 = vmax.f32 %v6017_v20, 0.0  ;;  %v6065_v7 = vpack.c.bf16 %v6055_v13, %v6054_v57  ;;  %15001 = vst [vmem:[#allocation34_spill] sm:$0xff] %v11677_v11  ;;  %v3443_v20 = vadd.s32 1, %v7852_v51  ;;  %v3540_v13 = vand.u32 2139095040, %v11677_v11 }
 0x67a   : > { %v3853_v57 = vshrl.u32 %v3852_v27, 23 }
 0x67b   : > { %v6064_v28 = vpack.c.bf16 %v6053_v45, %v6052_v10  ;;  %vm3444_vm4 = vcmp.gt.s32.totalorder %v3443_v20, 0  ;;  %v3541_v45 = vshrl.u32 %v3540_v13, 23 }
 0x67d   : > { %8571 = vmatprep.mubr.msk.bf16.mxu1 %vm5370_vm12, %v6064_v28 }
 0x67e   : > { %8572 = vmatmul.mubr.msk.bf16.gmra.mxu1 %vm5370_vm12, %v6065_v7  ;;  %v7856_v7 = vadd.s32 4294967169, %v3541_v45 }
 0x6be   : > { %v8553_v62 = vpop.f32.mrf.mxu0 }
 0x6bf   : > { %v6038_v21 = vadd.f32 %v8553_v62, %v7979_v55  ;;  %v3645_v62 = vshrl.u32 %v3644_v47, 23 }
 0x6c0   : > { %v6029_v3 = vpop.f32.mrf.mxu0 }
 0x6c1   : > { %v6030_v56 = vadd.f32 %v7979_v55, %v6029_v3  ;;  %v6058_v48 = vmax.f32 %v6038_v21, 0.0  ;;  %v3445_v3 = vsel %vm3444_vm4, %v3443_v20, 0  ;;  %v7860_v0 = vadd.s32 4294967169, %v3645_v62 }
 0x6c2   : > { %v8554_v12 = vpop.f32.mrf.mxu0  ;;  %v11705_v30 = vshrl.u32 %v3445_v3, 5 }
 0x6c3   : > { %v6041_v33 = vadd.f32 %v8554_v12, %v7979_v55  ;;  %v6056_v14 = vmax.f32 %v6030_v56, 0.0  ;;  %v7868_v12 = vadd.s32 4294967169, %v3853_v57  ;;  %v11692_v56 = vadd.f32 %v11522_v34, %v11656_v49 }
 0x6c4   : > { %v6032_v16 = vpop.f32.mrf.mxu0  ;;  %v3651_v21 = vadd.s32 1, %v7860_v0  ;;  %vm3468_vm15 = vcmp.lt.s32.totalorder %v11705_v30, 4 }
 0x6c5   : > { %v6033_v37 = vadd.f32 %v7979_v55, %v6032_v16  ;;  %v6059_v4 = vmax.f32 %v6041_v33, 0.0  ;;  %v11668_v55 = vadd.f32 %v11656_v49, %v11511_v32  ;;  %15004 = vst [vmem:[#allocation48_spill] sm:$0xff] %v11692_v56  ;;  %v11694_v33 = vand.u32 31, %v3445_v3 }
 0x6c6   : > { %v3547_v16 = vadd.s32 1, %v7856_v7  ;;  %vm3652_vm1 = vcmp.gt.s32.totalorder %v3651_v21, 0  ;;  %v11735_v7 = vadd.f32 %v11656_v49, %v11524_v18 }
 0x6c7   : > { %v6057_v42 = vmax.f32 %v6033_v37, 0.0  ;;  %v6067_v5 = vpack.c.bf16 %v6059_v4, %v6058_v48  ;;  %14999 = vst [vmem:[#allocation22_spill] sm:$0xff] %v11668_v55  ;;  %v3332_v58 = vand.u32 2139095040, %v11668_v55  ;;  %v3859_v37 = vadd.s32 1, %v7868_v12 }
 0x6c8   : > { %v3748_v4 = vand.u32 2139095040, %v11688_v43  ;;  %vm3548_vm7 = vcmp.gt.s32.totalorder %v3547_v16, 0  ;;  %v3653_v39 = vsel %vm3652_vm1, %v3651_v21, 0  ;;  %15006 = vst [vmem:[#allocation23_spill] sm:$0xff] %v11735_v7  ;;  %vm3467_vm1 = vcmp.lt.s32.totalorder %v11705_v30, 3 }
 0x6c9   : > { %v6066_v40 = vpack.c.bf16 %v6057_v42, %v6056_v14  ;;  %v3333_v32 = vshrl.u32 %v3332_v58, 23  ;;  %v4060_v14 = vand.u32 2139095040, %v11692_v56  ;;  %v11699_v42 = vsub.s32 32, %v11694_v33 }
 0x6ca   : > { %vm3860_vm0 = vcmp.gt.s32.totalorder %v3859_v37, 0  ;;  %v3749_v48 = vshrl.u32 %v3748_v4, 23  ;;  %v11711_v58 = vshll.u32 %v14852_v15, %v11694_v33  ;;  %v3549_v20 = vsel %vm3548_vm7, %v3547_v16, 0 }
 0x6cb   : > { %8575 = vmatprep.mubr.msk.bf16.mxu1 %vm5370_vm12, %v6066_v40  ;;  %v7848_v10 = vadd.s32 4294967169, %v3333_v32  ;;  %v4061_v34 = vshrl.u32 %v4060_v14, 23  ;;  %v3459_v40 = vshll.u32 %v14837_v6, %v11694_v33  ;;  %v11715_v47 = vshrl.u32 %v14835_v54, %v11699_v42 }
 0x6cc   : > { %8576 = vmatmul.mubr.msk.bf16.gmra.mxu1 %vm5370_vm12, %v6067_v5  ;;  %v3460_v5 = vshrl.u32 %v14852_v15, %v11699_v42  ;;  %v3861_v32 = vsel %vm3860_vm0, %v3859_v37, 0  ;;  %v11717_v13 = vand.u32 31, %v3653_v39  ;;  %v7864_v27 = vadd.s32 4294967169, %v3749_v48 }
 0x6cd   : > { %v3339_v28 = vadd.s32 1, %v7848_v10  ;;  %v7876_v62 = vadd.s32 4294967169, %v4061_v34  ;;  %v11727_v3 = vand.u32 31, %v3549_v20  ;;  %v11729_v0 = vand.u32 31, %v3861_v32 }
 0x6ce   : > { %v11719_v10 = vor.u32 %v3460_v5, %v3459_v40  ;;  %v11737_v12 = vshrl.u32 %v3653_v39, 5  ;;  %v11740_v21 = vsub.s32 32, %v11717_v13  ;;  %v3755_v16 = vadd.s32 1, %v7864_v27 }
 0x6cf   : > { %vm3340_vm14 = vcmp.gt.s32.totalorder %v3339_v28, 0  ;;  %15005 = vst [vmem:[#allocation54_spill] sm:$0xff] %v11729_v0  ;;  %v4067_v37 = vadd.s32 1, %v7876_v62  ;;  %v11757_v34 = vsub.s32 32, %v11727_v3  ;;  %v11760_v40 = vsub.s32 32, %v11729_v0 }
 0x6d0   : > { %v3341_v19 = vsel %vm3340_vm14, %v3339_v28, 0  ;;  %v3464_v28 = vor.u32 %v11715_v47, %v11711_v58  ;;  %v11745_v4 = vsel %vm3468_vm15, %v11719_v10, 920167782  ;;  %v3667_v5 = vshll.u32 %v14837_v6, %v11717_v13 }
 0x6d1   : > { %v11707_v51 = vand.u32 31, %v3341_v19  ;;  %v11721_v45 = vshrl.u32 %v3341_v19, 5  ;;  %15007 = vst [vmem:[#allocation40_spill] sm:$0xff] %v11760_v40  ;;  %v3670_v39 = vshll.u32 %v14852_v15, %v11717_v13  ;;  %v3956_v58 = vand.u32 2139095040, %v11735_v7 }
 0x6d2   : > { %v11769_v47 = vadd.f32 %v11526_v36, %v11656_v49  ;;  %v3668_v27 = vshrl.u32 %v14852_v15, %v11740_v21  ;;  %vm3676_vm8 = vcmp.lt.s32.totalorder %v11737_v12, 4  ;;  %vm3756_vm3 = vcmp.gt.s32.totalorder %v3755_v16, 0 }
 0x6d3   : > { %v11725_v57 = vsub.s32 32, %v11707_v51  ;;  %v3355_v14 = vshll.u32 %v14837_v6, %v11707_v51  ;;  %v3358_v19 = vshll.u32 %v14852_v15, %v11707_v51  ;;  %vm3364_vm11 = vcmp.lt.s32.totalorder %v11721_v45, 4 }
 0x6d4   : > { %15008 = vst [vmem:[#allocation36_spill] sm:$0xff] %v11769_v47  ;;  %vm4068_vm9 = vcmp.gt.s32.totalorder %v4067_v37, 0  ;;  %v3671_v62 = vshrl.u32 %v14835_v54, %v11740_v21  ;;  %v11776_v53 = vshrl.u32 %v3549_v20, 5  ;;  %v3563_v60 = vshll.u32 %v14837_v6, %v11727_v3 }
 0x6d5   : > { %v3356_v18 = vshrl.u32 %v14852_v15, %v11725_v57  ;;  %v3359_v48 = vshrl.u32 %v14835_v54, %v11725_v57  ;;  %v3566_v26 = vshll.u32 %v14852_v15, %v11727_v3  ;;  %v3564_v36 = vshrl.u32 %v14852_v15, %v11757_v34 }
 0x6d6   : > { %15009 = vst [vmem:[#allocation49_spill] sm:$0xff] %v11776_v53  ;;  %v3567_v24 = vshrl.u32 %v14835_v54, %v11757_v34  ;;  %v3875_v25 = vshll.u32 %v14837_v6, %v11729_v0  ;;  %v3876_v9 = vshrl.u32 %v14852_v15, %v11760_v40  ;;  %v3757_v20 = vsel %vm3756_vm3, %v3755_v16, 0 }
 0x6d7   : > { %v4069_v1 = vsel %vm4068_vm9, %v4067_v37, 0  ;;  %v3957_v22 = vshrl.u32 %v3956_v58, 23  ;;  %v4268_v2 = vand.u32 2139095040, %v11769_v47  ;;  %v11791_v52 = vor.u32 %v3356_v18, %v3355_v14 }
 0x6d8   : > { %v11793_v59 = vshrl.u32 %v3861_v32, 5  ;;  %v3878_v7 = vshll.u32 %v14852_v15, %v11729_v0  ;;  %v3879_v56 = vshrl.u32 %v14835_v54, %v11760_v40  ;;  %v3360_v43 = vor.u32 %v3359_v48, %v3358_v19 }
 0x6d9   : > { %v11799_v44 = vor.u32 %v3668_v27, %v3667_v5  ;;  %v3672_v38 = vor.u32 %v3671_v62, %v3670_v39  ;;  %vm3572_vm2 = vcmp.lt.s32.totalorder %v11776_v53, 4  ;;  %v11802_v16 = vor.u32 %v3564_v36, %v3563_v60 }
 0x6da   : > { %15010 = vst [vmem:[#allocation58_spill] sm:$0xff] %v11793_v59  ;;  %v3568_v37 = vor.u32 %v3567_v24, %v3566_v26  ;;  %v11804_v58 = vand.u32 31, %v3757_v20  ;;  %v11806_v14 = vand.u32 31, %v4069_v1  ;;  %v11808_v32 = vor.u32 %v3876_v9, %v3875_v25 }
 0x6db   : > { %15011 = vst [vmem:[#allocation50_spill] sm:$0xff] %v11802_v16  ;;  %v7872_v18 = vadd.s32 4294967169, %v3957_v22  ;;  %v4269_v47 = vshrl.u32 %v4268_v2, 23  ;;  %v11812_v40 = vadd.f32 %v11656_v49, %v11528_v46  ;;  %v11816_v19 = vsel %vm3468_vm15, %v3464_v28, 1326507024 }
 0x6dc   : > { %15012 = vst [vmem:[#allocation57_spill] sm:$0xff] %v11804_v58  ;;  %15013 = vst [vmem:[#allocation24_spill] sm:$0xff] %v11806_v14  ;;  %v11821_v24 = vsel %vm3364_vm11, %v11791_v52, 920167782  ;;  %v3880_v26 = vor.u32 %v3879_v56, %v3878_v7  ;;  %vm3884_vm6 = vcmp.lt.s32.totalorder %v11793_v59, 4  ;;  %v11847_v60 = vsub.s32 32, %v11804_v58 }
 0x6dd   : > { %15014 = vst [vmem:[#allocation46_spill] sm:$0xff] %v11808_v32  ;;  %15015 = vst [vmem:[#allocation43_spill] sm:$0xff] %v11812_v40  ;;  %v11826_v22 = vsel %vm3364_vm11, %v3360_v43, 1326507024  ;;  %v11831_v46 = vsel %vm3676_vm8, %v11799_v44, 920167782  ;;  %v11868_v27 = vadd.f32 %v11530_v35, %v11656_v49  ;;  %v3771_v62 = vshll.u32 %v14837_v6, %v11804_v58 }
 0x6de   : > { %v11835_v2 = vsel %vm3676_vm8, %v3672_v38, 1326507024  ;;  %v11840_v9 = vsel %vm3572_vm2, %v11802_v16, 920167782  ;;  %v11844_v25 = vsel %vm3572_vm2, %v3568_v37, 1326507024  ;;  %v4083_v36 = vshll.u32 %v14837_v6, %v11806_v14 }
 0x6df   : > { %15016 = vst [vmem:[#allocation60_spill] sm:$0xff] %v11840_v9  ;;  %15017 = vst [vmem:[#allocation63_spill] sm:$0xff] %v11844_v25  ;;  %v11850_v43 = vsub.s32 32, %v11806_v14  ;;  %v11855_v38 = vsel %vm3884_vm6, %v11808_v32, 920167782  ;;  %v3963_v56 = vadd.s32 1, %v7872_v18  ;;  %v11878_v37 = vshll.u32 %v14852_v15, %v11806_v14 }
 0x6e0   : > { %15018 = vst [vmem:[#allocation26_spill] sm:$0xff] %v11847_v60  ;;  %15020 = vst [vmem:[#allocation51_spill] sm:$0xff] %v11855_v38  ;;  %v7884_v28 = vadd.s32 4294967169, %v4269_v47  ;;  %v4164_v7 = vand.u32 2139095040, %v11812_v40  ;;  %v11860_v48 = vsel %vm3884_vm6, %v3880_v26, 1326507024  ;;  %v3774_v47 = vshll.u32 %v14852_v15, %v11804_v58 }
 0x6e1   : > { %15019 = vst [vmem:[#allocation59_spill] sm:$0xff] %v11850_v43  ;;  %15021 = vst [vmem:[#allocation65_spill] sm:$0xff] %v11860_v48  ;;  %v11862_v5 = vshrl.u32 %v3757_v20, 5  ;;  %v11864_v39 = vshrl.u32 %v4069_v1, 5  ;;  %v8966_v20 = vld [vmem:[%s14995_s7] sm:$0xff]   ;;  %v3772_v1 = vshrl.u32 %v14852_v15, %v11847_v60  ;;  %v3775_v35 = vshrl.u32 %v14835_v54, %v11847_v60 }
 0x6e2   : > { %15023 = vst [vmem:[#allocation28_spill] sm:$0xff] %v11868_v27  ;;  %v4084_v18 = vshrl.u32 %v14852_v15, %v11850_v43  ;;  %v11889_v26 = vshrl.u32 %v14835_v54, %v11850_v43  ;;  %vm3964_vm10 = vcmp.gt.s32.totalorder %v3963_v56, 0  ;;  %v4275_v40 = vadd.s32 1, %v7884_v28  ;;  %8607 = vmatprep.subr.bf16.mxu1 %v8966_v20 }
 0x6e3   : > { %15022 = vst [vmem:[#allocation68_spill] sm:$0xff] %v11864_v39  ;;  %v4165_v32 = vshrl.u32 %v4164_v7, 23  ;;  %v3450_v48 = vshll.u32 %v14865_v63, %v11694_v33  ;;  %v3451_v58 = vshrl.u32 %v14870_v29, %v11699_v42  ;;  %v3453_v60 = vshll.u32 %v14870_v29, %v11694_v33  ;;  %8608 = vmatpush3.bf16.msra.mxu1 %v8966_v20 }
 0x6e4   : > { %v3454_v38 = vshrl.u32 %v14871_v8, %v11699_v42  ;;  %vm3780_vm13 = vcmp.lt.s32.totalorder %v11862_v5, 4  ;;  %vm4092_vm5 = vcmp.lt.s32.totalorder %v11864_v39, 4  ;;  %v3456_v28 = vshll.u32 %v14871_v8, %v11694_v33 }
 0x6e5   : > { %v3457_v7 = vshrl.u32 %v14837_v6, %v11699_v42  ;;  %v11906_v14 = vor.u32 %v3772_v1, %v3771_v62  ;;  %v3776_v43 = vor.u32 %v3775_v35, %v3774_v47  ;;  %v11908_v59 = vor.u32 %v4084_v18, %v4083_v36 }
 0x6e6   : > { %v3965_v20 = vsel %vm3964_vm10, %v3963_v56, 0  ;;  %vm4276_vm4 = vcmp.gt.s32.totalorder %v4275_v40, 0  ;;  %v7880_v16 = vadd.s32 4294967169, %v4165_v32  ;;  %v15026_v25 = vand.u32 2147483647, %v11661_v41 }
 0x6e7   : > { %15024 = vst [vmem:[#allocation61_spill] sm:$0xff] %v11906_v14  ;;  %15025 = vst [vmem:[#allocation62_spill] sm:$0xff] %v11908_v59  ;;  %v3452_v53 = vor.u32 %v3451_v58, %v3450_v48  ;;  %v11915_v33 = vor.u32 %v3454_v38, %v3453_v60  ;;  %vm3465_vm14 = vcmp.lt.s32.totalorder %v11705_v30, 1  ;;  %v14666_v62 = vand.u32 2147483647, %v11668_v55 }
 0x6e8   : > { %v3440_v9 = vand.u32 8388607, %v15026_v25  ;;  %v3458_v47 = vor.u32 %v3457_v7, %v3456_v28  ;;  %v3346_v36 = vshll.u32 %v14865_v63, %v11707_v51  ;;  %v3347_v56 = vshrl.u32 %v14870_v29, %v11725_v57 }
 0x6e9   : > { %v3349_v32 = vshll.u32 %v14870_v29, %v11707_v51  ;;  %v3350_v58 = vshrl.u32 %v14871_v8, %v11725_v57  ;;  %v3352_v25 = vshll.u32 %v14871_v8, %v11707_v51  ;;  %v3353_v60 = vshrl.u32 %v14837_v6, %v11725_v57 }
 0x6ea   : > { %v11935_v38 = vsel %vm3780_vm13, %v11906_v14, 920167782  ;;  %v11939_v48 = vsel %vm3780_vm13, %v3776_v43, 1326507024  ;;  %v11941_v1 = vshrl.u32 %v3965_v20, 5  ;;  %v3441_v35 = vor.u32 8388608, %v3440_v9 }
 0x6eb   : > { %v11943_v18 = vand.u32 31, %v3965_v20  ;;  %v4277_v28 = vsel %vm4276_vm4, %v4275_v40, 0  ;;  %v4171_v51 = vadd.s32 1, %v7880_v16  ;;  %v3336_v7 = vand.u32 8388607, %v14666_v62 }
 0x6ec   : > { %15027 = vst [vmem:[#allocation64_spill] sm:$0xff] %v11941_v1  ;;  %vm3466_vm7 = vcmp.lt.s32.totalorder %v11705_v30, 2  ;;  %v3473_v0 = vsel %vm3465_vm14, %v3452_v53, %v11915_v33  ;;  %v3475_v43 = vsel %vm3467_vm1, %v3458_v47, %v11745_v4  ;;  %v3479_v9 = vsel %vm3467_vm1, %v11719_v10, %v11816_v19 }
 0x6ed   : > { %15028 = vst [vmem:[#allocation72_spill] sm:$0xff] %v11943_v18  ;;  %v3477_v40 = vsel %vm3465_vm14, %v11915_v33, %v3458_v47  ;;  %v3348_v16 = vor.u32 %v3347_v56, %v3346_v36  ;;  %v3351_v20 = vor.u32 %v3350_v58, %v3349_v32  ;;  %v3354_v62 = vor.u32 %v3353_v60, %v3352_v25 }
 0x6ee   : > { %v11965_v55 = vsel %vm4092_vm5, %v11908_v59, 920167782  ;;  %v11967_v41 = vshll.u32 %v3441_v35, 8  ;;  %vm3361_vm0 = vcmp.lt.s32.totalorder %v11721_v45, 1  ;;  %vm3363_vm3 = vcmp.lt.s32.totalorder %v11721_v45, 3 }
 0x6ef   : > { %15029 = vst [vmem:[#allocation69_spill] sm:$0xff] %v11965_v55  ;;  %v11972_v10 = vsub.s32 32, %v11943_v18  ;;  %v3979_v4 = vshll.u32 %v14837_v6, %v11943_v18  ;;  %v3476_v19 = vsel %vm3466_vm7, %v3473_v0, %v3475_v43  ;;  %v3337_v36 = vor.u32 8388608, %v3336_v7 }
 0x6f0   : > { %v11978_v56 = vand.u32 31, %v4277_v28  ;;  %vm4172_vm9 = vcmp.gt.s32.totalorder %v4171_v51, 0  ;;  %v4476_v32 = vand.u32 2139095040, %v11868_v27  ;;  %v3480_v58 = vsel %vm3466_vm7, %v3477_v40, %v3479_v9 }
 0x6f1   : > { %15030 = vst [vmem:[#allocation71_spill] sm:$0xff] %v11972_v10  ;;  %v3449_v25 = vshrl.u32 %v14865_v63, %v11699_v42  ;;  %vm3362_vm10 = vcmp.lt.s32.totalorder %v11721_v45, 2  ;;  %v3369_v60 = vsel %vm3361_vm0, %v3348_v16, %v3351_v20  ;;  %v3371_v0 = vsel %vm3363_vm3, %v3354_v62, %v11821_v24 }
 0x6f2   : > { %15031 = vst [vmem:[#allocation47_spill] sm:$0xff] %v11978_v56  ;;  %v11992_v35 = vmul.u32.u64.low %v11967_v41, %v3476_v19  ;;  %v11993_v7 = vmul.u32.u64.high %v11967_v41, %v3476_v19, %v11992_v35  ;;  %v3373_v43 = vsel %vm3361_vm0, %v3351_v20, %v3354_v62  ;;  %v3375_v42 = vsel %vm3363_vm3, %v11791_v52, %v11826_v22 }
 0x6f3   : > { %v4173_v9 = vsel %vm4172_vm9, %v4171_v51, 0  ;;  %v12003_v40 = vmul.u32.u64.low %v11967_v41, %v3480_v58  ;;  %v12004_v27 = vmul.u32.u64.high %v11967_v41, %v3480_v58, %v12003_v40  ;;  %v12006_v55 = vshll.u32 %v3337_v36, 8 }
 0x6f4   : > { %v3982_v24 = vshll.u32 %v14852_v15, %v11943_v18  ;;  %v4477_v19 = vshrl.u32 %v4476_v32, 23  ;;  %v3470_v59 = vsel %vm3468_vm15, %v3458_v47, 2102212464  ;;  %v3372_v14 = vsel %vm3362_vm10, %v3369_v60, %v3371_v0 }
 0x6f5   : > { %v3980_v52 = vshrl.u32 %v14852_v15, %v11972_v10  ;;  %v3983_v22 = vshrl.u32 %v14835_v54, %v11972_v10  ;;  %v12020_v51 = vadd.f32 %v11656_v49, %v11532_v50  ;;  %v3376_v36 = vsel %vm3362_vm10, %v3373_v43, %v3375_v42 }
 0x6f6   : > { %v12024_v32 = vshrl.u32 %v4277_v28, 5  ;;  %v12027_v47 = vsub.s32 32, %v11978_v56  ;;  %v12029_v58 = vand.u32 31, %v4173_v9  ;;  %v3469_v60 = vsel %vm3465_vm14, %v3449_v25, %v3452_v53 }
 0x6f7   : > { %15032 = vst [vmem:[#allocation73_spill] sm:$0xff] %v12020_v51  ;;  %v3471_v0 = vsel %vm3467_vm1, %v11915_v33, %v3470_v59  ;;  %v3345_v50 = vshrl.u32 %v14865_v63, %v11725_v57  ;;  %v12039_v40 = vmul.u32.u64.low %v12006_v55, %v3372_v14  ;;  %v12040_v43 = vmul.u32.u64.high %v12006_v55, %v3372_v14, %v12039_v40 }
 0x6f8   : > { %15033 = vst [vmem:[#allocation70_spill] sm:$0xff] %v12024_v32  ;;  %15034 = vst [vmem:[#allocation55_spill] sm:$0xff] %v12027_v47  ;;  %v7892_v28 = vadd.s32 4294967169, %v4477_v19  ;;  %v3366_v42 = vsel %vm3364_vm11, %v3354_v62, 2102212464  ;;  %v12046_v53 = vmul.u32.u64.low %v12006_v55, %v3376_v36  ;;  %v12047_v25 = vmul.u32.u64.high %v12006_v55, %v3376_v36, %v12046_v53 }
 0x6f9   : > { %15035 = vst [vmem:[#allocation74_spill] sm:$0xff] %v12029_v58  ;;  %v15037_v59 = vor.u32 %v11889_v26, %v11878_v37  ;;  %v12056_v14 = vor.u32 %v3980_v52, %v3979_v4  ;;  %v3984_v33 = vor.u32 %v3983_v22, %v3982_v24  ;;  %vm3988_vm15 = vcmp.lt.s32.totalorder %v11941_v1, 4  ;;  %v8967_v52 = vld [vmem:[%s15036_s16 + $0x18] sm:$0xff]   ;;  %v8968_v22 = vld [vmem:[%s15036_s16 + $0x10] sm:$0xff]  }
 0x6fa   : > { %v4291_v19 = vshll.u32 %v14837_v6, %v11978_v56  ;;  %v4292_v62 = vshrl.u32 %v14852_v15, %v12027_v47  ;;  %v3472_v36 = vsel %vm3466_vm7, %v3469_v60, %v3471_v0  ;;  %v3491_v37 = vadd.s32 1, %v11993_v7  ;;  %8625 = vmatprep.subr.bf16.mxu0 %v8967_v52 }
 0x6fb   : > { %v12054_v57 = vsel %vm4092_vm5, %v15037_v59, 1326507024  ;;  %15039 = vst [vmem:[#allocation67_spill] sm:$0xff] %v12056_v14  ;;  %v12067_v26 = vsub.s32 32, %v12029_v58  ;;  %vm3490_vm11 = vc.u32 %v12004_v27, %v11992_v35  ;;  %v3365_v4 = vsel %vm3361_vm0, %v3345_v50, %v3348_v16  ;;  %8626 = vmatpush3.bf16.msra.mxu0 %v8967_v52 }
 0x6fc   : > { %15038 = vst [vmem:[#allocation66_spill] sm:$0xff] %v12054_v57  ;;  %v3367_v24 = vsel %vm3363_vm3, %v3351_v20, %v3366_v42  ;;  %v4294_v30 = vshll.u32 %v14852_v15, %v11978_v56  ;;  %vm4300_vm4 = vcmp.lt.s32.totalorder %v12024_v32, 4  ;;  %v4483_v60 = vadd.s32 1, %v7892_v28  ;;  %8627 = vmatprep.subr.bf16.mxu0 %v8968_v22 }
 0x6fd   : > { %15040 = vst [vmem:[#allocation75_spill] sm:$0xff] %v12067_v26  ;;  %v4372_v0 = vand.u32 2139095040, %v12020_v51  ;;  %v12084_v53 = vsel %vm3988_vm15, %v12056_v14, 920167782  ;;  %v12088_v16 = vsel %vm3988_vm15, %v3984_v33, 1326507024  ;;  %v3488_v50 = vmul.u32 %v11967_v41, %v3472_v36 }
 0x6fe   : > { %15041 = vst [vmem:[#allocation76_spill] sm:$0xff] %v12084_v53  ;;  %15042 = vst [vmem:[#allocation77_spill] sm:$0xff] %v12088_v16  ;;  %v12090_v20 = vshrl.u32 %v4173_v9, 5  ;;  %v4295_v28 = vshrl.u32 %v14835_v54, %v12027_v47  ;;  %v4187_v42 = vshll.u32 %v14837_v6, %v12029_v58  ;;  %v3492_v59 = vsel %vm3490_vm11, %v3491_v37, %v11993_v7  ;;  %v8969_v47 = vld [vmem:[%s15036_s16 + $0x8] sm:$0xff]  }
 0x6ff   : > { %v3368_v33 = vsel %vm3362_vm10, %v3365_v4, %v3367_v24  ;;  %v12103_v9 = vor.u32 %v4292_v62, %v4291_v19  ;;  %v4188_v41 = vshrl.u32 %v14852_v15, %v12067_v26  ;;  %v4190_v36 = vshll.u32 %v14852_v15, %v12029_v58  ;;  %8628 = vmatpush3.bf16.msra.mxu0 %v8968_v22 }
 0x700   : > { %15043 = vst [vmem:[#allocation78_spill] sm:$0xff] %v12090_v20  ;;  %v3387_v51 = vadd.s32 1, %v12040_v43  ;;  %vm4484_vm14 = vcmp.gt.s32.totalorder %v4483_v60, 0  ;;  %v4373_v56 = vshrl.u32 %v4372_v0, 23  ;;  %vm3386_vm1 = vc.u32 %v12047_v25, %v12039_v40  ;;  %8629 = vmatprep.subr.bf16.mxu0 %v8969_v47 }
 0x701   : > { %15044 = vst [vmem:[#allocation79_spill] sm:$0xff] %v12103_v9  ;;  %v12114_v7 = vadd.s32 %v3492_v59, %v3488_v50  ;;  %v3384_v19 = vmul.u32 %v12006_v55, %v3368_v33  ;;  %v3658_v62 = vshll.u32 %v14865_v63, %v11717_v13  ;;  %v3659_v37 = vshrl.u32 %v14870_v29, %v11740_v21 }
 0x702   : > { %v3661_v4 = vshll.u32 %v14870_v29, %v11717_v13  ;;  %v3662_v24 = vshrl.u32 %v14871_v8, %v11740_v21  ;;  %v3664_v52 = vshll.u32 %v14871_v8, %v11717_v13  ;;  %v3665_v0 = vshrl.u32 %v14837_v6, %v11740_v21 }
 0x703   : > { %v4296_v55 = vor.u32 %v4295_v28, %v4294_v30  ;;  %v4191_v50 = vshrl.u32 %v14835_v54, %v12067_v26  ;;  %vm14742_vm7 = vcmp.lt.s32.totalorder %v12090_v20, 4  ;;  %v3388_v59 = vsel %vm3386_vm1, %v3387_v51, %v12040_v43  ;;  %8630 = vmatpush3.bf16.msra.mxu0 %v8969_v47 }
 0x704   : > { %v4485_v33 = vsel %vm4484_vm14, %v4483_v60, 0  ;;  %v12136_v45 = vadd.f32 %v11537_v23, %v11656_v49  ;;  %v12140_v13 = vadd.f32 %v11656_v49, %v11540_v17  ;;  %v15047_v22 = vand.u32 2147483647, %v11672_v61 }
 0x705   : > { %v12147_v28 = vsel %vm4300_vm4, %v12103_v9, 920167782  ;;  %v12149_v51 = vor.u32 %v4188_v41, %v4187_v42  ;;  %v7888_v43 = vadd.s32 4294967169, %v4373_v56  ;;  %v3494_v60 = vadd.s32 536870912, %v12114_v7 }
 0x706   : > { %15045 = vst [vmem:[#allocation80_spill] sm:$0xff] %v12136_v45  ;;  %15046 = vst [vmem:[#allocation81_spill] sm:$0xff] %v12140_v13  ;;  %v3648_v30 = vand.u32 8388607, %v15047_v22  ;;  %v12152_v26 = vadd.s32 %v3388_v59, %v3384_v19  ;;  %v3660_v23 = vor.u32 %v3659_v37, %v3658_v62  ;;  %v3663_v58 = vor.u32 %v3662_v24, %v3661_v4 }
 0x707   : > { %15048 = vst [vmem:[#allocation82_spill] sm:$0xff] %v12147_v28  ;;  %15049 = vst [vmem:[#allocation83_spill] sm:$0xff] %v12149_v51  ;;  %v3666_v14 = vor.u32 %v3665_v0, %v3664_v52  ;;  %v4192_v17 = vor.u32 %v4191_v50, %v4190_v36  ;;  %v12154_v16 = vand.u32 31, %v4485_v33  ;;  %vm3673_vm0 = vcmp.lt.s32.totalorder %v11737_v12, 1 }
 0x708   : > { %vm3675_vm3 = vcmp.lt.s32.totalorder %v11737_v12, 3  ;;  %v12160_v42 = vsel %vm4300_vm4, %v4296_v55, 1326507024  ;;  %v4684_v56 = vand.u32 2139095040, %v12136_v45  ;;  %v4580_v41 = vand.u32 2139095040, %v12140_v13 }
 0x709   : > { %15050 = vst [vmem:[#allocation84_spill] sm:$0xff] %v12154_v16  ;;  %15051 = vst [vmem:[#allocation85_spill] sm:$0xff] %v12160_v42  ;;  %v3649_v19 = vor.u32 8388608, %v3648_v30  ;;  %v12167_v47 = vsel %vm14742_vm7, %v12149_v51, 920167782  ;;  %v12169_v36 = vshrl.u32 %v4485_v33, 5  ;;  %v3681_v24 = vsel %vm3673_vm0, %v3660_v23, %v3663_v58 }
 0x70a   : > { %15052 = vst [vmem:[#allocation86_spill] sm:$0xff] %v12167_v47  ;;  %v4379_v62 = vadd.s32 1, %v7888_v43  ;;  %v12171_v37 = vshrl.u32 %v3494_v60, 30  ;;  %v3390_v4 = vadd.s32 536870912, %v12152_v26  ;;  %vm3674_vm9 = vcmp.lt.s32.totalorder %v11737_v12, 2 }
 0x70b   : > { %15053 = vst [vmem:[#allocation87_spill] sm:$0xff] %v12169_v36  ;;  %v3683_v52 = vsel %vm3675_vm3, %v3666_v14, %v11831_v46  ;;  %v12182_v0 = vsel %vm14742_vm7, %v4192_v17, 1326507024  ;;  %v12185_v55 = vsub.s32 32, %v12154_v16  ;;  %v3685_v50 = vsel %vm3673_vm0, %v3663_v58, %v3666_v14 }
 0x70c   : > { %15054 = vst [vmem:[#allocation88_spill] sm:$0xff] %v12182_v0  ;;  %v3687_v59 = vsel %vm3675_vm3, %v11799_v44, %v11835_v2  ;;  %v4499_v33 = vshll.u32 %v14837_v6, %v12154_v16  ;;  %v4685_v22 = vshrl.u32 %v4684_v56, 23  ;;  %v4581_v46 = vshrl.u32 %v4580_v41, 23 }
 0x70d   : > { %15055 = vst [vmem:[#allocation89_spill] sm:$0xff] %v12185_v55  ;;  %v12195_v30 = vshll.u32 %v3649_v19, 8  ;;  %vm4380_vm10 = vcmp.gt.s32.totalorder %v4379_v62, 0  ;;  %v3496_v43 = vshll.u32 %v12171_v37, 30  ;;  %v3684_v60 = vsel %vm3674_vm9, %v3681_v24, %v3683_v52 }
 0x70e   : > { %v12201_v13 = vshrl.u32 %v3390_v4, 30  ;;  %v3688_v44 = vsel %vm3674_vm9, %v3685_v50, %v3687_v59  ;;  %v3554_v2 = vshll.u32 %v14865_v63, %v11727_v3  ;;  %v3555_v56 = vshrl.u32 %v14870_v29, %v11757_v34 }
 0x70f   : > { %v3557_v41 = vshll.u32 %v14870_v29, %v11727_v3  ;;  %v3558_v19 = vshrl.u32 %v14871_v8, %v11757_v34  ;;  %v3560_v24 = vshll.u32 %v14871_v8, %v11727_v3  ;;  %v3561_v4 = vshrl.u32 %v14837_v6, %v11757_v34 }
 0x710   : > { %v12219_v52 = vshll.u32 %v14852_v15, %v12154_v16  ;;  %v3657_v50 = vshrl.u32 %v14865_v63, %v11740_v21  ;;  %v12224_v59 = vmul.u32.u64.low %v12195_v30, %v3684_v60  ;;  %v12225_v17 = vmul.u32.u64.high %v12195_v30, %v3684_v60, %v12224_v59 }
 0x711   : > { %v12229_v45 = vsub.s32 %v12114_v7, %v3496_v43  ;;  %v12232_v3 = vmul.u32.u64.low %v12195_v30, %v3688_v44  ;;  %v12233_v51 = vmul.u32.u64.high %v12195_v30, %v3688_v44, %v12232_v3  ;;  %v15056_v0 = vand.u32 2147483647, %v11677_v11  ;;  %v15092_v11 = vld [vmem:[#allocation46_spill] sm:$0xff] }
 0x712   : > { %v4381_v16 = vsel %vm4380_vm10, %v4379_v62, 0  ;;  %v7900_v20 = vadd.s32 4294967169, %v4685_v22  ;;  %v7896_v9 = vadd.s32 4294967169, %v4581_v46  ;;  %v3678_v21 = vsel %vm3676_vm8, %v3666_v14, 2102212464  ;;  %v15058_v62 = vld [vmem:[#allocation49_spill] sm:$0xff] }
 0x713   : > { %v3544_v47 = vand.u32 8388607, %v15056_v0  ;;  %v3392_v60 = vshll.u32 %v12201_v13, 30  ;;  %v12241_v42 = vor.u32 %v3555_v56, %v3554_v2  ;;  %v12243_v7 = vor.u32 %v3558_v19, %v3557_v41 }
 0x714   : > { %v3562_v43 = vor.u32 %v3561_v4, %v3560_v24  ;;  %v4500_v44 = vshrl.u32 %v14852_v15, %v12185_v55  ;;  %v12249_v0 = vadd.f32 %v11542_v31, %v11656_v49  ;;  %vm3569_vm11 = vcmp.lt.s32.totalorder %v15058_v62, 1 }
 0x715   : > { %vm3571_vm14 = vcmp.lt.s32.totalorder %v15058_v62, 3  ;;  %v3499_v14 = vsub.s32 0, %v12229_v45  ;;  %v3677_v22 = vsel %vm3673_vm0, %v3657_v50, %v3660_v23  ;;  %v3679_v46 = vsel %vm3675_vm3, %v3663_v58, %v3678_v21  ;;  %v15060_v23 = vld [vmem:[#allocation60_spill] sm:$0xff]  ;;  %v15062_v50 = vld [vmem:[#allocation50_spill] sm:$0xff] }
 0x716   : > { %15057 = vst [vmem:[#allocation90_spill] sm:$0xff] %v12249_v0  ;;  %v3545_v2 = vor.u32 8388608, %v3544_v47  ;;  %v4503_v56 = vshrl.u32 %v14835_v54, %v12185_v55  ;;  %vm14741_vm8 = vcmp.lt.s32.totalorder %v12169_v36, 4  ;;  %v12261_v31 = vand.u32 31, %v4381_v16 }
 0x717   : > { %v4691_v41 = vadd.s32 1, %v7900_v20  ;;  %v4587_v19 = vadd.s32 1, %v7896_v9  ;;  %v12264_v24 = vsub.s32 %v12152_v26, %v3392_v60  ;;  %vm3570_vm1 = vcmp.lt.s32.totalorder %v15058_v62, 2  ;;  %v15061_v9 = vld [vmem:[#allocation63_spill] sm:$0xff] }
 0x718   : > { %15059 = vst [vmem:[#allocation49_spill] sm:$0xff] %v12261_v31  ;;  %v3577_v58 = vsel %vm3569_vm11, %v12241_v42, %v12243_v7  ;;  %v3579_v47 = vsel %vm3571_vm14, %v3562_v43, %v15060_v23  ;;  %v3680_v4 = vsel %vm3674_vm9, %v3677_v22, %v3679_v46  ;;  %v3699_v20 = vadd.s32 1, %v12225_v17  ;;  %v15064_v23 = vld [vmem:[#allocation19_spill] sm:$0xff] }
 0x719   : > { %v3581_v26 = vsel %vm3569_vm11, %v12243_v7, %v3562_v43  ;;  %v3583_v3 = vsel %vm3571_vm14, %v15062_v50, %v15061_v9  ;;  %v4892_v21 = vand.u32 2139095040, %v12249_v0  ;;  %v7853_v60 = vmin.u32 %v3499_v14, %v12229_v45 }
 0x71a   : > { %vm3698_vm0 = vc.u32 %v12233_v51, %v12224_v59  ;;  %v12288_v12 = vshll.u32 %v3545_v2, 8  ;;  %v12290_v22 = vor.u32 %v4500_v44, %v4499_v33  ;;  %v4504_v46 = vor.u32 %v4503_v56, %v12219_v52 }
 0x71b   : > { %v12295_v55 = vadd.f32 %v11656_v49, %v15064_v23  ;;  %v3580_v9 = vsel %vm3570_vm1, %v3577_v58, %v3579_v47  ;;  %vm4692_vm3 = vcmp.gt.s32.totalorder %v4691_v41, 0  ;;  %v3395_v50 = vsub.s32 0, %v12264_v24 }
 0x71c   : > { %15063 = vst [vmem:[#allocation60_spill] sm:$0xff] %v12290_v22  ;;  %v3696_v14 = vmul.u32 %v12195_v30, %v3680_v4  ;;  %v3584_v2 = vsel %vm3570_vm1, %v3581_v26, %v3583_v3  ;;  %v12303_v0 = vshrl.u32 %v4381_v16, 5  ;;  %v12306_v33 = vsub.s32 32, %v12261_v31 }
 0x71d   : > { %15065 = vst [vmem:[#allocation63_spill] sm:$0xff] %v12295_v55  ;;  %vm4588_vm9 = vcmp.gt.s32.totalorder %v4587_v19, 0  ;;  %v3700_v49 = vsel %vm3698_vm0, %v3699_v20, %v12225_v17  ;;  %v4893_v52 = vshrl.u32 %v4892_v21, 23  ;;  %v3501_v44 = vclz %v7853_v60 }
 0x71e   : > { %15066 = vst [vmem:[#allocation50_spill] sm:$0xff] %v12303_v0  ;;  %15067 = vst [vmem:[#allocation19_spill] sm:$0xff] %v12306_v33  ;;  %v12310_v56 = vmul.u32.u64.low %v12288_v12, %v3580_v9  ;;  %v12311_v58 = vmul.u32.u64.high %v12288_v12, %v3580_v9, %v12310_v56  ;;  %v4693_v47 = vsel %vm4692_vm3, %v4691_v41, 0  ;;  %v3553_v30 = vshrl.u32 %v14865_v63, %v11757_v34 }
 0x71f   : > { %v12317_v16 = vmul.u32.u64.low %v12288_v12, %v3584_v2  ;;  %v12318_v4 = vmul.u32.u64.high %v12288_v12, %v3584_v2, %v12317_v16  ;;  %v4589_v26 = vsel %vm4588_vm9, %v4587_v19, 0  ;;  %v7849_v3 = vmin.u32 %v3395_v50, %v12264_v24 }
 0x720   : > { %v12321_v23 = vadd.s32 %v3700_v49, %v3696_v14  ;;  %v3574_v17 = vsel %vm3572_vm2, %v3562_v43, 2102212464  ;;  %v4395_v20 = vshll.u32 %v14837_v6, %v12261_v31  ;;  %v4396_v41 = vshrl.u32 %v14852_v15, %v12306_v33 }
 0x721   : > { %v4398_v34 = vshll.u32 %v14852_v15, %v12261_v31  ;;  %v4399_v21 = vshrl.u32 %v14835_v54, %v12306_v33  ;;  %v12336_v19 = vsel %vm14741_vm8, %v12290_v22, 920167782  ;;  %v12338_v60 = vand.u32 31, %v4693_v47 }
 0x722   : > { %15068 = vst [vmem:[#allocation91_spill] sm:$0xff] %v12336_v19  ;;  %v7908_v43 = vadd.s32 4294967169, %v4893_v52  ;;  %v7854_v9 = vadd.s32 4294967294, %v3501_v44  ;;  %v12340_v50 = vand.u32 31, %v4589_v26  ;;  %v4788_v14 = vand.u32 2139095040, %v12295_v55 }
 0x723   : > { %15069 = vst [vmem:[#allocation92_spill] sm:$0xff] %v12338_v60  ;;  %v3573_v2 = vsel %vm3569_vm11, %v3553_v30, %v12241_v42  ;;  %v3575_v49 = vsel %vm3571_vm14, %v12243_v7, %v3574_v17  ;;  %v12351_v16 = vsel %vm14741_vm8, %v4504_v46, 1326507024  ;;  %vm14740_vm2 = vcmp.lt.s32.totalorder %v12303_v0, 4 }
 0x724   : > { %15070 = vst [vmem:[#allocation93_spill] sm:$0xff] %v12340_v50  ;;  %15071 = vst [vmem:[#allocation94_spill] sm:$0xff] %v12351_v16  ;;  %v3397_v52 = vclz %v7849_v3  ;;  %v3702_v44 = vadd.s32 536870912, %v12321_v23  ;;  %v12355_v19 = vor.u32 %v4396_v41, %v4395_v20  ;;  %v4400_v55 = vor.u32 %v4399_v21, %v4398_v34 }
 0x725   : > { %v12357_v33 = vshrl.u32 %v4693_v47, 5  ;;  %v12359_v31 = vshrl.u32 %v4589_v26, 5  ;;  %v12362_v42 = vsub.s32 32, %v12338_v60  ;;  %vm7855_vm10 = vcmp.lt.s32.totalorder %v7854_v9, 0 }
 0x726   : > { %15072 = vst [vmem:[#allocation95_spill] sm:$0xff] %v12355_v19  ;;  %v3576_v7 = vsel %vm3570_vm1, %v3573_v2, %v3575_v49  ;;  %v3595_v46 = vadd.s32 1, %v12311_v58  ;;  %v12368_v30 = vsub.s32 32, %v12340_v50  ;;  %v4899_v3 = vadd.s32 1, %v7908_v43 }
 0x727   : > { %15073 = vst [vmem:[#allocation96_spill] sm:$0xff] %v12357_v33  ;;  %15074 = vst [vmem:[#allocation97_spill] sm:$0xff] %v12359_v31  ;;  %v4789_v17 = vshrl.u32 %v4788_v14, 23  ;;  %vm3594_vm11 = vc.u32 %v12318_v4, %v12310_v56  ;;  %v4707_v47 = vshll.u32 %v14837_v6, %v12338_v60  ;;  %v12376_v26 = vshll.u32 %v14852_v15, %v12338_v60 }
 0x728   : > { %15075 = vst [vmem:[#allocation98_spill] sm:$0xff] %v12362_v42  ;;  %15076 = vst [vmem:[#allocation99_spill] sm:$0xff] %v12368_v30  ;;  %v7850_v20 = vadd.s32 4294967294, %v3397_v52  ;;  %v12378_v62 = vshrl.u32 %v3702_v44, 30  ;;  %v12383_v41 = vsel %vm14740_vm2, %v12355_v19, 920167782  ;;  %v3592_v43 = vmul.u32 %v12288_v12, %v3576_v7 }
 0x729   : > { %15078 = vst [vmem:[#allocation101_spill] sm:$0xff] %v12383_v41  ;;  %v12387_v34 = vsel %vm14740_vm2, %v4400_v55, 1326507024  ;;  %v3504_v21 = vsel %vm7855_vm10, 0, %v7854_v9  ;;  %v4708_v14 = vshrl.u32 %v14852_v15, %v12362_v42  ;;  %v12394_v2 = vshrl.u32 %v14835_v54, %v12362_v42  ;;  %v15080_v19 = vld [vmem:[#allocation44_spill] sm:$0xff] }
 0x72a   : > { %15077 = vst [vmem:[#allocation100_spill] sm:$0xff] %v12378_v62  ;;  %15079 = vst [vmem:[#allocation102_spill] sm:$0xff] %v12387_v34  ;;  %v4603_v49 = vshll.u32 %v14837_v6, %v12340_v50  ;;  %v3596_v52 = vsel %vm3594_vm11, %v3595_v46, %v12311_v58  ;;  %v4604_v44 = vshrl.u32 %v14852_v15, %v12368_v30  ;;  %vm4900_vm14 = vcmp.gt.s32.totalorder %v4899_v3, 0  ;;  %v15081_v46 = vld [vmem:[#allocation54_spill] sm:$0xff]  ;;  %v15082_v41 = vld [vmem:[#allocation40_spill] sm:$0xff] }
 0x72b   : > { %v12403_v55 = vshll.u32 %v14852_v15, %v12340_v50  ;;  %v3489_v12 = vadd.s32 %v11992_v35, %v12004_v27  ;;  %v3505_v9 = vsub.s32 32, %v3504_v21  ;;  %v3509_v7 = vsub.s32 4294967266, %v3504_v21 }
 0x72c   : > { %vm7851_vm1 = vcmp.lt.s32.totalorder %v7850_v20, 0  ;;  %v3704_v42 = vshll.u32 %v12378_v62, 30  ;;  %v12408_v60 = vadd.s32 %v3596_v52, %v3592_v43  ;;  %v3866_v34 = vshll.u32 %v14865_v63, %v15081_v46 }
 0x72d   : > { %v3867_v50 = vshrl.u32 %v14870_v29, %v15082_v41  ;;  %v3869_v0 = vshll.u32 %v14870_v29, %v15081_v46  ;;  %v3870_v27 = vshrl.u32 %v14871_v8, %v15082_v41  ;;  %v3872_v35 = vshll.u32 %v14871_v8, %v15081_v46 }
 0x72e   : > { %v3873_v43 = vshrl.u32 %v14837_v6, %v15082_v41  ;;  %v12423_v52 = vor.u32 %v4708_v14, %v4707_v47  ;;  %v12429_v22 = vshrl.u32 %v14835_v54, %v12368_v30  ;;  %v7904_v16 = vadd.s32 4294967169, %v4789_v17 }
 0x72f   : > { %v3506_v36 = vshll.u32 %v12229_v45, %v3504_v21  ;;  %v3507_v28 = vshrl.u32 %v3489_v12, %v3505_v9  ;;  %v3510_v32 = vadd.s32 127, %v3509_v7  ;;  %v12433_v53 = vsub.s32 %v12321_v23, %v3704_v42  ;;  %v15090_v9 = vld [vmem:[#allocation26_spill] sm:$0xff] }
 0x730   : > { %15083 = vst [vmem:[#allocation54_spill] sm:$0xff] %v12423_v52  ;;  %v12436_v46 = vsel %vm4900_vm14, %v4899_v3, 0  ;;  %v12439_v47 = vsel %vm7851_vm1, 0, %v7850_v20  ;;  %v3598_v14 = vadd.s32 536870912, %v12408_v60  ;;  %v15084_v58 = vand.u32 2147483647, %v15080_v19 }
 0x731   : > { %v12444_v1 = vor.u32 %v4604_v44, %v4603_v49  ;;  %v12446_v17 = vor.u32 %v3867_v50, %v3866_v34  ;;  %v12448_v45 = vor.u32 %v3870_v27, %v3869_v0  ;;  %v3874_v21 = vor.u32 %v3873_v43, %v3872_v35  ;;  %v15086_v3 = vld [vmem:[#allocation58_spill] sm:$0xff]  ;;  %v15091_v19 = vld [vmem:[#allocation65_spill] sm:$0xff] }
 0x732   : > { %v3856_v30 = vand.u32 8388607, %v15084_v58  ;;  %v12450_v23 = vadd.s32 1, %v7904_v16  ;;  %v3385_v42 = vadd.s32 %v12039_v40, %v12047_v25  ;;  %vm3881_vm0 = vcmp.lt.s32.totalorder %v15086_v3, 1  ;;  %v15087_v16 = vld [vmem:[#allocation56_spill] sm:$0xff]  ;;  %v15088_v25 = vld [vmem:[#allocation51_spill] sm:$0xff] }
 0x733   : > { %15085 = vst [vmem:[#allocation40_spill] sm:$0xff] %v12444_v1  ;;  %vm3883_vm3 = vcmp.lt.s32.totalorder %v15086_v3, 3  ;;  %v12456_v20 = vor.u32 %v3507_v28, %v3506_v36  ;;  %v3511_v12 = vshll.u32 %v3510_v32, 23  ;;  %v3405_v49 = vsub.s32 4294967266, %v12439_v47  ;;  %v15089_v28 = vld [vmem:[#allocation57_spill] sm:$0xff] }
 0x734   : > { %v3707_v50 = vsub.s32 0, %v12433_v53  ;;  %v12460_v34 = vshrl.u32 %v3598_v14, 30  ;;  %v3857_v0 = vor.u32 8388608, %v3856_v30  ;;  %vm3882_vm9 = vcmp.lt.s32.totalorder %v15086_v3, 2  ;;  %v12475_v30 = vpop.f32.mrf.mxu0 }
 0x735   : > { %v3889_v40 = vsel %vm3881_vm0, %v12446_v17, %v12448_v45  ;;  %v3891_v32 = vsel %vm3883_vm3, %v3874_v21, %v15088_v25  ;;  %v3762_v36 = vshll.u32 %v14865_v63, %v15089_v28  ;;  %v3763_v7 = vshrl.u32 %v14870_v29, %v15090_v9 }
 0x736   : > { %v3765_v58 = vshll.u32 %v14870_v29, %v15089_v28  ;;  %v3766_v27 = vshrl.u32 %v14871_v8, %v15090_v9  ;;  %v3768_v35 = vshll.u32 %v14871_v8, %v15089_v28  ;;  %v3769_v43 = vshrl.u32 %v14837_v6, %v15090_v9  ;;  %v12505_v29 = vpop.f32.mrf.mxu0 }
 0x737   : > { %vm4716_vm10 = vcmp.lt.s32.totalorder %v12357_v33, 4  ;;  %v3512_v14 = vor.u32 4788187, %v3511_v12  ;;  %v7861_v25 = vmin.u32 %v3707_v50, %v12433_v53  ;;  %v3893_v44 = vsel %vm3881_vm0, %v12448_v45, %v3874_v21 }
 0x738   : > { %v3895_v10 = vsel %vm3883_vm3, %v15092_v11, %v15091_v19  ;;  %v3515_v18 = vcvt.s32.f32 %v12456_v20  ;;  %v3600_v28 = vshll.u32 %v12460_v34, 30  ;;  %v12496_v62 = vshll.u32 %v3857_v0, 8 }
 0x739   : > { %v15093_v61 = vand.u32 2147483647, %v15087_v16  ;;  %v3401_v50 = vsub.s32 32, %v12439_v47  ;;  %v3402_v57 = vshll.u32 %v12264_v24, %v12439_v47  ;;  %v3406_v39 = vadd.s32 127, %v3405_v49 }
 0x73a   : > { %v3892_v8 = vsel %vm3882_vm9, %v3889_v40, %v3891_v32  ;;  %v3896_v11 = vsel %vm3882_vm9, %v3893_v44, %v3895_v10  ;;  %v12509_v19 = vor.u32 %v3763_v7, %v3762_v36  ;;  %v12511_v20 = vor.u32 %v3766_v27, %v3765_v58  ;;  %v12532_v36 = vpop.f32.mrf.mxu0  ;;  %v15094_v27 = vld [vmem:[#allocation61_spill] sm:$0xff] }
 0x73b   : > { %v3752_v12 = vand.u32 8388607, %v15093_v61  ;;  %v3770_v0 = vor.u32 %v3769_v43, %v3768_v35  ;;  %v3709_v61 = vclz %v7861_v25  ;;  %v3865_v16 = vshrl.u32 %v14865_v63, %v15082_v41 }
 0x73c   : > { %vm3777_vm11 = vcmp.lt.s32.totalorder %v11862_v5, 1  ;;  %vm3779_vm14 = vcmp.lt.s32.totalorder %v11862_v5, 3  ;;  %vm4612_vm1 = vcmp.lt.s32.totalorder %v12359_v31, 4  ;;  %v12519_v24 = vsub.s32 %v12408_v60, %v3600_v28 }
 0x73d   : > { %v12522_v10 = vmul.u32.u64.low %v12496_v62, %v3892_v8  ;;  %v12523_v47 = vmul.u32.u64.high %v12496_v62, %v3892_v8, %v12522_v10  ;;  %v3753_v49 = vor.u32 8388608, %v3752_v12  ;;  %v3403_v44 = vshrl.u32 %v3385_v42, %v3401_v50  ;;  %v12568_v50 = vpop.f32.mrf.mxu0 }
 0x73e   : > { %v3886_v40 = vsel %vm3884_vm6, %v3874_v21, 2102212464  ;;  %v12529_v41 = vmul.u32.u64.low %v12496_v62, %v3896_v11  ;;  %v12530_v32 = vmul.u32.u64.high %v12496_v62, %v3896_v11, %v12529_v41  ;;  %v3407_v7 = vshll.u32 %v3406_v39, 23 }
 0x73f   : > { %vm3778_vm2 = vcmp.lt.s32.totalorder %v11862_v5, 2  ;;  %v3785_v8 = vsel %vm3777_vm11, %v12509_v19, %v12511_v20  ;;  %v3787_v60 = vsel %vm3779_vm14, %v3770_v0, %v11935_v38  ;;  %v3513_v42 = vand.u32 2147483647, %v3512_v14  ;;  %v12596_v3 = vpop.f32.mrf.mxu0 }
 0x740   : > { %v7862_v21 = vadd.s32 4294967294, %v3709_v61  ;;  %v3789_v58 = vsel %vm3777_vm11, %v12511_v20, %v3770_v0  ;;  %v3791_v39 = vsel %vm3779_vm14, %v15094_v27, %v11939_v48  ;;  %v3603_v35 = vsub.s32 0, %v12519_v24 }
 0x741   : > { %v3885_v43 = vsel %vm3881_vm0, %v3865_v16, %v12446_v17  ;;  %v3887_v38 = vsel %vm3883_vm3, %v12448_v45, %v3886_v40  ;;  %v12556_v14 = vshll.u32 %v3753_v49, 8  ;;  %v4608_v25 = vor.u32 %v12429_v22, %v12403_v55  ;;  %v15097_v17 = vld [vmem:[#allocation52_spill] sm:$0xff] }
 0x742   : > { %v12561_v28 = vshrl.u32 %v12436_v46, 5  ;;  %v12564_v48 = vand.u32 31, %v12436_v46  ;;  %v3788_v12 = vsel %vm3778_vm2, %v3785_v8, %v3787_v60  ;;  %vm3435_vm6 = vcmp.lt.s32.totalorder %v15097_v17, 0 }
 0x743   : > { %v12574_v45 = vsel %vm4716_vm10, %v12423_v52, 920167782  ;;  %v3404_v16 = vor.u32 %v3403_v44, %v3402_v57  ;;  %v3408_v22 = vor.u32 4788187, %v3407_v7  ;;  %v3792_v55 = vsel %vm3778_vm2, %v3789_v58, %v3791_v39  ;;  %v15104_v39 = vld [vmem:[#allocation22_spill] sm:$0xff] }
 0x744   : > { %15095 = vst [vmem:[#allocation58_spill] sm:$0xff] %v12561_v28  ;;  %15096 = vst [vmem:[#allocation51_spill] sm:$0xff] %v12564_v48  ;;  %vm4796_vm0 = vcmp.gt.s32.totalorder %v12450_v23, 0  ;;  %v3516_v46 = vmul.f32 %v3515_v18, %v3513_v42  ;;  %vm7863_vm3 = vcmp.lt.s32.totalorder %v7862_v21, 0  ;;  %v3888_v11 = vsel %vm3882_vm9, %v3885_v43, %v3887_v38 }
 0x745   : > { %15098 = vst [vmem:[#allocation57_spill] sm:$0xff] %v12574_v45  ;;  %v7857_v61 = vmin.u32 %v3603_v35, %v12519_v24  ;;  %v3907_v49 = vadd.s32 1, %v12523_v47  ;;  %v12584_v40 = vmul.u32.u64.low %v12556_v14, %v3788_v12  ;;  %v12585_v41 = vmul.u32.u64.high %v12556_v14, %v3788_v12, %v12584_v40 }
 0x746   : > { %vm3906_vm8 = vc.u32 %v12530_v32, %v12522_v10  ;;  %v3761_v57 = vshrl.u32 %v14865_v63, %v15090_v9  ;;  %v12593_v18 = vmul.u32.u64.low %v12556_v14, %v3792_v55  ;;  %v12594_v44 = vmul.u32.u64.high %v12556_v14, %v3792_v55, %v12593_v18  ;;  %v12643_v55 = vpop.f32.mrf.mxu0 }
 0x747   : > { %v15099_v7 = vor.u32 %v12394_v2, %v12376_v26  ;;  %v15101_v60 = vand.u32 2147483647, %v15097_v17  ;;  %v3409_v9 = vand.u32 2147483647, %v3408_v22  ;;  %v3411_v58 = vcvt.s32.f32 %v3404_v16 }
 0x748   : > { %v3782_v27 = vsel %vm3780_vm13, %v3770_v0, 2102212464  ;;  %vm3331_vm7 = vcmp.lt.s32.totalorder %v15104_v39, 0  ;;  %v12617_v26 = vsel %vm4612_vm1, %v12444_v1, 920167782  ;;  %v12620_v2 = vsub.s32 32, %v12564_v48 }
 0x749   : > { %v12603_v8 = vsel %vm4716_vm10, %v15099_v7, 1326507024  ;;  %vm12607_vm9 = vcmp.le.f32.partialorder %v15101_v60, 0.7853982  ;;  %15105 = vst [vmem:[#allocation65_spill] sm:$0xff] %v12617_v26  ;;  %v3712_v35 = vsel %vm7863_vm3, 0, %v7862_v21  ;;  %v3904_v43 = vmul.u32 %v12496_v62, %v3888_v11 }
 0x74a   : > { %15100 = vst [vmem:[#allocation26_spill] sm:$0xff] %v12603_v8  ;;  %15106 = vst [vmem:[#allocation46_spill] sm:$0xff] %v12620_v2  ;;  %v12626_v38 = vsel %vm4612_vm1, %v4608_v25, 1326507024  ;;  %v4915_v0 = vshll.u32 %v14837_v6, %v12564_v48  ;;  %v4797_v12 = vsel %vm4796_vm0, %v12450_v23, 0  ;;  %v3908_v16 = vsel %vm3906_vm8, %v3907_v49, %v12523_v47 }
 0x74b   : > { %15107 = vst [vmem:[#allocation61_spill] sm:$0xff] %v12626_v38  ;;  %v3517_v22 = vxor.u32 2147483648, %v3516_v46  ;;  %v3605_v21 = vclz %v7857_v61  ;;  %v3781_v62 = vsel %vm3777_vm11, %v3761_v57, %v12509_v19  ;;  %v3783_v25 = vsel %vm3779_vm14, %v12511_v20, %v3782_v27 }
 0x74c   : > { %v3412_v11 = vmul.f32 %v3411_v58, %v3409_v9  ;;  %v3697_v23 = vadd.s32 %v12224_v59, %v12233_v51  ;;  %v3713_v18 = vsub.s32 32, %v3712_v35  ;;  %v3717_v7 = vsub.s32 4294967266, %v3712_v35  ;;  %v12666_v58 = vpop.f32.mrf.mxu0 }
 0x74d   : > { %v4916_v47 = vshrl.u32 %v14852_v15, %v12620_v2  ;;  %v4918_v61 = vshll.u32 %v14852_v15, %v12564_v48  ;;  %v4919_v19 = vshrl.u32 %v14835_v54, %v12620_v2  ;;  %v12653_v49 = vadd.s32 %v3908_v16, %v3904_v43 }
 0x74e   : > { %vm4924_vm13 = vcmp.lt.s32.totalorder %v12561_v28, 4  ;;  %v12656_v20 = vand.u32 31, %v4797_v12  ;;  %v3784_v51 = vsel %vm3778_vm2, %v3781_v62, %v3783_v25  ;;  %v3803_v59 = vadd.s32 1, %v12585_v41 }
 0x74f   : > { %v3518_v57 = vsel %vm3435_vm6, %v3517_v22, %v3516_v46  ;;  %v3519_v60 = vsub.s32 4, %v12171_v37  ;;  %v7858_v9 = vadd.s32 4294967294, %v3605_v21  ;;  %vm3802_vm8 = vc.u32 %v12594_v44, %v12584_v40 }
 0x750   : > { %15108 = vst [vmem:[#allocation22_spill] sm:$0xff] %v12656_v20  ;;  %v3413_v27 = vxor.u32 2147483648, %v3412_v11  ;;  %v3714_v43 = vshll.u32 %v12433_v53, %v3712_v35  ;;  %v3715_v16 = vshrl.u32 %v3697_v23, %v3713_v18  ;;  %v3718_v2 = vadd.s32 127, %v3717_v7 }
 0x751   : > { %v12669_v5 = vor.u32 %v4916_v47, %v4915_v0  ;;  %v4920_v62 = vor.u32 %v4919_v19, %v4918_v61  ;;  %v3910_v25 = vadd.s32 536870912, %v12653_v49  ;;  %v3800_v46 = vmul.u32 %v12556_v14, %v3784_v51 }
 0x752   : > { %v12673_v22 = vshrl.u32 %v4797_v12, 5  ;;  %v12676_v21 = vsub.s32 32, %v12656_v20  ;;  %v12680_v48 = vshll.u32 %v14837_v6, %v12656_v20  ;;  %v3804_v53 = vsel %vm3802_vm8, %v3803_v59, %v12585_v41  ;;  %v12695_v12 = vpop.f32.mrf.mxu0  ;;  %v8565_v59 = vpop.f32.mrf.mxu1 }
 0x753   : > { %15109 = vst [vmem:[#allocation103_spill] sm:$0xff] %v12669_v5  ;;  %v12685_v35 = vshll.u32 %v14852_v15, %v12656_v20  ;;  %v12690_v0 = vsel %vm3435_vm6, %v3519_v60, %v12171_v37  ;;  %v3521_v14 = vsel %vm12607_vm9, %v15097_v17, %v3518_v57  ;;  %vm7859_vm2 = vcmp.lt.s32.totalorder %v7858_v9, 0  ;;  %v15118_v60 = vld [vmem:[#allocation24_spill] sm:$0xff] }
 0x754   : > { %v15110_v23 = vand.u32 2147483647, %v15104_v39  ;;  %v3414_v18 = vsel %vm3331_vm7, %v3413_v27, %v3412_v11  ;;  %v12705_v7 = vor.u32 %v3715_v16, %v3714_v43  ;;  %v3719_v37 = vshll.u32 %v3718_v2, 23  ;;  %v12737_v43 = vpop.f32.mrf.mxu0  ;;  %v6165_v16 = vpop.f32.mrf.mxu1 }
 0x755   : > { %v12710_v47 = vsel %vm4924_vm13, %v12669_v5, 920167782  ;;  %v12714_v61 = vsel %vm4924_vm13, %v4920_v62, 1326507024  ;;  %v12716_v19 = vshrl.u32 %v3910_v25, 30  ;;  %v12718_v51 = vadd.s32 %v3804_v53, %v3800_v46  ;;  %v15119_v5 = vld [vmem:[#allocation59_spill] sm:$0xff] }
 0x756   : > { %vm12699_vm11 = vcmp.le.f32.partialorder %v15110_v23, 0.7853982  ;;  %15113 = vst [vmem:[#allocation104_spill] sm:$0xff] %v12710_v47  ;;  %15114 = vst [vmem:[#allocation105_spill] sm:$0xff] %v12714_v61  ;;  %v12722_v11 = vshrl.u32 %v14852_v15, %v12676_v21  ;;  %9051 = vcosq.f32 %v3521_v14  ;;  %v12727_v57 = vsel %vm7859_vm2, 0, %v7858_v9  ;;  %v12765_v2 = vpop.f32.mrf.mxu0 }
 0x757   : > { %15115 = vst [vmem:[#allocation106_spill] sm:$0xff] %v12716_v19  ;;  %9053 = vsinq.f32 %v3521_v14  ;;  %v12733_v27 = vsel %vm12699_vm11, %v15104_v39, %v3414_v18  ;;  %v3593_v15 = vadd.s32 %v12310_v56, %v12318_v4  ;;  %v12739_v62 = vor.u32 4788187, %v3719_v37  ;;  %v8566_v56 = vpop.f32.mrf.mxu1  ;;  %v15117_v4 = vld [vmem:[#allocation48_spill] sm:$0xff]  ;;  %v12754_v47 = vld [vmem:[%s15116_s0] ss:$0 sm:$0xff] }
 0x758   : > { %v3609_v25 = vsub.s32 32, %v12727_v57  ;;  %v6281_v46 = vadd.f32 %v12505_v29, %v6165_v16  ;;  %v3613_v53 = vsub.s32 4294967266, %v12727_v57  ;;  %v3912_v14 = vshll.u32 %v12716_v19, 30  ;;  %s15325_s0 = sld [smem:[#allocation14_spill]] }
 0x759   : > { %v3806_v23 = vadd.s32 536870912, %v12718_v51  ;;  %v6289_v18 = vadd.f32 %v12475_v30, %v8565_v59  ;;  %v4074_v37 = vshll.u32 %v14865_v63, %v15118_v60  ;;  %v15120_v9 = vmov 2475754826   ;;  %v6168_v1 = vpop.f32.mrf.mxu1 }
 0x75a   : > { %v4075_v61 = vshrl.u32 %v15120_v9, %v15119_v5  ;;  %v6292_v29 = vadd.f32 %v12532_v36, %v8566_v56  ;;  %v4077_v16 = vshll.u32 %v15120_v9, %v15118_v60  ;;  %v15121_v28 = vmov 2131351028  }
 0x75b   : > { %v4078_v20 = vshrl.u32 %v15121_v28, %v15119_v5  ;;  %v4080_v30 = vshll.u32 %v15121_v28, %v15118_v60  ;;  %v4081_v59 = vshrl.u32 %v14837_v6, %v15119_v5  ;;  %v3721_v38 = vand.u32 2147483647, %v12739_v62  ;;  %v8569_v45 = vpop.f32.mrf.mxu1 }
 0x75c   : > { %v6349_v26 = vadd.f32 %v12754_v47, %v6281_v46  ;;  %v6352_v36 = vadd.f32 %v12754_v47, %v6292_v29  ;;  %v6284_v56 = vadd.f32 %v12568_v50, %v6168_v1  ;;  %v3610_v31 = vshll.u32 %v12519_v24, %v12727_v57  ;;  %v8596_v50 = vpop.f32.mrf.mxu0 }
 0x75d   : > { %v3611_v52 = vshrl.u32 %v3593_v15, %v3609_v25  ;;  %v12773_v8 = vshrl.u32 %v3806_v23, 30  ;;  %v6351_v60 = vadd.f32 %v12754_v47, %v6289_v18  ;;  %v3614_v33 = vadd.s32 127, %v3613_v53  ;;  %v6181_v15 = vpop.f32.mrf.mxu1  ;;  %v15124_v25 = vld [vmem:[#allocation68_spill] sm:$0xff] }
 0x75e   : > { %v12777_v19 = vsub.s32 %v12653_v49, %v3912_v14  ;;  %v15123_v62 = vand.u32 2147483647, %v15117_v4  ;;  %v6350_v29 = vadd.f32 %v12754_v47, %v6284_v56  ;;  %v12782_v17 = vor.u32 %v4075_v61, %v4074_v37  ;;  %v6315_v56 = vpop.f32.mrf.mxu0 }
 0x75f   : > { %15122 = vst [vmem:[#allocation24_spill] sm:$0xff] %v12773_v8  ;;  %v12784_v1 = vor.u32 %v4078_v20, %v4077_v16  ;;  %v4082_v24 = vor.u32 %v4081_v59, %v4080_v30  ;;  %v6368_v57 = vmax.f32 %v6352_v36, 0.0  ;;  %vm4089_vm14 = vcmp.lt.s32.totalorder %v15124_v25, 1  ;;  %v8570_v37 = vpop.f32.mrf.mxu1 }
 0x760   : > { %v4064_v46 = vand.u32 8388607, %v15123_v62  ;;  %v6365_v23 = vmax.f32 %v6349_v26, 0.0  ;;  %v6366_v53 = vmax.f32 %v6350_v29, 0.0  ;;  %v6297_v49 = vadd.f32 %v12643_v55, %v6181_v15 }
 0x761   : > { %v3808_v14 = vshll.u32 %v12773_v8, 30  ;;  %vm4091_vm6 = vcmp.lt.s32.totalorder %v15124_v25, 3  ;;  %v6367_v18 = vmax.f32 %v6351_v60, 0.0  ;;  %v6305_v61 = vadd.f32 %v12596_v3, %v8569_v45  ;;  %v6184_v62 = vpop.f32.mrf.mxu1  ;;  %v15126_v3 = vld [vmem:[#allocation62_spill] sm:$0xff]  ;;  %v15136_v8 = vld [vmem:[#allocation72_spill] sm:$0xff] }
 0x762   : > { %v3615_v20 = vshll.u32 %v3614_v33, 23  ;;  %v4065_v16 = vor.u32 8388608, %v4064_v46  ;;  %v6381_v30 = vpack.c.bf16 %v6366_v53, %v6365_v23  ;;  %v6308_v59 = vadd.f32 %v12666_v58, %v8570_v37  ;;  %v15125_v33 = vld [vmem:[#allocation66_spill] sm:$0xff]  ;;  %v15127_v53 = vld [vmem:[#allocation69_spill] sm:$0xff] }
 0x763   : > { %v12792_v36 = vpop.eup %9051  ;;  %v3915_v26 = vsub.s32 0, %v12777_v19  ;;  %vm4090_vm0 = vcmp.lt.s32.totalorder %v15124_v25, 2  ;;  %v4101_v55 = vsel %vm4089_vm14, %v12784_v1, %v4082_v24  ;;  %v6382_v60 = vpack.c.bf16 %v6368_v57, %v6367_v18  ;;  %v8573_v37 = vpop.f32.mrf.mxu1 }
 0x764   : > { %v12799_v45 = vpop.eup %9053  ;;  %v4103_v58 = vsel %vm4091_vm6, %v15126_v3, %v15125_v33  ;;  %v6353_v46 = vadd.f32 %v12754_v47, %v6297_v49  ;;  %v6356_v29 = vadd.f32 %v12754_v47, %v6308_v59  ;;  %v6300_v15 = vadd.f32 %v12695_v12, %v6184_v62  ;;  %8609 = vmatprep.mubr.msk.bf16.mxu1 %vm5370_vm12, %v6381_v30  ;;  %v8599_v3 = vpop.f32.mrf.mxu0 }
 0x765   : > { %v12810_v23 = vsub.s32 %v12718_v51, %v3808_v14  ;;  %v4097_v57 = vsel %vm4089_vm14, %v12782_v17, %v12784_v1  ;;  %v4099_v18 = vsel %vm4091_vm6, %v4082_v24, %v15127_v53  ;;  %v6355_v49 = vadd.f32 %v12754_v47, %v6305_v61  ;;  %8610 = vmatmul.mubr.msk.bf16.vlgmr.msra.gmra.mxu1 %vm5370_vm12, %v6382_v60  ;;  %v6197_v60 = vpop.f32.mrf.mxu1 }
 0x766   : > { %v15128_v12 = vcvt.s32.f32 %v12705_v7  ;;  %v12825_v51 = vor.u32 %v3611_v52, %v3610_v31  ;;  %v12827_v14 = vshll.u32 %v4065_v16, 8  ;;  %v6354_v59 = vadd.f32 %v12754_v47, %v6300_v15 }
 0x767   : > { %v12830_v62 = vor.u32 4788187, %v3615_v20  ;;  %v7869_v33 = vmin.u32 %v3915_v26, %v12777_v19  ;;  %v4104_v61 = vsel %vm4090_vm0, %v4101_v55, %v4103_v58  ;;  %v6372_v53 = vmax.f32 %v6356_v29, 0.0 }
 0x768   : > { %v12823_v30 = vmul.f32 %v15128_v12, %v3721_v38  ;;  %v4100_v38 = vsel %vm4090_vm0, %v4097_v57, %v4099_v18  ;;  %v6369_v7 = vmax.f32 %v6353_v46, 0.0  ;;  %v6370_v31 = vmax.f32 %v6354_v59, 0.0  ;;  %v8574_v12 = vpop.f32.mrf.mxu1  ;;  %v15129_v57 = vld [vmem:[#allocation39_spill] sm:$0xff] }
 0x769   : > { %v6313_v52 = vadd.f32 %v12765_v2, %v6197_v60  ;;  %v3811_v16 = vsub.s32 0, %v12810_v23  ;;  %v4073_v20 = vshrl.u32 %v14865_v63, %v15119_v5  ;;  %v6371_v15 = vmax.f32 %v6355_v49, 0.0  ;;  %v6328_v5 = vpop.f32.mrf.mxu0 }
 0x76a   : > { %v6321_v26 = vadd.f32 %v12737_v43, %v8573_v37  ;;  %v12843_v55 = vmul.u32.u64.low %v12827_v14, %v4104_v61  ;;  %v12844_v58 = vmul.u32.u64.high %v12827_v14, %v4104_v61, %v12843_v55  ;;  %v6383_v29 = vpack.c.bf16 %v6370_v31, %v6369_v7  ;;  %v6200_v43 = vpop.f32.mrf.mxu1 }
 0x76b   : > { %v6324_v4 = vadd.f32 %v8596_v50, %v8574_v12  ;;  %vm3643_vm3 = vcmp.lt.s32.totalorder %v15129_v57, 0  ;;  %v4094_v2 = vsel %vm4092_vm5, %v4082_v24, 2102212464  ;;  %v6384_v49 = vpack.c.bf16 %v6372_v53, %v6371_v15  ;;  %v8600_v12 = vpop.f32.mrf.mxu0 }
 0x76c   : > { %v12850_v46 = vmul.u32.u64.low %v12827_v14, %v4100_v38  ;;  %v12851_v18 = vmul.u32.u64.high %v12827_v14, %v4100_v38, %v12850_v46  ;;  %v3917_v37 = vclz %v7869_v33  ;;  %v6357_v59 = vadd.f32 %v12754_v47, %v6313_v52  ;;  %8613 = vmatprep.mubr.msk.bf16.mxu1 %vm5370_vm12, %v6383_v29  ;;  %v15131_v38 = vld [vmem:[#allocation100_spill] sm:$0xff] }
 0x76d   : > { %v6360_v61 = vadd.f32 %v12754_v47, %v6324_v4  ;;  %v6316_v60 = vadd.f32 %v6315_v56, %v6200_v43  ;;  %v15130_v50 = vsub.s32 4, %v12201_v13  ;;  %9055 = vcosq.f32 %v12733_v27  ;;  %8614 = vmatmul.mubr.msk.bf16.gmra.mxu1 %vm5370_vm12, %v6384_v49 }
 0x76e   : > { %v6359_v33 = vadd.f32 %v12754_v47, %v6321_v26  ;;  %v7865_v4 = vmin.u32 %v3811_v16, %v12810_v23  ;;  %v4093_v56 = vsel %vm4089_vm14, %v4073_v20, %v12782_v17  ;;  %v3725_v52 = vxor.u32 2147483648, %v12823_v30 }
 0x76f   : > { %v12862_v24 = vsel %vm3331_vm7, %v15130_v50, %v12201_v13  ;;  %v4095_v13 = vsel %vm4091_vm6, %v12784_v1, %v4094_v2  ;;  %v6358_v31 = vadd.f32 %v12754_v47, %v6316_v60  ;;  %v3617_v15 = vand.u32 2147483647, %v12830_v62  ;;  %v15135_v2 = vld [vmem:[#allocation23_spill] sm:$0xff] }
 0x770   : > { %v3619_v26 = vcvt.s32.f32 %v12825_v51  ;;  %v6376_v55 = vmax.f32 %v6360_v61, 0.0  ;;  %v7870_v16 = vadd.s32 4294967294, %v3917_v37  ;;  %v6373_v49 = vmax.f32 %v6357_v59, 0.0 }
 0x771   : > { %v6374_v43 = vmax.f32 %v6358_v31, 0.0  ;;  %v15132_v17 = vand.u32 2147483647, %v15129_v57  ;;  %v4096_v1 = vsel %vm4090_vm0, %v4093_v56, %v4095_v13  ;;  %v14766_v62 = vand.u32 2147483647, %v15135_v2  ;;  %v6331_v56 = vpop.f32.mrf.mxu0 }
 0x772   : > { %v6375_v60 = vmax.f32 %v6359_v33, 0.0  ;;  %v3813_v61 = vclz %v7865_v4  ;;  %v3970_v37 = vshll.u32 %v14865_v63, %v15136_v8  ;;  %vm4114_vm7 = vc.u32 %v12844_v58, %v12850_v46 }
 0x773   : > { %vm12881_vm5 = vcmp.le.f32.partialorder %v15132_v17, 0.7853982  ;;  %v6385_v59 = vpack.c.bf16 %v6374_v43, %v6373_v49  ;;  %v4115_v31 = vadd.s32 1, %v12851_v18  ;;  %9057 = vsinq.f32 %v12733_v27 }
 0x774   : > { %v6386_v13 = vpack.c.bf16 %v6376_v55, %v6375_v60  ;;  %v3726_v43 = vsel %vm3643_vm3, %v3725_v52, %v12823_v30  ;;  %vm7871_vm2 = vcmp.lt.s32.totalorder %v7870_v16, 0 }
 0x775   : > { %8617 = vmatprep.mubr.msk.bf16.mxu1 %vm5370_vm12, %v6385_v59  ;;  %v15138_v59 = vld [vmem:[#allocation34_spill] sm:$0xff]  ;;  %v12951_v42 = vsel %vm7871_vm2, 0, %v7870_v16 }
 0x776   : > { %8618 = vmatmul.mubr.msk.bf16.gmra.mxu1 %vm5370_vm12, %v6386_v13  ;;  %vm3539_vm8 = vcmp.lt.s32.totalorder %v15138_v59, 0 }
 0x78c   : > { %v8577_v7 = vpop.f32.mrf.mxu1 }
 0x78d   : > { %v6337_v51 = vadd.f32 %v8599_v3, %v8577_v7  ;;  %v3973_v3 = vshll.u32 %v15120_v9, %v15136_v8 }
 0x78e   : > { %v6213_v29 = vpop.f32.mrf.mxu1 }
 0x78f   : > { %v6329_v50 = vadd.f32 %v6328_v5, %v6213_v29  ;;  %v15137_v29 = vld [vmem:[#allocation71_spill] sm:$0xff]  ;;  %v6363_v49 = vadd.f32 %v12754_v47, %v6337_v51  ;;  %v4116_v51 = vsel %vm4114_vm7, %v4115_v31, %v12851_v18  ;;  %vm4820_vm7 = vcmp.lt.s32.totalorder %v12673_v22, 4 }
 0x790   : > { %v8578_v53 = vpop.f32.mrf.mxu1  ;;  %v3971_v25 = vshrl.u32 %v15120_v9, %v15137_v29  ;;  %v3977_v55 = vshrl.u32 %v14837_v6, %v15137_v29 }
 0x791   : > { %v6340_v5 = vadd.f32 %v8600_v12, %v8578_v53  ;;  %v6361_v33 = vadd.f32 %v12754_v47, %v6329_v50  ;;  %v3974_v53 = vshrl.u32 %v15121_v28, %v15137_v29  ;;  %v3976_v12 = vshll.u32 %v15121_v28, %v15136_v8 }
 0x792   : > { %v6216_v17 = vpop.f32.mrf.mxu1  ;;  %v4112_v50 = vmul.u32 %v12827_v14, %v4096_v1  ;;  %v3620_v8 = vmul.f32 %v3619_v26, %v3617_v15  ;;  %v12921_v52 = vor.u32 %v3971_v25, %v3970_v37  ;;  %v6379_v1 = vmax.f32 %v6363_v49, 0.0  ;;  %v12925_v15 = vpop.eup %9055 }
 0x793   : > { %v6364_v7 = vadd.f32 %v12754_v47, %v6340_v5  ;;  %v6332_v4 = vadd.f32 %v6331_v56, %v6216_v17  ;;  %v3960_v5 = vand.u32 8388607, %v14766_v62  ;;  %v7866_v56 = vadd.s32 4294967294, %v3813_v61  ;;  %v15139_v17 = vld [vmem:[#allocation64_spill] sm:$0xff] }
 0x794   : > { %v6377_v13 = vmax.f32 %v6361_v33, 0.0  ;;  %v12923_v14 = vor.u32 %v3974_v53, %v3973_v3  ;;  %v12927_v26 = vadd.s32 %v4116_v51, %v4112_v50  ;;  %vm3985_vm14 = vcmp.lt.s32.totalorder %v15139_v17, 1 }
 0x795   : > { %v6362_v60 = vadd.f32 %v12754_v47, %v6332_v4  ;;  %v6380_v27 = vmax.f32 %v6364_v7, 0.0  ;;  %v3978_v47 = vor.u32 %v3977_v55, %v3976_v12  ;;  %vm3987_vm6 = vcmp.lt.s32.totalorder %v15139_v17, 3  ;;  %v15143_v12 = vld [vmem:[#allocation77_spill] sm:$0xff]  ;;  %v15144_v55 = vld [vmem:[#allocation67_spill] sm:$0xff] }
 0x796   : > { %v12933_v61 = vshrl.u32 %v14835_v54, %v12676_v21  ;;  %v15140_v37 = vsel %vm12607_vm9, 0, %v12690_v0  ;;  %v3961_v25 = vor.u32 8388608, %v3960_v5  ;;  %v3418_v33 = vsel %vm12699_vm11, 0, %v12862_v24  ;;  %v15142_v24 = vld [vmem:[#allocation76_spill] sm:$0xff] }
 0x797   : > { %v6378_v30 = vmax.f32 %v6362_v60, 0.0  ;;  %v3526_v31 = vadd.s32 3, %v15140_v37  ;;  %v6388_v3 = vpack.c.bf16 %v6380_v27, %v6379_v1  ;;  %v15141_v7 = vsub.s32 4, %v15131_v38 }
 0x798   : > { %v3729_v54 = vsel %vm12881_vm5, %v15129_v57, %v3726_v43  ;;  %v3621_v0 = vxor.u32 2147483648, %v3620_v8  ;;  %vm3986_vm9 = vcmp.lt.s32.totalorder %v15139_v17, 2  ;;  %v3993_v41 = vsel %vm3985_vm14, %v12921_v52, %v12923_v14 }
 0x799   : > { %v6387_v18 = vpack.c.bf16 %v6378_v30, %v6377_v13  ;;  %v3728_v4 = vsel %vm3643_vm3, %v15141_v7, %v15131_v38  ;;  %v3995_v38 = vsel %vm3987_vm6, %v3978_v47, %v15142_v24  ;;  %vm7867_vm11 = vcmp.lt.s32.totalorder %v7866_v56, 0 }
 0x79a   : > { %v4118_v16 = vadd.s32 536870912, %v12927_v26  ;;  %v3997_v53 = vsel %vm3985_vm14, %v12923_v14, %v3978_v47  ;;  %v3999_v49 = vsel %vm3987_vm6, %v15144_v55, %v15143_v12  ;;  %v12973_v43 = vor.u32 %v12722_v11, %v12680_v48 }
 0x79b   : > { %8621 = vmatprep.mubr.msk.bf16.mxu1 %vm5370_vm12, %v6387_v18  ;;  %v4816_v50 = vor.u32 %v12933_v61, %v12685_v35  ;;  %v3925_v60 = vsub.s32 4294967266, %v12951_v42  ;;  %v12978_v51 = vshll.u32 %v3961_v25, 8  ;;  %v12980_v5 = vand.u32 3, %v3526_v31 }
 0x79c   : > { %8622 = vmatmul.mubr.msk.bf16.gmra.mxu1 %vm5370_vm12, %v6388_v3  ;;  %v3422_v27 = vadd.s32 3, %v3418_v33  ;;  %v15145_v13 = vand.u32 2147483647, %v15138_v59  ;;  %v3996_v48 = vsel %vm3986_vm9, %v3993_v41, %v3995_v38  ;;  %v3730_v11 = vsel %vm12881_vm5, 0, %v3728_v4  ;;  %v9058_v3 = vpop.eup %9057 }
 0x79d   : > { %9059 = vcosq.f32 %v3729_v54  ;;  %v12992_v1 = vsel %vm7867_vm11, 0, %v7866_v56  ;;  %v4000_v18 = vsel %vm3986_vm9, %v3997_v53, %v3999_v49  ;;  %v3622_v37 = vsel %vm3539_vm8, %v3621_v0, %v3620_v8 }
 0x79e   : > { %vm12984_vm0 = vcmp.le.f32.partialorder %v15145_v13, 0.7853982  ;;  %9061 = vsinq.f32 %v3729_v54  ;;  %v3905_v31 = vadd.s32 %v12522_v10, %v12530_v32  ;;  %v13000_v25 = vshrl.u32 %v4118_v16, 30 }
 0x79f   : > { %v3921_v33 = vsub.s32 32, %v12951_v42  ;;  %v3926_v20 = vadd.s32 127, %v3925_v60  ;;  %v13004_v7 = vmul.u32.u64.low %v12978_v51, %v3996_v48  ;;  %v13005_v56 = vmul.u32.u64.high %v12978_v51, %v3996_v48, %v13004_v7 }
 0x7a0   : > { %v3821_v4 = vsub.s32 4294967266, %v12992_v1  ;;  %v3969_v54 = vshrl.u32 %v14865_v63, %v15137_v29  ;;  %v13012_v8 = vmul.u32.u64.low %v12978_v51, %v4000_v18  ;;  %v13013_v0 = vmul.u32.u64.high %v12978_v51, %v4000_v18, %v13012_v8 }
 0x7a1   : > { %vm3529_vm3 = vcmp.eq.s32.totalorder %v12980_v5, 0  ;;  %vm3532_vm5 = vcmp.eq.s32.totalorder %v12980_v5, 2  ;;  %v3623_v10 = vsub.s32 4, %v12460_v34  ;;  %v3990_v32 = vsel %vm3988_vm15, %v3978_v47, 2102212464 }
 0x7a2   : > { %v3423_v41 = vand.u32 3, %v3422_v27  ;;  %v3734_v24 = vadd.s32 3, %v3730_v11  ;;  %v3625_v29 = vsel %vm12984_vm0, %v15138_v59, %v3622_v37  ;;  %v4120_v38 = vshll.u32 %v13000_v25, 30 }
 0x7a3   : > { %vm3528_vm2 = vcmp.lt.s32.totalorder %v12980_v5, 2  ;;  %v3922_v16 = vshll.u32 %v12777_v19, %v12951_v42  ;;  %v3923_v53 = vshrl.u32 %v3905_v31, %v3921_v33  ;;  %v3927_v12 = vshll.u32 %v3926_v20, 23  ;;  %v15148_v33 = vld [vmem:[#allocation44_spill] sm:$0xff] }
 0x7a4   : > { %v3801_v47 = vadd.s32 %v12584_v40, %v12594_v44  ;;  %v3817_v55 = vsub.s32 32, %v12992_v1  ;;  %v3822_v49 = vadd.s32 127, %v3821_v4  ;;  %v3989_v60 = vsel %vm3985_vm14, %v3969_v54, %v12921_v52 }
 0x7a5   : > { %v3991_v27 = vsel %vm3987_vm6, %v12923_v14, %v3990_v32  ;;  %v3530_v13 = vxor.u32 2147483648, %v12799_v45  ;;  %v3533_v19 = vxor.u32 2147483648, %v12792_v36  ;;  %v3624_v42 = vsel %vm3539_vm8, %v3623_v10, %v12460_v34 }
 0x7a6   : > { %9063 = vcosq.f32 %v3625_v29  ;;  %v3426_v40 = vxor.u32 2147483648, %v9058_v3  ;;  %v3429_v44 = vxor.u32 2147483648, %v12925_v15  ;;  %v13044_v48 = vsub.s32 %v12927_v26, %v4120_v38 }
 0x7a7   : > { %9065 = vsinq.f32 %v3625_v29  ;;  %v3924_v52 = vor.u32 %v3923_v53, %v3922_v16  ;;  %v3928_v11 = vor.u32 4788187, %v3927_v12  ;;  %v3992_v14 = vsel %vm3986_vm9, %v3989_v60, %v3991_v27  ;;  %v15151_v12 = vld [vmem:[#allocation106_spill] sm:$0xff] }
 0x7a8   : > { %v4011_v18 = vadd.s32 1, %v13005_v56  ;;  %v3818_v37 = vshll.u32 %v12810_v23, %v12992_v1  ;;  %v3819_v31 = vshrl.u32 %v3801_v47, %v3817_v55  ;;  %v3823_v34 = vshll.u32 %v3822_v49, 23 }
 0x7a9   : > { %vm4010_vm15 = vc.u32 %v13013_v0, %v13004_v7  ;;  %vm3851_vm8 = vcmp.lt.s32.totalorder %v15148_v33, 0  ;;  %vm3424_vm14 = vcmp.lt.s32.totalorder %v3423_v41, 2  ;;  %vm3425_vm6 = vcmp.eq.s32.totalorder %v3423_v41, 0 }
 0x7aa   : > { %vm3428_vm11 = vcmp.eq.s32.totalorder %v3423_v41, 2  ;;  %v3735_v26 = vand.u32 3, %v3734_v24  ;;  %v9060_v20 = vpop.eup %9059  ;;  %v3534_v17 = vsel %vm3532_vm5, %v3533_v19, %v12799_v45  ;;  %v3626_v4 = vsel %vm12984_vm0, 0, %v3624_v42 }
 0x7ab   : > { %v4123_v23 = vsub.s32 0, %v13044_v48  ;;  %v4008_v1 = vmul.u32 %v12978_v51, %v3992_v14  ;;  %v9062_v54 = vpop.eup %9061  ;;  %v3531_v8 = vsel %vm3529_vm3, %v12792_v36, %v3530_v13  ;;  %v3929_v10 = vand.u32 2147483647, %v3928_v11  ;;  %v15149_v51 = vld [vmem:[#allocation52_spill] sm:$0xff] }
 0x7ac   : > { %v3931_v32 = vcvt.s32.f32 %v3924_v52  ;;  %v4012_v24 = vsel %vm4010_vm15, %v4011_v18, %v13005_v56  ;;  %v3427_v29 = vsel %vm3425_vm6, %v12925_v15, %v3426_v40  ;;  %v3430_v38 = vsel %vm3428_vm11, %v3429_v44, %v9058_v3  ;;  %v15150_v36 = vld [vmem:[#allocation56_spill] sm:$0xff] }
 0x7ad   : > { %v3820_v45 = vor.u32 %v3819_v31, %v3818_v37  ;;  %v3824_v16 = vor.u32 4788187, %v3823_v34  ;;  %v13069_v30 = vsel %vm4820_vm7, %v12973_v43, 920167782  ;;  %vm3525_vm9 = vweird.f32 %v15149_v51  ;;  %v15152_v37 = vld [vmem:[#allocation24_spill] sm:$0xff]  ;;  %v15153_v34 = vld [vmem:[#allocation27_spill] sm:$0xff] }
 0x7ae   : > { %vm3421_vm0 = vweird.f32 %v15104_v39  ;;  %v3630_v53 = vadd.s32 3, %v3626_v4  ;;  %vm3747_vm3 = vcmp.lt.s32.totalorder %v15150_v36, 0  ;;  %v3535_v56 = vsel %vm3528_vm2, %v3531_v8, %v3534_v17  ;;  %v15161_v51 = vld [vmem:[#allocation36_spill] sm:$0xff]  ;;  %v15167_v4 = vld [vmem:[#allocation70_spill] sm:$0xff] }
 0x7af   : > { %v3935_v15 = vsub.s32 4, %v15151_v12  ;;  %v7877_v3 = vmin.u32 %v4123_v23, %v13044_v48  ;;  %v13078_v47 = vadd.s32 %v4012_v24, %v4008_v1  ;;  %v3431_v55 = vsel %vm3424_vm14, %v3427_v29, %v3430_v38  ;;  %v15158_v1 = vld [vmem:[#allocation25_spill] sm:$0xff] }
 0x7b0   : > { %v3738_v49 = vxor.u32 2147483648, %v9062_v54  ;;  %v3741_v60 = vxor.u32 2147483648, %v9060_v20  ;;  %v3932_v27 = vmul.f32 %v3931_v32, %v3929_v10  ;;  %vm3737_vm5 = vcmp.eq.s32.totalorder %v3735_v26, 0 }
 0x7b1   : > { %vm3740_vm15 = vcmp.eq.s32.totalorder %v3735_v26, 2  ;;  %v3825_v13 = vand.u32 2147483647, %v3824_v16  ;;  %v3827_v19 = vcvt.s32.f32 %v3820_v45  ;;  %v13086_v5 = vsel %vm4820_vm7, %v4816_v50, 1326507024 }
 0x7b2   : > { %v3536_v42 = vsel %vm3525_vm9, nan, %v3535_v56  ;;  %vm3736_vm2 = vcmp.lt.s32.totalorder %v3735_v26, 2  ;;  %v3631_v41 = vand.u32 3, %v3630_v53  ;;  %v3432_v44 = vsel %vm3421_vm0, nan, %v3431_v55  ;;  %v15162_v26 = vld [vmem:[#allocation47_spill] sm:$0xff] }
 0x7b3   : > { %v9064_v40 = vpop.eup %9063  ;;  %v3936_v52 = vsel %vm3851_vm8, %v3935_v15, %v15151_v12  ;;  %v4125_v11 = vclz %v7877_v3  ;;  %v4014_v35 = vadd.s32 536870912, %v13078_v47  ;;  %v3739_v14 = vsel %vm3737_vm5, %v9060_v20, %v3738_v49  ;;  %v15163_v12 = vld [vmem:[#allocation55_spill] sm:$0xff] }
 0x7b4   : > { %v9066_v61 = vpop.eup %9065  ;;  %v3742_v50 = vsel %vm3740_vm15, %v3741_v60, %v9062_v54  ;;  %v3933_v18 = vxor.u32 2147483648, %v3932_v27  ;;  %v3831_v31 = vsub.s32 4, %v15152_v37  ;;  %v13098_v17 = vadd.f32 %v15153_v34, %v3536_v42 }
 0x7b5   : > { %vm3733_vm14 = vweird.f32 %v15129_v57  ;;  %v15155_v39 = vand.u32 2147483647, %v15148_v33  ;;  %v3828_v23 = vmul.f32 %v3827_v19, %v3825_v13  ;;  %v13108_v8 = vadd.f32 %v15158_v1, %v3432_v44  ;;  %v15190_v44 = vld [vmem:[#allocation87_spill] sm:$0xff] }
 0x7b6   : > { %15154 = vst [vmem:[#allocation59_spill] sm:$0xff] %v13098_v17  ;;  %vm3632_vm11 = vcmp.lt.s32.totalorder %v3631_v41, 2  ;;  %vm3633_vm9 = vcmp.eq.s32.totalorder %v3631_v41, 0  ;;  %vm3636_vm0 = vcmp.eq.s32.totalorder %v3631_v41, 2  ;;  %v3743_v20 = vsel %vm3736_vm2, %v3739_v14, %v3742_v50 }
 0x7b7   : > { %vm13103_vm6 = vcmp.le.f32.partialorder %v15155_v39, 0.7853982  ;;  %15159 = vst [vmem:[#allocation68_spill] sm:$0xff] %v13108_v8  ;;  %v7878_v10 = vadd.s32 4294967294, %v4125_v11  ;;  %v13113_v32 = vshrl.u32 %v4014_v35, 30  ;;  %v3634_v24 = vxor.u32 2147483648, %v9066_v61 }
 0x7b8   : > { %v3938_v54 = vsel %vm13103_vm6, 0, %v3936_v52  ;;  %v3637_v29 = vxor.u32 2147483648, %v9064_v40  ;;  %v3934_v38 = vsel %vm3851_vm8, %v3933_v18, %v3932_v27  ;;  %v3832_v45 = vsel %vm3747_vm3, %v3831_v31, %v15152_v37 }
 0x7b9   : > { %15160 = vst [vmem:[#allocation66_spill] sm:$0xff] %v13113_v32  ;;  %v3829_v16 = vxor.u32 2147483648, %v3828_v23  ;;  %v14765_v53 = vand.u32 2147483647, %v15161_v51  ;;  %v4282_v56 = vshll.u32 %v14865_v63, %v15162_v26  ;;  %v4283_v15 = vshrl.u32 %v15120_v9, %v15163_v12  ;;  %v15232_v51 = vld [vmem:[#allocation22_spill] sm:$0xff] }
 0x7ba   : > { %vm3629_vm5 = vweird.f32 %v15138_v59  ;;  %v4285_v3 = vshll.u32 %v15120_v9, %v15162_v26  ;;  %v4286_v55 = vshrl.u32 %v15121_v28, %v15163_v12  ;;  %v4288_v49 = vshll.u32 %v15121_v28, %v15162_v26 }
 0x7bb   : > { %v4289_v60 = vshrl.u32 %v14837_v6, %v15163_v12  ;;  %v3942_v27 = vadd.s32 3, %v3938_v54  ;;  %v15164_v13 = vand.u32 2147483647, %v15150_v36  ;;  %vm7879_vm15 = vcmp.lt.s32.totalorder %v7878_v10, 0 }
 0x7bc   : > { %v4016_v42 = vshll.u32 %v13113_v32, 30  ;;  %v3744_v52 = vsel %vm3733_vm14, nan, %v3743_v20  ;;  %v3638_v11 = vsel %vm3636_vm0, %v3637_v29, %v9066_v61  ;;  %v3635_v14 = vsel %vm3633_vm9, %v9064_v40, %v3634_v24 }
 0x7bd   : > { %vm13136_vm8 = vcmp.le.f32.partialorder %v15164_v13, 0.7853982  ;;  %v3937_v50 = vsel %vm13103_vm6, %v15148_v33, %v3934_v38  ;;  %v3830_v18 = vsel %vm3747_vm3, %v3829_v16, %v3828_v23  ;;  %v4272_v37 = vand.u32 8388607, %v14765_v53  ;;  %v15168_v23 = vld [vmem:[#allocation31_spill] sm:$0xff]  ;;  %v15170_v38 = vld [vmem:[#allocation82_spill] sm:$0xff] }
 0x7be   : > { %v3834_v35 = vsel %vm13136_vm8, 0, %v3832_v45  ;;  %v13156_v31 = vsel %vm7879_vm15, 0, %v7878_v10  ;;  %v13158_v57 = vor.u32 %v4283_v15, %v4282_v56  ;;  %v13160_v61 = vor.u32 %v4286_v55, %v4285_v3  ;;  %v15171_v16 = vld [vmem:[#allocation43_spill] sm:$0xff]  ;;  %v15172_v15 = vld [vmem:[#allocation85_spill] sm:$0xff] }
 0x7bf   : > { %v4290_v34 = vor.u32 %v4289_v60, %v4288_v49  ;;  %v13162_v39 = vand.u32 3, %v3942_v27  ;;  %v13165_v40 = vsub.s32 %v13078_v47, %v4016_v42  ;;  %vm4297_vm2 = vcmp.lt.s32.totalorder %v15167_v4, 1  ;;  %v15173_v3 = vld [vmem:[#allocation79_spill] sm:$0xff]  ;;  %v15174_v49 = vld [vmem:[#allocation74_spill] sm:$0xff] }
 0x7c0   : > { %vm4299_vm14 = vcmp.lt.s32.totalorder %v15167_v4, 3  ;;  %v13170_v1 = vadd.f32 %v15168_v23, %v3744_v52  ;;  %v3639_v20 = vsel %vm3632_vm11, %v3635_v14, %v3638_v11  ;;  %9067 = vcosq.f32 %v3937_v50  ;;  %v15175_v27 = vld [vmem:[#allocation75_spill] sm:$0xff] }
 0x7c1   : > { %v3838_v54 = vadd.s32 3, %v3834_v35  ;;  %v3833_v10 = vsel %vm13136_vm8, %v15150_v36, %v3830_v18  ;;  %v4133_v24 = vsub.s32 4294967266, %v13156_v31  ;;  %v4273_v29 = vor.u32 8388608, %v4272_v37 }
 0x7c2   : > { %15169 = vst [vmem:[#allocation62_spill] sm:$0xff] %v13170_v1  ;;  %vm4298_vm3 = vcmp.lt.s32.totalorder %v15167_v4, 2  ;;  %v4305_v47 = vsel %vm4297_vm2, %v13158_v57, %v13160_v61  ;;  %v4307_v41 = vsel %vm4299_vm14, %v4290_v34, %v15170_v38  ;;  %v4309_v45 = vsel %vm4297_vm2, %v13160_v61, %v4290_v34 }
 0x7c3   : > { %v14764_v26 = vand.u32 2147483647, %v15171_v16  ;;  %v4019_v56 = vsub.s32 0, %v13165_v40  ;;  %v4311_v55 = vsel %vm4299_vm14, %v15173_v3, %v15172_v15  ;;  %v4178_v60 = vshll.u32 %v14865_v63, %v15174_v49  ;;  %v15178_v3 = vld [vmem:[#allocation78_spill] sm:$0xff] }
 0x7c4   : > { %v4179_v13 = vshrl.u32 %v15120_v9, %v15175_v27  ;;  %v4181_v19 = vshll.u32 %v15120_v9, %v15174_v49  ;;  %v4182_v42 = vshrl.u32 %v15121_v28, %v15175_v27  ;;  %v4184_v52 = vshll.u32 %v15121_v28, %v15174_v49 }
 0x7c5   : > { %v4185_v11 = vshrl.u32 %v14837_v6, %v15175_v27  ;;  %v13208_v35 = vsel %vm3629_vm5, nan, %v3639_v20  ;;  %9069 = vsinq.f32 %v3937_v50  ;;  %v13210_v14 = vand.u32 3, %v3838_v54 }
 0x7c6   : > { %15176 = vst [vmem:[#allocation69_spill] sm:$0xff] %v13208_v35  ;;  %v13212_v18 = vshll.u32 %v4273_v29, 8  ;;  %v4113_v37 = vadd.s32 %v12850_v46, %v12844_v58  ;;  %v4129_v23 = vsub.s32 32, %v13156_v31  ;;  %v4308_v38 = vsel %vm4298_vm3, %v4305_v47, %v4307_v41 }
 0x7c7   : > { %v4168_v15 = vand.u32 8388607, %v14764_v26  ;;  %9071 = vcosq.f32 %v3833_v10  ;;  %v4134_v59 = vadd.s32 127, %v4133_v24  ;;  %v4281_v50 = vshrl.u32 %v14865_v63, %v15163_v12 }
 0x7c8   : > { %v4312_v20 = vsel %vm4298_vm3, %v4309_v45, %v4311_v55  ;;  %v7873_v54 = vmin.u32 %v4019_v56, %v13165_v40  ;;  %v4180_v58 = vor.u32 %v4179_v13, %v4178_v60  ;;  %v13226_v46 = vor.u32 %v4182_v42, %v4181_v19  ;;  %v8970_v13 = vld [vmem:[%s15036_s16] sm:$0xff]   ;;  %v15180_v42 = vld [vmem:[#allocation86_spill] sm:$0xff] }
 0x7c9   : > { %v4186_v29 = vor.u32 %v4185_v11, %v4184_v52  ;;  %v13229_v47 = vmul.u32.u64.low %v13212_v18, %v4308_v38  ;;  %v13230_v41 = vmul.u32.u64.high %v13212_v18, %v4308_v38, %v13229_v47  ;;  %vm4193_vm6 = vcmp.lt.s32.totalorder %v15178_v3, 1  ;;  %v15182_v52 = vld [vmem:[#allocation83_spill] sm:$0xff]  ;;  %8631 = vmatprep.subr.bf16.mxu0 %v8970_v13 }
 0x7ca   : > { %vm4195_vm11 = vcmp.lt.s32.totalorder %v15178_v3, 3  ;;  %v4130_v12 = vshll.u32 %v13044_v48, %v13156_v31  ;;  %v4131_v24 = vshrl.u32 %v4113_v37, %v4129_v23  ;;  %v4302_v45 = vsel %vm4300_vm4, %v4290_v34, 2102212464  ;;  %v15181_v34 = vld [vmem:[#allocation88_spill] sm:$0xff]  ;;  %8632 = vmatpush3.bf16.msra.mxu0 %v8970_v13 }
 0x7cb   : > { %15177 = vst [vmem:[#allocation39_spill] sm:$0xff] %v13229_v47  ;;  %v4169_v56 = vor.u32 8388608, %v4168_v15  ;;  %v4135_v55 = vshll.u32 %v4134_v59, 23  ;;  %v13240_v49 = vmul.u32.u64.low %v13212_v18, %v4312_v20  ;;  %v13241_v60 = vmul.u32.u64.high %v13212_v18, %v4312_v20, %v13240_v49 }
 0x7cc   : > { %vm4194_vm9 = vcmp.lt.s32.totalorder %v15178_v3, 2  ;;  %v4201_v19 = vsel %vm4193_vm6, %v4180_v58, %v13226_v46  ;;  %v4203_v48 = vsel %vm4195_vm11, %v4186_v29, %v15180_v42  ;;  %v4205_v31 = vsel %vm4193_vm6, %v13226_v46, %v4186_v29 }
 0x7cd   : > { %15179 = vst [vmem:[#allocation100_spill] sm:$0xff] %v13241_v60  ;;  %v4207_v11 = vsel %vm4195_vm11, %v15182_v52, %v15181_v34  ;;  %v13258_v37 = vpop.eup %9067  ;;  %9073 = vsinq.f32 %v3833_v10  ;;  %v13263_v38 = vadd.s32 %v13004_v7, %v13013_v0  ;;  %v4021_v15 = vclz %v7873_v54  ;;  %v15183_v0 = vld [vmem:[#allocation28_spill] sm:$0xff] }
 0x7ce   : > { %v4132_v59 = vor.u32 %v4131_v24, %v4130_v12  ;;  %v4301_v20 = vsel %vm4297_vm2, %v4281_v50, %v13158_v57  ;;  %v4303_v49 = vsel %vm4299_vm14, %v13160_v61, %v4302_v45  ;;  %v13271_v42 = vshll.u32 %v4169_v56, 8  ;;  %v15184_v12 = vld [vmem:[#allocation84_spill] sm:$0xff]  ;;  %v15185_v57 = vld [vmem:[#allocation89_spill] sm:$0xff] }
 0x7cf   : > { %v4136_v10 = vor.u32 4788187, %v4135_v55  ;;  %v4204_v34 = vsel %vm4194_vm9, %v4201_v19, %v4203_v48  ;;  %v4208_v7 = vsel %vm4194_vm9, %v4205_v31, %v4207_v11  ;;  %v14767_v54 = vand.u32 2147483647, %v15183_v0 }
 0x7d0   : > { %v4493_v24 = vshll.u32 %v15120_v9, %v15184_v12  ;;  %v4494_v50 = vshrl.u32 %v15121_v28, %v15185_v57  ;;  %v4496_v61 = vshll.u32 %v15121_v28, %v15184_v12  ;;  %v4497_v45 = vshrl.u32 %v14837_v6, %v15185_v57 }
 0x7d1   : > { %v7874_v56 = vadd.s32 4294967294, %v4021_v15  ;;  %v4304_v55 = vsel %vm4298_vm3, %v4301_v20, %v4303_v49  ;;  %v4323_v13 = vadd.s32 1, %v13230_v41  ;;  %v4177_v19 = vshrl.u32 %v14865_v63, %v15175_v27 }
 0x7d2   : > { %v13291_v48 = vpop.eup %9069  ;;  %v13294_v31 = vmul.u32.u64.low %v13271_v42, %v4208_v7  ;;  %v13295_v52 = vmul.u32.u64.high %v13271_v42, %v4208_v7, %v13294_v31  ;;  %v4490_v11 = vshll.u32 %v14865_v63, %v15184_v12  ;;  %v4491_v15 = vshrl.u32 %v15120_v9, %v15185_v57 }
 0x7d3   : > { %vm4322_vm4 = vc.u32 %v13241_v60, %v13229_v47  ;;  %v13304_v4 = vmul.u32.u64.low %v13271_v42, %v4204_v34  ;;  %v13305_v20 = vmul.u32.u64.high %v13271_v42, %v4204_v34, %v13304_v4  ;;  %v4480_v27 = vand.u32 8388607, %v14767_v54 }
 0x7d4   : > { %15186 = vst [vmem:[#allocation23_spill] sm:$0xff] %v13295_v52  ;;  %v13310_v49 = vpop.eup %9071  ;;  %vm15189_vm0 = vcmp.lt.s32.totalorder %v15178_v3, 4  ;;  %v13314_v12 = vor.u32 %v4494_v50, %v4493_v24  ;;  %v4498_v31 = vor.u32 %v4497_v45, %v4496_v61  ;;  %vm4507_vm5 = vcmp.lt.s32.totalorder %v15190_v44, 3  ;;  %v15193_v50 = vld [vmem:[#allocation73_spill] sm:$0xff]  ;;  %v15197_v61 = vld [vmem:[#allocation91_spill] sm:$0xff] }
 0x7d5   : > { %15187 = vst [vmem:[#allocation72_spill] sm:$0xff] %v13304_v4  ;;  %15188 = vst [vmem:[#allocation71_spill] sm:$0xff] %v13310_v49  ;;  %v4198_v7 = vsel %vm15189_vm0, %v4186_v29, 2102212464  ;;  %v4137_v26 = vand.u32 2147483647, %v4136_v10  ;;  %v4139_v53 = vcvt.s32.f32 %v4132_v59  ;;  %v4320_v62 = vmul.u32 %v13212_v18, %v4304_v55 }
 0x7d6   : > { %vm4505_vm8 = vcmp.lt.s32.totalorder %v15190_v44, 1  ;;  %vm7875_vm15 = vcmp.lt.s32.totalorder %v7874_v56, 0  ;;  %v4324_v34 = vsel %vm4322_vm4, %v4323_v13, %v13230_v41  ;;  %v4197_v54 = vsel %vm4193_vm6, %v4177_v19, %v4180_v58  ;;  %v15191_v10 = vld [vmem:[#allocation94_spill] sm:$0xff]  ;;  %v15192_v59 = vld [vmem:[#allocation60_spill] sm:$0xff]  ;;  %v15194_v58 = vld [vmem:[#allocation49_spill] sm:$0xff] }
 0x7d7   : > { %v4492_v23 = vor.u32 %v4491_v15, %v4490_v11  ;;  %v4199_v29 = vsel %vm4195_vm11, %v13226_v46, %v4198_v7  ;;  %v4481_v24 = vor.u32 8388608, %v4480_v27  ;;  %vm4506_vm2 = vcmp.lt.s32.totalorder %v15190_v44, 2  ;;  %v15195_v55 = vld [vmem:[#allocation19_spill] sm:$0xff] }
 0x7d8   : > { %v4519_v18 = vsel %vm4507_vm5, %v15192_v59, %v15191_v10  ;;  %v4517_v41 = vsel %vm4505_vm8, %v13314_v12, %v4498_v31  ;;  %v4386_v45 = vshll.u32 %v14865_v63, %v15194_v58  ;;  %v4387_v46 = vshrl.u32 %v15120_v9, %v15195_v55 }
 0x7d9   : > { %v4389_v13 = vshll.u32 %v15120_v9, %v15194_v58  ;;  %v4390_v19 = vshrl.u32 %v15121_v28, %v15195_v55  ;;  %v4392_v11 = vshll.u32 %v15121_v28, %v15194_v58  ;;  %v4393_v15 = vshrl.u32 %v14837_v6, %v15195_v55 }
 0x7da   : > { %v13346_v27 = vpop.eup %9073  ;;  %v13349_v7 = vsel %vm7875_vm15, 0, %v7874_v56  ;;  %v13351_v10 = vadd.s32 %v4324_v34, %v4320_v62  ;;  %v4513_v59 = vsel %vm4505_vm8, %v4492_v23, %v13314_v12  ;;  %v4515_v8 = vsel %vm4507_vm5, %v4498_v31, %v15197_v61 }
 0x7db   : > { %15196 = vst [vmem:[#allocation34_spill] sm:$0xff] %v13346_v27  ;;  %v13359_v17 = vmul.f32 %v4139_v53, %v4137_v26  ;;  %v4025_v58 = vsub.s32 32, %v13349_v7  ;;  %v4200_v0 = vsel %vm4194_vm9, %v4197_v54, %v4199_v29  ;;  %v13364_v16 = vshll.u32 %v4481_v24, 8  ;;  %v15199_v24 = vld [vmem:[#allocation50_spill] sm:$0xff] }
 0x7dc   : > { %vm4218_vm14 = vc.u32 %v13295_v52, %v13304_v4  ;;  %v4219_v62 = vadd.s32 1, %v13305_v20  ;;  %v4520_v56 = vsel %vm4506_vm2, %v4517_v41, %v4519_v18  ;;  %v15198_v34 = vand.u32 2147483647, %v15193_v50 }
 0x7dd   : > { %v4516_v53 = vsel %vm4506_vm2, %v4513_v59, %v4515_v8  ;;  %v4388_v26 = vor.u32 %v4387_v46, %v4386_v45  ;;  %v4391_v47 = vor.u32 %v4390_v19, %v4389_v13  ;;  %v4394_v3 = vor.u32 %v4393_v15, %v4392_v11  ;;  %v15204_v59 = vld [vmem:[#allocation102_spill] sm:$0xff] }
 0x7de   : > { %v4376_v61 = vand.u32 8388607, %v15198_v34  ;;  %v4029_v54 = vsub.s32 4294967266, %v13349_v7  ;;  %v4326_v29 = vadd.s32 536870912, %v13351_v10  ;;  %vm4401_vm3 = vcmp.lt.s32.totalorder %v15199_v24, 1 }
 0x7df   : > { %vm4403_vm6 = vcmp.lt.s32.totalorder %v15199_v24, 3  ;;  %v4216_v4 = vmul.u32 %v13271_v42, %v4200_v0  ;;  %v4489_v18 = vshrl.u32 %v14865_v63, %v15185_v57  ;;  %v4220_v8 = vsel %vm4218_vm14, %v4219_v62, %v13305_v20  ;;  %v15203_v0 = vld [vmem:[#allocation101_spill] sm:$0xff]  ;;  %v15205_v62 = vld [vmem:[#allocation95_spill] sm:$0xff] }
 0x7e0   : > { %v13383_v41 = vmul.u32.u64.low %v13364_v16, %v4520_v56  ;;  %v13384_v34 = vmul.u32.u64.high %v13364_v16, %v4520_v56, %v13383_v41  ;;  %v13388_v45 = vmul.u32.u64.low %v13364_v16, %v4516_v53  ;;  %v13389_v46 = vmul.u32.u64.high %v13364_v16, %v4516_v53, %v13388_v45 }
 0x7e1   : > { %v4377_v13 = vor.u32 8388608, %v4376_v61  ;;  %vm15202_vm11 = vcmp.lt.s32.totalorder %v15190_v44, 4  ;;  %vm4402_vm9 = vcmp.lt.s32.totalorder %v15199_v24, 2  ;;  %v4409_v42 = vsel %vm4401_vm3, %v4388_v26, %v4391_v47 }
 0x7e2   : > { %15200 = vst [vmem:[#allocation64_spill] sm:$0xff] %v13384_v34  ;;  %15201 = vst [vmem:[#allocation76_spill] sm:$0xff] %v13388_v45  ;;  %v4510_v19 = vsel %vm15202_vm11, %v4498_v31, 2102212464  ;;  %v4411_v57 = vsel %vm4403_vm6, %v4394_v3, %v15203_v0  ;;  %v4026_v20 = vshll.u32 %v13165_v40, %v13349_v7  ;;  %v4027_v11 = vshrl.u32 %v13263_v38, %v4025_v58 }
 0x7e3   : > { %v4413_v15 = vsel %vm4401_vm3, %v4391_v47, %v4394_v3  ;;  %v4415_v31 = vsel %vm4403_vm6, %v15205_v62, %v15204_v59  ;;  %v13409_v56 = vadd.s32 127, %v4029_v54  ;;  %v13411_v61 = vshrl.u32 %v4326_v29, 30  ;;  %v15208_v54 = vld [vmem:[#allocation80_spill] sm:$0xff] }
 0x7e4   : > { %v13413_v53 = vadd.s32 %v4220_v8, %v4216_v4  ;;  %v4509_v41 = vsel %vm4505_vm8, %v4489_v18, %v4492_v23  ;;  %v4511_v40 = vsel %vm4507_vm5, %v13314_v12, %v4510_v19  ;;  %v4385_v38 = vshrl.u32 %v14865_v63, %v15195_v55  ;;  %v15209_v8 = vld [vmem:[#allocation92_spill] sm:$0xff]  ;;  %v15210_v18 = vld [vmem:[#allocation98_spill] sm:$0xff] }
 0x7e5   : > { %15206 = vst [vmem:[#allocation77_spill] sm:$0xff] %v13411_v61  ;;  %v4412_v7 = vsel %vm4402_vm9, %v4409_v42, %v4411_v57  ;;  %v13424_v58 = vshll.u32 %v4377_v13, 8  ;;  %v4416_v4 = vsel %vm4402_vm9, %v4413_v15, %v4415_v31  ;;  %v4698_v23 = vshll.u32 %v14865_v63, %v15209_v8  ;;  %v13456_v29 = vld [vmem:[%s15207_s22 + $0x8] sm:$0xff]  }
 0x7e6   : > { %v4699_v12 = vshrl.u32 %v15120_v9, %v15210_v18  ;;  %v4701_v55 = vshll.u32 %v15120_v9, %v15209_v8  ;;  %v4702_v19 = vshrl.u32 %v15121_v28, %v15210_v18  ;;  %v4704_v13 = vshll.u32 %v15121_v28, %v15209_v8  ;;  %15213 = vst [vmem:[#allocation52_spill] sm:$0xff] %v13456_v29 }
 0x7e7   : > { %v4705_v42 = vshrl.u32 %v14837_v6, %v15210_v18  ;;  %v4328_v0 = vshll.u32 %v13411_v61, 30  ;;  %v4222_v57 = vadd.s32 536870912, %v13413_v53  ;;  %v4512_v15 = vsel %vm4506_vm2, %v4509_v41, %v4511_v40  ;;  %8673 = vmatprep.subr.bf16.mxu0 %v13456_v29 }
 0x7e8   : > { %vm15211_vm4 = vcmp.lt.s32.totalorder %v15199_v24, 4  ;;  %vm4530_vm0 = vc.u32 %v13384_v34, %v13388_v45  ;;  %v4531_v62 = vadd.s32 1, %v13389_v46  ;;  %v4405_v50 = vsel %vm4401_vm3, %v4385_v38, %v4388_v26  ;;  %v15216_v38 = vld [vmem:[#allocation96_spill] sm:$0xff] }
 0x7e9   : > { %v4406_v59 = vsel %vm15211_vm4, %v4394_v3, 2102212464  ;;  %v13451_v31 = vmul.u32.u64.low %v13424_v58, %v4412_v7  ;;  %v13452_v8 = vmul.u32.u64.high %v13424_v58, %v4412_v7, %v13451_v31  ;;  %v15215_v3 = vand.u32 2147483647, %v15208_v54  ;;  %v15223_v54 = vld [vmem:[#allocation97_spill] sm:$0xff] }
 0x7ea   : > { %v13461_v44 = vmul.u32.u64.low %v13424_v58, %v4416_v4  ;;  %v13462_v41 = vmul.u32.u64.high %v13424_v58, %v4416_v4, %v13461_v44  ;;  %v4407_v52 = vsel %vm4403_vm6, %v4391_v47, %v4406_v59  ;;  %v4700_v61 = vor.u32 %v4699_v12, %v4698_v23  ;;  %v15217_v23 = vld [vmem:[#allocation81_spill] sm:$0xff] }
 0x7eb   : > { %15212 = vst [vmem:[#allocation67_spill] sm:$0xff] %v13451_v31  ;;  %v4688_v40 = vand.u32 8388607, %v15215_v3  ;;  %v13468_v60 = vor.u32 %v4702_v19, %v4701_v55  ;;  %v4706_v7 = vor.u32 %v4705_v42, %v4704_v13  ;;  %v13471_v1 = vor.u32 %v4027_v11, %v4026_v20  ;;  %v15218_v19 = vld [vmem:[#allocation57_spill] sm:$0xff]  ;;  %v15222_v3 = vld [vmem:[#allocation54_spill] sm:$0xff] }
 0x7ec   : > { %15214 = vst [vmem:[#allocation106_spill] sm:$0xff] %v13462_v41  ;;  %vm4713_vm5 = vcmp.lt.s32.totalorder %v15216_v38, 1  ;;  %vm4715_vm8 = vcmp.lt.s32.totalorder %v15216_v38, 3  ;;  %v13477_v4 = vsub.s32 %v13351_v10, %v4328_v0  ;;  %v13479_v44 = vshrl.u32 %v4222_v57, 30  ;;  %v15219_v13 = vld [vmem:[#allocation93_spill] sm:$0xff]  ;;  %v15220_v0 = vld [vmem:[#allocation99_spill] sm:$0xff] }
 0x7ed   : > { %v4528_v47 = vmul.u32 %v13364_v16, %v4512_v15  ;;  %v14783_v12 = vand.u32 2147483647, %v15217_v23  ;;  %v4532_v20 = vsel %vm4530_vm0, %v4531_v62, %v13389_v46  ;;  %v13489_v11 = vsel %vm4402_vm9, %v4405_v50, %v4407_v52  ;;  %v15221_v62 = vld [vmem:[#allocation26_spill] sm:$0xff] }
 0x7ee   : > { %v4689_v55 = vor.u32 8388608, %v4688_v40  ;;  %vm4714_vm15 = vcmp.lt.s32.totalorder %v15216_v38, 2  ;;  %v4721_v10 = vsel %vm4713_vm5, %v4700_v61, %v13468_v60  ;;  %v4723_v16 = vsel %vm4715_vm8, %v4706_v7, %v15218_v19 }
 0x7ef   : > { %v4594_v42 = vshll.u32 %v14865_v63, %v15219_v13  ;;  %v4595_v46 = vshrl.u32 %v15120_v9, %v15220_v0  ;;  %v4597_v52 = vshll.u32 %v15120_v9, %v15219_v13  ;;  %v4598_v50 = vshrl.u32 %v15121_v28, %v15220_v0 }
 0x7f0   : > { %v4600_v24 = vshll.u32 %v15121_v28, %v15219_v13  ;;  %v4601_v57 = vshrl.u32 %v14837_v6, %v15220_v0  ;;  %v4427_v15 = vadd.s32 1, %v13452_v8  ;;  %v4725_v59 = vsel %vm4713_vm5, %v13468_v60, %v4706_v7 }
 0x7f1   : > { %v4727_v40 = vsel %vm4715_vm8, %v15222_v3, %v15221_v62  ;;  %v4584_v19 = vand.u32 8388607, %v14783_v12  ;;  %vm4426_vm2 = vc.u32 %v13462_v41, %v13451_v31  ;;  %v4697_v13 = vshrl.u32 %v14865_v63, %v15210_v18 }
 0x7f2   : > { %v13525_v29 = vshll.u32 %v4689_v55, 8  ;;  %v13528_v45 = vadd.s32 %v4532_v20, %v4528_v47  ;;  %v4724_v3 = vsel %vm4714_vm15, %v4721_v10, %v4723_v16  ;;  %v4728_v12 = vsel %vm4714_vm15, %v4725_v59, %v4727_v40  ;;  %v15228_v40 = vld [vmem:[#allocation51_spill] sm:$0xff] }
 0x7f3   : > { %v4596_v26 = vor.u32 %v4595_v46, %v4594_v42  ;;  %v13536_v23 = vor.u32 %v4598_v50, %v4597_v52  ;;  %v4602_v31 = vor.u32 %v4601_v57, %v4600_v24  ;;  %v13539_v18 = vsel %vm4426_vm2, %v4427_v15, %v13452_v8  ;;  %v15224_v46 = vld [vmem:[#allocation90_spill] sm:$0xff]  ;;  %v15225_v50 = vld [vmem:[#allocation65_spill] sm:$0xff]  ;;  %v15227_v15 = vld [vmem:[#allocation40_spill] sm:$0xff] }
 0x7f4   : > { %v4585_v55 = vor.u32 8388608, %v4584_v19  ;;  %vm4609_vm14 = vcmp.lt.s32.totalorder %v15223_v54, 1  ;;  %vm4611_vm3 = vcmp.lt.s32.totalorder %v15223_v54, 3  ;;  %v4717_v47 = vsel %vm4713_vm5, %v4697_v13, %v4700_v61  ;;  %v15226_v57 = vld [vmem:[#allocation61_spill] sm:$0xff]  ;;  %v15229_v13 = vld [vmem:[#allocation46_spill] sm:$0xff] }
 0x7f5   : > { %v4718_v20 = vsel %vm4716_vm10, %v4706_v7, 2102212464  ;;  %v13548_v10 = vmul.u32.u64.low %v13525_v29, %v4724_v3  ;;  %v13549_v16 = vmul.u32.u64.high %v13525_v29, %v4724_v3, %v13548_v10  ;;  %vm4610_vm6 = vcmp.lt.s32.totalorder %v15223_v54, 2  ;;  %v8974_v54 = vld [vmem:[%s15239_s23 + $0x10] sm:$0xff]  }
 0x7f6   : > { %v13553_v42 = vmul.u32.u64.low %v13525_v29, %v4728_v12  ;;  %v13554_v8 = vmul.u32.u64.high %v13525_v29, %v4728_v12, %v13553_v42  ;;  %v4617_v61 = vsel %vm4609_vm14, %v4596_v26, %v13536_v23  ;;  %v4619_v7 = vsel %vm4611_vm3, %v4602_v31, %v15225_v50 }
 0x7f7   : > { %v4621_v24 = vsel %vm4609_vm14, %v13536_v23, %v4602_v31  ;;  %v4623_v12 = vsel %vm4611_vm3, %v15227_v15, %v15226_v57  ;;  %v13571_v59 = vshll.u32 %v4585_v55, 8  ;;  %v4906_v19 = vshll.u32 %v14865_v63, %v15228_v40  ;;  %v15230_v55 = vld [vmem:[#allocation63_spill] sm:$0xff] }
 0x7f8   : > { %v4907_v3 = vshrl.u32 %v15120_v9, %v15229_v13  ;;  %v4909_v42 = vshll.u32 %v15120_v9, %v15228_v40  ;;  %v4910_v50 = vshrl.u32 %v15121_v28, %v15229_v13  ;;  %v4912_v62 = vshll.u32 %v15121_v28, %v15228_v40 }
 0x7f9   : > { %v4913_v57 = vshrl.u32 %v14837_v6, %v15229_v13  ;;  %v4624_v52 = vsel %vm4610_vm6, %v4621_v24, %v4623_v12  ;;  %v15231_v41 = vand.u32 2147483647, %v15224_v46  ;;  %v4802_v27 = vshll.u32 %v14865_v63, %v15232_v51 }
 0x7fa   : > { %v4803_v36 = vshrl.u32 %v15120_v9, %v12676_v21  ;;  %v4805_v40 = vshll.u32 %v15120_v9, %v15232_v51  ;;  %v4806_v32 = vshrl.u32 %v15121_v28, %v12676_v21  ;;  %v4808_v15 = vshll.u32 %v15121_v28, %v15232_v51 }
 0x7fb   : > { %v4896_v34 = vand.u32 8388607, %v15231_v41  ;;  %v4809_v24 = vshrl.u32 %v14837_v6, %v12676_v21  ;;  %v4719_v41 = vsel %vm4715_vm8, %v13468_v60, %v4718_v20  ;;  %v4593_v12 = vshrl.u32 %v14865_v63, %v15220_v0  ;;  %v15234_v20 = vld [vmem:[#allocation58_spill] sm:$0xff] }
 0x7fc   : > { %v4614_v46 = vsel %vm4612_vm1, %v4602_v31, 2102212464  ;;  %v4620_v9 = vsel %vm4610_vm6, %v4617_v61, %v4619_v7  ;;  %v13611_v49 = vor.u32 %v4907_v3, %v4906_v19  ;;  %v13613_v33 = vor.u32 %v4910_v50, %v4909_v42  ;;  %v15236_v42 = vld [vmem:[#allocation105_spill] sm:$0xff]  ;;  %v15237_v50 = vld [vmem:[#allocation103_spill] sm:$0xff] }
 0x7fd   : > { %v4914_v28 = vor.u32 %v4913_v57, %v4912_v62  ;;  %v15233_v6 = vand.u32 2147483647, %v15230_v55  ;;  %v13618_v35 = vmul.u32.u64.low %v13571_v59, %v4624_v52  ;;  %v13619_v60 = vmul.u32.u64.high %v13571_v59, %v4624_v52, %v13618_v35 }
 0x7fe   : > { %vm4921_vm10 = vcmp.lt.s32.totalorder %v15234_v20, 1  ;;  %vm4923_vm11 = vcmp.lt.s32.totalorder %v15234_v20, 3  ;;  %v4897_v31 = vor.u32 8388608, %v4896_v34  ;;  %v13623_v0 = vor.u32 %v4803_v36, %v4802_v27  ;;  %v15235_v35 = vld [vmem:[#allocation104_spill] sm:$0xff] }
 0x7ff   : > { %v4792_v51 = vand.u32 8388607, %v15233_v6  ;;  %v13625_v61 = vor.u32 %v4806_v32, %v4805_v40  ;;  %v4810_v7 = vor.u32 %v4809_v24, %v4808_v15  ;;  %vm4817_vm1 = vcmp.lt.s32.totalorder %v12673_v22, 1 }
 0x800   : > { %v13628_v19 = vmul.u32.u64.low %v13571_v59, %v4620_v9  ;;  %v13629_v62 = vmul.u32.u64.high %v13571_v59, %v4620_v9, %v13628_v19  ;;  %vm4819_vm9 = vcmp.lt.s32.totalorder %v12673_v22, 3  ;;  %vm4922_vm4 = vcmp.lt.s32.totalorder %v15234_v20, 2 }
 0x801   : > { %v4929_v36 = vsel %vm4921_vm10, %v13611_v49, %v13613_v33  ;;  %v4931_v32 = vsel %vm4923_vm11, %v4914_v28, %v15235_v35  ;;  %v4793_v27 = vor.u32 8388608, %v4792_v51  ;;  %v4720_v34 = vsel %vm4714_vm15, %v4717_v47, %v4719_v41  ;;  %v15238_v47 = vld [vmem:[#allocation48_spill] sm:$0xff] }
 0x802   : > { %v4613_v52 = vsel %vm4609_vm14, %v4593_v12, %v4596_v26  ;;  %v4933_v3 = vsel %vm4921_vm10, %v13613_v33, %v4914_v28  ;;  %v4935_v57 = vsel %vm4923_vm11, %v15237_v50, %v15236_v42  ;;  %v13653_v15 = vshll.u32 %v4897_v31, 8 }
 0x803   : > { %vm4818_vm0 = vcmp.lt.s32.totalorder %v12673_v22, 2  ;;  %v4825_v38 = vsel %vm4817_vm1, %v13623_v0, %v13625_v61  ;;  %v4827_v26 = vsel %vm4819_vm9, %v4810_v7, %v13069_v30  ;;  %vm4059_vm5 = vcmp.lt.s32.totalorder %v15238_v47, 0 }
 0x804   : > { %v4615_v40 = vsel %vm4611_vm3, %v13536_v23, %v4614_v46  ;;  %v4932_v24 = vsel %vm4922_vm4, %v4929_v36, %v4931_v32  ;;  %v4829_v41 = vsel %vm4817_vm1, %v13625_v61, %v4810_v7  ;;  %v4831_v12 = vsel %vm4819_vm9, %v12973_v43, %v13086_v5 }
 0x805   : > { %v4534_v30 = vadd.s32 536870912, %v13528_v45  ;;  %v15240_v9 = vmul.u32 %v13424_v58, %v13489_v11  ;;  %v4936_v46 = vsel %vm4922_vm4, %v4933_v3, %v4935_v57  ;;  %v13685_v6 = vshll.u32 %v4793_v27, 8  ;;  %v8973_v27 = vld [vmem:[%s15239_s23 + $0x18] sm:$0xff]  }
 0x806   : > { %v4736_v51 = vmul.u32 %v13525_v29, %v4720_v34  ;;  %vm4738_vm8 = vc.u32 %v13554_v8, %v13548_v10  ;;  %v4739_v43 = vadd.s32 1, %v13549_v16  ;;  %v4828_v5 = vsel %vm4818_vm0, %v4825_v38, %v4827_v26  ;;  %8649 = vmatprep.subr.bf16.mxu1 %v8973_v27 }
 0x807   : > { %v13681_v23 = vadd.s32 %v13539_v18, %v15240_v9  ;;  %v4616_v58 = vsel %vm4610_vm6, %v4613_v52, %v4615_v40  ;;  %v13696_v11 = vmul.u32.u64.low %v13653_v15, %v4932_v24  ;;  %v13697_v18 = vmul.u32.u64.high %v13653_v15, %v4932_v24, %v13696_v11  ;;  %8650 = vmatpush3.bf16.msra.mxu1 %v8973_v27 }
 0x808   : > { %v4832_v31 = vsel %vm4818_vm0, %v4829_v41, %v4831_v12  ;;  %v4635_v29 = vadd.s32 1, %v13629_v62  ;;  %v4905_v36 = vshrl.u32 %v14865_v63, %v15229_v13  ;;  %vm4634_vm15 = vc.u32 %v13619_v60, %v13628_v19  ;;  %8651 = vmatprep.subr.bf16.mxu1 %v8974_v54 }
 0x809   : > { %v13706_v35 = vmul.u32.u64.low %v13653_v15, %v4936_v46  ;;  %v13707_v32 = vmul.u32.u64.high %v13653_v15, %v4936_v46, %v13706_v35  ;;  %v4926_v34 = vsel %vm4924_vm13, %v4914_v28, 2102212464  ;;  %v4740_v42 = vsel %vm4738_vm8, %v4739_v43, %v13549_v16 }
 0x80a   : > { %v13716_v52 = vmul.u32.u64.low %v13685_v6, %v4828_v5  ;;  %v13717_v3 = vmul.u32.u64.high %v13685_v6, %v4828_v5, %v13716_v52  ;;  %v4801_v13 = vshrl.u32 %v14865_v63, %v12676_v21  ;;  %vm3945_vm2 = vcmp.eq.s32.totalorder %v13162_v39, 0 }
 0x80b   : > { %v13724_v50 = vmul.u32.u64.low %v13685_v6, %v4832_v31  ;;  %v13725_v57 = vmul.u32.u64.high %v13685_v6, %v4832_v31, %v13724_v50  ;;  %vm3948_vm13 = vcmp.eq.s32.totalorder %v13162_v39, 2  ;;  %v15241_v28 = vand.u32 2147483647, %v15238_v47  ;;  %8652 = vmatpush3.bf16.msra.mxu1 %v8974_v54 }
 0x80c   : > { %v15244_v16 = vshll.u32 %v13409_v56, 23  ;;  %v15245_v63 = vsub.s32 0, %v13477_v4  ;;  %v4632_v40 = vmul.u32 %v13571_v59, %v4616_v58  ;;  %v4822_v24 = vsel %vm4820_vm7, %v4810_v7, 2102212464  ;;  %v8975_v59 = vld [vmem:[%s15239_s23 + $0x8] sm:$0xff]   ;;  %v15249_v50 = vld [vmem:[#allocation37_spill] sm:$0xff] }
 0x80d   : > { %vm13731_vm14 = vcmp.le.f32.partialorder %v15241_v28, 0.7853982  ;;  %v13743_v41 = vshrl.u32 %v4534_v30, 30  ;;  %v4636_v12 = vsel %vm4634_vm15, %v4635_v29, %v13629_v62  ;;  %v4925_v56 = vsel %vm4921_vm10, %v4905_v36, %v13611_v49  ;;  %8653 = vmatprep.subr.bf16.mxu1 %v8975_v59 }
 0x80e   : > { %v4032_v26 = vor.u32 4788187, %v15244_v16  ;;  %v7885_v21 = vmin.u32 %v15245_v63, %v13477_v4  ;;  %v4927_v9 = vsel %vm4923_vm11, %v13613_v33, %v4926_v34  ;;  %v3949_v7 = vxor.u32 2147483648, %v13258_v37  ;;  %v15250_v63 = vld [vmem:[#allocation44_spill] sm:$0xff] }
 0x80f   : > { %v15246_v30 = vsub.s32 4, %v13000_v25  ;;  %v15247_v62 = vshll.u32 %v13479_v44, 30  ;;  %v13767_v49 = vadd.s32 %v4740_v42, %v4736_v51  ;;  %v4141_v5 = vxor.u32 2147483648, %v13359_v17  ;;  %8654 = vmatpush3.bf16.msra.mxu1 %v8975_v59 }
 0x810   : > { %v4430_v33 = vadd.s32 536870912, %v13681_v23  ;;  %v4821_v58 = vsel %vm4817_vm1, %v4801_v13, %v13623_v0  ;;  %v4823_v31 = vsel %vm4819_vm9, %v13625_v61, %v4822_v24  ;;  %vm3944_vm7 = vcmp.lt.s32.totalorder %v13162_v39, 2  ;;  %v15248_v13 = vld [vmem:[#allocation69_spill] sm:$0xff] }
 0x811   : > { %v4144_v46 = vsel %vm4059_vm5, %v15246_v30, %v13000_v25  ;;  %v13765_v43 = vsub.s32 %v13413_v53, %v15247_v62  ;;  %v4333_v25 = vclz %v7885_v21  ;;  %v13778_v29 = vadd.s32 %v4636_v12, %v4632_v40  ;;  %v15254_v62 = vld [vmem:[#allocation71_spill] sm:$0xff] }
 0x812   : > { %v4928_v53 = vsel %vm4922_vm4, %v4925_v56, %v4927_v9  ;;  %v4947_v51 = vadd.s32 1, %v13697_v18  ;;  %vm3844_vm3 = vcmp.eq.s32.totalorder %v13210_v14, 2  ;;  %v4033_v36 = vand.u32 2147483647, %v4032_v26 }
 0x813   : > { %v4035_v0 = vcvt.s32.f32 %v13471_v1  ;;  %v4536_v35 = vshll.u32 %v13743_v41, 30  ;;  %vm4946_vm6 = vc.u32 %v13707_v32, %v13696_v11  ;;  %vm3841_vm10 = vcmp.eq.s32.totalorder %v13210_v14, 0 }
 0x814   : > { %v4227_v61 = vsub.s32 0, %v13765_v43  ;;  %v4742_v20 = vadd.s32 536870912, %v13767_v49  ;;  %v4824_v27 = vsel %vm4818_vm0, %v4821_v58, %v4823_v31  ;;  %v4843_v54 = vadd.s32 1, %v13717_v3 }
 0x815   : > { %vm3955_vm11 = vcmp.lt.s32.totalorder %v15135_v2, 0  ;;  %v3946_v1 = vxor.u32 2147483648, %v13291_v48  ;;  %v13796_v34 = vshrl.u32 %v4430_v33, 30  ;;  %v4944_v42 = vmul.u32 %v13653_v15, %v4928_v53  ;;  %v15255_v33 = vld [vmem:[#allocation66_spill] sm:$0xff] }
 0x816   : > { %vm4842_vm1 = vc.u32 %v13725_v57, %v13716_v52  ;;  %v13803_v28 = vadd.f32 %v15249_v50, %v15248_v13  ;;  %v7886_v16 = vadd.s32 4294967294, %v4333_v25  ;;  %v4638_v22 = vadd.s32 536870912, %v13778_v29  ;;  %v15257_v25 = vld [vmem:[#allocation34_spill] sm:$0xff]  ;;  %v15258_v50 = vld [vmem:[#allocation36_spill] sm:$0xff] }
 0x817   : > { %v4948_v26 = vsel %vm4946_vm6, %v4947_v51, %v13697_v18  ;;  %vm3941_vm9 = vweird.f32 %v15250_v63  ;;  %vm3840_vm4 = vcmp.lt.s32.totalorder %v13210_v14, 2  ;;  %v4142_v15 = vsel %vm4059_vm5, %v4141_v5, %v13359_v17 }
 0x818   : > { %v4146_v21 = vsel %vm13731_vm14, 0, %v4144_v46  ;;  %v13815_v40 = vsub.s32 %v13528_v45, %v4536_v35  ;;  %v4840_v24 = vmul.u32 %v13685_v6, %v4824_v27  ;;  %v15251_v12 = vand.u32 2147483647, %v15135_v2 }
 0x819   : > { %v4036_v56 = vmul.f32 %v4035_v0, %v4033_v36  ;;  %v7881_v9 = vmin.u32 %v4227_v61, %v13765_v43  ;;  %v13825_v59 = vshrl.u32 %v4742_v20, 30  ;;  %v4844_v17 = vsel %vm4842_vm1, %v4843_v54, %v13717_v3  ;;  %v15256_v3 = vld [vmem:[#allocation56_spill] sm:$0xff] }
 0x81a   : > { %vm13820_vm0 = vcmp.le.f32.partialorder %v15251_v12, 0.7853982  ;;  %v3947_v45 = vsel %vm3945_vm2, %v13258_v37, %v3946_v1  ;;  %v3950_v6 = vsel %vm3948_vm13, %v3949_v7, %v13291_v48  ;;  %v4432_v30 = vshll.u32 %v13796_v34, 30 }
 0x81b   : > { %v13838_v46 = vadd.s32 %v4948_v26, %v4944_v42  ;;  %v3845_v5 = vxor.u32 2147483648, %v15254_v62  ;;  %v4039_v58 = vsub.s32 4, %v15255_v33  ;;  %vm7887_vm5 = vcmp.lt.s32.totalorder %v7886_v16, 0 }
 0x81c   : > { %v13842_v31 = vshrl.u32 %v4638_v22, 30  ;;  %vm3837_vm8 = vweird.f32 %v15256_v3  ;;  %v3842_v53 = vxor.u32 2147483648, %v15257_v25  ;;  %v4145_v37 = vsel %vm13731_vm14, %v15238_v47, %v4142_v15 }
 0x81d   : > { %v4539_v48 = vsub.s32 0, %v13815_v40  ;;  %v13850_v7 = vadd.s32 %v4844_v17, %v4840_v24  ;;  %v4150_v51 = vadd.s32 3, %v4146_v21  ;;  %v4037_v36 = vxor.u32 2147483648, %v4036_v56  ;;  %v15259_v21 = vld [vmem:[#allocation62_spill] sm:$0xff] }
 0x81e   : > { %v4229_v0 = vclz %v7881_v9  ;;  %v4744_v35 = vshll.u32 %v13825_v59, 30  ;;  %v3951_v61 = vsel %vm3944_vm7, %v3947_v45, %v3950_v6  ;;  %v13855_v20 = vsel %vm7887_vm5, 0, %v7886_v16 }
 0x81f   : > { %v13858_v27 = vsub.s32 %v13681_v23, %v4432_v30  ;;  %v4950_v38 = vadd.s32 536870912, %v13838_v46  ;;  %v3846_v54 = vsel %vm3844_vm3, %v3845_v5, %v15257_v25  ;;  %9075 = vcosq.f32 %v4145_v37  ;;  %v15261_v5 = vld [vmem:[#allocation39_spill] sm:$0xff] }
 0x820   : > { %v4040_v1 = vsel %vm3955_vm11, %v4039_v58, %v15255_v33  ;;  %v4640_v42 = vshll.u32 %v13842_v31, 30  ;;  %v3843_v39 = vsel %vm3841_vm10, %v15254_v62, %v3842_v53  ;;  %9077 = vsinq.f32 %v4145_v37  ;;  %v15260_v62 = vld [vmem:[#allocation100_spill] sm:$0xff]  ;;  %v15262_v37 = vld [vmem:[#allocation38_spill] sm:$0xff] }
 0x821   : > { %v7893_v23 = vmin.u32 %v4539_v48, %v13815_v40  ;;  %v4846_v13 = vadd.s32 536870912, %v13850_v7  ;;  %vm4267_vm15 = vcmp.lt.s32.totalorder %v15258_v50, 0  ;;  %v4038_v16 = vsel %vm3955_vm11, %v4037_v36, %v4036_v56 }
 0x822   : > { %v4341_v22 = vsub.s32 4294967266, %v13855_v20  ;;  %v7882_v26 = vadd.s32 4294967294, %v4229_v0  ;;  %v13878_v15 = vsub.s32 %v13767_v49, %v4744_v35  ;;  %v13882_v12 = vand.u32 3, %v4150_v51 }
 0x823   : > { %v4435_v9 = vsub.s32 0, %v13858_v27  ;;  %v13885_v17 = vshrl.u32 %v4950_v38, 30  ;;  %v3952_v45 = vsel %vm3941_vm9, nan, %v3951_v61  ;;  %v3847_v56 = vsel %vm3840_vm4, %v3843_v39, %v3846_v54 }
 0x824   : > { %v4042_v6 = vsel %vm13820_vm0, 0, %v4040_v1  ;;  %v13894_v49 = vsub.s32 %v13778_v29, %v4640_v42  ;;  %v4041_v30 = vsel %vm13820_vm0, %v15135_v2, %v4038_v16  ;;  %v4321_v33 = vadd.s32 %v15261_v5, %v15260_v62  ;;  %v15264_v29 = vld [vmem:[#allocation77_spill] sm:$0xff]  ;;  %v15265_v16 = vld [vmem:[#allocation32_spill] sm:$0xff] }
 0x825   : > { %v4541_v58 = vclz %v7893_v23  ;;  %v13901_v25 = vshrl.u32 %v4846_v13, 30  ;;  %v4337_v63 = vsub.s32 32, %v13855_v20  ;;  %v4342_v14 = vadd.s32 127, %v4341_v22 }
 0x826   : > { %vm7883_vm2 = vcmp.lt.s32.totalorder %v7882_v26, 0  ;;  %v4747_v53 = vsub.s32 0, %v13878_v15  ;;  %v13906_v48 = vadd.f32 %v15262_v37, %v3952_v45  ;;  %v4351_v51 = vsub.s32 4, %v15264_v29  ;;  %v15271_v37 = vld [vmem:[#allocation23_spill] sm:$0xff] }
 0x827   : > { %v7889_v18 = vmin.u32 %v4435_v9, %v13858_v27  ;;  %v4952_v36 = vshll.u32 %v13885_v17, 30  ;;  %v3848_v0 = vsel %vm3837_vm8, nan, %v3847_v56  ;;  %9079 = vcosq.f32 %v4041_v30 }
 0x828   : > { %15263 = vst [vmem:[#allocation24_spill] sm:$0xff] %v13906_v48  ;;  %v4046_v35 = vadd.s32 3, %v4042_v6  ;;  %v4643_v61 = vsub.s32 0, %v13894_v49  ;;  %9081 = vsinq.f32 %v4041_v30  ;;  %v13914_v38 = vsel %vm7883_vm2, 0, %v7882_v26  ;;  %v15270_v30 = vld [vmem:[#allocation43_spill] sm:$0xff] }
 0x829   : > { %v7894_v54 = vadd.s32 4294967294, %v4541_v58  ;;  %v4848_v1 = vshll.u32 %v13901_v25, 30  ;;  %v4338_v42 = vshll.u32 %v13477_v4, %v13855_v20  ;;  %v4339_v39 = vshrl.u32 %v4321_v33, %v4337_v63 }
 0x82a   : > { %v4343_v23 = vshll.u32 %v4342_v14, 23  ;;  %v7901_v13 = vmin.u32 %v4747_v53, %v13878_v15  ;;  %v13921_v3 = vadd.f32 %v15265_v16, %v3848_v0  ;;  %v4352_v22 = vsel %vm4267_vm15, %v4351_v51, %v15264_v29  ;;  %v15272_v29 = vld [vmem:[#allocation72_spill] sm:$0xff] }
 0x82b   : > { %v4437_v9 = vclz %v7889_v18  ;;  %v13927_v26 = vsub.s32 %v13838_v46, %v4952_v36  ;;  %vm4153_vm13 = vcmp.eq.s32.totalorder %v13882_v12, 0  ;;  %v15267_v45 = vand.u32 2147483647, %v15258_v50 }
 0x82c   : > { %15266 = vst [vmem:[#allocation27_spill] sm:$0xff] %v13921_v3  ;;  %v4237_v20 = vsub.s32 4294967266, %v13914_v38  ;;  %v7897_v56 = vmin.u32 %v4643_v61, %v13894_v49  ;;  %v9076_v6 = vpop.eup %9075  ;;  %vm4163_vm7 = vcmp.lt.s32.totalorder %v15270_v30, 0  ;;  %vm4152_vm3 = vcmp.lt.s32.totalorder %v13882_v12, 2 }
 0x82d   : > { %vm13932_vm14 = vcmp.le.f32.partialorder %v15267_v45, 0.7853982  ;;  %vm4156_vm6 = vcmp.eq.s32.totalorder %v13882_v12, 2  ;;  %v13941_v46 = vand.u32 3, %v4046_v35  ;;  %vm7895_vm10 = vcmp.lt.s32.totalorder %v7894_v54, 0  ;;  %v9078_v5 = vpop.eup %9077 }
 0x82e   : > { %v13944_v62 = vsub.s32 %v13850_v7, %v4848_v1  ;;  %v4340_v33 = vor.u32 %v4339_v39, %v4338_v42  ;;  %v4344_v58 = vor.u32 4788187, %v4343_v23  ;;  %v4354_v63 = vsel %vm13932_vm14, 0, %v4352_v22 }
 0x82f   : > { %v4749_v14 = vclz %v7901_v13  ;;  %v4217_v51 = vadd.s32 %v15272_v29, %v15271_v37  ;;  %v7890_v18 = vadd.s32 4294967294, %v4437_v9  ;;  %v4955_v36 = vsub.s32 0, %v13927_v26 }
 0x830   : > { %v4233_v0 = vsub.s32 32, %v13914_v38  ;;  %v4238_v7 = vadd.s32 127, %v4237_v20  ;;  %v13954_v35 = vsel %vm7895_vm10, 0, %v7894_v54  ;;  %v4645_v61 = vclz %v7897_v56 }
 0x831   : > { %vm4149_vm11 = vweird.f32 %v15238_v47  ;;  %v4154_v1 = vxor.u32 2147483648, %v9078_v5  ;;  %v4157_v42 = vxor.u32 2147483648, %v9076_v6  ;;  %v4358_v39 = vadd.s32 3, %v4354_v63 }
 0x832   : > { %v4851_v23 = vsub.s32 0, %v13944_v62  ;;  %v4345_v13 = vand.u32 2147483647, %v4344_v58  ;;  %v4347_v16 = vcvt.s32.f32 %v4340_v33  ;;  %v4247_v22 = vsub.s32 4, %v13479_v44 }
 0x833   : > { %v7902_v9 = vadd.s32 4294967294, %v4749_v14  ;;  %vm4049_vm1 = vcmp.eq.s32.totalorder %v13941_v46, 0  ;;  %vm4052_vm9 = vcmp.eq.s32.totalorder %v13941_v46, 2  ;;  %v15273_v54 = vand.u32 2147483647, %v15270_v30 }
 0x834   : > { %v4549_v20 = vsub.s32 4294967266, %v13954_v35  ;;  %vm7891_vm0 = vcmp.lt.s32.totalorder %v7890_v18, 0  ;;  %v7909_v56 = vmin.u32 %v4955_v36, %v13927_v26  ;;  %v4234_v33 = vshll.u32 %v13765_v43, %v13914_v38  ;;  %v9080_v37 = vpop.eup %9079  ;;  %v15277_v36 = vld [vmem:[#allocation76_spill] sm:$0xff] }
 0x835   : > { %vm13963_vm4 = vcmp.le.f32.partialorder %v15273_v54, 0.7853982  ;;  %v4235_v58 = vshrl.u32 %v4217_v51, %v4233_v0  ;;  %v4239_v63 = vshll.u32 %v4238_v7, 23  ;;  %v7898_v14 = vadd.s32 4294967294, %v4645_v61  ;;  %v9082_v3 = vpop.eup %9081  ;;  %v15276_v51 = vld [vmem:[#allocation64_spill] sm:$0xff] }
 0x836   : > { %v4155_v29 = vsel %vm4153_vm13, %v9076_v6, %v4154_v1  ;;  %v4158_v54 = vsel %vm4156_vm6, %v4157_v42, %v9078_v5  ;;  %v13975_v53 = vand.u32 3, %v4358_v39  ;;  %v7905_v24 = vmin.u32 %v4851_v23, %v13944_v62 }
 0x837   : > { %v4348_v48 = vmul.f32 %v4347_v16, %v4345_v13  ;;  %v4248_v43 = vsel %vm4163_vm7, %v4247_v22, %v13479_v44  ;;  %v13981_v38 = vsel %vm7891_vm0, 0, %v7890_v18  ;;  %vm7903_vm5 = vcmp.lt.s32.totalorder %v7902_v9, 0 }
 0x838   : > { %v4529_v0 = vadd.s32 %v15277_v36, %v15276_v51  ;;  %v4545_v6 = vsub.s32 32, %v13954_v35  ;;  %v4550_v7 = vadd.s32 127, %v4549_v20  ;;  %v4957_v5 = vclz %v7909_v56 }
 0x839   : > { %v4159_v61 = vsel %vm4152_vm3, %v4155_v29, %v4158_v54  ;;  %vm4048_vm8 = vcmp.lt.s32.totalorder %v13941_v46, 2  ;;  %v4236_v1 = vor.u32 %v4235_v58, %v4234_v33  ;;  %v4240_v42 = vor.u32 4788187, %v4239_v63  ;;  %v15278_v54 = vld [vmem:[#allocation106_spill] sm:$0xff] }
 0x83a   : > { %vm7899_vm2 = vcmp.lt.s32.totalorder %v7898_v14, 0  ;;  %v4250_v44 = vsel %vm13963_vm4, 0, %v4248_v43  ;;  %v4445_v18 = vsub.s32 4294967266, %v13981_v38  ;;  %v13992_v39 = vsel %vm7903_vm5, 0, %v7902_v9  ;;  %v15279_v43 = vld [vmem:[#allocation67_spill] sm:$0xff] }
 0x83b   : > { %v4853_v23 = vclz %v7905_v24  ;;  %v4050_v13 = vxor.u32 2147483648, %v9082_v3  ;;  %v4053_v16 = vxor.u32 2147483648, %v9080_v37  ;;  %v4349_v22 = vxor.u32 2147483648, %v4348_v48 }
 0x83c   : > { %v4546_v12 = vshll.u32 %v13815_v40, %v13954_v35  ;;  %v4547_v20 = vshrl.u32 %v4529_v0, %v4545_v6  ;;  %v4551_v56 = vshll.u32 %v4550_v7, 23  ;;  %v13996_v29 = vsel %vm7899_vm2, 0, %v7898_v14 }
 0x83d   : > { %v7910_v33 = vadd.s32 4294967294, %v4957_v5  ;;  %v14000_v58 = vsel %vm4149_vm11, nan, %v4159_v61  ;;  %vm4045_vm13 = vweird.f32 %v15135_v2  ;;  %v4241_v9 = vand.u32 2147483647, %v4240_v42 }
 0x83e   : > { %v4243_v63 = vcvt.s32.f32 %v4236_v1  ;;  %v4757_v24 = vsub.s32 4294967266, %v13992_v39  ;;  %v4425_v51 = vadd.s32 %v15279_v43, %v15278_v54  ;;  %v4441_v40 = vsub.s32 32, %v13981_v38  ;;  %v15280_v43 = vld [vmem:[#allocation28_spill] sm:$0xff] }
 0x83f   : > { %v4446_v35 = vadd.s32 127, %v4445_v18  ;;  %v7906_v36 = vadd.s32 4294967294, %v4853_v23  ;;  %v4051_v14 = vsel %vm4049_vm1, %v9080_v37, %v4050_v13  ;;  %v4054_v47 = vsel %vm4052_vm9, %v4053_v16, %v9082_v3 }
 0x840   : > { %v4254_v0 = vadd.s32 3, %v4250_v44  ;;  %v4653_v6 = vsub.s32 4294967266, %v13996_v29  ;;  %v4350_v7 = vsel %vm4267_vm15, %v4349_v22, %v4348_v48  ;;  %v4548_v5 = vor.u32 %v4547_v20, %v4546_v12 }
 0x841   : > { %v4552_v61 = vor.u32 4788187, %v4551_v56  ;;  %vm7911_vm3 = vcmp.lt.s32.totalorder %v7910_v33, 0  ;;  %v4244_v1 = vmul.f32 %v4243_v63, %v4241_v9  ;;  %v4737_v42 = vadd.s32 %v13548_v10, %v13554_v8 }
 0x842   : > { %v4753_v18 = vsub.s32 32, %v13992_v39  ;;  %v4758_v23 = vadd.s32 127, %v4757_v24  ;;  %v4442_v37 = vshll.u32 %v13858_v27, %v13981_v38  ;;  %v4443_v3 = vshrl.u32 %v4425_v51, %v4441_v40  ;;  %v8611_v40 = vpop.f32.mrf.mxu1 }
 0x843   : > { %v4447_v44 = vshll.u32 %v4446_v35, 23  ;;  %vm7907_vm6 = vcmp.lt.s32.totalorder %v7906_v36, 0  ;;  %v4633_v13 = vadd.s32 %v13628_v19, %v13619_v60  ;;  %v4649_v48 = vsub.s32 32, %v13996_v29 }
 0x844   : > { %v4654_v16 = vadd.s32 127, %v4653_v6  ;;  %v14022_v22 = vsel %vm7911_vm3, 0, %v7910_v33  ;;  %v4055_v10 = vsel %vm4048_vm8, %v4051_v14, %v4054_v47  ;;  %v4353_v8 = vsel %vm13932_vm14, %v15258_v50, %v4350_v7 }
 0x845   : > { %v4553_v12 = vand.u32 2147483647, %v4552_v61  ;;  %v4555_v27 = vcvt.s32.f32 %v4548_v5  ;;  %v4754_v38 = vshll.u32 %v13878_v15, %v13992_v39  ;;  %v4755_v20 = vshrl.u32 %v4737_v42, %v4753_v18  ;;  %v14051_v42 = vld [vmem:[%s15281_s26] ss:$0 sm:$0xff]  ;;  %v15282_v18 = vld [vmem:[#allocation73_spill] sm:$0xff]  ;;  %s14365_s26 = scalar_lea.vmem %s9341_s3, %s9354_s18 }
 0x846   : > { %v4759_v56 = vshll.u32 %v4758_v23, 23  ;;  %v14031_v60 = vsel %vm7907_vm6, 0, %v7906_v36  ;;  %v4245_v19 = vxor.u32 2147483648, %v4244_v1  ;;  %v14033_v9 = vand.u32 3, %v4254_v0  ;;  %v6486_v0 = vpop.f32.mrf.mxu1 }
 0x847   : > { %v4444_v33 = vor.u32 %v4443_v3, %v4442_v37  ;;  %v4965_v46 = vsub.s32 4294967266, %v14022_v22  ;;  %v4448_v63 = vor.u32 4788187, %v4447_v44  ;;  %v4650_v4 = vshll.u32 %v13894_v49, %v13996_v29 }
 0x848   : > { %v4651_v24 = vshrl.u32 %v4633_v13, %v4649_v48  ;;  %v4655_v54 = vshll.u32 %v4654_v16, 23  ;;  %vm4475_vm15 = vcmp.lt.s32.totalorder %v15280_v43, 0  ;;  %v14041_v15 = vsel %vm4045_vm13, nan, %v4055_v10  ;;  %v8612_v44 = vpop.f32.mrf.mxu1 }
 0x849   : > { %9083 = vcosq.f32 %v4353_v8  ;;  %v4556_v39 = vmul.f32 %v4555_v27, %v4553_v12  ;;  %v4861_v51 = vsub.s32 4294967266, %v14031_v60  ;;  %v4559_v35 = vsub.s32 4, %v13743_v41 }
 0x84a   : > { %9085 = vsinq.f32 %v4353_v8  ;;  %v4756_v36 = vor.u32 %v4755_v20, %v4754_v38  ;;  %v4760_v14 = vor.u32 4788187, %v4759_v56  ;;  %v4246_v49 = vsel %vm4163_vm7, %v4245_v19, %v4244_v1  ;;  %v6489_v20 = vpop.f32.mrf.mxu1  ;;  %v15286_v56 = vld [vmem:[#allocation80_spill] sm:$0xff] }
 0x84b   : > { %v4945_v29 = vadd.s32 %v13696_v11, %v13707_v32  ;;  %v4961_v2 = vsub.s32 32, %v14022_v22  ;;  %v4966_v47 = vadd.s32 127, %v4965_v46  ;;  %v4449_v6 = vand.u32 2147483647, %v4448_v63 }
 0x84c   : > { %v4451_v7 = vcvt.s32.f32 %v4444_v33  ;;  %v4652_v5 = vor.u32 %v4651_v24, %v4650_v4  ;;  %v4656_v61 = vor.u32 4788187, %v4655_v54  ;;  %vm4371_vm14 = vcmp.lt.s32.totalorder %v15282_v18, 0  ;;  %v8615_v54 = vpop.f32.mrf.mxu1 }
 0x84d   : > { %v15283_v23 = vand.u32 2147483647, %v15280_v43  ;;  %v4557_v1 = vxor.u32 2147483648, %v4556_v39  ;;  %v4841_v11 = vadd.s32 %v13716_v52, %v13725_v57  ;;  %v4857_v32 = vsub.s32 32, %v14031_v60 }
 0x84e   : > { %v4862_v3 = vadd.s32 127, %v4861_v51  ;;  %v4761_v13 = vand.u32 2147483647, %v4760_v14  ;;  %v4763_v48 = vcvt.s32.f32 %v4756_v36  ;;  %v6487_v16 = vadd.f32 %v14051_v42, %v6486_v0 }
 0x84f   : > { %vm14056_vm10 = vcmp.le.f32.partialorder %v15283_v23, 0.7853982  ;;  %v6498_v10 = vadd.f32 %v8612_v44, %v14051_v42  ;;  %v4962_v8 = vshll.u32 %v13927_v26, %v14022_v22  ;;  %v4963_v12 = vshrl.u32 %v4945_v29, %v4961_v2  ;;  %v15287_v26 = vld [vmem:[#allocation81_spill] sm:$0xff]  ;;  %v6502_v2 = vpop.f32.mrf.mxu1  ;;  %v8972_v23 = vld [vmem:[%s15207_s22] sm:$0xff]  }
 0x850   : > { %v4967_v27 = vshll.u32 %v4966_v47, 23  ;;  %v6495_v38 = vadd.f32 %v8611_v40, %v14051_v42  ;;  %vm4683_vm7 = vcmp.lt.s32.totalorder %v15286_v56, 0  ;;  %v4452_v52 = vmul.f32 %v4451_v7, %v4449_v6 }
 0x851   : > { %v4657_v57 = vand.u32 2147483647, %v4656_v61  ;;  %v4659_v19 = vcvt.s32.f32 %v4652_v5  ;;  %v6490_v33 = vadd.f32 %v14051_v42, %v6489_v20  ;;  %v4858_v46 = vshll.u32 %v13944_v62, %v14031_v60  ;;  %v8616_v61 = vpop.f32.mrf.mxu1  ;;  %v15292_v20 = vld [vmem:[#allocation52_spill] sm:$0xff] }
 0x852   : > { %v4859_v63 = vshrl.u32 %v4841_v11, %v4857_v32  ;;  %v4863_v4 = vshll.u32 %v4862_v3, 23  ;;  %v6552_v24 = vmax.f32 %v6498_v10, 0.0  ;;  %vm4579_vm11 = vcmp.lt.s32.totalorder %v15287_v26, 0 }
 0x853   : > { %v4249_v22 = vsel %vm13963_vm4, %v15270_v30, %v4246_v49  ;;  %v14079_v51 = vsel %vm4475_vm15, %v4559_v35, %v13743_v41  ;;  %v6549_v40 = vmax.f32 %v6487_v16, 0.0  ;;  %v6550_v36 = vmax.f32 %v6490_v33, 0.0  ;;  %v6505_v10 = vpop.f32.mrf.mxu1 }
 0x854   : > { %v4764_v14 = vmul.f32 %v4763_v48, %v4761_v13  ;;  %v4964_v62 = vor.u32 %v4963_v12, %v4962_v8  ;;  %v4968_v60 = vor.u32 4788187, %v4967_v27  ;;  %v6551_v29 = vmax.f32 %v6495_v38, 0.0  ;;  %v15291_v8 = vld [vmem:[#allocation90_spill] sm:$0xff] }
 0x855   : > { %v4558_v47 = vsel %vm4475_vm15, %v4557_v1, %v4556_v39  ;;  %v15288_v0 = vand.u32 2147483647, %v15282_v18  ;;  %v4453_v49 = vxor.u32 2147483648, %v4452_v52  ;;  %v6565_v41 = vpack.c.bf16 %v6550_v36, %v6549_v40 }
 0x856   : > { %v4660_v35 = vmul.f32 %v4659_v19, %v4657_v57  ;;  %v4860_v6 = vor.u32 %v4859_v63, %v4858_v46  ;;  %v4864_v7 = vor.u32 4788187, %v4863_v4  ;;  %v6566_v5 = vpack.c.bf16 %v6552_v24, %v6551_v29  ;;  %v14090_v11 = vpop.eup %9083  ;;  %v8619_v63 = vpop.f32.mrf.mxu1 }
 0x857   : > { %vm14085_vm1 = vcmp.le.f32.partialorder %v15288_v0, 0.7853982  ;;  %9087 = vcosq.f32 %v4249_v22  ;;  %v4562_v39 = vsel %vm14056_vm10, 0, %v14079_v51  ;;  %v6503_v1 = vadd.f32 %v14051_v42, %v6502_v2  ;;  %8633 = vmatprep.mubr.msk.bf16.mxu0 %vm5370_vm12, %v6565_v41  ;;  %v14098_v3 = vpop.eup %9085 }
 0x858   : > { %v6514_v32 = vadd.f32 %v8616_v61, %v14051_v42  ;;  %v4765_v44 = vxor.u32 2147483648, %v4764_v14  ;;  %v4969_v13 = vand.u32 2147483647, %v4968_v60  ;;  %v4971_v48 = vcvt.s32.f32 %v4964_v62  ;;  %8634 = vmatmul.mubr.msk.bf16.vlgmr.msra.gmra.mxu0 %vm5370_vm12, %v6566_v5  ;;  %v6518_v29 = vpop.f32.mrf.mxu1 }
 0x859   : > { %v6511_v16 = vadd.f32 %v8615_v54, %v14051_v42  ;;  %vm4891_vm9 = vcmp.lt.s32.totalorder %v15291_v8, 0  ;;  %9089 = vsinq.f32 %v4249_v22  ;;  %v4561_v12 = vsel %vm14056_vm10, %v15280_v43, %v4558_v47  ;;  %8674 = vmatpush3.bf16.msra.mxu0 %v15292_v20 }
 0x85a   : > { %v4454_v27 = vsel %vm4371_vm14, %v4453_v49, %v4452_v52  ;;  %v6506_v38 = vadd.f32 %v14051_v42, %v6505_v10  ;;  %v4661_v57 = vxor.u32 2147483648, %v4660_v35  ;;  %v4865_v19 = vand.u32 2147483647, %v4864_v7  ;;  %8675 = vmatprep.subr.bf16.mxu0 %v8972_v23  ;;  %v8620_v5 = vpop.f32.mrf.mxu1 }
 0x85b   : > { %v4867_v33 = vcvt.s32.f32 %v4860_v6  ;;  %v6556_v46 = vmax.f32 %v6514_v32, 0.0  ;;  %vm4787_vm4 = vcmp.lt.s32.totalorder %v15230_v55, 0  ;;  %v4365_v4 = vxor.u32 2147483648, %v14090_v11 }
 0x85c   : > { %v15293_v24 = vand.u32 2147483647, %v15286_v56  ;;  %v6553_v52 = vmax.f32 %v6503_v1, 0.0  ;;  %v6554_v22 = vmax.f32 %v6506_v38, 0.0  ;;  %v4455_v40 = vsub.s32 4, %v13796_v34 }
 0x85d   : > { %v4766_v36 = vsel %vm4683_vm7, %v4765_v44, %v4764_v14  ;;  %v4972_v62 = vmul.f32 %v4971_v48, %v4969_v13  ;;  %v6555_v60 = vmax.f32 %v6511_v16, 0.0  ;;  %vm4361_vm5 = vcmp.eq.s32.totalorder %v13975_v53, 0  ;;  %8676 = vmatpush3.bf16.msra.mxu0 %v8972_v23  ;;  %v6521_v13 = vpop.f32.mrf.mxu1 }
 0x85e   : > { %vm14114_vm0 = vcmp.le.f32.partialorder %v15293_v24, 0.7853982  ;;  %vm4364_vm8 = vcmp.eq.s32.totalorder %v13975_v53, 2  ;;  %9091 = vcosq.f32 %v4561_v12  ;;  %v4457_v2 = vsel %vm14085_vm1, %v15282_v18, %v4454_v27 }
 0x85f   : > { %v15296_v47 = vand.u32 2147483647, %v15287_v26  ;;  %v6567_v49 = vpack.c.bf16 %v6554_v22, %v6553_v52  ;;  %v4767_v14 = vsub.s32 4, %v13825_v59  ;;  %v4662_v41 = vsel %vm4579_vm11, %v4661_v57, %v4660_v35  ;;  %v8623_v20 = vpop.f32.mrf.mxu1 }
 0x860   : > { %v4868_v6 = vmul.f32 %v4867_v33, %v4865_v19  ;;  %v6568_v7 = vpack.c.bf16 %v6556_v46, %v6555_v60  ;;  %9093 = vsinq.f32 %v4561_v12  ;;  %v4769_v61 = vsel %vm14114_vm0, %v15286_v56, %v4766_v36 }
 0x861   : > { %vm14128_vm2 = vcmp.le.f32.partialorder %v15296_v47, 0.7853982  ;;  %v6519_v1 = vadd.f32 %v14051_v42, %v6518_v29  ;;  %v6530_v32 = vadd.f32 %v8620_v5, %v14051_v42  ;;  %8637 = vmatprep.mubr.msk.bf16.mxu0 %vm5370_vm12, %v6567_v49  ;;  %v4362_v23 = vxor.u32 2147483648, %v14098_v3  ;;  %v6534_v52 = vpop.f32.mrf.mxu1 }
 0x862   : > { %9095 = vcosq.f32 %v4457_v2  ;;  %v4973_v44 = vxor.u32 2147483648, %v4972_v62  ;;  %v6527_v35 = vadd.f32 %v8619_v63, %v14051_v42  ;;  %8638 = vmatmul.mubr.msk.bf16.gmra.mxu0 %vm5370_vm12, %v6568_v7  ;;  %v4456_v48 = vsel %vm4371_vm14, %v4455_v40, %v13796_v34 }
 0x863   : > { %9097 = vsinq.f32 %v4457_v2  ;;  %v4665_v16 = vsel %vm14128_vm2, %v15287_v26, %v4662_v41  ;;  %v6522_v10 = vadd.f32 %v14051_v42, %v6521_v13  ;;  %vm4360_vm13 = vcmp.lt.s32.totalorder %v13975_v53, 2  ;;  %v8624_v51 = vpop.f32.mrf.mxu1 }
 0x864   : > { %v4768_v12 = vsel %vm4683_vm7, %v4767_v14, %v13825_v59  ;;  %9099 = vcosq.f32 %v4769_v61  ;;  %v4869_v27 = vxor.u32 2147483648, %v4868_v6  ;;  %v6560_v38 = vmax.f32 %v6530_v32, 0.0  ;;  %v14161_v46 = vpop.eup %9087 }
 0x865   : > { %9101 = vsinq.f32 %v4769_v61  ;;  %v15299_v34 = vand.u32 2147483647, %v15291_v8  ;;  %v6557_v19 = vmax.f32 %v6519_v1, 0.0  ;;  %v6558_v33 = vmax.f32 %v6522_v10, 0.0  ;;  %v6537_v7 = vpop.f32.mrf.mxu1 }
 0x866   : > { %vm4257_vm6 = vcmp.eq.s32.totalorder %v14033_v9, 0  ;;  %v4663_v63 = vsub.s32 4, %v13842_v31  ;;  %9103 = vcosq.f32 %v4665_v16  ;;  %v4974_v59 = vsel %vm4891_vm9, %v4973_v44, %v4972_v62  ;;  %v9090_v36 = vpop.eup %9089 }
 0x867   : > { %vm14157_vm3 = vcmp.le.f32.partialorder %v15299_v34, 0.7853982  ;;  %v6559_v24 = vmax.f32 %v6527_v35, 0.0  ;;  %vm4260_vm15 = vcmp.eq.s32.totalorder %v14033_v9, 2  ;;  %v4566_v22 = vadd.s32 3, %v4562_v39 }
 0x868   : > { %9105 = vsinq.f32 %v4665_v16  ;;  %v6569_v40 = vpack.c.bf16 %v6558_v33, %v6557_v19  ;;  %vm4357_vm14 = vweird.f32 %v15258_v50  ;;  %v4458_v60 = vsel %vm14085_vm1, 0, %v4456_v48 }
 0x869   : > { %v15302_v29 = vand.u32 2147483647, %v15230_v55  ;;  %v4870_v37 = vsel %vm4787_vm4, %v4869_v27, %v4868_v6  ;;  %v6570_v2 = vpack.c.bf16 %v6560_v38, %v6559_v24  ;;  %v4770_v39 = vsel %vm14114_vm0, 0, %v4768_v12 }
 0x86a   : > { %v4977_v47 = vsel %vm14157_vm3, %v15291_v8, %v4974_v59  ;;  %v6535_v45 = vadd.f32 %v14051_v42, %v6534_v52  ;;  %v6546_v49 = vadd.f32 %v8624_v51, %v14051_v42  ;;  %8641 = vmatprep.mubr.msk.bf16.mxu0 %vm5370_vm12, %v6569_v40  ;;  %v4363_v14 = vsel %vm4361_vm5, %v14090_v11, %v4362_v23 }
 0x86b   : > { %vm14177_vm7 = vcmp.le.f32.partialorder %v15302_v29, 0.7853982  ;;  %v4366_v54 = vsel %vm4364_vm8, %v4365_v4, %v14098_v3  ;;  %v4664_v41 = vsel %vm4579_vm11, %v4663_v63, %v13842_v31  ;;  %v6543_v6 = vadd.f32 %v8623_v20, %v14051_v42  ;;  %8642 = vmatmul.mubr.msk.bf16.gmra.mxu0 %vm5370_vm12, %v6570_v2  ;;  %v14209_v32 = vpop.eup %9091  ;;  %v15305_v63 = vld [vmem:[#allocation20_spill] sm:$0xff] }
 0x86c   : > { %v4258_v5 = vxor.u32 2147483648, %v9090_v36  ;;  %v4261_v61 = vxor.u32 2147483648, %v14161_v46  ;;  %v4873_v1 = vsel %vm14177_vm7, %v15230_v55, %v4870_v37  ;;  %v6538_v11 = vadd.f32 %v14051_v42, %v6537_v7  ;;  %v15308_v37 = vld [vmem:[#allocation68_spill] sm:$0xff] }
 0x86d   : > { %v4462_v3 = vadd.s32 3, %v4458_v60  ;;  %v4774_v4 = vadd.s32 3, %v4770_v39  ;;  %9107 = vcosq.f32 %v4977_v47  ;;  %v6564_v31 = vmax.f32 %v6546_v49, 0.0  ;;  %v9094_v13 = vpop.eup %9093 }
 0x86e   : > { %v4666_v23 = vsel %vm14128_vm2, 0, %v4664_v41  ;;  %9109 = vsinq.f32 %v4977_v47  ;;  %v6561_v44 = vmax.f32 %v6535_v45, 0.0  ;;  %v6562_v35 = vmax.f32 %v6538_v11, 0.0 }
 0x86f   : > { %vm4253_vm10 = vweird.f32 %v15270_v30  ;;  %v4975_v48 = vsub.s32 4, %v13885_v17  ;;  %v4871_v16 = vsub.s32 4, %v13901_v25  ;;  %9111 = vcosq.f32 %v4873_v1  ;;  %v9096_v10 = vpop.eup %9095 }
 0x870   : > { %v6563_v42 = vmax.f32 %v6543_v6, 0.0  ;;  %v4367_v12 = vsel %vm4360_vm13, %v4363_v14, %v4366_v54  ;;  %v14218_v27 = vand.u32 3, %v4566_v22  ;;  %9113 = vsinq.f32 %v4873_v1  ;;  %v9098_v38 = vpop.eup %9097  ;;  %v15306_v22 = vld [vmem:[#allocation33_spill] sm:$0xff] }
 0x871   : > { %v6571_v0 = vpack.c.bf16 %v6562_v35, %v6561_v44  ;;  %v14220_v20 = vand.u32 3, %v4462_v3  ;;  %v4670_v34 = vadd.s32 3, %v4666_v23  ;;  %vm6963_vm11 = vcmask 261120   ;;  %v9100_v33 = vpop.eup %9099 }
 0x872   : > { %v6572_v19 = vpack.c.bf16 %v6564_v31, %v6563_v42  ;;  %v14224_v59 = vadd.f32 %v15305_v63, %v14000_v58  ;;  %vm4256_vm1 = vcmp.lt.s32.totalorder %v14033_v9, 2  ;;  %v4259_v53 = vsel %vm4257_vm6, %v14161_v46, %v4258_v5  ;;  %v9102_v52 = vpop.eup %9101 }
 0x873   : > { %v4262_v24 = vsel %vm4260_vm15, %v4261_v61, %v9090_v36  ;;  %8645 = vmatprep.mubr.msk.bf16.mxu0 %vm5370_vm12, %v6571_v0  ;;  %v14235_v40 = vadd.f32 %v15306_v22, %v14041_v15  ;;  %v4775_v60 = vand.u32 3, %v4774_v4  ;;  %v4976_v58 = vsel %vm4891_vm9, %v4975_v48, %v13885_v17  ;;  %v9104_v46 = vpop.eup %9103  ;;  %v15307_v15 = vld [vmem:[#allocation59_spill] sm:$0xff] }
 0x874   : > { %v4872_v29 = vsel %vm4787_vm4, %v4871_v16, %v13901_v25  ;;  %8646 = vmatmul.mubr.msk.bf16.gmra.mxu0 %vm5370_vm12, %v6572_v19  ;;  %v4368_v36 = vsel %vm4357_vm14, nan, %v4367_v12  ;;  %vm4568_vm0 = vcmp.lt.s32.totalorder %v14218_v27, 2  ;;  %vm4569_vm5 = vcmp.eq.s32.totalorder %v14218_v27, 0  ;;  %v15312_v48 = vld [vmem:[#allocation27_spill] sm:$0xff]  ;;  %v15314_v12 = vld [vmem:[#allocation29_spill] sm:$0xff] }
 0x875   : > { %vm4572_vm8 = vcmp.eq.s32.totalorder %v14218_v27, 2  ;;  %v15309_v2 = vpack.c.bf16 %v15307_v15, %v15308_v37  ;;  %v9106_v17 = vpop.eup %9105  ;;  %v4263_v25 = vsel %vm4256_vm1, %v4259_v53, %v4262_v24  ;;  %vm4465_vm9 = vcmp.eq.s32.totalorder %v14220_v20, 0  ;;  %v15316_v15 = vld [vmem:[#allocation21_spill] sm:$0xff]  ;;  %v15317_v37 = vld [vmem:[#allocation35_spill] sm:$0xff] }
 0x876   : > { %vm4468_vm4 = vcmp.eq.s32.totalorder %v14220_v20, 2  ;;  %v4671_v50 = vand.u32 3, %v4670_v34  ;;  %v4570_v51 = vxor.u32 2147483648, %v9094_v13  ;;  %v4573_v39 = vxor.u32 2147483648, %v14209_v32 }
 0x877   : > { %8677 = vmatprep.mubr.msk.bf16.mxu0 %vm6963_vm11, %v15309_v2  ;;  %v4978_v47 = vsel %vm14157_vm3, 0, %v4976_v58  ;;  %v4874_v45 = vsel %vm14177_vm7, 0, %v4872_v29  ;;  %vm4565_vm2 = vweird.f32 %v15280_v43  ;;  %v4466_v49 = vxor.u32 2147483648, %v9098_v38 }
 0x878   : > { %v4469_v14 = vxor.u32 2147483648, %v9096_v10  ;;  %vm4777_vm13 = vcmp.eq.s32.totalorder %v4775_v60, 0  ;;  %vm4780_vm6 = vcmp.eq.s32.totalorder %v4775_v60, 2  ;;  %v4778_v9 = vxor.u32 2147483648, %v9102_v52 }
 0x879   : > { %v4781_v54 = vxor.u32 2147483648, %v9100_v33  ;;  %v4674_v41 = vxor.u32 2147483648, %v9106_v17  ;;  %v4677_v6 = vxor.u32 2147483648, %v9104_v46  ;;  %vm4673_vm15 = vcmp.eq.s32.totalorder %v4671_v50, 0 }
 0x87a   : > { %vm4676_vm14 = vcmp.eq.s32.totalorder %v4671_v50, 2  ;;  %v4982_v7 = vadd.s32 3, %v4978_v47  ;;  %v4878_v5 = vadd.s32 3, %v4874_v45  ;;  %v9108_v61 = vpop.eup %9107  ;;  %v4264_v57 = vsel %vm4253_vm10, nan, %v4263_v25  ;;  %v15319_v25 = vld [vmem:[#allocation41_spill] sm:$0xff] }
 0x87b   : > { %v4571_v62 = vsel %vm4569_vm5, %v14209_v32, %v4570_v51  ;;  %v4574_v1 = vsel %vm4572_vm8, %v4573_v39, %v9094_v13  ;;  %vm4464_vm3 = vcmp.lt.s32.totalorder %v14220_v20, 2  ;;  %v9110_v11 = vpop.eup %9109  ;;  %v4467_v3 = vsel %vm4465_vm9, %v9096_v10, %v4466_v49  ;;  %v15311_v13 = vld [vmem:[#allocation24_spill] sm:$0xff] }
 0x87c   : > { %v4470_v4 = vsel %vm4468_vm4, %v4469_v14, %v9098_v38  ;;  %vm4776_vm7 = vcmp.lt.s32.totalorder %v4775_v60, 2  ;;  %vm4672_vm1 = vcmp.lt.s32.totalorder %v4671_v50, 2  ;;  %v15310_v30 = vpack.c.bf16 %v15259_v21, %v13803_v28  ;;  %v9112_v32 = vpop.eup %9111  ;;  %v15315_v38 = vld [vmem:[#allocation42_spill] sm:$0xff]  ;;  %v15322_v14 = vld [vmem:[#allocation53_spill] sm:$0xff] }
 0x87d   : > { %v4779_v31 = vsel %vm4777_vm13, %v9100_v33, %v4778_v9  ;;  %v4782_v23 = vsel %vm4780_vm6, %v4781_v54, %v9102_v52  ;;  %v4675_v44 = vsel %vm4673_vm15, %v9104_v46, %v4674_v41  ;;  %v4678_v35 = vsel %vm4676_vm14, %v4677_v6, %v9106_v17  ;;  %v9114_v42 = vpop.eup %9113  ;;  %v15323_v54 = vld [vmem:[#allocation45_spill] sm:$0xff] }
 0x87e   : > { %8678 = vmatmul.mubr.msk.bf16.vlgmr.msra.gmra.mxu0 %vm6963_vm11, %v15310_v30  ;;  %v15313_v16 = vpack.c.bf16 %v15311_v13, %v15312_v48  ;;  %v5149_v28 = vpack.c.bf16 %v14224_v59, %v14235_v40  ;;  %vm4461_vm10 = vweird.f32 %v15282_v18  ;;  %v4983_v21 = vand.u32 3, %v4982_v7  ;;  %v15318_v18 = vld [vmem:[#allocation30_spill] sm:$0xff] }
 0x87f   : > { %v4879_v10 = vand.u32 3, %v4878_v5  ;;  %v5105_v0 = vadd.f32 %v15314_v12, %v4368_v36  ;;  %v5100_v34 = vadd.f32 %v15315_v38, %v4264_v57  ;;  %v4575_v19 = vsel %vm4568_vm0, %v4571_v62, %v4574_v1 }
 0x880   : > { %8681 = vmatprep.mubr.msk.bf16.mxu0 %vm6963_vm11, %v15313_v16  ;;  %vm4773_vm5 = vweird.f32 %v15286_v56  ;;  %v4471_v33 = vsel %vm4464_vm3, %v4467_v3, %v4470_v4  ;;  %v4783_v63 = vsel %vm4776_vm7, %v4779_v31, %v4782_v23  ;;  %vm4669_vm8 = vweird.f32 %v15287_v26 }
 0x881   : > { %v4679_v59 = vsel %vm4672_vm1, %v4675_v44, %v4678_v35  ;;  %v4986_v53 = vxor.u32 2147483648, %v9110_v11  ;;  %v4989_v24 = vxor.u32 2147483648, %v9108_v61  ;;  %v4882_v52 = vxor.u32 2147483648, %v9114_v42 }
 0x882   : > { %v4885_v22 = vxor.u32 2147483648, %v9112_v32  ;;  %vm4985_vm9 = vcmp.eq.s32.totalorder %v4983_v21, 0  ;;  %vm4988_vm4 = vcmp.eq.s32.totalorder %v4983_v21, 2  ;;  %vm4881_vm13 = vcmp.eq.s32.totalorder %v4879_v10, 0 }
 0x883   : > { %vm4884_vm6 = vcmp.eq.s32.totalorder %v4879_v10, 2  ;;  %v5150_v27 = vpack.c.bf16 %v5105_v0, %v5100_v34  ;;  %v4576_v40 = vsel %vm4565_vm2, nan, %v4575_v19  ;;  %v4472_v20 = vsel %vm4461_vm10, nan, %v4471_v33  ;;  %v8979_v19 = vld [vmem:[%s15320_s2 + $0x8] sm:$0xff]  }
 0x884   : > { %v4784_v26 = vsel %vm4773_vm5, nan, %v4783_v63  ;;  %v4680_v60 = vsel %vm4669_vm8, nan, %v4679_v59  ;;  %vm4984_vm0 = vcmp.lt.s32.totalorder %v4983_v21, 2  ;;  %vm4880_vm15 = vcmp.lt.s32.totalorder %v4879_v10, 2 }
 0x885   : > { %v4987_v58 = vsel %vm4985_vm9, %v9108_v61, %v4986_v53  ;;  %v4990_v29 = vsel %vm4988_vm4, %v4989_v24, %v9110_v11  ;;  %v4883_v46 = vsel %vm4881_vm13, %v9112_v32, %v4882_v52  ;;  %v4886_v36 = vsel %vm4884_vm6, %v4885_v22, %v9114_v42  ;;  %v8029_v61 = vld [vmem:[%s15321_s10] ss:$0 sm:$0xff]  ;;  %v8978_v42 = vld [vmem:[%s15320_s2 + $0x10] sm:$0xff]   ;;  %s15326_s10 = sld [smem:[#allocation17_spill]] }
 0x886   : > { %8682 = vmatmul.mubr.msk.bf16.gmra.mxu0 %vm6963_vm11, %v5149_v28  ;;  %v5115_v43 = vadd.f32 %v15316_v15, %v4576_v40  ;;  %v5110_v2 = vadd.f32 %v15317_v37, %v4472_v20  ;;  %v5125_v17 = vadd.f32 %v15318_v18, %v4784_v26  ;;  %v5120_v56 = vadd.f32 %v15319_v25, %v4680_v60 }
 0x887   : > { %8685 = vmatprep.mubr.msk.bf16.mxu0 %vm6963_vm11, %v5150_v27  ;;  %vm4981_vm2 = vweird.f32 %v15291_v8  ;;  %v4991_v50 = vsel %vm4984_vm0, %v4987_v58, %v4990_v29  ;;  %vm4877_vm14 = vweird.f32 %v15230_v55  ;;  %v4887_v51 = vsel %vm4880_vm15, %v4883_v46, %v4886_v36  ;;  %v8976_v8 = vld [vmem:[%s15239_s23] sm:$0xff]   ;;  %v8977_v55 = vld [vmem:[%s15320_s2 + $0x18] sm:$0xff]  }
 0x888   : > { %v5151_v39 = vpack.c.bf16 %v5115_v43, %v5110_v2  ;;  %v5152_v47 = vpack.c.bf16 %v5125_v17, %v5120_v56  ;;  %v4992_v45 = vsel %vm4981_vm2, nan, %v4991_v50  ;;  %v4888_v49 = vsel %vm4877_vm14, nan, %v4887_v51  ;;  %8655 = vmatprep.subr.bf16.mxu1 %v8976_v8 }
 0x889   : > { %v5135_v9 = vadd.f32 %v15322_v14, %v4992_v45  ;;  %v5130_v41 = vadd.f32 %v15323_v54, %v4888_v49  ;;  %8656 = vmatpush3.bf16.msra.mxu1 %v8976_v8  ;;  %v8980_v54 = vld [vmem:[%s15320_s2] sm:$0xff]  }
 0x88a   : > { %8693 = vmatprep.subr.bf16.mxu1 %v8977_v55  ;;  %v8986_v8 = vld [vmem:[%s9326_s20] sm:$0xff]  }
 0x88b   : > { %v5153_v6 = vpack.c.bf16 %v5135_v9, %v5130_v41  ;;  %v8981_v41 = vld [vmem:[%s15324_s11 + $0x18] sm:$0xff]  }
 0x88e   : > { %8686 = vmatmul.mubr.msk.bf16.gmra.mxu0 %vm6963_vm11, %v5151_v39 }
 0x88f   : > { %8689 = vmatprep.mubr.msk.bf16.mxu0 %vm6963_vm11, %v5152_v47 }
 0x896   : > { %8690 = vmatmul.mubr.msk.bf16.gmra.mxu0 %vm6963_vm11, %v5153_v6  ;;  %v8985_v6 = vld [vmem:[%s9326_s20 + $0x8] sm:$0xff]  }
 0x897   : > { %8717 = vmatprep.subr.bf16.mxu0 %v8985_v6 }
 0x898   : > { %8718 = vmatpush3.bf16.msra.mxu0 %v8985_v6 }
 0x899   : > { %8719 = vmatprep.subr.bf16.mxu0 %v8986_v8 }
 0x89c   : > { %8720 = vmatpush3.bf16.msra.mxu0 %v8986_v8 }
 0x918   : > { %v8635_v7 = vpop.f32.mrf.mxu0 }
 0x919   : > { %v6679_v11 = vadd.f32 %v8635_v7, %v8029_v61 }
 0x91a   : > { %v6670_v5 = vpop.f32.mrf.mxu0 }
 0x91b   : > { %v6671_v62 = vadd.f32 %v8029_v61, %v6670_v5  ;;  %v6735_v44 = vmax.f32 %v6679_v11, 0.0 }
 0x91c   : > { %v8636_v57 = vpop.f32.mrf.mxu0 }
 0x91d   : > { %v6682_v1 = vadd.f32 %v8636_v57, %v8029_v61  ;;  %v6733_v31 = vmax.f32 %v6671_v62, 0.0 }
 0x91e   : > { %v6673_v3 = vpop.f32.mrf.mxu0 }
 0x91f   : > { %v6674_v4 = vadd.f32 %v8029_v61, %v6673_v3  ;;  %v6736_v30 = vmax.f32 %v6682_v1, 0.0 }
 0x921   : > { %v6734_v23 = vmax.f32 %v6674_v4, 0.0  ;;  %v14324_v48 = vpack.c.bf16 %v6736_v30, %v6735_v44  ;;  %v8982_v44 = vld [vmem:[%s15324_s11 + $0x10] sm:$0xff]  }
 0x922   : > { %v8639_v32 = vpop.f32.mrf.mxu0 }
 0x923   : > { %v14322_v13 = vpack.c.bf16 %v6734_v23, %v6733_v31  ;;  %v6695_v10 = vadd.f32 %v8639_v32, %v8029_v61 }
 0x924   : > { %v6686_v35 = vpop.f32.mrf.mxu0 }
 0x925   : > { %v6687_v28 = vadd.f32 %v8029_v61, %v6686_v35  ;;  %8657 = vmatprep.mubr.msk.bf16.mxu1 %vm5370_vm12, %v14322_v13  ;;  %v6739_v59 = vmax.f32 %v6695_v10, 0.0 }
 0x926   : > { %v8640_v16 = vpop.f32.mrf.mxu0  ;;  %8658 = vmatmul.mubr.msk.bf16.vlgmr.msra.gmra.mxu1 %vm5370_vm12, %v14324_v48 }
 0x927   : > { %v6698_v21 = vadd.f32 %v8640_v16, %v8029_v61  ;;  %8694 = vmatpush3.bf16.msra.mxu1 %v8977_v55  ;;  %v6737_v33 = vmax.f32 %v6687_v28, 0.0  ;;  %v14361_v55 = vld [vmem:[%s15325_s0] ss:$0 sm:$0xff]  ;;  %s14474_s0 = scalar_lea.vmem %s9336_s4, %s9354_s18 }
 0x928   : > { %v6689_v12 = vpop.f32.mrf.mxu0  ;;  %8695 = vmatprep.subr.bf16.mxu1 %v8978_v42 }
 0x929   : > { %v6690_v0 = vadd.f32 %v8029_v61, %v6689_v12  ;;  %v6740_v38 = vmax.f32 %v6698_v21, 0.0  ;;  %v8983_v21 = vld [vmem:[%s15324_s11 + $0x8] sm:$0xff]  }
 0x92b   : > { %v8643_v34 = vpop.f32.mrf.mxu0  ;;  %v6738_v63 = vmax.f32 %v6690_v0, 0.0  ;;  %8696 = vmatpush3.bf16.msra.mxu1 %v8978_v42  ;;  %v14334_v52 = vpack.c.bf16 %v6740_v38, %v6739_v59 }
 0x92c   : > { %8697 = vmatprep.subr.bf16.mxu1 %v8979_v19  ;;  %v6711_v20 = vadd.f32 %v8643_v34, %v8029_v61 }
 0x92d   : > { %v6702_v53 = vpop.f32.mrf.mxu0  ;;  %v14332_v24 = vpack.c.bf16 %v6738_v63, %v6737_v33  ;;  %v8984_v33 = vld [vmem:[%s15324_s11] sm:$0xff]  }
 0x92e   : > { %v6703_v27 = vadd.f32 %v8029_v61, %v6702_v53  ;;  %v6743_v15 = vmax.f32 %v6711_v20, 0.0 }
 0x92f   : > { %v8644_v22 = vpop.f32.mrf.mxu0  ;;  %8661 = vmatprep.mubr.msk.bf16.mxu1 %vm5370_vm12, %v14332_v24  ;;  %8698 = vmatpush3.bf16.msra.mxu1 %v8979_v19 }
 0x930   : > { %v6714_v40 = vadd.f32 %v8644_v22, %v8029_v61  ;;  %8662 = vmatmul.mubr.msk.bf16.gmra.mxu1 %vm5370_vm12, %v14334_v52  ;;  %v6741_v46 = vmax.f32 %v6703_v27, 0.0  ;;  %8699 = vmatprep.subr.bf16.mxu1 %v8980_v54 }
 0x931   : > { %v6705_v26 = vpop.f32.mrf.mxu0 }
 0x932   : > { %v6706_v60 = vadd.f32 %v8029_v61, %v6705_v26  ;;  %v6744_v58 = vmax.f32 %v6714_v40, 0.0 }
 0x933   : > { %8700 = vmatpush3.bf16.msra.mxu1 %v8980_v54  ;;  %v14443_v54 = vld [vmem:[%s15326_s10] ss:$0 sm:$0xff] }
 0x934   : > { %v8647_v29 = vpop.f32.mrf.mxu0  ;;  %v6742_v36 = vmax.f32 %v6706_v60, 0.0  ;;  %v14342_v2 = vpack.c.bf16 %v6744_v58, %v6743_v15  ;;  %8737 = vmatprep.subr.bf16.mxu1 %v8981_v41 }
 0x935   : > { %v6727_v56 = vadd.f32 %v8647_v29, %v8029_v61 }
 0x936   : > { %v6718_v43 = vpop.f32.mrf.mxu0  ;;  %v14340_v37 = vpack.c.bf16 %v6742_v36, %v6741_v46 }
 0x937   : > { %v6719_v17 = vadd.f32 %v8029_v61, %v6718_v43  ;;  %v6747_v49 = vmax.f32 %v6727_v56, 0.0 }
 0x938   : > { %v8648_v18 = vpop.f32.mrf.mxu0  ;;  %8665 = vmatprep.mubr.msk.bf16.mxu1 %vm5370_vm12, %v14340_v37 }
 0x939   : > { %v6730_v25 = vadd.f32 %v8648_v18, %v8029_v61  ;;  %8666 = vmatmul.mubr.msk.bf16.gmra.mxu1 %vm5370_vm12, %v14342_v2  ;;  %v6745_v47 = vmax.f32 %v6719_v17, 0.0 }
 0x93a   : > { %v6721_v50 = vpop.f32.mrf.mxu0 }
 0x93b   : > { %v6722_v51 = vadd.f32 %v8029_v61, %v6721_v50  ;;  %v6748_v39 = vmax.f32 %v6730_v25, 0.0 }
 0x93d   : > { %v6746_v45 = vmax.f32 %v6722_v51, 0.0  ;;  %v14350_v9 = vpack.c.bf16 %v6748_v39, %v6747_v49 }
 0x93f   : > { %v14348_v14 = vpack.c.bf16 %v6746_v45, %v6745_v47 }
 0x941   : > { %8669 = vmatprep.mubr.msk.bf16.mxu1 %vm5370_vm12, %v14348_v14 }
 0x942   : > { %8670 = vmatmul.mubr.msk.bf16.gmra.mxu1 %vm5370_vm12, %v14350_v9 }
 0x9e6   : > { %v8659_v7 = vpop.f32.mrf.mxu1 }
 0x9e7   : > { %v6889_v5 = vadd.f32 %v8659_v7, %v14361_v55 }
 0x9e8   : > { %v6880_v61 = vpop.f32.mrf.mxu1 }
 0x9e9   : > { %7571 = vst.msk [vmem:[%s14365_s26 + $0x10] sm:$0xff] %vm5370_vm12, %v6889_v5  ;;  %v6881_v57 = vadd.f32 %v14361_v55, %v6880_v61 }
 0x9ea   : > { %v8660_v62 = vpop.f32.mrf.mxu1 }
 0x9eb   : > { %7569 = vst.msk [vmem:[%s14365_s26] sm:$0xff] %vm5370_vm12, %v6881_v57  ;;  %v6892_v1 = vadd.f32 %v8660_v62, %v14361_v55 }
 0x9ec   : > { %v6883_v11 = vpop.f32.mrf.mxu1 }
 0x9ed   : > { %7572 = vst.msk [vmem:[%s14365_s26 + $0x18] sm:$0xff] %vm5370_vm12, %v6892_v1  ;;  %v6884_v3 = vadd.f32 %v14361_v55, %v6883_v11  ;;  %v6944_v31 = vpack.c.bf16 %v6892_v1, %v6889_v5 }
 0x9ef   : > { %v6943_v30 = vpack.c.bf16 %v6884_v3, %v6881_v57  ;;  %7570 = vst.msk [vmem:[%s14365_s26 + $0x8] sm:$0xff] %vm5370_vm12, %v6884_v3 }
 0x9f0   : > { %v8663_v4 = vpop.f32.mrf.mxu1 }
 0x9f1   : > { %v6905_v32 = vadd.f32 %v8663_v4, %v14361_v55  ;;  %8701 = vmatprep.mubr.msk.bf16.mxu1 %vm5370_vm12, %v6943_v30 }
 0x9f2   : > { %v6896_v23 = vpop.f32.mrf.mxu1  ;;  %8702 = vmatmul.mubr.msk.bf16.vlgmr.msra.gmra.mxu1 %vm5370_vm12, %v6944_v31 }
 0x9f3   : > { %7575 = vst.msk [vmem:[%s14365_s26 + $0x30] sm:$0xff] %vm5370_vm12, %v6905_v32  ;;  %v6897_v35 = vadd.f32 %v14361_v55, %v6896_v23  ;;  %8738 = vmatpush3.bf16.msra.mxu1 %v8981_v41 }
 0x9f4   : > { %v8664_v16 = vpop.f32.mrf.mxu1  ;;  %8739 = vmatprep.subr.bf16.mxu1 %v8982_v44 }
 0x9f5   : > { %7573 = vst.msk [vmem:[%s14365_s26 + $0x20] sm:$0xff] %vm5370_vm12, %v6897_v35  ;;  %v6908_v42 = vadd.f32 %v8664_v16, %v14361_v55 }
 0x9f6   : > { %v6899_v28 = vpop.f32.mrf.mxu1 }
 0x9f7   : > { %7576 = vst.msk [vmem:[%s14365_s26 + $0x38] sm:$0xff] %vm5370_vm12, %v6908_v42  ;;  %v6900_v10 = vadd.f32 %v14361_v55, %v6899_v28  ;;  %8740 = vmatpush3.bf16.msra.mxu1 %v8982_v44  ;;  %v6946_v34 = vpack.c.bf16 %v6908_v42, %v6905_v32 }
 0x9f8   : > { %8741 = vmatprep.subr.bf16.mxu1 %v8983_v21 }
 0x9f9   : > { %v8667_v12 = vpop.f32.mrf.mxu1  ;;  %v6945_v0 = vpack.c.bf16 %v6900_v10, %v6897_v35  ;;  %7574 = vst.msk [vmem:[%s14365_s26 + $0x28] sm:$0xff] %vm5370_vm12, %v6900_v10 }
 0x9fa   : > { %v6921_v38 = vadd.f32 %v8667_v12, %v14361_v55 }
 0x9fb   : > { %v6912_v19 = vpop.f32.mrf.mxu1  ;;  %8705 = vmatprep.mubr.msk.bf16.mxu1 %vm5370_vm12, %v6945_v0  ;;  %8742 = vmatpush3.bf16.msra.mxu1 %v8983_v21 }
 0x9fc   : > { %7579 = vst.msk [vmem:[%s14365_s26 + $0x50] sm:$0xff] %vm5370_vm12, %v6921_v38  ;;  %v6913_v63 = vadd.f32 %v14361_v55, %v6912_v19  ;;  %8706 = vmatmul.mubr.msk.bf16.gmra.mxu1 %vm5370_vm12, %v6946_v34  ;;  %8743 = vmatprep.subr.bf16.mxu1 %v8984_v33 }
 0x9fd   : > { %v8668_v59 = vpop.f32.mrf.mxu1 }
 0x9fe   : > { %7577 = vst.msk [vmem:[%s14365_s26 + $0x40] sm:$0xff] %vm5370_vm12, %v6913_v63  ;;  %v6924_v53 = vadd.f32 %v8668_v59, %v14361_v55 }
 0x9ff   : > { %v6915_v22 = vpop.f32.mrf.mxu1  ;;  %8744 = vmatpush3.bf16.msra.mxu1 %v8984_v33 }
 0xa00   : > { %7580 = vst.msk [vmem:[%s14365_s26 + $0x58] sm:$0xff] %vm5370_vm12, %v6924_v53  ;;  %v6916_v27 = vadd.f32 %v14361_v55, %v6915_v22  ;;  %v6948_v60 = vpack.c.bf16 %v6924_v53, %v6921_v38 }
 0xa02   : > { %v8671_v40 = vpop.f32.mrf.mxu1  ;;  %v6947_v20 = vpack.c.bf16 %v6916_v27, %v6913_v63  ;;  %7578 = vst.msk [vmem:[%s14365_s26 + $0x48] sm:$0xff] %vm5370_vm12, %v6916_v27 }
 0xa03   : > { %v6937_v26 = vadd.f32 %v8671_v40, %v14361_v55 }
 0xa04   : > { %v6928_v58 = vpop.f32.mrf.mxu1  ;;  %8709 = vmatprep.mubr.msk.bf16.mxu1 %vm5370_vm12, %v6947_v20 }
 0xa05   : > { %7583 = vst.msk [vmem:[%s14365_s26 + $0x70] sm:$0xff] %vm5370_vm12, %v6937_v26  ;;  %v6929_v29 = vadd.f32 %v14361_v55, %v6928_v58  ;;  %8710 = vmatmul.mubr.msk.bf16.gmra.mxu1 %vm5370_vm12, %v6948_v60 }
 0xa06   : > { %v8672_v46 = vpop.f32.mrf.mxu1 }
 0xa07   : > { %7581 = vst.msk [vmem:[%s14365_s26 + $0x60] sm:$0xff] %vm5370_vm12, %v6929_v29  ;;  %v6940_v36 = vadd.f32 %v8672_v46, %v14361_v55 }
 0xa08   : > { %v6931_v15 = vpop.f32.mrf.mxu1 }
 0xa09   : > { %7584 = vst.msk [vmem:[%s14365_s26 + $0x78] sm:$0xff] %vm5370_vm12, %v6940_v36  ;;  %v6932_v43 = vadd.f32 %v14361_v55, %v6931_v15  ;;  %v6950_v17 = vpack.c.bf16 %v6940_v36, %v6937_v26 }
 0xa0b   : > { %v6949_v18 = vpack.c.bf16 %v6932_v43, %v6929_v29  ;;  %7582 = vst.msk [vmem:[%s14365_s26 + $0x68] sm:$0xff] %vm5370_vm12, %v6932_v43 }
 0xa0d   : > { %8713 = vmatprep.mubr.msk.bf16.mxu1 %vm5370_vm12, %v6949_v18 }
 0xa0e   : > { %8714 = vmatmul.mubr.msk.bf16.gmra.mxu1 %vm5370_vm12, %v6950_v17 }
 0xa0f   : > { %8745 = vmatprep.mubr.msk.bf16.mxu1 %vm5370_vm12, %v14322_v13  ;;  %v8679_v13 = vpop.f32.mrf.mxu0 }
 0xa16   : > { %8746 = vmatmul.mubr.msk.bf16.vlgmr.msra.gmra.mxu1 %vm5370_vm12, %v14324_v48  ;;  %v7022_v48 = vpop.f32.mrf.mxu0 }
 0xa17   : > { %8749 = vmatprep.mubr.msk.bf16.mxu1 %vm5370_vm12, %v14332_v24 }
 0xa18   : > { %v8680_v25 = vpop.f32.mrf.mxu0 }
 0xa1a   : > { %v7025_v24 = vpop.f32.mrf.mxu0 }
 0xa1c   : > { %v8683_v56 = vpop.f32.mrf.mxu0 }
 0xa1e   : > { %8750 = vmatmul.mubr.msk.bf16.gmra.mxu1 %vm5370_vm12, %v14334_v52  ;;  %v7038_v50 = vpop.f32.mrf.mxu0 }
 0xa1f   : > { %8753 = vmatprep.mubr.msk.bf16.mxu1 %vm5370_vm12, %v14340_v37 }
 0xa20   : > { %v8684_v52 = vpop.f32.mrf.mxu0 }
 0xa22   : > { %v7041_v51 = vpop.f32.mrf.mxu0 }
 0xa24   : > { %v8687_v37 = vpop.f32.mrf.mxu0 }
 0xa26   : > { %8754 = vmatmul.mubr.msk.bf16.gmra.mxu1 %vm5370_vm12, %v14342_v2  ;;  %v7054_v41 = vpop.f32.mrf.mxu0 }
 0xa27   : > { %8757 = vmatprep.mubr.msk.bf16.mxu1 %vm5370_vm12, %v14348_v14 }
 0xa28   : > { %v8688_v57 = vpop.f32.mrf.mxu0 }
 0xa2a   : > { %v7057_v35 = vpop.f32.mrf.mxu0 }
 0xa2c   : > { %v8691_v34 = vpop.f32.mrf.mxu0 }
 0xa2e   : > { %8758 = vmatmul.mubr.msk.bf16.gmra.mxu1 %vm5370_vm12, %v14350_v9  ;;  %v7070_v60 = vpop.f32.mrf.mxu0  ;;  %vm7552_vm12 = vcmask 31744  }
 0xab2   : > { %v8703_v39 = vpop.f32.mrf.mxu1 }
 0xab3   : > { %v7176_v2 = vadd.f32 %v8703_v39, %v8679_v13  ;;  %v8692_v13 = vpop.f32.mrf.mxu0 }
 0xab4   : > { %v7167_v47 = vpop.f32.mrf.mxu1 }
 0xab5   : > { %v7168_v45 = vadd.f32 %v7167_v47, %v7022_v48  ;;  %v7238_v7 = vadd.f32 %v14443_v54, %v7176_v2 }
 0xab6   : > { %v8704_v49 = vpop.f32.mrf.mxu1 }
 0xab7   : > { %v7179_v14 = vadd.f32 %v8704_v49, %v8680_v25  ;;  %v7236_v9 = vadd.f32 %v14443_v54, %v7168_v45  ;;  %v7254_v30 = vmax.f32 %v7238_v7, 0.0  ;;  %v7073_v45 = vpop.f32.mrf.mxu0 }
 0xab8   : > { %v7170_v6 = vpop.f32.mrf.mxu1 }
 0xab9   : > { %v7239_v8 = vadd.f32 %v14443_v54, %v7179_v14  ;;  %v7171_v55 = vadd.f32 %v7170_v6, %v7025_v24  ;;  %v7252_v11 = vmax.f32 %v7236_v9, 0.0 }
 0xabb   : > { %v7237_v61 = vadd.f32 %v14443_v54, %v7171_v55  ;;  %v7255_v62 = vmax.f32 %v7239_v8, 0.0 }
 0xabc   : > { %v8707_v5 = vpop.f32.mrf.mxu1 }
 0xabd   : > { %v7253_v3 = vmax.f32 %v7237_v61, 0.0  ;;  %v7192_v32 = vadd.f32 %v8707_v5, %v8683_v56  ;;  %v7269_v16 = vpack.c.bf16 %v7255_v62, %v7254_v30 }
 0xabe   : > { %v7183_v1 = vpop.f32.mrf.mxu1 }
 0xabf   : > { %v7184_v4 = vadd.f32 %v7183_v1, %v7038_v50  ;;  %v7268_v23 = vpack.c.bf16 %v7253_v3, %v7252_v11  ;;  %v7242_v12 = vadd.f32 %v14443_v54, %v7192_v32 }
 0xac0   : > { %v8708_v31 = vpop.f32.mrf.mxu1 }
 0xac1   : > { %v7195_v44 = vadd.f32 %v8708_v31, %v8684_v52  ;;  %v7240_v28 = vadd.f32 %v14443_v54, %v7184_v4  ;;  %8721 = vmatprep.mubr.msk.bf16.mxu0 %vm6963_vm11, %v7268_v23  ;;  %v7258_v22 = vmax.f32 %v7242_v12, 0.0  ;;  %v14470_v23 = vld [vmem:[%s9331_s6] ss:$0 sm:$0xff] }
 0xac2   : > { %v7186_v42 = vpop.f32.mrf.mxu1  ;;  %8722 = vmatmul.mubr.msk.bf16.vlgmr.msra.gmra.mxu0 %vm6963_vm11, %v7269_v16 }
 0xac3   : > { %v7243_v21 = vadd.f32 %v14443_v54, %v7195_v44  ;;  %v7187_v10 = vadd.f32 %v7186_v42, %v7041_v51  ;;  %v7256_v63 = vmax.f32 %v7240_v28, 0.0 }
 0xac5   : > { %v8711_v0 = vpop.f32.mrf.mxu1  ;;  %v7241_v38 = vadd.f32 %v14443_v54, %v7187_v10  ;;  %v7259_v19 = vmax.f32 %v7243_v21, 0.0 }
 0xac6   : > { %v7208_v27 = vadd.f32 %v8711_v0, %v8687_v37 }
 0xac7   : > { %v7199_v33 = vpop.f32.mrf.mxu1  ;;  %v7257_v59 = vmax.f32 %v7241_v38, 0.0  ;;  %v7271_v58 = vpack.c.bf16 %v7259_v19, %v7258_v22 }
 0xac8   : > { %v7200_v53 = vadd.f32 %v7199_v33, %v7054_v41  ;;  %v7246_v43 = vadd.f32 %v14443_v54, %v7208_v27 }
 0xac9   : > { %v8712_v40 = vpop.f32.mrf.mxu1  ;;  %v7270_v20 = vpack.c.bf16 %v7257_v59, %v7256_v63 }
 0xaca   : > { %v7211_v26 = vadd.f32 %v8712_v40, %v8688_v57  ;;  %v7244_v46 = vadd.f32 %v14443_v54, %v7200_v53  ;;  %v7262_v52 = vmax.f32 %v7246_v43, 0.0 }
 0xacb   : > { %v7202_v29 = vpop.f32.mrf.mxu1  ;;  %8725 = vmatprep.mubr.msk.bf16.mxu0 %vm6963_vm11, %v7270_v20 }
 0xacc   : > { %v7247_v36 = vadd.f32 %v14443_v54, %v7211_v26  ;;  %v7203_v15 = vadd.f32 %v7202_v29, %v7057_v35  ;;  %8726 = vmatmul.mubr.msk.bf16.gmra.mxu0 %vm6963_vm11, %v7271_v58  ;;  %v7260_v24 = vmax.f32 %v7244_v46, 0.0 }
 0xace   : > { %v8715_v18 = vpop.f32.mrf.mxu1  ;;  %v7245_v17 = vadd.f32 %v14443_v54, %v7203_v15  ;;  %v7263_v48 = vmax.f32 %v7247_v36, 0.0 }
 0xacf   : > { %v7224_v51 = vadd.f32 %v8715_v18, %v8691_v34 }
 0xad0   : > { %v7215_v25 = vpop.f32.mrf.mxu1  ;;  %v7261_v56 = vmax.f32 %v7245_v17, 0.0  ;;  %v7273_v2 = vpack.c.bf16 %v7263_v48, %v7262_v52 }
 0xad1   : > { %v7216_v50 = vadd.f32 %v7215_v25, %v7070_v60  ;;  %v7250_v9 = vadd.f32 %v14443_v54, %v7224_v51 }
 0xad2   : > { %v8716_v39 = vpop.f32.mrf.mxu1  ;;  %v7272_v37 = vpack.c.bf16 %v7261_v56, %v7260_v24 }
 0xad3   : > { %v7227_v47 = vadd.f32 %v8716_v39, %v8692_v13  ;;  %v7248_v14 = vadd.f32 %v14443_v54, %v7216_v50  ;;  %v7266_v61 = vmax.f32 %v7250_v9, 0.0 }
 0xad4   : > { %v7218_v49 = vpop.f32.mrf.mxu1  ;;  %8729 = vmatprep.mubr.msk.bf16.mxu0 %vm6963_vm11, %v7272_v37 }
 0xad5   : > { %v7251_v41 = vadd.f32 %v14443_v54, %v7227_v47  ;;  %v7219_v6 = vadd.f32 %v7218_v49, %v7073_v45  ;;  %8730 = vmatmul.mubr.msk.bf16.gmra.mxu0 %vm6963_vm11, %v7273_v2  ;;  %v7264_v7 = vmax.f32 %v7248_v14, 0.0 }
 0xad6   : > { %v8747_v1 = vpop.f32.mrf.mxu1 }
 0xad7   : > { %v7249_v8 = vadd.f32 %v14443_v54, %v7219_v6  ;;  %v7267_v55 = vmax.f32 %v7251_v41, 0.0 }
 0xad8   : > { %v7467_v11 = vpop.f32.mrf.mxu1 }
 0xad9   : > { %v7265_v5 = vmax.f32 %v7249_v8, 0.0  ;;  %v7275_v62 = vpack.c.bf16 %v7267_v55, %v7266_v61 }
 0xada   : > { %v8748_v3 = vpop.f32.mrf.mxu1 }
 0xadb   : > { %v7274_v57 = vpack.c.bf16 %v7265_v5, %v7264_v7 }
 0xadc   : > { %v7470_v4 = vpop.f32.mrf.mxu1 }
 0xadd   : > { %8733 = vmatprep.mubr.msk.bf16.mxu0 %vm6963_vm11, %v7274_v57 }
 0xade   : > { %8734 = vmatmul.mubr.msk.bf16.gmra.mxu0 %vm6963_vm11, %v7275_v62  ;;  %v8751_v30 = vpop.f32.mrf.mxu1 }
 0xae0   : > { %v7483_v32 = vpop.f32.mrf.mxu1 }
 0xae2   : > { %v8752_v54 = vpop.f32.mrf.mxu1 }
 0xae4   : > { %v7486_v31 = vpop.f32.mrf.mxu1 }
 0xae6   : > { %v8755_v16 = vpop.f32.mrf.mxu1 }
 0xae8   : > { %v7499_v38 = vpop.f32.mrf.mxu1 }
 0xaea   : > { %v8756_v22 = vpop.f32.mrf.mxu1 }
 0xaec   : > { %v7502_v29 = vpop.f32.mrf.mxu1 }
 0xaee   : > { %v8759_v13 = vpop.f32.mrf.mxu1 }
 0xaf0   : > { %v7515_v51 = vpop.f32.mrf.mxu1 }
 0xaf2   : > { %v8760_v14 = vpop.f32.mrf.mxu1 }
 0xaf4   : > { %v7518_v5 = vpop.f32.mrf.mxu1 }
 0xb82   : > { %v8723_v44 = vpop.f32.mrf.mxu0 }
 0xb83   : > { %v7476_v35 = vadd.f32 %v8747_v1, %v8723_v44 }
 0xb84   : > { %v7346_v42 = vpop.f32.mrf.mxu0 }
 0xb85   : > { %v7538_v28 = vadd.f32 %v14470_v23, %v7476_v35  ;;  %v7468_v21 = vadd.f32 %v7467_v11, %v7346_v42 }
 0xb86   : > { %v8724_v10 = vpop.f32.mrf.mxu0 }
 0xb87   : > { %7555 = vst.msk [vmem:[%s14474_s0 + $0x10] sm:$0xff] %vm7552_vm12, %v7538_v28  ;;  %v7536_v12 = vadd.f32 %v14470_v23, %v7468_v21  ;;  %v7479_v0 = vadd.f32 %v8748_v3, %v8724_v10 }
 0xb88   : > { %v7349_v34 = vpop.f32.mrf.mxu0 }
 0xb89   : > { %7553 = vst.msk [vmem:[%s14474_s0] sm:$0xff] %vm7552_vm12, %v7536_v12  ;;  %v7539_v19 = vadd.f32 %v14470_v23, %v7479_v0  ;;  %v7471_v33 = vadd.f32 %v7470_v4, %v7349_v34 }
 0xb8b   : > { %7556 = vst.msk [vmem:[%s14474_s0 + $0x18] sm:$0xff] %vm7552_vm12, %v7539_v19  ;;  %v7537_v59 = vadd.f32 %v14470_v23, %v7471_v33 }
 0xb8c   : > { %v8727_v63 = vpop.f32.mrf.mxu0 }
 0xb8d   : > { %v7492_v53 = vadd.f32 %v8751_v30, %v8727_v63  ;;  %7554 = vst.msk [vmem:[%s14474_s0 + $0x8] sm:$0xff] %vm7552_vm12, %v7537_v59 }
 0xb8e   : > { %v7362_v27 = vpop.f32.mrf.mxu0 }
 0xb8f   : > { %v7542_v40 = vadd.f32 %v14470_v23, %v7492_v53  ;;  %v7484_v20 = vadd.f32 %v7483_v32, %v7362_v27 }
 0xb90   : > { %v8728_v26 = vpop.f32.mrf.mxu0 }
 0xb91   : > { %7559 = vst.msk [vmem:[%s14474_s0 + $0x30] sm:$0xff] %vm7552_vm12, %v7542_v40  ;;  %v7540_v60 = vadd.f32 %v14470_v23, %v7484_v20  ;;  %v7495_v58 = vadd.f32 %v8752_v54, %v8728_v26 }
 0xb92   : > { %v7365_v46 = vpop.f32.mrf.mxu0 }
 0xb93   : > { %7557 = vst.msk [vmem:[%s14474_s0 + $0x20] sm:$0xff] %vm7552_vm12, %v7540_v60  ;;  %v7543_v36 = vadd.f32 %v14470_v23, %v7495_v58  ;;  %v7487_v15 = vadd.f32 %v7486_v31, %v7365_v46 }
 0xb95   : > { %v8731_v43 = vpop.f32.mrf.mxu0  ;;  %7560 = vst.msk [vmem:[%s14474_s0 + $0x38] sm:$0xff] %vm7552_vm12, %v7543_v36  ;;  %v7541_v18 = vadd.f32 %v14470_v23, %v7487_v15 }
 0xb96   : > { %v7508_v17 = vadd.f32 %v8755_v16, %v8731_v43 }
 0xb97   : > { %v7378_v48 = vpop.f32.mrf.mxu0  ;;  %7558 = vst.msk [vmem:[%s14474_s0 + $0x28] sm:$0xff] %vm7552_vm12, %v7541_v18 }
 0xb98   : > { %v7546_v25 = vadd.f32 %v14470_v23, %v7508_v17  ;;  %v7500_v24 = vadd.f32 %v7499_v38, %v7378_v48 }
 0xb99   : > { %v8732_v56 = vpop.f32.mrf.mxu0 }
 0xb9a   : > { %7563 = vst.msk [vmem:[%s14474_s0 + $0x50] sm:$0xff] %vm7552_vm12, %v7546_v25  ;;  %v7544_v50 = vadd.f32 %v14470_v23, %v7500_v24  ;;  %v7511_v52 = vadd.f32 %v8756_v22, %v8732_v56 }
 0xb9b   : > { %v7381_v39 = vpop.f32.mrf.mxu0 }
 0xb9c   : > { %7561 = vst.msk [vmem:[%s14474_s0 + $0x40] sm:$0xff] %vm7552_vm12, %v7544_v50  ;;  %v7547_v37 = vadd.f32 %v14470_v23, %v7511_v52  ;;  %v7503_v47 = vadd.f32 %v7502_v29, %v7381_v39 }
 0xb9e   : > { %v8735_v45 = vpop.f32.mrf.mxu0  ;;  %7564 = vst.msk [vmem:[%s14474_s0 + $0x58] sm:$0xff] %vm7552_vm12, %v7547_v37  ;;  %v7545_v2 = vadd.f32 %v14470_v23, %v7503_v47 }
 0xb9f   : > { %v7524_v49 = vadd.f32 %v8759_v13, %v8735_v45 }
 0xba0   : > { %v7394_v41 = vpop.f32.mrf.mxu0  ;;  %7562 = vst.msk [vmem:[%s14474_s0 + $0x48] sm:$0xff] %vm7552_vm12, %v7545_v2 }
 0xba1   : > { %v7550_v6 = vadd.f32 %v14470_v23, %v7524_v49  ;;  %v7516_v9 = vadd.f32 %v7515_v51, %v7394_v41 }
 0xba2   : > { %v8736_v8 = vpop.f32.mrf.mxu0 }
 0xba3   : > { %7567 = vst.msk [vmem:[%s14474_s0 + $0x70] sm:$0xff] %vm7552_vm12, %v7550_v6  ;;  %v7548_v55 = vadd.f32 %v14470_v23, %v7516_v9  ;;  %v7527_v7 = vadd.f32 %v8760_v14, %v8736_v8 }
 0xba4   : > { %v7397_v61 = vpop.f32.mrf.mxu0 }
 0xba5   : > { %7565 = vst.msk [vmem:[%s14474_s0 + $0x60] sm:$0xff] %vm7552_vm12, %v7548_v55  ;;  %v7551_v57 = vadd.f32 %v14470_v23, %v7527_v7  ;;  %v7519_v62 = vadd.f32 %v7518_v5, %v7397_v61 }
 0xba7   : > { %7568 = vst.msk [vmem:[%s14474_s0 + $0x78] sm:$0xff] %vm7552_vm12, %v7551_v57  ;;  %v7549_v1 = vadd.f32 %v14470_v23, %v7519_v62 }
 0xba9   : > { %7566 = vst.msk [vmem:[%s14474_s0 + $0x68] sm:$0xff] %vm7552_vm12, %v7549_v1 }
 0xbaa PF: > { %s80_s15 = sadd.s32 1, %s9121_s15  }
 0xbab   : > { %p77_p4 = scmp.ge.s32.totalorder %s80_s15, 4  }
 0xbad   :  { %79 = sbr.rel (!%p77_p4) target bundleno = 53 (0x35), region = 231 }

</bundles_post_ra>
